<compile_context>
chip_gen: v5e
topology: v5e:2x2
jax: 0.10.0
libtpu: 0.0.40
codegen_flags: <defaults>
</compile_context>

<pallas_src>
import numpy as np
import jax
import jax.numpy as jnp
from jax.experimental import pallas as pl
from jax.experimental.pallas import tpu as pltpu

# keep the XLA reference path in true f32 so the parity check is meaningful
jax.config.update("jax_default_matmul_precision", "highest")

# ---- model hyper-parameters (small, consistent with FS2TransformerEncoder) ----
B, T, D = 2, 16, 32          # batch, sequence length, hidden_dim
BT = B * T
N_LAYERS = 2                 # n_layers
N_HEADS = 2                  # n_heads
D_K = D // N_HEADS           # d_k = d_v
D_INNER = 64                 # d_inner (conv channels)
CONV_K = 9                   # first conv kernel size (second conv has k=1)
PAD = (CONV_K - 1) // 2
LN_EPS = 1e-5                # PyTorch nn.LayerNorm default
NEG_INF = -1e30              # finite stand-in for masked_fill(-inf); masked
                             # probabilities underflow to exactly 0 either way


def _layer_norm(x, w, b):
    mu = jnp.mean(x, axis=-1, keepdims=True)
    var = jnp.mean(jnp.square(x - mu), axis=-1, keepdims=True)
    return (x - mu) * jax.lax.rsqrt(var + LN_EPS) * w + b


# ------------------------------- Pallas kernel ---------------------------------
def encoder_kernel(x_ref, keybias_ref, keep_ref,
                   wqkv_ref, bqkv_ref, wo_ref, bo_ref, ln1w_ref, ln1b_ref,
                   w1_ref, b1_ref, w2_ref, b2_ref, ln2w_ref, ln2b_ref,
                   out_ref):
    x2 = x_ref[...]                     # (B*T, D) resident activation
    key_bias = keybias_ref[...]         # (B, 1, T): NEG_INF at padded keys, 0 else
    keep = keep_ref[...]                # (B*T, 1): 0.0 at padded rows, 1.0 else

    inv_temp = np.float32(1.0 / np.sqrt(D_K))
    zpad = jnp.zeros((B, PAD, D), jnp.float32)   # conv halo, hoisted (traced once)

    # TODO(synk): dropout omitted (eval-mode forward == identity).
    for l in range(N_LAYERS):           # L=2: unrolled, params stay in VMEM
        # ---------------- multi-head self-attention ----------------
        residual = x2
        # fused QKV projection: one (BT,32)@(32,96) MXU matmul, bias added once
        qkv = jnp.dot(x2, wqkv_ref[l],
                      preferred_element_type=jnp.float32) + bqkv_ref[l]
        q3 = qkv[:, 0 * D:1 * D].reshape(B, T, D)
        k3 = qkv[:, 1 * D:2 * D].reshape(B, T, D)
        v3 = qkv[:, 2 * D:3 * D].reshape(B, T, D)

        heads = []
        for h in range(N_HEADS):        # per-head score/PV matmuls (inherent to MHA)
            sl = slice(h * D_K, (h + 1) * D_K)
            s = jnp.einsum('bqd,bkd->bqk', q3[:, :, sl], k3[:, :, sl],
                           preferred_element_type=jnp.float32) * inv_temp
            s = s + key_bias            # masked_fill(mask, -inf) equivalent
            m = jnp.max(s, axis=-1, keepdims=True)
            e = jnp.exp(s - m)
            p = e / jnp.sum(e, axis=-1, keepdims=True)
            heads.append(jnp.einsum('bqk,bkd->bqd', p, v3[:, :, sl],
                                    preferred_element_type=jnp.float32))
        # concat heads along lanes -> single Wo matmul (no per-head projections)
        attn = jnp.concatenate(heads, axis=-1).reshape(BT, D)
        attn = jnp.dot(attn, wo_ref[l],
                       preferred_element_type=jnp.float32) + bo_ref[l]
        h1 = _layer_norm(attn + residual, ln1w_ref[l], ln1b_ref[l])
        h1 = h1 * keep                  # masked_fill(mask, 0)

        # ------------- conv FFN: im2col + two matmuls ---------------
        # zero-pad along time as a value (no scratch ref, no per-layer re-zeroing)
        h1_3d = h1.reshape(B, T, D)
        h1_pad = jnp.concatenate([zpad, h1_3d, zpad], axis=1)       # (B, T+2P, D)
        cols = [h1_pad[:, tap:tap + T, :] for tap in range(CONV_K)]  # 9 x (B,T,D)
        x_col = jnp.concatenate(cols, axis=-1).reshape(BT, CONV_K * D)  # (BT, 288)
        # single K=288 matmul replaces nine K=32 matmuls + eight accumulates
        y = jnp.dot(x_col, w1_ref[l],
                    preferred_element_type=jnp.float32) + b1_ref[l]  # (BT, D_INNER)
        y = jnp.maximum(y, 0.0)
        y = jnp.dot(y, w2_ref[l],
                    preferred_element_type=jnp.float32) + b2_ref[l]  # (BT, D)
        h2 = _layer_norm(y + h1, ln2w_ref[l], ln2b_ref[l])
        x2 = h2 * keep                  # masked_fill(mask, 0)

    out_ref[...] = x2


# --------------------------------- glue ----------------------------------------
def sinusoid_encoding_table(n_position, d_hid):
    pos = np.arange(n_position, dtype=np.float64)[:, None]
    dim = np.arange(d_hid, dtype=np.float64)[None, :]
    angle = pos / np.power(10000.0, 2.0 * (dim // 2) / d_hid)
    table = np.zeros((n_position, d_hid), dtype=np.float64)
    table[:, 0::2] = np.sin(angle[:, 0::2])
    table[:, 1::2] = np.cos(angle[:, 1::2])
    return jnp.asarray(table, dtype=jnp.float32)


def init_params(key):
    keys = jax.random.split(key, 8)

    def nrm(k, shape, scale=0.1):
        return (scale * jax.random.normal(k, shape)).astype(jnp.float32)

    L = N_LAYERS
    return dict(
        wq=nrm(keys[0], (L, D, D)), bq=jnp.zeros((L, 1, D), jnp.float32),
        wk=nrm(keys[1], (L, D, D)), bk=jnp.zeros((L, 1, D), jnp.float32),
        wv=nrm(keys[2], (L, D, D)), bv=jnp.zeros((L, 1, D), jnp.float32),
        wo=nrm(keys[3], (L, D, D)), bo=nrm(keys[4], (L, 1, D), 0.02),
        ln1w=jnp.ones((L, 1, D), jnp.float32),
        ln1b=jnp.zeros((L, 1, D), jnp.float32),
        w1=nrm(keys[5], (L, CONV_K, D, D_INNER)),      # (tap, in, out) per layer
        b1=nrm(keys[6], (L, 1, D_INNER), 0.02),
        w2=nrm(keys[7], (L, D_INNER, D)),
        b2=jnp.zeros((L, 1, D), jnp.float32),
        ln2w=jnp.ones((L, 1, D), jnp.float32),
        ln2b=jnp.zeros((L, 1, D), jnp.float32),
    )


def encoder_forward(src_seq, mask_bool, params):
    pos = sinusoid_encoding_table(T + 1, D)
    x = (src_seq + pos[None, :T, :]).astype(jnp.float32)
    x2 = x.reshape(BT, D)

    maskf = mask_bool.astype(jnp.float32)                            # 1.0 == padded
    key_bias = jnp.where(mask_bool[:, None, :],
                         jnp.float32(NEG_INF), jnp.float32(0.0))     # (B, 1, T)
    keep = (1.0 - maskf).reshape(BT, 1).astype(jnp.float32)          # (B*T, 1)

    # wrapper-side weight fusion (layout plumbing, not compute hoisting)
    wqkv = jnp.concatenate([params['wq'], params['wk'], params['wv']], axis=-1)
    bqkv = jnp.concatenate([params['bq'], params['bk'], params['bv']], axis=-1)
    w1f = params['w1'].reshape(N_LAYERS, CONV_K * D, D_INNER)        # im2col weight
    fused = [wqkv, bqkv, params['wo'], params['bo'],
             params['ln1w'], params['ln1b'],
             w1f, params['b1'], params['w2'], params['b2'],
             params['ln2w'], params['ln2b']]

    # single invocation, no grid: all operands (< 0.3 MiB total) live in VMEM
    out2 = pl.pallas_call(
        encoder_kernel,
        out_shape=jax.ShapeDtypeStruct((BT, D), jnp.float32),
    )(x2, key_bias, keep, *fused)
    return out2.reshape(B, T, D)


# --------------------- independent XLA reference (parity check) -----------------
def reference_forward(src_seq, mask_bool, params):
    pos = sinusoid_encoding_table(T + 1, D)
    x = (src_seq + pos[None, :T, :]).astype(jnp.float32)
    key_mask4 = mask_bool[:, None, None, :]        # (B,1,1,T) over (B,H,Tq,Tk)
    pad_mask = mask_bool[:, :, None]               # (B,T,1)

    def layer_norm(y, w, b):
        mu = jnp.mean(y, axis=-1, keepdims=True)
        var = jnp.mean(jnp.square(y - mu), axis=-1, keepdims=True)
        return (y - mu) / jnp.sqrt(var + LN_EPS) * w + b

    for l in range(N_LAYERS):
        # --- multi-head self-attention (per-head formulation, unfused params) ---
        q = x @ params['wq'][l] + params['bq'][l]
        k = x @ params['wk'][l] + params['bk'][l]
        v = x @ params['wv'][l] + params['bv'][l]

        def split(z):                                  # (B,T,D) -> (B,H,T,dk)
            return z.reshape(B, T, N_HEADS, D_K).transpose(0, 2, 1, 3)

        qh, kh, vh = split(q), split(k), split(v)
        s = jnp.einsum('bhqd,bhkd->bhqk', qh, kh) / np.sqrt(D_K)
        s = jnp.where(key_mask4, -jnp.inf, s)          # masked_fill(mask, -inf)
        p = jax.nn.softmax(s, axis=-1)
        o = jnp.einsum('bhqk,bhkd->bhqd', p, vh)
        o = o.transpose(0, 2, 1, 3).reshape(B, T, D)
        o = o @ params['wo'][l] + params['bo'][l]
        x = layer_norm(o + x, params['ln1w'][l], params['ln1b'][l])
        x = jnp.where(pad_mask, 0.0, x)                # masked_fill(mask, 0)

        # --- position-wise conv FFN: Conv1d(k=9,p=4) -> ReLU -> Conv1d(k=1) ---
        y = jax.lax.conv_general_dilated(
            x, params['w1'][l], window_strides=(1,), padding=[(PAD, PAD)],
            dimension_numbers=('NWC', 'WIO', 'NWC'))
        y = jax.nn.relu(y + params['b1'][l])
        y = y @ params['w2'][l] + params['b2'][l]
        x = layer_norm(y + x, params['ln2w'][l], params['ln2b'][l])
        x = jnp.where(pad_mask, 0.0, x)                # masked_fill(mask, 0)
    return x


if __name__ == "__main__":
    key = jax.random.PRNGKey(0)
    k_x, k_p = jax.random.split(key)
    src_seq = jax.random.normal(k_x, (B, T, D), dtype=jnp.float32)
    lengths = jnp.array([T, T - 4], dtype=jnp.int32)            # second sample padded
    mask_bool = jnp.arange(T)[None, :] >= lengths[:, None]      # True == padded
    params = init_params(k_p)

    out = encoder_forward(src_seq, mask_bool, params)
    out = jax.block_until_ready(out)

    ref = reference_forward(src_seq, mask_bool, params)
    np.testing.assert_allclose(np.asarray(out), np.asarray(ref),
                               rtol=1e-3, atol=1e-3)
    print("KERNEL_OK")
</pallas_src>

<mosaic_0001>
module attributes {stable_mosaic.version = 11 : i64} {
  func.func @encoder_kernel(%arg0: memref<32x32xf32, #tpu.memory_space<vmem>>, %arg1: memref<2x1x16xf32, #tpu.memory_space<vmem>>, %arg2: memref<32x1xf32, #tpu.memory_space<vmem>>, %arg3: memref<2x32x96xf32, #tpu.memory_space<vmem>>, %arg4: memref<2x1x96xf32, #tpu.memory_space<vmem>>, %arg5: memref<2x32x32xf32, #tpu.memory_space<vmem>>, %arg6: memref<2x1x32xf32, #tpu.memory_space<vmem>>, %arg7: memref<2x1x32xf32, #tpu.memory_space<vmem>>, %arg8: memref<2x1x32xf32, #tpu.memory_space<vmem>>, %arg9: memref<2x288x64xf32, #tpu.memory_space<vmem>>, %arg10: memref<2x1x64xf32, #tpu.memory_space<vmem>>, %arg11: memref<2x64x32xf32, #tpu.memory_space<vmem>>, %arg12: memref<2x1x32xf32, #tpu.memory_space<vmem>>, %arg13: memref<2x1x32xf32, #tpu.memory_space<vmem>>, %arg14: memref<2x1x32xf32, #tpu.memory_space<vmem>>, %arg15: memref<32x32xf32, #tpu.memory_space<vmem>>) attributes {dimension_semantics = [], scalar_prefetch = 0 : i64, scratch_operands = 0 : i64, tpu.core_type = #tpu.core_type<tc>} {
    %c0 = arith.constant 0 : index
    %c0_0 = arith.constant 0 : index
    %0 = vector.load %arg0[%c0, %c0_0] : memref<32x32xf32, #tpu.memory_space<vmem>>, vector<32x32xf32>
    %c0_1 = arith.constant 0 : index
    %c0_2 = arith.constant 0 : index
    %c0_3 = arith.constant 0 : index
    %1 = vector.load %arg1[%c0_1, %c0_2, %c0_3] : memref<2x1x16xf32, #tpu.memory_space<vmem>>, vector<2x1x16xf32>
    %c0_4 = arith.constant 0 : index
    %c0_5 = arith.constant 0 : index
    %2 = vector.load %arg2[%c0_4, %c0_5] : memref<32x1xf32, #tpu.memory_space<vmem>>, vector<32x1xf32>
    %cst = arith.constant 0.000000e+00 : f32
    %3 = vector.broadcast %cst : f32 to vector<2x4x32xf32>
    %c0_6 = arith.constant 0 : index
    %c0_7 = arith.constant 0 : index
    %c0_8 = arith.constant 0 : index
    %4 = vector.load %arg3[%c0_6, %c0_7, %c0_8] : memref<2x32x96xf32, #tpu.memory_space<vmem>>, vector<1x32x96xf32>
    %5 = vector.shape_cast %4 : vector<1x32x96xf32> to vector<32x96xf32>
    %cst_9 = arith.constant dense<0.000000e+00> : vector<32x96xf32>
    %6 = tpu.matmul %0, %5, %cst_9 {dimension_numbers = #tpu.dot_dimension_numbers<[1], [0], [0], [1], [0, 0, 1, 1], [], []>, precision = #tpu.contract_precision<fp32>} : vector<32x32xf32>, vector<32x96xf32>, vector<32x96xf32> -> vector<32x96xf32>
    %c0_10 = arith.constant 0 : index
    %c0_11 = arith.constant 0 : index
    %c0_12 = arith.constant 0 : index
    %7 = vector.load %arg4[%c0_10, %c0_11, %c0_12] : memref<2x1x96xf32, #tpu.memory_space<vmem>>, vector<1x1x96xf32>
    %8 = vector.shape_cast %7 : vector<1x1x96xf32> to vector<1x96xf32>
    %9 = vector.broadcast %8 : vector<1x96xf32> to vector<32x96xf32>
    %10 = arith.addf %6, %9 : vector<32x96xf32>
    %11 = vector.extract_strided_slice %10 {offsets = [0, 0], sizes = [32, 32], strides = [1, 1]} : vector<32x96xf32> to vector<32x32xf32>
    %12 = vector.shape_cast %11 : vector<32x32xf32> to vector<2x16x32xf32>
    %13 = vector.extract_strided_slice %10 {offsets = [0, 32], sizes = [32, 32], strides = [1, 1]} : vector<32x96xf32> to vector<32x32xf32>
    %14 = vector.shape_cast %13 : vector<32x32xf32> to vector<2x16x32xf32>
    %15 = vector.extract_strided_slice %10 {offsets = [0, 64], sizes = [32, 32], strides = [1, 1]} : vector<32x96xf32> to vector<32x32xf32>
    %16 = vector.shape_cast %15 : vector<32x32xf32> to vector<2x16x32xf32>
    %17 = vector.extract_strided_slice %12 {offsets = [0, 0, 0], sizes = [2, 16, 16], strides = [1, 1, 1]} : vector<2x16x32xf32> to vector<2x16x16xf32>
    %18 = vector.extract_strided_slice %14 {offsets = [0, 0, 0], sizes = [2, 16, 16], strides = [1, 1, 1]} : vector<2x16x32xf32> to vector<2x16x16xf32>
    "tpu.trace_start"() <{level = 10 : i32, message = "bqd,bkd->bqk"}> : () -> ()
    %cst_13 = arith.constant dense<0.000000e+00> : vector<2x16x16xf32>
    %19 = tpu.matmul %17, %18, %cst_13 {dimension_numbers = #tpu.dot_dimension_numbers<[2], [2], [1], [1], [0, 0, 0, 1, 1, 1], [0], [0]>, precision = #tpu.contract_precision<fp32>} : vector<2x16x16xf32>, vector<2x16x16xf32>, vector<2x16x16xf32> -> vector<2x16x16xf32>
    "tpu.trace_stop"() : () -> ()
    %cst_14 = arith.constant 2.500000e-01 : f32
    %20 = vector.broadcast %cst_14 : f32 to vector<2x16x16xf32>
    %21 = arith.mulf %19, %20 : vector<2x16x16xf32>
    %22 = vector.broadcast %1 : vector<2x1x16xf32> to vector<2x16x16xf32>
    %23 = arith.addf %21, %22 : vector<2x16x16xf32>
    %cst_15 = arith.constant dense<0xFF800000> : vector<2x16xf32>
    %24 = vector.multi_reduction <maximumf>, %23, %cst_15 [2] : vector<2x16x16xf32> to vector<2x16xf32>
    %25 = vector.shape_cast %24 : vector<2x16xf32> to vector<2x16x1xf32>
    %26 = vector.broadcast %25 : vector<2x16x1xf32> to vector<2x16x16xf32>
    %27 = arith.subf %23, %26 : vector<2x16x16xf32>
    %28 = math.exp %27 : vector<2x16x16xf32>
    %cst_16 = arith.constant dense<0.000000e+00> : vector<2x16xf32>
    %29 = vector.multi_reduction <add>, %28, %cst_16 [2] : vector<2x16x16xf32> to vector<2x16xf32>
    %30 = vector.shape_cast %29 : vector<2x16xf32> to vector<2x16x1xf32>
    %31 = vector.broadcast %30 : vector<2x16x1xf32> to vector<2x16x16xf32>
    %32 = arith.divf %28, %31 : vector<2x16x16xf32>
    %33 = vector.extract_strided_slice %16 {offsets = [0, 0, 0], sizes = [2, 16, 16], strides = [1, 1, 1]} : vector<2x16x32xf32> to vector<2x16x16xf32>
    "tpu.trace_start"() <{level = 10 : i32, message = "bqk,bkd->bqd"}> : () -> ()
    %cst_17 = arith.constant dense<0.000000e+00> : vector<2x16x16xf32>
    %34 = tpu.matmul %32, %33, %cst_17 {dimension_numbers = #tpu.dot_dimension_numbers<[2], [1], [1], [2], [0, 0, 0, 1, 1, 2], [0], [0]>, precision = #tpu.contract_precision<fp32>} : vector<2x16x16xf32>, vector<2x16x16xf32>, vector<2x16x16xf32> -> vector<2x16x16xf32>
    "tpu.trace_stop"() : () -> ()
    %35 = vector.extract_strided_slice %12 {offsets = [0, 0, 16], sizes = [2, 16, 16], strides = [1, 1, 1]} : vector<2x16x32xf32> to vector<2x16x16xf32>
    %36 = vector.extract_strided_slice %14 {offsets = [0, 0, 16], sizes = [2, 16, 16], strides = [1, 1, 1]} : vector<2x16x32xf32> to vector<2x16x16xf32>
    "tpu.trace_start"() <{level = 10 : i32, message = "bqd,bkd->bqk"}> : () -> ()
    %cst_18 = arith.constant dense<0.000000e+00> : vector<2x16x16xf32>
    %37 = tpu.matmul %35, %36, %cst_18 {dimension_numbers = #tpu.dot_dimension_numbers<[2], [2], [1], [1], [0, 0, 0, 1, 1, 1], [0], [0]>, precision = #tpu.contract_precision<fp32>} : vector<2x16x16xf32>, vector<2x16x16xf32>, vector<2x16x16xf32> -> vector<2x16x16xf32>
    "tpu.trace_stop"() : () -> ()
    %cst_19 = arith.constant 2.500000e-01 : f32
    %38 = vector.broadcast %cst_19 : f32 to vector<2x16x16xf32>
    %39 = arith.mulf %37, %38 : vector<2x16x16xf32>
    %40 = vector.broadcast %1 : vector<2x1x16xf32> to vector<2x16x16xf32>
    %41 = arith.addf %39, %40 : vector<2x16x16xf32>
    %cst_20 = arith.constant dense<0xFF800000> : vector<2x16xf32>
    %42 = vector.multi_reduction <maximumf>, %41, %cst_20 [2] : vector<2x16x16xf32> to vector<2x16xf32>
    %43 = vector.shape_cast %42 : vector<2x16xf32> to vector<2x16x1xf32>
    %44 = vector.broadcast %43 : vector<2x16x1xf32> to vector<2x16x16xf32>
    %45 = arith.subf %41, %44 : vector<2x16x16xf32>
    %46 = math.exp %45 : vector<2x16x16xf32>
    %cst_21 = arith.constant dense<0.000000e+00> : vector<2x16xf32>
    %47 = vector.multi_reduction <add>, %46, %cst_21 [2] : vector<2x16x16xf32> to vector<2x16xf32>
    %48 = vector.shape_cast %47 : vector<2x16xf32> to vector<2x16x1xf32>
    %49 = vector.broadcast %48 : vector<2x16x1xf32> to vector<2x16x16xf32>
    %50 = arith.divf %46, %49 : vector<2x16x16xf32>
    %51 = vector.extract_strided_slice %16 {offsets = [0, 0, 16], sizes = [2, 16, 16], strides = [1, 1, 1]} : vector<2x16x32xf32> to vector<2x16x16xf32>
    "tpu.trace_start"() <{level = 10 : i32, message = "bqk,bkd->bqd"}> : () -> ()
    %cst_22 = arith.constant dense<0.000000e+00> : vector<2x16x16xf32>
    %52 = tpu.matmul %50, %51, %cst_22 {dimension_numbers = #tpu.dot_dimension_numbers<[2], [1], [1], [2], [0, 0, 0, 1, 1, 2], [0], [0]>, precision = #tpu.contract_precision<fp32>} : vector<2x16x16xf32>, vector<2x16x16xf32>, vector<2x16x16xf32> -> vector<2x16x16xf32>
    "tpu.trace_stop"() : () -> ()
    %53 = tpu.concatenate %34, %52 in 2 : vector<2x16x16xf32>, vector<2x16x16xf32> -> vector<2x16x32xf32>
    %54 = vector.shape_cast %53 : vector<2x16x32xf32> to vector<32x32xf32>
    %c0_23 = arith.constant 0 : index
    %c0_24 = arith.constant 0 : index
    %c0_25 = arith.constant 0 : index
    %55 = vector.load %arg5[%c0_23, %c0_24, %c0_25] : memref<2x32x32xf32, #tpu.memory_space<vmem>>, vector<1x32x32xf32>
    %56 = vector.shape_cast %55 : vector<1x32x32xf32> to vector<32x32xf32>
    %cst_26 = arith.constant dense<0.000000e+00> : vector<32x32xf32>
    %57 = tpu.matmul %54, %56, %cst_26 {dimension_numbers = #tpu.dot_dimension_numbers<[1], [0], [0], [1], [0, 0, 1, 1], [], []>, precision = #tpu.contract_precision<fp32>} : vector<32x32xf32>, vector<32x32xf32>, vector<32x32xf32> -> vector<32x32xf32>
    %c0_27 = arith.constant 0 : index
    %c0_28 = arith.constant 0 : index
    %c0_29 = arith.constant 0 : index
    %58 = vector.load %arg6[%c0_27, %c0_28, %c0_29] : memref<2x1x32xf32, #tpu.memory_space<vmem>>, vector<1x1x32xf32>
    %59 = vector.shape_cast %58 : vector<1x1x32xf32> to vector<1x32xf32>
    %60 = vector.broadcast %59 : vector<1x32xf32> to vector<32x32xf32>
    %61 = arith.addf %57, %60 : vector<32x32xf32>
    %62 = arith.addf %61, %0 : vector<32x32xf32>
    %c0_30 = arith.constant 0 : index
    %c0_31 = arith.constant 0 : index
    %c0_32 = arith.constant 0 : index
    %63 = vector.load %arg7[%c0_30, %c0_31, %c0_32] : memref<2x1x32xf32, #tpu.memory_space<vmem>>, vector<1x1x32xf32>
    %64 = vector.shape_cast %63 : vector<1x1x32xf32> to vector<1x32xf32>
    %c0_33 = arith.constant 0 : index
    %c0_34 = arith.constant 0 : index
    %c0_35 = arith.constant 0 : index
    %65 = vector.load %arg8[%c0_33, %c0_34, %c0_35] : memref<2x1x32xf32, #tpu.memory_space<vmem>>, vector<1x1x32xf32>
    %66 = vector.shape_cast %65 : vector<1x1x32xf32> to vector<1x32xf32>
    %cst_36 = arith.constant dense<0.000000e+00> : vector<32xf32>
    %67 = vector.multi_reduction <add>, %62, %cst_36 [1] : vector<32x32xf32> to vector<32xf32>
    %68 = vector.shape_cast %67 : vector<32xf32> to vector<32x1xf32>
    %cst_37 = arith.constant 3.200000e+01 : f32
    %69 = vector.broadcast %cst_37 : f32 to vector<32x1xf32>
    %70 = arith.divf %68, %69 : vector<32x1xf32>
    %71 = vector.broadcast %70 : vector<32x1xf32> to vector<32x32xf32>
    %72 = arith.subf %62, %71 : vector<32x32xf32>
    %73 = arith.mulf %72, %72 : vector<32x32xf32>
    %cst_38 = arith.constant dense<0.000000e+00> : vector<32xf32>
    %74 = vector.multi_reduction <add>, %73, %cst_38 [1] : vector<32x32xf32> to vector<32xf32>
    %75 = vector.shape_cast %74 : vector<32xf32> to vector<32x1xf32>
    %cst_39 = arith.constant 3.200000e+01 : f32
    %76 = vector.broadcast %cst_39 : f32 to vector<32x1xf32>
    %77 = arith.divf %75, %76 : vector<32x1xf32>
    %78 = vector.broadcast %70 : vector<32x1xf32> to vector<32x32xf32>
    %79 = arith.subf %62, %78 : vector<32x32xf32>
    %cst_40 = arith.constant 9.99999974E-6 : f32
    %80 = vector.broadcast %cst_40 : f32 to vector<32x1xf32>
    %81 = arith.addf %77, %80 : vector<32x1xf32>
    %82 = math.rsqrt %81 : vector<32x1xf32>
    %83 = vector.broadcast %82 : vector<32x1xf32> to vector<32x32xf32>
    %84 = arith.mulf %79, %83 : vector<32x32xf32>
    %85 = vector.broadcast %64 : vector<1x32xf32> to vector<32x32xf32>
    %86 = arith.mulf %84, %85 : vector<32x32xf32>
    %87 = vector.broadcast %66 : vector<1x32xf32> to vector<32x32xf32>
    %88 = arith.addf %86, %87 : vector<32x32xf32>
    %89 = vector.broadcast %2 : vector<32x1xf32> to vector<32x32xf32>
    %90 = arith.mulf %88, %89 : vector<32x32xf32>
    %91 = vector.shape_cast %90 : vector<32x32xf32> to vector<2x16x32xf32>
    %92 = tpu.concatenate %3, %91, %3 in 1 : vector<2x4x32xf32>, vector<2x16x32xf32>, vector<2x4x32xf32> -> vector<2x24x32xf32>
    %93 = vector.extract_strided_slice %92 {offsets = [0, 0, 0], sizes = [2, 16, 32], strides = [1, 1, 1]} : vector<2x24x32xf32> to vector<2x16x32xf32>
    %94 = vector.extract_strided_slice %92 {offsets = [0, 1, 0], sizes = [2, 16, 32], strides = [1, 1, 1]} : vector<2x24x32xf32> to vector<2x16x32xf32>
    %95 = vector.extract_strided_slice %92 {offsets = [0, 2, 0], sizes = [2, 16, 32], strides = [1, 1, 1]} : vector<2x24x32xf32> to vector<2x16x32xf32>
    %96 = vector.extract_strided_slice %92 {offsets = [0, 3, 0], sizes = [2, 16, 32], strides = [1, 1, 1]} : vector<2x24x32xf32> to vector<2x16x32xf32>
    %97 = vector.extract_strided_slice %92 {offsets = [0, 4, 0], sizes = [2, 16, 32], strides = [1, 1, 1]} : vector<2x24x32xf32> to vector<2x16x32xf32>
    %98 = vector.extract_strided_slice %92 {offsets = [0, 5, 0], sizes = [2, 16, 32], strides = [1, 1, 1]} : vector<2x24x32xf32> to vector<2x16x32xf32>
    %99 = vector.extract_strided_slice %92 {offsets = [0, 6, 0], sizes = [2, 16, 32], strides = [1, 1, 1]} : vector<2x24x32xf32> to vector<2x16x32xf32>
    %100 = vector.extract_strided_slice %92 {offsets = [0, 7, 0], sizes = [2, 16, 32], strides = [1, 1, 1]} : vector<2x24x32xf32> to vector<2x16x32xf32>
    %101 = vector.extract_strided_slice %92 {offsets = [0, 8, 0], sizes = [2, 16, 32], strides = [1, 1, 1]} : vector<2x24x32xf32> to vector<2x16x32xf32>
    %102 = tpu.concatenate %93, %94, %95, %96, %97, %98, %99, %100, %101 in 2 : vector<2x16x32xf32>, vector<2x16x32xf32>, vector<2x16x32xf32>, vector<2x16x32xf32>, vector<2x16x32xf32>, vector<2x16x32xf32>, vector<2x16x32xf32>, vector<2x16x32xf32>, vector<2x16x32xf32> -> vector<2x16x288xf32>
    %103 = vector.shape_cast %102 : vector<2x16x288xf32> to vector<32x288xf32>
    %c0_41 = arith.constant 0 : index
    %c0_42 = arith.constant 0 : index
    %c0_43 = arith.constant 0 : index
    %104 = vector.load %arg9[%c0_41, %c0_42, %c0_43] : memref<2x288x64xf32, #tpu.memory_space<vmem>>, vector<1x288x64xf32>
    %105 = vector.shape_cast %104 : vector<1x288x64xf32> to vector<288x64xf32>
    %cst_44 = arith.constant dense<0.000000e+00> : vector<32x64xf32>
    %106 = tpu.matmul %103, %105, %cst_44 {dimension_numbers = #tpu.dot_dimension_numbers<[1], [0], [0], [1], [0, 0, 1, 1], [], []>, precision = #tpu.contract_precision<fp32>} : vector<32x288xf32>, vector<288x64xf32>, vector<32x64xf32> -> vector<32x64xf32>
    %c0_45 = arith.constant 0 : index
    %c0_46 = arith.constant 0 : index
    %c0_47 = arith.constant 0 : index
    %107 = vector.load %arg10[%c0_45, %c0_46, %c0_47] : memref<2x1x64xf32, #tpu.memory_space<vmem>>, vector<1x1x64xf32>
    %108 = vector.shape_cast %107 : vector<1x1x64xf32> to vector<1x64xf32>
    %109 = vector.broadcast %108 : vector<1x64xf32> to vector<32x64xf32>
    %110 = arith.addf %106, %109 : vector<32x64xf32>
    %cst_48 = arith.constant 0.000000e+00 : f32
    %111 = vector.broadcast %cst_48 : f32 to vector<32x64xf32>
    %112 = arith.maximumf %110, %111 : vector<32x64xf32>
    %c0_49 = arith.constant 0 : index
    %c0_50 = arith.constant 0 : index
    %c0_51 = arith.constant 0 : index
    %113 = vector.load %arg11[%c0_49, %c0_50, %c0_51] : memref<2x64x32xf32, #tpu.memory_space<vmem>>, vector<1x64x32xf32>
    %114 = vector.shape_cast %113 : vector<1x64x32xf32> to vector<64x32xf32>
    %cst_52 = arith.constant dense<0.000000e+00> : vector<32x32xf32>
    %115 = tpu.matmul %112, %114, %cst_52 {dimension_numbers = #tpu.dot_dimension_numbers<[1], [0], [0], [1], [0, 0, 1, 1], [], []>, precision = #tpu.contract_precision<fp32>} : vector<32x64xf32>, vector<64x32xf32>, vector<32x32xf32> -> vector<32x32xf32>
    %c0_53 = arith.constant 0 : index
    %c0_54 = arith.constant 0 : index
    %c0_55 = arith.constant 0 : index
    %116 = vector.load %arg12[%c0_53, %c0_54, %c0_55] : memref<2x1x32xf32, #tpu.memory_space<vmem>>, vector<1x1x32xf32>
    %117 = vector.shape_cast %116 : vector<1x1x32xf32> to vector<1x32xf32>
    %118 = vector.broadcast %117 : vector<1x32xf32> to vector<32x32xf32>
    %119 = arith.addf %115, %118 : vector<32x32xf32>
    %120 = arith.addf %119, %90 : vector<32x32xf32>
    %c0_56 = arith.constant 0 : index
    %c0_57 = arith.constant 0 : index
    %c0_58 = arith.constant 0 : index
    %121 = vector.load %arg13[%c0_56, %c0_57, %c0_58] : memref<2x1x32xf32, #tpu.memory_space<vmem>>, vector<1x1x32xf32>
    %122 = vector.shape_cast %121 : vector<1x1x32xf32> to vector<1x32xf32>
    %c0_59 = arith.constant 0 : index
    %c0_60 = arith.constant 0 : index
    %c0_61 = arith.constant 0 : index
    %123 = vector.load %arg14[%c0_59, %c0_60, %c0_61] : memref<2x1x32xf32, #tpu.memory_space<vmem>>, vector<1x1x32xf32>
    %124 = vector.shape_cast %123 : vector<1x1x32xf32> to vector<1x32xf32>
    %cst_62 = arith.constant dense<0.000000e+00> : vector<32xf32>
    %125 = vector.multi_reduction <add>, %120, %cst_62 [1] : vector<32x32xf32> to vector<32xf32>
    %126 = vector.shape_cast %125 : vector<32xf32> to vector<32x1xf32>
    %cst_63 = arith.constant 3.200000e+01 : f32
    %127 = vector.broadcast %cst_63 : f32 to vector<32x1xf32>
    %128 = arith.divf %126, %127 : vector<32x1xf32>
    %129 = vector.broadcast %128 : vector<32x1xf32> to vector<32x32xf32>
    %130 = arith.subf %120, %129 : vector<32x32xf32>
    %131 = arith.mulf %130, %130 : vector<32x32xf32>
    %cst_64 = arith.constant dense<0.000000e+00> : vector<32xf32>
    %132 = vector.multi_reduction <add>, %131, %cst_64 [1] : vector<32x32xf32> to vector<32xf32>
    %133 = vector.shape_cast %132 : vector<32xf32> to vector<32x1xf32>
    %cst_65 = arith.constant 3.200000e+01 : f32
    %134 = vector.broadcast %cst_65 : f32 to vector<32x1xf32>
    %135 = arith.divf %133, %134 : vector<32x1xf32>
    %136 = vector.broadcast %128 : vector<32x1xf32> to vector<32x32xf32>
    %137 = arith.subf %120, %136 : vector<32x32xf32>
    %cst_66 = arith.constant 9.99999974E-6 : f32
    %138 = vector.broadcast %cst_66 : f32 to vector<32x1xf32>
    %139 = arith.addf %135, %138 : vector<32x1xf32>
    %140 = math.rsqrt %139 : vector<32x1xf32>
    %141 = vector.broadcast %140 : vector<32x1xf32> to vector<32x32xf32>
    %142 = arith.mulf %137, %141 : vector<32x32xf32>
    %143 = vector.broadcast %122 : vector<1x32xf32> to vector<32x32xf32>
    %144 = arith.mulf %142, %143 : vector<32x32xf32>
    %145 = vector.broadcast %124 : vector<1x32xf32> to vector<32x32xf32>
    %146 = arith.addf %144, %145 : vector<32x32xf32>
    %147 = vector.broadcast %2 : vector<32x1xf32> to vector<32x32xf32>
    %148 = arith.mulf %146, %147 : vector<32x32xf32>
    %c1 = arith.constant 1 : index
    %c0_67 = arith.constant 0 : index
    %c0_68 = arith.constant 0 : index
    %149 = vector.load %arg3[%c1, %c0_67, %c0_68] : memref<2x32x96xf32, #tpu.memory_space<vmem>>, vector<1x32x96xf32>
    %150 = vector.shape_cast %149 : vector<1x32x96xf32> to vector<32x96xf32>
    %cst_69 = arith.constant dense<0.000000e+00> : vector<32x96xf32>
    %151 = tpu.matmul %148, %150, %cst_69 {dimension_numbers = #tpu.dot_dimension_numbers<[1], [0], [0], [1], [0, 0, 1, 1], [], []>, precision = #tpu.contract_precision<fp32>} : vector<32x32xf32>, vector<32x96xf32>, vector<32x96xf32> -> vector<32x96xf32>
    %c1_70 = arith.constant 1 : index
    %c0_71 = arith.constant 0 : index
    %c0_72 = arith.constant 0 : index
    %152 = vector.load %arg4[%c1_70, %c0_71, %c0_72] : memref<2x1x96xf32, #tpu.memory_space<vmem>>, vector<1x1x96xf32>
    %153 = vector.shape_cast %152 : vector<1x1x96xf32> to vector<1x96xf32>
    %154 = vector.broadcast %153 : vector<1x96xf32> to vector<32x96xf32>
    %155 = arith.addf %151, %154 : vector<32x96xf32>
    %156 = vector.extract_strided_slice %155 {offsets = [0, 0], sizes = [32, 32], strides = [1, 1]} : vector<32x96xf32> to vector<32x32xf32>
    %157 = vector.shape_cast %156 : vector<32x32xf32> to vector<2x16x32xf32>
    %158 = vector.extract_strided_slice %155 {offsets = [0, 32], sizes = [32, 32], strides = [1, 1]} : vector<32x96xf32> to vector<32x32xf32>
    %159 = vector.shape_cast %158 : vector<32x32xf32> to vector<2x16x32xf32>
    %160 = vector.extract_strided_slice %155 {offsets = [0, 64], sizes = [32, 32], strides = [1, 1]} : vector<32x96xf32> to vector<32x32xf32>
    %161 = vector.shape_cast %160 : vector<32x32xf32> to vector<2x16x32xf32>
    %162 = vector.extract_strided_slice %157 {offsets = [0, 0, 0], sizes = [2, 16, 16], strides = [1, 1, 1]} : vector<2x16x32xf32> to vector<2x16x16xf32>
    %163 = vector.extract_strided_slice %159 {offsets = [0, 0, 0], sizes = [2, 16, 16], strides = [1, 1, 1]} : vector<2x16x32xf32> to vector<2x16x16xf32>
    "tpu.trace_start"() <{level = 10 : i32, message = "bqd,bkd->bqk"}> : () -> ()
    %cst_73 = arith.constant dense<0.000000e+00> : vector<2x16x16xf32>
    %164 = tpu.matmul %162, %163, %cst_73 {dimension_numbers = #tpu.dot_dimension_numbers<[2], [2], [1], [1], [0, 0, 0, 1, 1, 1], [0], [0]>, precision = #tpu.contract_precision<fp32>} : vector<2x16x16xf32>, vector<2x16x16xf32>, vector<2x16x16xf32> -> vector<2x16x16xf32>
    "tpu.trace_stop"() : () -> ()
    %cst_74 = arith.constant 2.500000e-01 : f32
    %165 = vector.broadcast %cst_74 : f32 to vector<2x16x16xf32>
    %166 = arith.mulf %164, %165 : vector<2x16x16xf32>
    %167 = vector.broadcast %1 : vector<2x1x16xf32> to vector<2x16x16xf32>
    %168 = arith.addf %166, %167 : vector<2x16x16xf32>
    %cst_75 = arith.constant dense<0xFF800000> : vector<2x16xf32>
    %169 = vector.multi_reduction <maximumf>, %168, %cst_75 [2] : vector<2x16x16xf32> to vector<2x16xf32>
    %170 = vector.shape_cast %169 : vector<2x16xf32> to vector<2x16x1xf32>
    %171 = vector.broadcast %170 : vector<2x16x1xf32> to vector<2x16x16xf32>
    %172 = arith.subf %168, %171 : vector<2x16x16xf32>
    %173 = math.exp %172 : vector<2x16x16xf32>
    %cst_76 = arith.constant dense<0.000000e+00> : vector<2x16xf32>
    %174 = vector.multi_reduction <add>, %173, %cst_76 [2] : vector<2x16x16xf32> to vector<2x16xf32>
    %175 = vector.shape_cast %174 : vector<2x16xf32> to vector<2x16x1xf32>
    %176 = vector.broadcast %175 : vector<2x16x1xf32> to vector<2x16x16xf32>
    %177 = arith.divf %173, %176 : vector<2x16x16xf32>
    %178 = vector.extract_strided_slice %161 {offsets = [0, 0, 0], sizes = [2, 16, 16], strides = [1, 1, 1]} : vector<2x16x32xf32> to vector<2x16x16xf32>
    "tpu.trace_start"() <{level = 10 : i32, message = "bqk,bkd->bqd"}> : () -> ()
    %cst_77 = arith.constant dense<0.000000e+00> : vector<2x16x16xf32>
    %179 = tpu.matmul %177, %178, %cst_77 {dimension_numbers = #tpu.dot_dimension_numbers<[2], [1], [1], [2], [0, 0, 0, 1, 1, 2], [0], [0]>, precision = #tpu.contract_precision<fp32>} : vector<2x16x16xf32>, vector<2x16x16xf32>, vector<2x16x16xf32> -> vector<2x16x16xf32>
    "tpu.trace_stop"() : () -> ()
    %180 = vector.extract_strided_slice %157 {offsets = [0, 0, 16], sizes = [2, 16, 16], strides = [1, 1, 1]} : vector<2x16x32xf32> to vector<2x16x16xf32>
    %181 = vector.extract_strided_slice %159 {offsets = [0, 0, 16], sizes = [2, 16, 16], strides = [1, 1, 1]} : vector<2x16x32xf32> to vector<2x16x16xf32>
    "tpu.trace_start"() <{level = 10 : i32, message = "bqd,bkd->bqk"}> : () -> ()
    %cst_78 = arith.constant dense<0.000000e+00> : vector<2x16x16xf32>
    %182 = tpu.matmul %180, %181, %cst_78 {dimension_numbers = #tpu.dot_dimension_numbers<[2], [2], [1], [1], [0, 0, 0, 1, 1, 1], [0], [0]>, precision = #tpu.contract_precision<fp32>} : vector<2x16x16xf32>, vector<2x16x16xf32>, vector<2x16x16xf32> -> vector<2x16x16xf32>
    "tpu.trace_stop"() : () -> ()
    %cst_79 = arith.constant 2.500000e-01 : f32
    %183 = vector.broadcast %cst_79 : f32 to vector<2x16x16xf32>
    %184 = arith.mulf %182, %183 : vector<2x16x16xf32>
    %185 = vector.broadcast %1 : vector<2x1x16xf32> to vector<2x16x16xf32>
    %186 = arith.addf %184, %185 : vector<2x16x16xf32>
    %cst_80 = arith.constant dense<0xFF800000> : vector<2x16xf32>
    %187 = vector.multi_reduction <maximumf>, %186, %cst_80 [2] : vector<2x16x16xf32> to vector<2x16xf32>
    %188 = vector.shape_cast %187 : vector<2x16xf32> to vector<2x16x1xf32>
    %189 = vector.broadcast %188 : vector<2x16x1xf32> to vector<2x16x16xf32>
    %190 = arith.subf %186, %189 : vector<2x16x16xf32>
    %191 = math.exp %190 : vector<2x16x16xf32>
    %cst_81 = arith.constant dense<0.000000e+00> : vector<2x16xf32>
    %192 = vector.multi_reduction <add>, %191, %cst_81 [2] : vector<2x16x16xf32> to vector<2x16xf32>
    %193 = vector.shape_cast %192 : vector<2x16xf32> to vector<2x16x1xf32>
    %194 = vector.broadcast %193 : vector<2x16x1xf32> to vector<2x16x16xf32>
    %195 = arith.divf %191, %194 : vector<2x16x16xf32>
    %196 = vector.extract_strided_slice %161 {offsets = [0, 0, 16], sizes = [2, 16, 16], strides = [1, 1, 1]} : vector<2x16x32xf32> to vector<2x16x16xf32>
    "tpu.trace_start"() <{level = 10 : i32, message = "bqk,bkd->bqd"}> : () -> ()
    %cst_82 = arith.constant dense<0.000000e+00> : vector<2x16x16xf32>
    %197 = tpu.matmul %195, %196, %cst_82 {dimension_numbers = #tpu.dot_dimension_numbers<[2], [1], [1], [2], [0, 0, 0, 1, 1, 2], [0], [0]>, precision = #tpu.contract_precision<fp32>} : vector<2x16x16xf32>, vector<2x16x16xf32>, vector<2x16x16xf32> -> vector<2x16x16xf32>
    "tpu.trace_stop"() : () -> ()
    %198 = tpu.concatenate %179, %197 in 2 : vector<2x16x16xf32>, vector<2x16x16xf32> -> vector<2x16x32xf32>
    %199 = vector.shape_cast %198 : vector<2x16x32xf32> to vector<32x32xf32>
    %c1_83 = arith.constant 1 : index
    %c0_84 = arith.constant 0 : index
    %c0_85 = arith.constant 0 : index
    %200 = vector.load %arg5[%c1_83, %c0_84, %c0_85] : memref<2x32x32xf32, #tpu.memory_space<vmem>>, vector<1x32x32xf32>
    %201 = vector.shape_cast %200 : vector<1x32x32xf32> to vector<32x32xf32>
    %cst_86 = arith.constant dense<0.000000e+00> : vector<32x32xf32>
    %202 = tpu.matmul %199, %201, %cst_86 {dimension_numbers = #tpu.dot_dimension_numbers<[1], [0], [0], [1], [0, 0, 1, 1], [], []>, precision = #tpu.contract_precision<fp32>} : vector<32x32xf32>, vector<32x32xf32>, vector<32x32xf32> -> vector<32x32xf32>
    %c1_87 = arith.constant 1 : index
    %c0_88 = arith.constant 0 : index
    %c0_89 = arith.constant 0 : index
    %203 = vector.load %arg6[%c1_87, %c0_88, %c0_89] : memref<2x1x32xf32, #tpu.memory_space<vmem>>, vector<1x1x32xf32>
    %204 = vector.shape_cast %203 : vector<1x1x32xf32> to vector<1x32xf32>
    %205 = vector.broadcast %204 : vector<1x32xf32> to vector<32x32xf32>
    %206 = arith.addf %202, %205 : vector<32x32xf32>
    %207 = arith.addf %206, %148 : vector<32x32xf32>
    %c1_90 = arith.constant 1 : index
    %c0_91 = arith.constant 0 : index
    %c0_92 = arith.constant 0 : index
    %208 = vector.load %arg7[%c1_90, %c0_91, %c0_92] : memref<2x1x32xf32, #tpu.memory_space<vmem>>, vector<1x1x32xf32>
    %209 = vector.shape_cast %208 : vector<1x1x32xf32> to vector<1x32xf32>
    %c1_93 = arith.constant 1 : index
    %c0_94 = arith.constant 0 : index
    %c0_95 = arith.constant 0 : index
    %210 = vector.load %arg8[%c1_93, %c0_94, %c0_95] : memref<2x1x32xf32, #tpu.memory_space<vmem>>, vector<1x1x32xf32>
    %211 = vector.shape_cast %210 : vector<1x1x32xf32> to vector<1x32xf32>
    %cst_96 = arith.constant dense<0.000000e+00> : vector<32xf32>
    %212 = vector.multi_reduction <add>, %207, %cst_96 [1] : vector<32x32xf32> to vector<32xf32>
    %213 = vector.shape_cast %212 : vector<32xf32> to vector<32x1xf32>
    %cst_97 = arith.constant 3.200000e+01 : f32
    %214 = vector.broadcast %cst_97 : f32 to vector<32x1xf32>
    %215 = arith.divf %213, %214 : vector<32x1xf32>
    %216 = vector.broadcast %215 : vector<32x1xf32> to vector<32x32xf32>
    %217 = arith.subf %207, %216 : vector<32x32xf32>
    %218 = arith.mulf %217, %217 : vector<32x32xf32>
    %cst_98 = arith.constant dense<0.000000e+00> : vector<32xf32>
    %219 = vector.multi_reduction <add>, %218, %cst_98 [1] : vector<32x32xf32> to vector<32xf32>
    %220 = vector.shape_cast %219 : vector<32xf32> to vector<32x1xf32>
    %cst_99 = arith.constant 3.200000e+01 : f32
    %221 = vector.broadcast %cst_99 : f32 to vector<32x1xf32>
    %222 = arith.divf %220, %221 : vector<32x1xf32>
    %223 = vector.broadcast %215 : vector<32x1xf32> to vector<32x32xf32>
    %224 = arith.subf %207, %223 : vector<32x32xf32>
    %cst_100 = arith.constant 9.99999974E-6 : f32
    %225 = vector.broadcast %cst_100 : f32 to vector<32x1xf32>
    %226 = arith.addf %222, %225 : vector<32x1xf32>
    %227 = math.rsqrt %226 : vector<32x1xf32>
    %228 = vector.broadcast %227 : vector<32x1xf32> to vector<32x32xf32>
    %229 = arith.mulf %224, %228 : vector<32x32xf32>
    %230 = vector.broadcast %209 : vector<1x32xf32> to vector<32x32xf32>
    %231 = arith.mulf %229, %230 : vector<32x32xf32>
    %232 = vector.broadcast %211 : vector<1x32xf32> to vector<32x32xf32>
    %233 = arith.addf %231, %232 : vector<32x32xf32>
    %234 = vector.broadcast %2 : vector<32x1xf32> to vector<32x32xf32>
    %235 = arith.mulf %233, %234 : vector<32x32xf32>
    %236 = vector.shape_cast %235 : vector<32x32xf32> to vector<2x16x32xf32>
    %237 = tpu.concatenate %3, %236, %3 in 1 : vector<2x4x32xf32>, vector<2x16x32xf32>, vector<2x4x32xf32> -> vector<2x24x32xf32>
    %238 = vector.extract_strided_slice %237 {offsets = [0, 0, 0], sizes = [2, 16, 32], strides = [1, 1, 1]} : vector<2x24x32xf32> to vector<2x16x32xf32>
    %239 = vector.extract_strided_slice %237 {offsets = [0, 1, 0], sizes = [2, 16, 32], strides = [1, 1, 1]} : vector<2x24x32xf32> to vector<2x16x32xf32>
    %240 = vector.extract_strided_slice %237 {offsets = [0, 2, 0], sizes = [2, 16, 32], strides = [1, 1, 1]} : vector<2x24x32xf32> to vector<2x16x32xf32>
    %241 = vector.extract_strided_slice %237 {offsets = [0, 3, 0], sizes = [2, 16, 32], strides = [1, 1, 1]} : vector<2x24x32xf32> to vector<2x16x32xf32>
    %242 = vector.extract_strided_slice %237 {offsets = [0, 4, 0], sizes = [2, 16, 32], strides = [1, 1, 1]} : vector<2x24x32xf32> to vector<2x16x32xf32>
    %243 = vector.extract_strided_slice %237 {offsets = [0, 5, 0], sizes = [2, 16, 32], strides = [1, 1, 1]} : vector<2x24x32xf32> to vector<2x16x32xf32>
    %244 = vector.extract_strided_slice %237 {offsets = [0, 6, 0], sizes = [2, 16, 32], strides = [1, 1, 1]} : vector<2x24x32xf32> to vector<2x16x32xf32>
    %245 = vector.extract_strided_slice %237 {offsets = [0, 7, 0], sizes = [2, 16, 32], strides = [1, 1, 1]} : vector<2x24x32xf32> to vector<2x16x32xf32>
    %246 = vector.extract_strided_slice %237 {offsets = [0, 8, 0], sizes = [2, 16, 32], strides = [1, 1, 1]} : vector<2x24x32xf32> to vector<2x16x32xf32>
    %247 = tpu.concatenate %238, %239, %240, %241, %242, %243, %244, %245, %246 in 2 : vector<2x16x32xf32>, vector<2x16x32xf32>, vector<2x16x32xf32>, vector<2x16x32xf32>, vector<2x16x32xf32>, vector<2x16x32xf32>, vector<2x16x32xf32>, vector<2x16x32xf32>, vector<2x16x32xf32> -> vector<2x16x288xf32>
    %248 = vector.shape_cast %247 : vector<2x16x288xf32> to vector<32x288xf32>
    %c1_101 = arith.constant 1 : index
    %c0_102 = arith.constant 0 : index
    %c0_103 = arith.constant 0 : index
    %249 = vector.load %arg9[%c1_101, %c0_102, %c0_103] : memref<2x288x64xf32, #tpu.memory_space<vmem>>, vector<1x288x64xf32>
    %250 = vector.shape_cast %249 : vector<1x288x64xf32> to vector<288x64xf32>
    %cst_104 = arith.constant dense<0.000000e+00> : vector<32x64xf32>
    %251 = tpu.matmul %248, %250, %cst_104 {dimension_numbers = #tpu.dot_dimension_numbers<[1], [0], [0], [1], [0, 0, 1, 1], [], []>, precision = #tpu.contract_precision<fp32>} : vector<32x288xf32>, vector<288x64xf32>, vector<32x64xf32> -> vector<32x64xf32>
    %c1_105 = arith.constant 1 : index
    %c0_106 = arith.constant 0 : index
    %c0_107 = arith.constant 0 : index
    %252 = vector.load %arg10[%c1_105, %c0_106, %c0_107] : memref<2x1x64xf32, #tpu.memory_space<vmem>>, vector<1x1x64xf32>
    %253 = vector.shape_cast %252 : vector<1x1x64xf32> to vector<1x64xf32>
    %254 = vector.broadcast %253 : vector<1x64xf32> to vector<32x64xf32>
    %255 = arith.addf %251, %254 : vector<32x64xf32>
    %cst_108 = arith.constant 0.000000e+00 : f32
    %256 = vector.broadcast %cst_108 : f32 to vector<32x64xf32>
    %257 = arith.maximumf %255, %256 : vector<32x64xf32>
    %c1_109 = arith.constant 1 : index
    %c0_110 = arith.constant 0 : index
    %c0_111 = arith.constant 0 : index
    %258 = vector.load %arg11[%c1_109, %c0_110, %c0_111] : memref<2x64x32xf32, #tpu.memory_space<vmem>>, vector<1x64x32xf32>
    %259 = vector.shape_cast %258 : vector<1x64x32xf32> to vector<64x32xf32>
    %cst_112 = arith.constant dense<0.000000e+00> : vector<32x32xf32>
    %260 = tpu.matmul %257, %259, %cst_112 {dimension_numbers = #tpu.dot_dimension_numbers<[1], [0], [0], [1], [0, 0, 1, 1], [], []>, precision = #tpu.contract_precision<fp32>} : vector<32x64xf32>, vector<64x32xf32>, vector<32x32xf32> -> vector<32x32xf32>
    %c1_113 = arith.constant 1 : index
    %c0_114 = arith.constant 0 : index
    %c0_115 = arith.constant 0 : index
    %261 = vector.load %arg12[%c1_113, %c0_114, %c0_115] : memref<2x1x32xf32, #tpu.memory_space<vmem>>, vector<1x1x32xf32>
    %262 = vector.shape_cast %261 : vector<1x1x32xf32> to vector<1x32xf32>
    %263 = vector.broadcast %262 : vector<1x32xf32> to vector<32x32xf32>
    %264 = arith.addf %260, %263 : vector<32x32xf32>
    %265 = arith.addf %264, %235 : vector<32x32xf32>
    %c1_116 = arith.constant 1 : index
    %c0_117 = arith.constant 0 : index
    %c0_118 = arith.constant 0 : index
    %266 = vector.load %arg13[%c1_116, %c0_117, %c0_118] : memref<2x1x32xf32, #tpu.memory_space<vmem>>, vector<1x1x32xf32>
    %267 = vector.shape_cast %266 : vector<1x1x32xf32> to vector<1x32xf32>
    %c1_119 = arith.constant 1 : index
    %c0_120 = arith.constant 0 : index
    %c0_121 = arith.constant 0 : index
    %268 = vector.load %arg14[%c1_119, %c0_120, %c0_121] : memref<2x1x32xf32, #tpu.memory_space<vmem>>, vector<1x1x32xf32>
    %269 = vector.shape_cast %268 : vector<1x1x32xf32> to vector<1x32xf32>
    %cst_122 = arith.constant dense<0.000000e+00> : vector<32xf32>
    %270 = vector.multi_reduction <add>, %265, %cst_122 [1] : vector<32x32xf32> to vector<32xf32>
    %271 = vector.shape_cast %270 : vector<32xf32> to vector<32x1xf32>
    %cst_123 = arith.constant 3.200000e+01 : f32
    %272 = vector.broadcast %cst_123 : f32 to vector<32x1xf32>
    %273 = arith.divf %271, %272 : vector<32x1xf32>
    %274 = vector.broadcast %273 : vector<32x1xf32> to vector<32x32xf32>
    %275 = arith.subf %265, %274 : vector<32x32xf32>
    %276 = arith.mulf %275, %275 : vector<32x32xf32>
    %cst_124 = arith.constant dense<0.000000e+00> : vector<32xf32>
    %277 = vector.multi_reduction <add>, %276, %cst_124 [1] : vector<32x32xf32> to vector<32xf32>
    %278 = vector.shape_cast %277 : vector<32xf32> to vector<32x1xf32>
    %cst_125 = arith.constant 3.200000e+01 : f32
    %279 = vector.broadcast %cst_125 : f32 to vector<32x1xf32>
    %280 = arith.divf %278, %279 : vector<32x1xf32>
    %281 = vector.broadcast %273 : vector<32x1xf32> to vector<32x32xf32>
    %282 = arith.subf %265, %281 : vector<32x32xf32>
    %cst_126 = arith.constant 9.99999974E-6 : f32
    %283 = vector.broadcast %cst_126 : f32 to vector<32x1xf32>
    %284 = arith.addf %280, %283 : vector<32x1xf32>
    %285 = math.rsqrt %284 : vector<32x1xf32>
    %286 = vector.broadcast %285 : vector<32x1xf32> to vector<32x32xf32>
    %287 = arith.mulf %282, %286 : vector<32x32xf32>
    %288 = vector.broadcast %267 : vector<1x32xf32> to vector<32x32xf32>
    %289 = arith.mulf %287, %288 : vector<32x32xf32>
    %290 = vector.broadcast %269 : vector<1x32xf32> to vector<32x32xf32>
    %291 = arith.addf %289, %290 : vector<32x32xf32>
    %292 = vector.broadcast %2 : vector<32x1xf32> to vector<32x32xf32>
    %293 = arith.mulf %291, %292 : vector<32x32xf32>
    %c0_127 = arith.constant 0 : index
    %c0_128 = arith.constant 0 : index
    %294 = vector.load %arg15[%c0_127, %c0_128] : memref<32x32xf32, #tpu.memory_space<vmem>>, vector<32x32xf32>
    tpu.vector_store %arg15[%c0_127, %c0_128], %293 {strides = array<i32>} : memref<32x32xf32, #tpu.memory_space<vmem>>, vector<32x32xf32>,
    return
  }
}

</mosaic_0001>

<bundles_post_ra>
// kernel: tpu_custom_call.1
= control target key start
LH: loop header
LB: loop body
LE: loop exit
PB: predicated region body
PF: predicated region fallthrough
CT: control target
= control target key end

     0   :  { %vm69_vm0 = vcmask 261120   ;;  %s12580_s0 = inlined_call_operand.vmem [shape: f32[32,32], index: 0, kind: input, shape index: {}]   ;;  %s12581_s1 = inlined_call_operand.vmem [shape: f32[2,1,16], index: 1, kind: input, shape index: {}]   ;;  %s12582_s2 = inlined_call_operand.vmem [shape: f32[32,1], index: 2, kind: input, shape index: {}]   ;;  %s12583_s3 = inlined_call_operand.vmem [shape: f32[2,32,96], index: 3, kind: input, shape index: {}]   ;;  %s12584_s4 = inlined_call_operand.vmem [shape: f32[2,1,96], index: 4, kind: input, shape index: {}]   ;;  %s12585_s5 = inlined_call_operand.vmem [shape: f32[2,32,32], index: 5, kind: input, shape index: {}]   ;;  %s12586_s6 = inlined_call_operand.vmem [shape: f32[2,1,32], index: 6, kind: input, shape index: {}]   ;;  %s12587_s7 = inlined_call_operand.vmem [shape: f32[2,1,32], index: 7, kind: input, shape index: {}]   ;;  %s12588_s8 = inlined_call_operand.vmem [shape: f32[2,1,32], index: 8, kind: input, shape index: {}]   ;;  %s12589_s9 = inlined_call_operand.vmem [shape: f32[2,288,64], index: 9, kind: input, shape index: {}]   ;;  %s12590_s10 = inlined_call_operand.vmem [shape: f32[2,1,64], index: 10, kind: input, shape index: {}]   ;;  %s12591_s11 = inlined_call_operand.vmem [shape: f32[2,64,32], index: 11, kind: input, shape index: {}]   ;;  %s12592_s12 = inlined_call_operand.vmem [shape: f32[2,1,32], index: 12, kind: input, shape index: {}]   ;;  %s12593_s13 = inlined_call_operand.vmem [shape: f32[2,1,32], index: 13, kind: input, shape index: {}]   ;;  %s12594_s14 = inlined_call_operand.vmem [shape: f32[2,1,32], index: 14, kind: input, shape index: {}]   ;;  %s12595_s15 = inlined_call_operand.hbm [shape: f32[32,32], index: 15, kind: output, shape index: {}]  }
   0x1   :  { %v64_v0 = vld [vmem:[%s12583_s3 + $0x18] sm:$0xff]  ;;  %v63_v1 = vld [vmem:[%s12583_s3 + $0x10] sm:$0xff]  ;;  %v62_v2 = vld [vmem:[%s12583_s3 + $0x8] sm:$0xff] }
   0x2   :  { %v9315_v3 = vand.u32 4294901760, %v64_v0  ;;  %v9317_v4 = vand.u32 4294901760, %v63_v1  ;;  %v9319_v5 = vand.u32 4294901760, %v62_v2  ;;  %v61_v6 = vld [vmem:[%s12583_s3] sm:$0xff]  ;;  %v53_v7 = vld [vmem:[%s12580_s0 + $0x10] sm:$0xff]  ;;  %v54_v8 = vld [vmem:[%s12580_s0 + $0x18] sm:$0xff] }
   0x3   :  { %v9330_v9 = vand.u32 4294901760, %v61_v6  ;;  %v77_v10 = vsel %vm69_vm0, %v53_v7, 0  ;;  %v80_v11 = vsel %vm69_vm0, %v54_v8, 0  ;;  %v51_v12 = vld [vmem:[%s12580_s0] sm:$0xff]  ;;  %v52_v13 = vld [vmem:[%s12580_s0 + $0x8] sm:$0xff] }
   0x4   :  { %9043 = vmatpush.msra.mxu2 %v9315_v3  ;;  %v148_v14 = vsub.f32 %v64_v0, %v9315_v3  ;;  %v9342_v15 = vand.u32 4294901760, %v77_v10  ;;  %v154_v16 = vsub.f32 %v63_v1, %v9317_v4  ;;  %v160_v17 = vsub.f32 %v62_v2, %v9319_v5  ;;  %95 = vmatpush.msra.mxu0 %v9315_v3 }
   0x5   :  { %v166_v18 = vsub.f32 %v61_v6, %v9330_v9  ;;  %v9348_v19 = vand.u32 4294901760, %v80_v11  ;;  %v71_v20 = vsel %vm69_vm0, %v51_v12, 0  ;;  %v74_v21 = vsel %vm69_vm0, %v52_v13, 0 }
   0x6   :  { %9044 = vmatpush.msra.mxu2 %v9317_v4  ;;  %v149_v22 = vand.u32 4294901760, %v148_v14  ;;  %v9354_v23 = vsub.f32 %v77_v10, %v9342_v15  ;;  %v155_v24 = vand.u32 4294901760, %v154_v16  ;;  %v161_v25 = vand.u32 4294901760, %v160_v17  ;;  %97 = vmatpush.msra.mxu0 %v9317_v4 }
   0x7   :  { %v167_v26 = vand.u32 4294901760, %v166_v18  ;;  %v9358_v27 = vsub.f32 %v80_v11, %v9348_v19  ;;  %v9360_v28 = vand.u32 4294901760, %v71_v20  ;;  %v9362_v29 = vand.u32 4294901760, %v74_v21 }
   0x8   :  { %9045 = vmatpush.msra.mxu2 %v9319_v5  ;;  %v150_v30 = vsub.f32 %v148_v14, %v149_v22  ;;  %v120_v31 = vand.u32 4294901760, %v9354_v23  ;;  %v156_v32 = vsub.f32 %v154_v16, %v155_v24  ;;  %v162_v33 = vsub.f32 %v160_v17, %v161_v25  ;;  %99 = vmatpush.msra.mxu0 %v9319_v5 }
   0x9   :  { %v168_v34 = vsub.f32 %v166_v18, %v167_v26  ;;  %v103_v35 = vsub.f32 %v71_v20, %v9360_v28  ;;  %v111_v36 = vsub.f32 %v74_v21, %v9362_v29  ;;  %v128_v40 = vand.u32 4294901760, %v9358_v27 }
   0xa   :  { %9046 = vmatpush.msra.mxu2 %v9330_v9  ;;  %v151_v37 = vand.u32 4294901760, %v150_v30  ;;  %v121_v38 = vsub.f32 %v9354_v23, %v120_v31  ;;  %v157_v39 = vand.u32 4294901760, %v156_v32  ;;  %101 = vmatpush.msra.mxu0 %v9330_v9  ;;  %v163_v43 = vand.u32 4294901760, %v162_v33 }
   0xb   :  { %v104_v41 = vand.u32 4294901760, %v103_v35  ;;  %v169_v44 = vand.u32 4294901760, %v168_v34  ;;  %v112_v46 = vand.u32 4294901760, %v111_v36  ;;  %v129_v47 = vsub.f32 %v9358_v27, %v128_v40 }
   0xc   :  { %202 = vmatpush.msrb.mxu2 %v148_v14  ;;  %293 = vmatpush.msrb.mxu0 %v149_v22  ;;  %v122_v42 = vand.u32 4294901760, %v121_v38 }
   0xd   :  { %9047 = vmatpush.msra.mxu3 %v151_v37  ;;  %152 = vmatpush.msra.mxu1 %v151_v37  ;;  %v105_v45 = vsub.f32 %v103_v35, %v104_v41 }
   0xe   :  { %205 = vmatpush.msrb.mxu2 %v154_v16  ;;  %297 = vmatpush.msrb.mxu0 %v155_v24 }
   0xf   :  { %123 = vmatmul.f32.vlgmr.msra.gmra.mxu2 %v122_v42  ;;  %9048 = vmatpush.msra.mxu3 %v157_v39  ;;  %v106_v48 = vand.u32 4294901760, %v105_v45 }
  0x10   :  { %158 = vmatpush.msra.mxu1 %v157_v39  ;;  %208 = vmatpush.msrb.mxu2 %v160_v17 }
  0x11   :  { %20 = vsyncpa [#allocation3], 0  ;;  %9049 = vmatpush.msra.mxu3 %v163_v43  ;;  %301 = vmatpush.msrb.mxu0 %v161_v25  ;;  %v113_v49 = vsub.f32 %v111_v36, %v112_v46  ;;  %v130_v50 = vand.u32 4294901760, %v129_v47  ;;  %v9066_v63 = vld [vmem:[%s12584_s4] ss:$0 sm:$0xff]  ;;  %s9214_s21 = smov 96  }
  0x12   :  { %164 = vmatpush.msra.mxu1 %v163_v43  ;;  %107 = vmatmul.f32.vlgmr.msra.gmra.mxu0 %v106_v48  ;;  %vm366_vm1 = vcmask 130048   ;;  %s9215_s26 = smov 64   ;;  %s9216_s27 = smov 112  }
  0x13   :  { %9050 = vmatpush.msra.mxu3 %v169_v44  ;;  %211 = vmatpush.msrb.mxu2 %v166_v18  ;;  %v114_v51 = vand.u32 4294901760, %v113_v49  ;;  %s9217_s28 = smov 80   ;;  %s9218_s29 = smov 48  }
  0x14   :  { %180 = vmatmul.f32.vlgmr.msra.gmra.mxu3 %v9342_v15  ;;  %170 = vmatpush.msra.mxu1 %v169_v44  ;;  %s9219_s30 = smov 16   ;;  %s9222_s17 = smov 32  }
  0x15   :  { %246 = vmatpush.msrb.mxu3 %v9315_v3  ;;  %172 = vmatmul.f32.vlgmr.msra.gmra.mxu1 %v9360_v28  ;;  %s8971_s19 = sshll.u32 %s12595_s15, 4  ;;  %s9224_s20 = smov 128   ;;  %s8972_s19 = int_to_ptr.hbm [resolvable:$true] %s8971_s19 }
  0x16   :  { %336 = vmatpush.msrb.mxu1 %v9315_v3  ;;  %305 = vmatpush.msrb.mxu0 %v167_v26 }
  0x17   :  { %131 = vmatmul.f32.gmra.mxu2 %v130_v50  ;;  %248 = vmatpush.msrb.mxu3 %v9317_v4 }
  0x18   :  { %338 = vmatpush.msrb.mxu1 %v9317_v4 }
  0x19   :  { %250 = vmatpush.msrb.mxu3 %v9319_v5 }
  0x1a   :  { %115 = vmatmul.f32.gmra.mxu0 %v114_v51  ;;  %340 = vmatpush.msrb.mxu1 %v9319_v5 }
  0x1b   :  { %252 = vmatpush.msrb.mxu3 %v9330_v9 }
  0x1c   :  { %184 = vmatmul.f32.gmra.mxu3 %v9348_v19  ;;  %342 = vmatpush.msrb.mxu1 %v9330_v9 }
  0x1d   :  { %176 = vmatmul.f32.gmra.mxu1 %v9362_v29 }
  0x1f   :  { %214 = vmatmul.f32.vlgmr.msrb.gmra.mxu2 %v103_v35 }
  0x22   :  { %307 = vmatmul.f32.vlgmr.msrb.gmra.mxu0 %v9360_v28 }
  0x24   :  { %256 = vmatmul.f32.vlgmr.msrb.gmra.mxu3 %v104_v41 }
  0x25   :  { %344 = vmatmul.f32.vlgmr.msrb.gmra.mxu1 %v9360_v28 }
  0x27   :  { %219 = vmatmul.f32.gmra.mxu2 %v111_v36 }
  0x2a   :  { %311 = vmatmul.f32.gmra.mxu0 %v9362_v29 }
  0x2c   :  { %262 = vmatmul.f32.gmra.mxu3 %v112_v46 }
  0x2d   :  { %348 = vmatmul.f32.gmra.mxu1 %v9362_v29 }
  0x2f   :  { %224 = vmatmul.f32.gmra.mxu2 %v9354_v23 }
  0x32   :  { %315 = vmatmul.f32.gmra.mxu0 %v9342_v15 }
  0x34   :  { %268 = vmatmul.f32.gmra.mxu3 %v120_v31 }
  0x35   :  { %352 = vmatmul.f32.gmra.mxu1 %v9342_v15 }
  0x37   :  { %229 = vmatmul.f32.gmra.mxu2 %v9358_v27 }
  0x3a   :  { %319 = vmatmul.f32.gmra.mxu0 %v9348_v19 }
  0x3c   :  { %274 = vmatmul.f32.gmra.mxu3 %v128_v40 }
  0x3d   :  { %356 = vmatmul.f32.gmra.mxu1 %v9348_v19 }
  0x8f   :  { %v108_v52 = vpop.f32.mrf.mxu0 }
  0x90   :  { %v109_v4 = vadd.f32 %v9066_v63, %v108_v52 }
  0x92   :  { %v124_v53 = vpop.f32.mrf.mxu2  ;;  %v173_v54 = vpop.f32.mrf.mxu1 }
  0x93   :  { %v174_v9 = vadd.f32 %v173_v54, %v109_v4  ;;  %v125_v22 = vadd.f32 %v9066_v63, %v124_v53 }
  0x97   :  { %v181_v55 = vpop.f32.mrf.mxu3  ;;  %v116_v56 = vpop.f32.mrf.mxu0 }
  0x98   :  { %v117_v1 = vadd.f32 %v9066_v63, %v116_v56  ;;  %v182_v28 = vadd.f32 %v181_v55, %v125_v22 }
  0x9a   :  { %v132_v57 = vpop.f32.mrf.mxu2  ;;  %v177_v58 = vpop.f32.mrf.mxu1 }
  0x9b   :  { %v178_v5 = vadd.f32 %v177_v58, %v117_v1  ;;  %v133_v19 = vadd.f32 %v9066_v63, %v132_v57 }
  0x9f   :  { %v185_v59 = vpop.f32.mrf.mxu3  ;;  %v308_v60 = vpop.f32.mrf.mxu0 }
  0xa0   :  { %v186_v23 = vadd.f32 %v185_v59, %v133_v19 }
  0xa2   :  { %v215_v61 = vpop.f32.mrf.mxu2  ;;  %v345_v62 = vpop.f32.mrf.mxu1 }
  0xa3   :  { %v216_v11 = vadd.f32 %v215_v61, %v174_v9 }
  0xa7   :  { %v257_v0 = vpop.f32.mrf.mxu3  ;;  %v312_v3 = vpop.f32.mrf.mxu0 }
  0xa8   :  { %v258_v14 = vadd.f32 %v257_v0, %v216_v11 }
  0xaa   :  { %v220_v2 = vpop.f32.mrf.mxu2  ;;  %v349_v6 = vpop.f32.mrf.mxu1  ;;  %v309_v20 = vadd.f32 %v308_v60, %v258_v14 }
  0xab   :  { %v221_v7 = vadd.f32 %v220_v2, %v178_v5 }
  0xac   :  { %v9407_v24 = vadd.f32 %v345_v62, %v309_v20 }
  0xae   :  { %v367_v37 = vsel %vm366_vm1, %v9407_v24, 0 }
  0xaf   :  { %v263_v8 = vpop.f32.mrf.mxu3  ;;  %v316_v16 = vpop.f32.mrf.mxu0  ;;  %v393_v38 = vand.u32 4294901760, %v367_v37 }
  0xb0   :  { %v264_v10 = vadd.f32 %v263_v8, %v221_v7 }
  0xb1   :  { %v9422_v41 = vsub.f32 %v367_v37, %v393_v38 }
  0xb2   :  { %v225_v12 = vpop.f32.mrf.mxu2  ;;  %v313_v13 = vadd.f32 %v312_v3, %v264_v10  ;;  %v353_v18 = vpop.f32.mrf.mxu1 }
  0xb3   :  { %v226_v31 = vadd.f32 %v225_v12, %v182_v28  ;;  %v395_v45 = vand.u32 4294901760, %v9422_v41 }
  0xb4   :  { %v9403_v15 = vadd.f32 %v349_v6, %v313_v13 }
  0xb5   :  { %v396_v51 = vsub.f32 %v9422_v41, %v395_v45 }
  0xb6   :  { %364 = vrot.lane.b32.xlu0 %v9403_v15, %s9214_s21  ;;  %v369_v43 = vsel %vm366_vm1, %v9403_v15, 0 }
  0xb7   :  { %v269_v17 = vpop.f32.mrf.mxu3  ;;  %v320_v27 = vpop.f32.mrf.mxu0  ;;  %v401_v46 = vand.u32 4294901760, %v369_v43  ;;  %v397_v56 = vand.u32 4294901760, %v396_v51 }
  0xb8   :  { %v270_v33 = vadd.f32 %v269_v17, %v226_v31 }
  0xb9   :  { %v9431_v52 = vsub.f32 %v369_v43, %v401_v46 }
  0xba   :  { %v230_v21 = vpop.f32.mrf.mxu2  ;;  %v357_v30 = vpop.f32.mrf.mxu1  ;;  %v317_v35 = vadd.f32 %v316_v16, %v270_v33 }
  0xbb   :  { %v231_v25 = vadd.f32 %v230_v21, %v186_v23  ;;  %v403_v57 = vand.u32 4294901760, %v9431_v52 }
  0xbc   :  { %v9415_v36 = vadd.f32 %v353_v18, %v317_v35 }
  0xbd   :  { %v404_v62 = vsub.f32 %v9431_v52, %v403_v57 }
  0xbe   :  { %362 = vrot.lane.b32.xlu0 %v9407_v24, %s9214_s21  ;;  %v571_v1 = vsel %vm366_vm1, %v9415_v36, 0 }
  0xbf   :  { %v275_v26 = vpop.f32.mrf.mxu3  ;;  %v405_v3 = vand.u32 4294901760, %v404_v62  ;;  %v597_v5 = vand.u32 4294901760, %v571_v1 }
  0xc0   :  { %v276_v29 = vadd.f32 %v275_v26, %v231_v25 }
  0xc1   :  { %v598_v11 = vsub.f32 %v571_v1, %v597_v5 }
  0xc2   :  { %v321_v32 = vadd.f32 %v320_v27, %v276_v29 }
  0xc3   :  { %v599_v14 = vand.u32 4294901760, %v598_v11 }
  0xc4   :  { %v9411_v34 = vadd.f32 %v357_v30, %v321_v32 }
  0xc5   :  { %v600_v22 = vsub.f32 %v598_v11, %v599_v14 }
  0xc6   :  { %569 = vrot.lane.b32.xlu1 %v9411_v34, %s9214_s21  ;;  %v573_v12 = vsel %vm366_vm1, %v9411_v34, 0 }
  0xc7   :  { %v605_v17 = vand.u32 4294901760, %v573_v12  ;;  %v601_v23 = vand.u32 4294901760, %v600_v22 }
  0xc9   :  { %v606_v20 = vsub.f32 %v573_v12, %v605_v17 }
  0xcb   :  { %v607_v21 = vand.u32 4294901760, %v606_v20 }
  0xcd   :  { %v608_v25 = vsub.f32 %v606_v20, %v607_v21 }
  0xce   :  { %567 = vrot.lane.b32.xlu1 %v9415_v36, %s9214_s21 }
  0xcf   :  { %v609_v26 = vand.u32 4294901760, %v608_v25 }
 0x128   :  { %v365_v39 = vpop.permute.xlu0 %364 }
 0x129   :  { %v373_v40 = vsel %vm366_vm1, %v365_v39, 0 }
 0x12a   :  { %v389_v42 = vand.u32 4294901760, %v373_v40 }
 0x12c   :  { %v425_v44 = vsub.f32 %v373_v40, %v389_v42  ;;  %390 = vmatpush.xpose.msra.mxu2 %v389_v42  ;;  %553 = vmatpush.xpose.msra.mxu1 %v389_v42 }
 0x12e   :  { %v426_v47 = vand.u32 4294901760, %v425_v44 }
 0x130   :  { %v427_v48 = vsub.f32 %v425_v44, %v426_v47  ;;  %524 = vmatpush.xpose.msra.mxu0 %v426_v47  ;;  %v363_v49 = vpop.permute.xlu0 %362 }
 0x131   :  { %v371_v50 = vsel %vm366_vm1, %v363_v49, 0 }
 0x132   :  { %v391_v53 = vand.u32 4294901760, %v371_v50  ;;  %v428_v54 = vand.u32 4294901760, %v427_v48 }
 0x134   :  { %v431_v55 = vsub.f32 %v371_v50, %v391_v53  ;;  %392 = vmatpush.xpose.msra.mxu2 %v391_v53  ;;  %429 = vmatpush.xpose.msra.mxu3 %v428_v54 }
 0x135   :  { %555 = vmatpush.xpose.msra.mxu1 %v391_v53 }
 0x136   :  { %v432_v58 = vand.u32 4294901760, %v431_v55 }
 0x137   :  { %398 = vmatmul.f32.vlgmr.msra.gmra.mxu2 %v397_v56 }
 0x138   :  { %461 = vmatpush.xpose.msrb.mxu2 %v425_v44  ;;  %557 = vmatmul.f32.vlgmr.msra.gmra.mxu1 %v393_v38  ;;  %v570_v59 = vpop.permute.xlu1 %569  ;;  %v433_v60 = vsub.f32 %v431_v55, %v432_v58  ;;  %v9448_v44 = vld [vmem:[%s12581_s1] ss:$0 sm:$0xff] }
 0x139   :  { %528 = vmatpush.xpose.msra.mxu0 %v432_v58  ;;  %v577_v61 = vsel %vm366_vm1, %v570_v59, 0 }
 0x13a   :  { %v593_v63 = vand.u32 4294901760, %v577_v61  ;;  %v434_v0 = vand.u32 4294901760, %v433_v60 }
 0x13c   :  { %464 = vmatpush.xpose.msrb.mxu2 %v431_v55  ;;  %530 = vmatmul.f32.vlgmr.msra.gmra.mxu0 %v393_v38  ;;  %v629_v2 = vsub.f32 %v577_v61, %v593_v63 }
 0x13d   :  { %435 = vmatpush.xpose.msra.mxu3 %v434_v0  ;;  %695 = vmatpush.xpose.msrb.mxu1 %v593_v63 }
 0x13e   :  { %v630_v4 = vand.u32 4294901760, %v629_v2  ;;  %665 = vmatpush.xpose.msrb.mxu0 %v629_v2 }
 0x13f   :  { %406 = vmatmul.f32.gmra.mxu2 %v405_v3 }
 0x140   :  { %594 = vmatpush.xpose.msra.mxu2 %v593_v63  ;;  %437 = vmatmul.f32.vlgmr.msra.gmra.mxu3 %v393_v38  ;;  %v631_v6 = vsub.f32 %v629_v2, %v630_v4  ;;  %v568_v7 = vpop.permute.xlu1 %567 }
 0x141   :  { %491 = vmatpush.xpose.msrb.mxu3 %v389_v42  ;;  %561 = vmatmul.f32.gmra.mxu1 %v401_v46  ;;  %v575_v8 = vsel %vm366_vm1, %v568_v7, 0 }
 0x142   :  { %v595_v9 = vand.u32 4294901760, %v575_v8  ;;  %v632_v10 = vand.u32 4294901760, %v631_v6 }
 0x144   :  { %534 = vmatmul.f32.gmra.mxu0 %v401_v46  ;;  %v635_v13 = vsub.f32 %v575_v8, %v595_v9  ;;  %596 = vmatpush.xpose.msra.mxu2 %v595_v9 }
 0x145   :  { %493 = vmatpush.xpose.msrb.mxu3 %v391_v53  ;;  %697 = vmatpush.xpose.msrb.mxu1 %v595_v9 }
 0x146   :  { %668 = vmatpush.xpose.msrb.mxu0 %v635_v13  ;;  %v636_v16 = vand.u32 4294901760, %v635_v13 }
 0x147   :  { %467 = vmatmul.f32.vlgmr.msrb.gmra.mxu2 %v9422_v41 }
 0x148   :  { %441 = vmatmul.f32.gmra.mxu3 %v401_v46  ;;  %728 = vmatpush.xpose.msrb.mxu2 %v630_v4  ;;  %v637_v18 = vsub.f32 %v635_v13, %v636_v16 }
 0x149   :  { %633 = vmatpush.xpose.msra.mxu3 %v632_v10  ;;  %701 = vmatmul.f32.vlgmr.msrb.gmra.mxu1 %v599_v14  ;;  %v9457_v10 = vld [vmem:[%s12581_s1 + $0x1] ss:$0 sm:$0xff] }
 0x14a   :  { %v638_v19 = vand.u32 4294901760, %v637_v18 }
 0x14c   :  { %671 = vmatmul.f32.vlgmr.msrb.gmra.mxu0 %v598_v11  ;;  %732 = vmatpush.xpose.msrb.mxu2 %v636_v16 }
 0x14d   :  { %639 = vmatpush.xpose.msra.mxu3 %v638_v19 }
 0x14f   :  { %472 = vmatmul.f32.gmra.mxu2 %v9431_v52 }
 0x150   :  { %497 = vmatmul.f32.vlgmr.msrb.gmra.mxu3 %v395_v45 }
 0x151   :  { %707 = vmatmul.f32.gmra.mxu1 %v607_v21  ;;  %757 = vmatpush.xpose.msrb.mxu3 %v593_v63 }
 0x154   :  { %676 = vmatmul.f32.gmra.mxu0 %v606_v20 }
 0x155   :  { %759 = vmatpush.xpose.msrb.mxu3 %v595_v9 }
 0x157   :  { %602 = vmatmul.f32.vlgmr.msra.gmra.mxu2 %v601_v23 }
 0x158   :  { %503 = vmatmul.f32.gmra.mxu3 %v403_v57 }
 0x15f   :  { %610 = vmatmul.f32.gmra.mxu2 %v609_v26 }
 0x160   :  { %641 = vmatmul.f32.vlgmr.msra.gmra.mxu3 %v597_v5 }
 0x167   :  { %734 = vmatmul.f32.vlgmr.msrb.gmra.mxu2 %v597_v5 }
 0x168   :  { %645 = vmatmul.f32.gmra.mxu3 %v605_v17 }
 0x16f   :  { %738 = vmatmul.f32.gmra.mxu2 %v605_v17 }
 0x170   :  { %761 = vmatmul.f32.vlgmr.msrb.gmra.mxu3 %v597_v5 }
 0x178   :  { %765 = vmatmul.f32.gmra.mxu3 %v605_v17 }
 0x1b5   :  { %v558_v40 = vpop.f32.mrf.mxu1 }
 0x1b9   :  { %v531_v33 = vpop.f32.mrf.mxu0 }
 0x1ba   :  { %v399_v27 = vpop.f32.mrf.mxu2 }
 0x1be   :  { %v562_v54 = vpop.f32.mrf.mxu1 }
 0x1c1   :  { %v535_v51 = vpop.f32.mrf.mxu0 }
 0x1c2   :  { %v407_v28 = vpop.f32.mrf.mxu2 }
 0x1c3   :  { %v438_v29 = vpop.f32.mrf.mxu3 }
 0x1c4   :  { %v439_v32 = vadd.f32 %v438_v29, %v399_v27 }
 0x1c6   :  { %v702_v1 = vpop.f32.mrf.mxu1 }
 0x1c9   :  { %v672_v62 = vpop.f32.mrf.mxu0 }
 0x1ca   :  { %v468_v31 = vpop.f32.mrf.mxu2 }
 0x1cb   :  { %v442_v30 = vpop.f32.mrf.mxu3  ;;  %v469_v35 = vadd.f32 %v468_v31, %v439_v32 }
 0x1cc   :  { %v443_v42 = vadd.f32 %v442_v30, %v407_v28 }
 0x1ce   :  { %v708_v12 = vpop.f32.mrf.mxu1 }
 0x1d1   :  { %v677_v6 = vpop.f32.mrf.mxu0 }
 0x1d2   :  { %v473_v37 = vpop.f32.mrf.mxu2 }
 0x1d3   :  { %v498_v38 = vpop.f32.mrf.mxu3  ;;  %v474_v45 = vadd.f32 %v473_v37, %v443_v42 }
 0x1d4   :  { %v499_v39 = vadd.f32 %v498_v38, %v469_v35 }
 0x1d6   :  { %v532_v41 = vadd.f32 %v531_v33, %v499_v39 }
 0x1d8   :  { %v559_v43 = vadd.f32 %v558_v40, %v532_v41 }
 0x1da   :  { %v769_v46 = vmul.f32 0.25, %v559_v43  ;;  %v603_v48 = vpop.f32.mrf.mxu2 }
 0x1db   :  { %v504_v47 = vpop.f32.mrf.mxu3 }
 0x1dc   :  { %v505_v49 = vadd.f32 %v504_v47, %v474_v45  ;;  %v779_v50 = vadd.f32 %v9448_v44, %v769_v46 }
 0x1de   :  { %v536_v52 = vadd.f32 %v535_v51, %v505_v49  ;;  %v783_v53 = vsel %vm366_vm1, %v779_v50, -inf }
 0x1df   :  { %784 = vmax.xlane.f32.xlu2 %v783_v53 }
 0x1e0   :  { %v563_v55 = vadd.f32 %v562_v54, %v536_v52 }
 0x1e2   :  { %v770_v56 = vmul.f32 0.25, %v563_v55  ;;  %v611_v57 = vpop.f32.mrf.mxu2 }
 0x1e3   :  { %v642_v58 = vpop.f32.mrf.mxu3 }
 0x1e4   :  { %v780_v59 = vadd.f32 %v9448_v44, %v770_v56  ;;  %v643_v61 = vadd.f32 %v642_v58, %v603_v48 }
 0x1e6   :  { %v786_v60 = vsel %vm366_vm1, %v780_v59, -inf  ;;  %v673_v0 = vadd.f32 %v672_v62, %v643_v61 }
 0x1e7   :  { %787 = vmax.xlane.f32.xlu2 %v786_v60 }
 0x1e8   :  { %v703_v4 = vadd.f32 %v702_v1, %v673_v0 }
 0x1ea   :  { %v735_v2 = vpop.f32.mrf.mxu2 }
 0x1eb   :  { %v646_v63 = vpop.f32.mrf.mxu3  ;;  %v736_v5 = vadd.f32 %v735_v2, %v703_v4 }
 0x1ec   :  { %v647_v3 = vadd.f32 %v646_v63, %v611_v57 }
 0x1ee   :  { %v678_v8 = vadd.f32 %v677_v6, %v647_v3 }
 0x1f0   :  { %v709_v14 = vadd.f32 %v708_v12, %v678_v8 }
 0x1f2   :  { %v739_v13 = vpop.f32.mrf.mxu2 }
 0x1f3   :  { %v762_v7 = vpop.f32.mrf.mxu3  ;;  %v740_v17 = vadd.f32 %v739_v13, %v709_v14 }
 0x1f4   :  { %v763_v9 = vadd.f32 %v762_v7, %v736_v5 }
 0x1f6   :  { %v771_v11 = vmul.f32 0.25, %v763_v9 }
 0x1f8   :  { %v781_v16 = vadd.f32 %v9457_v10, %v771_v11 }
 0x1fa   :  { %v789_v18 = vsel %vm366_vm1, %v781_v16, -inf }
 0x1fb   :  { %v766_v19 = vpop.f32.mrf.mxu3  ;;  %790 = vmax.xlane.f32.xlu0 %v789_v18 }
 0x1fc   :  { %v767_v20 = vadd.f32 %v766_v19, %v740_v17 }
 0x1fe   :  { %v772_v21 = vmul.f32 0.25, %v767_v20 }
 0x1ff   :  { %881 = vrot.lane.b32.xlu2 %v9403_v15, %s9215_s26 }
 0x200   :  { %v782_v22 = vadd.f32 %v9457_v10, %v772_v21 }
 0x202   :  { %v792_v23 = vsel %vm366_vm1, %v782_v22, -inf }
 0x203   :  { %793 = vmax.xlane.f32.xlu1 %v792_v23 }
 0x21c   :  { %879 = vrot.lane.b32.xlu1 %v9407_v24, %s9215_s26 }
 0x224   :  { %1283 = vrot.lane.b32.xlu1 %v9407_v24, %s9216_s27 }
 0x22c   :  { %1493 = vrot.lane.b32.xlu1 %v9415_v36, %s9217_s28 }
 0x252   :  { %v785_v25 = vpop.xlane.xlu2 %784 }
 0x253   :  { %v795_v26 = vsub.f32 %v779_v50, %v785_v25 }
 0x255   :  { %v799_v27 = vmul.f32 1.442695, %v795_v26 }
 0x257   :  { %9084 = vpow2.f32 %v799_v27 }
 0x25a   :  { %v788_v28 = vpop.xlane.xlu2 %787 }
 0x25b   :  { %v796_v29 = vsub.f32 %v780_v59, %v788_v28 }
 0x25d   :  { %v9471_v30 = vpop.eup %9084  ;;  %v801_v31 = vmul.f32 1.442695, %v796_v29 }
 0x25e   :  { %v807_v32 = vsel %vm366_vm1, %v9471_v30, 0.0 }
 0x25f   :  { %9086 = vpow2.f32 %v801_v31  ;;  %808 = vadd.xlane.f32.xlu2 %v807_v32 }
 0x262   :  { %v882_v33 = vpop.permute.xlu2 %881 }
 0x263   :  { %v905_v35 = vand.u32 4294901760, %v882_v33 }
 0x265   :  { %v9475_v37 = vpop.eup %9086  ;;  %v941_v38 = vsub.f32 %v882_v33, %v905_v35  ;;  %906 = vmatpush.msra.mxu0 %v905_v35  ;;  %1007 = vmatpush.msra.mxu3 %v905_v35 }
 0x266   :  { %v810_v39 = vsel %vm366_vm1, %v9475_v37, 0.0 }
 0x267   :  { %v942_v40 = vand.u32 4294901760, %v941_v38  ;;  %811 = vadd.xlane.f32.xlu2 %v810_v39  ;;  %977 = vmatpush.msra.mxu2 %v941_v38 }
 0x269   :  { %v943_v41 = vsub.f32 %v941_v38, %v942_v40 }
 0x26b   :  { %v944_v42 = vand.u32 4294901760, %v943_v41 }
 0x26d   :  { %945 = vmatpush.msra.mxu1 %v944_v42 }
 0x26e   :  { %v791_v43 = vpop.xlane.xlu0 %790 }
 0x26f   :  { %v797_v45 = vsub.f32 %v781_v16, %v791_v43 }
 0x271   :  { %v803_v46 = vmul.f32 1.442695, %v797_v45 }
 0x273   :  { %9088 = vpow2.f32 %v803_v46 }
 0x276   :  { %v794_v47 = vpop.xlane.xlu1 %793 }
 0x277   :  { %v798_v48 = vsub.f32 %v782_v22, %v794_v47 }
 0x279   :  { %v9479_v49 = vpop.eup %9088  ;;  %v805_v50 = vmul.f32 1.442695, %v798_v48 }
 0x27a   :  { %v813_v51 = vsel %vm366_vm1, %v9479_v49, 0.0 }
 0x27b   :  { %9090 = vpow2.f32 %v805_v50  ;;  %814 = vadd.xlane.f32.xlu2 %v813_v51 }
 0x281   :  { %v9483_v52 = vpop.eup %9090 }
 0x282   :  { %v816_v53 = vsel %vm366_vm1, %v9483_v52, 0.0 }
 0x283   :  { %817 = vadd.xlane.f32.xlu0 %v816_v53 }
 0x28e   :  { %v880_v54 = vpop.permute.xlu1 %879 }
 0x28f   :  { %v907_v55 = vand.u32 4294901760, %v880_v54 }
 0x291   :  { %v947_v56 = vsub.f32 %v880_v54, %v907_v55  ;;  %908 = vmatpush.msra.mxu0 %v907_v55  ;;  %1009 = vmatpush.msra.mxu3 %v907_v55 }
 0x293   :  { %1040 = vmatpush.msrb.mxu0 %v942_v40  ;;  %1083 = vrot.lane.b32.xlu2 %v9411_v34, %s9215_s26  ;;  %v948_v57 = vand.u32 4294901760, %v947_v56 }
 0x294   :  { %980 = vmatpush.msra.mxu2 %v947_v56 }
 0x295   :  { %1044 = vmatpush.msrb.mxu0 %v948_v57  ;;  %v949_v58 = vsub.f32 %v947_v56, %v948_v57 }
 0x297   :  { %1081 = vrot.lane.b32.xlu0 %v9415_v36, %s9215_s26  ;;  %v950_v59 = vand.u32 4294901760, %v949_v58 }
 0x299   :  { %951 = vmatpush.msra.mxu1 %v950_v59 }
 0x29b   :  { %1069 = vmatpush.msrb.mxu1 %v905_v35  ;;  %1289 = vrot.lane.b32.xlu2 %v9403_v15, %s9217_s28 }
 0x29d   :  { %1071 = vmatpush.msrb.mxu1 %v907_v55 }
 0x29f   :  { %1285 = vrot.lane.b32.xlu0 %v9403_v15, %s9216_s27 }
 0x2a3   :  { %1287 = vrot.lane.b32.xlu2 %v9407_v24, %s9217_s28 }
 0x2a7   :  { %1489 = vrot.lane.b32.xlu0 %v9415_v36, %s9216_s27 }
 0x2ab   :  { %1495 = vrot.lane.b32.xlu2 %v9411_v34, %s9217_s28 }
 0x2b3   :  { %1491 = vrot.lane.b32.xlu2 %v9411_v34, %s9216_s27 }
 0x2d2   :  { %v809_v60 = vpop.xlane.xlu2 %808 }
 0x2d3   :  { %9092 = vrcp.f32 %v809_v60  ;;  %v830_v1 = vand.u32 2147483648, %v809_v60  ;;  %v828_v3 = vand.u32 2147483647, %v809_v60  ;;  %vm824_vm3 = vweird.f32 %v809_v60 }
 0x2d5   :  { %v831_v6 = vor.u32 1.1754944e-38, %v830_v1  ;;  %vm829_vm5 = vcmp.eq.f32.partialorder %v828_v3, 8.507059e+37 }
 0x2d9   :  { %v9093_v61 = vpop.eup %9092 }
 0x2da   :  { %v820_v62 = vmul.f32 %v9093_v61, %v809_v60  ;;  %v812_v63 = vpop.xlane.xlu2 %811  ;;  %vm825_vm2 = vweird.f32 %v9093_v61 }
 0x2db   :  { %9094 = vrcp.f32 %v812_v63  ;;  %vm826_vm4 = vmor %vm824_vm3, %vm825_vm2  ;;  %v845_v13 = vand.u32 2147483648, %v812_v63  ;;  %v843_v16 = vand.u32 2147483647, %v812_v63  ;;  %vm839_vm7 = vweird.f32 %v812_v63 }
 0x2dc   :  { %v821_v0 = vsub.f32 1.0, %v820_v62 }
 0x2dd   :  { %v846_v20 = vor.u32 1.1754944e-38, %v845_v13  ;;  %vm844_vm9 = vcmp.eq.f32.partialorder %v843_v16, 8.507059e+37 }
 0x2de   :  { %v822_v2 = vmul.f32 %v9093_v61, %v821_v0 }
 0x2e0   :  { %v823_v4 = vadd.f32 %v9093_v61, %v822_v2 }
 0x2e1   :  { %v9095_v5 = vpop.eup %9094 }
 0x2e2   :  { %v835_v7 = vmul.f32 %v9095_v5, %v812_v63  ;;  %v827_v8 = vsel %vm826_vm4, %v9093_v61, %v823_v4  ;;  %vm840_vm6 = vweird.f32 %v9095_v5 }
 0x2e3   :  { %v832_v9 = vsel %vm829_vm5, %v831_v6, %v827_v8  ;;  %vm841_vm8 = vmor %vm839_vm7, %vm840_vm6 }
 0x2e4   :  { %v836_v11 = vsub.f32 1.0, %v835_v7  ;;  %v833_v12 = vmul.f32 %v9471_v30, %v832_v9 }
 0x2e6   :  { %v837_v14 = vmul.f32 %v9095_v5, %v836_v11  ;;  %v886_v17 = vsel %vm366_vm1, %v833_v12, 0 }
 0x2e7   :  { %v9505_v18 = vand.u32 4294901760, %v886_v17 }
 0x2e8   :  { %v838_v19 = vadd.f32 %v9095_v5, %v837_v14 }
 0x2e9   :  { %953 = vmatmul.f32.vlgmr.msra.gmra.mxu1 %v9505_v18  ;;  %v910_v21 = vsub.f32 %v886_v17, %v9505_v18 }
 0x2ea   :  { %v842_v22 = vsel %vm841_vm8, %v9095_v5, %v838_v19 }
 0x2eb   :  { %983 = vmatmul.f32.vlgmr.msra.gmra.mxu2 %v910_v21  ;;  %v911_v23 = vand.u32 4294901760, %v910_v21  ;;  %v847_v25 = vsel %vm844_vm9, %v846_v20, %v842_v22  ;;  %v1284_v22 = vpop.permute.xlu1 %1283 }
 0x2ec   :  { %v848_v26 = vmul.f32 %v9475_v37, %v847_v25 }
 0x2ed   :  { %1013 = vmatmul.f32.vlgmr.msra.gmra.mxu3 %v911_v23  ;;  %v912_v27 = vsub.f32 %v910_v21, %v911_v23 }
 0x2ee   :  { %v815_v28 = vpop.xlane.xlu2 %814  ;;  %v889_v29 = vsel %vm366_vm1, %v848_v26, 0 }
 0x2ef   :  { %9096 = vrcp.f32 %v815_v28  ;;  %v913_v30 = vand.u32 4294901760, %v912_v27  ;;  %v9511_v31 = vand.u32 4294901760, %v889_v29  ;;  %v860_v45 = vand.u32 2147483648, %v815_v28 }
 0x2f0   :  { %v858_v47 = vand.u32 2147483647, %v815_v28  ;;  %vm854_vm11 = vweird.f32 %v815_v28 }
 0x2f1   :  { %914 = vmatmul.f32.vlgmr.msra.gmra.mxu0 %v913_v30  ;;  %957 = vmatmul.f32.gmra.mxu1 %v9511_v31  ;;  %v918_v32 = vsub.f32 %v889_v29, %v9511_v31  ;;  %v861_v54 = vor.u32 1.1754944e-38, %v860_v45 }
 0x2f2   :  { %vm859_vm13 = vcmp.eq.f32.partialorder %v858_v47, 8.507059e+37 }
 0x2f3   :  { %988 = vmatmul.f32.gmra.mxu2 %v918_v32  ;;  %v919_v33 = vand.u32 4294901760, %v918_v32 }
 0x2f5   :  { %v9097_v35 = vpop.eup %9096  ;;  %1019 = vmatmul.f32.gmra.mxu3 %v919_v33  ;;  %v920_v40 = vsub.f32 %v918_v32, %v919_v33 }
 0x2f6   :  { %v850_v38 = vmul.f32 %v9097_v35, %v815_v28  ;;  %v818_v37 = vpop.xlane.xlu0 %817  ;;  %v1084_v39 = vpop.permute.xlu2 %1083  ;;  %vm855_vm10 = vweird.f32 %v9097_v35 }
 0x2f7   :  { %9098 = vrcp.f32 %v818_v37  ;;  %v9515_v42 = vand.u32 4294901760, %v1084_v39  ;;  %v921_v43 = vand.u32 4294901760, %v920_v40  ;;  %vm856_vm12 = vmor %vm854_vm11, %vm855_vm10  ;;  %v873_v1 = vand.u32 2147483647, %v818_v37 }
 0x2f8   :  { %v851_v41 = vsub.f32 1.0, %v850_v38  ;;  %v875_v2 = vand.u32 2147483648, %v818_v37  ;;  %vm869_vm15 = vweird.f32 %v818_v37 }
 0x2f9   :  { %v9518_v48 = vsub.f32 %v1084_v39, %v9515_v42  ;;  %922 = vmatmul.f32.gmra.mxu0 %v921_v43  ;;  %1073 = vmatmul.f32.vlgmr.msrb.gmra.mxu1 %v9505_v18  ;;  %vm874_vm3 = vcmp.eq.f32.partialorder %v873_v1, 8.507059e+37 }
 0x2fa   :  { %v852_v46 = vmul.f32 %v9097_v35, %v851_v41  ;;  %1108 = vmatpush.msrb.mxu2 %v9515_v42  ;;  %1209 = vmatpush.msra.mxu1 %v9515_v42  ;;  %v876_v8 = vor.u32 1.1754944e-38, %v875_v2 }
 0x2fb   :  { %v1144_v51 = vand.u32 4294901760, %v9518_v48  ;;  %1179 = vmatpush.msra.mxu0 %v9518_v48 }
 0x2fc   :  { %v853_v50 = vadd.f32 %v9097_v35, %v852_v46 }
 0x2fd   :  { %v9099_v53 = vpop.eup %9098  ;;  %v1145_v58 = vsub.f32 %v9518_v48, %v1144_v51 }
 0x2fe   :  { %v857_v55 = vsel %vm856_vm12, %v9097_v35, %v853_v50  ;;  %v865_v56 = vmul.f32 %v9099_v53, %v818_v37  ;;  %v1290_v57 = vpop.permute.xlu2 %1289  ;;  %vm870_vm14 = vweird.f32 %v9099_v53 }
 0x2ff   :  { %v862_v59 = vsel %vm859_vm13, %v861_v54, %v857_v55  ;;  %v1297_v60 = vsel %vm366_vm1, %v1290_v57, 0  ;;  %v1146_v63 = vand.u32 4294901760, %v1145_v58  ;;  %vm871_vm2 = vmor %vm869_vm15, %vm870_vm14 }
 0x300   :  { %v866_v61 = vsub.f32 1.0, %v865_v56  ;;  %v9527_v62 = vand.u32 4294901760, %v1297_v60  ;;  %v863_v0 = vmul.f32 %v9479_v49, %v862_v59 }
 0x301   :  { %1046 = vmatmul.f32.vlgmr.msrb.gmra.mxu0 %v9505_v18  ;;  %1077 = vmatmul.f32.gmra.mxu1 %v9511_v31 }
 0x302   :  { %v867_v3 = vmul.f32 %v9099_v53, %v866_v61  ;;  %v9531_v4 = vsub.f32 %v1297_v60, %v9527_v62  ;;  %v1088_v5 = vsel %vm366_vm1, %v863_v0, 0  ;;  %1147 = vmatpush.msrb.mxu3 %v1146_v63 }
 0x303   :  { %v9536_v6 = vand.u32 4294901760, %v1088_v5 }
 0x304   :  { %v868_v7 = vadd.f32 %v9099_v53, %v867_v3  ;;  %v1350_v49 = vand.u32 4294901760, %v9531_v4 }
 0x305   :  { %v1112_v9 = vsub.f32 %v1088_v5, %v9536_v6 }
 0x306   :  { %v1288_v11 = vpop.permute.xlu2 %1287  ;;  %v872_v12 = vsel %vm871_vm2, %v9099_v53, %v868_v7  ;;  %v1351_v17 = vsub.f32 %v9531_v4, %v1350_v49 }
 0x307   :  { %v1295_v13 = vsel %vm366_vm1, %v1288_v11, 0  ;;  %v1113_v14 = vand.u32 4294901760, %v1112_v9  ;;  %v877_v16 = vsel %vm874_vm3, %v876_v8, %v872_v12 }
 0x308   :  { %v9542_v18 = vand.u32 4294901760, %v1295_v13  ;;  %v878_v19 = vmul.f32 %v9483_v52, %v877_v16  ;;  %v1352_v30 = vand.u32 4294901760, %v1351_v17  ;;  %v1291_v52 = vsel %vm366_vm1, %v1284_v22, 0 }
 0x309   :  { %v1082_v20 = vpop.permute.xlu0 %1081  ;;  %v1114_v21 = vsub.f32 %v1112_v9, %v1113_v14  ;;  %1050 = vmatmul.f32.gmra.mxu0 %v9511_v31  ;;  %v9552_v37 = vand.u32 4294901760, %v1291_v52 }
 0x30a   :  { %v1355_v23 = vsub.f32 %v1295_v13, %v9542_v18  ;;  %v1109_v25 = vand.u32 4294901760, %v1082_v20  ;;  %v1091_v26 = vsel %vm366_vm1, %v878_v19, 0 }
 0x30b   :  { %v1115_v27 = vand.u32 4294901760, %v1114_v21  ;;  %v9548_v28 = vand.u32 4294901760, %v1091_v26  ;;  %v9559_v50 = vsub.f32 %v1291_v52, %v9552_v37 }
 0x30c   :  { %v1149_v29 = vsub.f32 %v1082_v20, %v1109_v25  ;;  %1110 = vmatpush.msrb.mxu2 %v1109_v25  ;;  %1211 = vmatpush.msra.mxu1 %v1109_v25  ;;  %v1356_v32 = vand.u32 4294901760, %v1355_v23 }
 0x30d   :  { %1116 = vmatmul.f32.vlgmr.msrb.gmra.mxu2 %v1115_v27  ;;  %1215 = vmatmul.f32.vlgmr.msra.gmra.mxu1 %v1113_v14  ;;  %v1120_v33 = vsub.f32 %v1091_v26, %v9548_v28  ;;  %v1319_v56 = vand.u32 4294901760, %v9559_v50 }
 0x30e   :  { %1242 = vmatpush.msra.mxu2 %v1144_v51  ;;  %1353 = vmatpush.xpose.msrb.mxu1 %v1352_v30  ;;  %v1150_v35 = vand.u32 4294901760, %v1149_v29  ;;  %v1357_v31 = vsub.f32 %v1355_v23, %v1356_v32  ;;  %v1496_v39 = vpop.permute.xlu2 %1495  ;;  %v1494_v51 = vpop.permute.xlu1 %1493 }
 0x30f   :  { %1182 = vmatpush.msra.mxu0 %v1149_v29  ;;  %v1121_v38 = vand.u32 4294901760, %v1120_v33  ;;  %v1503_v47 = vsel %vm366_vm1, %v1496_v39, 0  ;;  %v1501_v55 = vsel %vm366_vm1, %v1494_v51, 0  ;;  %v1320_v60 = vsub.f32 %v9559_v50, %v1319_v56 }
 0x310   :  { %1246 = vmatpush.msra.mxu2 %v1150_v35  ;;  %v1358_v40 = vand.u32 4294901760, %v1357_v31  ;;  %v1151_v41 = vsub.f32 %v1149_v29, %v1150_v35  ;;  %v9563_v54 = vand.u32 4294901760, %v1503_v47  ;;  %v1521_v58 = vand.u32 4294901760, %v1501_v55 }
 0x311   :  { %1314 = vmatpush.xpose.msrb.mxu0 %v9527_v62  ;;  %v1122_v43 = vsub.f32 %v1120_v33, %v1121_v38  ;;  %v1286_v45 = vpop.permute.xlu0 %1285  ;;  %v1321_v0 = vand.u32 4294901760, %v1320_v60 }
 0x312   :  { %1385 = vmatpush.xpose.msrb.mxu2 %v9531_v4  ;;  %1185 = vmatmul.f32.vlgmr.msra.gmra.mxu0 %v1112_v9  ;;  %v1152_v46 = vand.u32 4294901760, %v1151_v41  ;;  %v1293_v53 = vsel %vm366_vm1, %v1286_v45, 0  ;;  %v1555_v59 = vsub.f32 %v1503_v47, %v9563_v54 }
 0x313   :  { %1359 = vmatpush.xpose.msrb.mxu1 %v1358_v40  ;;  %v1123_v48 = vand.u32 4294901760, %v1122_v43  ;;  %v1325_v57 = vand.u32 4294901760, %v1293_v53 }
 0x314   :  { %1153 = vmatpush.msrb.mxu3 %v1152_v46  ;;  %v1556_v63 = vand.u32 4294901760, %v1555_v59 }
 0x315   :  { %1316 = vmatpush.xpose.msrb.mxu0 %v9542_v18  ;;  %1124 = vmatmul.f32.gmra.mxu2 %v1123_v48  ;;  %v1326_v61 = vsub.f32 %v1293_v53, %v1325_v57 }
 0x316   :  { %1155 = vmatmul.f32.vlgmr.msrb.gmra.mxu3 %v9536_v6  ;;  %1221 = vmatmul.f32.gmra.mxu1 %v1121_v38  ;;  %v1557_v2 = vsub.f32 %v1555_v59, %v1556_v63  ;;  %v1492_v12 = vpop.permute.xlu2 %1491 }
 0x317   :  { %1477 = vmatpush.xpose.msra.mxu1 %v9527_v62  ;;  %1271 = vmatpush.msra.mxu3 %v9515_v42  ;;  %v1561_v42 = vsub.f32 %v1501_v55, %v1521_v58 }
 0x318   :  { %1388 = vmatpush.xpose.msrb.mxu2 %v1355_v23  ;;  %v1558_v5 = vand.u32 4294901760, %v1557_v2 }
 0x319   :  { %1448 = vmatpush.xpose.msra.mxu0 %v1350_v49  ;;  %1273 = vmatpush.msra.mxu3 %v1109_v25  ;;  %v1562_v1 = vand.u32 4294901760, %v1561_v42  ;;  %v1490_v4 = vpop.permute.xlu0 %1489 }
 0x31a   :  { %1190 = vmatmul.f32.gmra.mxu0 %v1120_v33  ;;  %v1497_v49 = vsel %vm366_vm1, %v1490_v4, 0 }
 0x31b   :  { %1479 = vmatpush.xpose.msra.mxu1 %v9542_v18  ;;  %1415 = vmatpush.xpose.msrb.mxu3 %v9527_v62  ;;  %v1327_v62 = vand.u32 4294901760, %v1326_v61  ;;  %v1563_v7 = vsub.f32 %v1561_v42, %v1562_v1  ;;  %v1523_v11 = vand.u32 4294901760, %v1497_v49 }
 0x31d   :  { %1452 = vmatpush.xpose.msra.mxu0 %v1356_v32  ;;  %1248 = vmatmul.f32.vlgmr.msra.gmra.mxu2 %v9536_v6  ;;  %v1328_v3 = vsub.f32 %v1326_v61, %v1327_v62  ;;  %v1564_v9 = vand.u32 4294901760, %v1563_v7  ;;  %v1524_v13 = vsub.f32 %v1497_v49, %v1523_v11 }
 0x31e   :  { %1361 = vmatmul.f32.vlgmr.msrb.gmra.mxu1 %v9552_v37  ;;  %1159 = vmatmul.f32.gmra.mxu3 %v9548_v28 }
 0x31f   :  { %1417 = vmatpush.xpose.msrb.mxu3 %v9542_v18  ;;  %1520 = vmatpush.xpose.msra.mxu2 %v9563_v54  ;;  %v1329_v8 = vand.u32 4294901760, %v1328_v3  ;;  %v1525_v16 = vand.u32 4294901760, %v1524_v13 }
 0x320   :  { %1621 = vmatpush.xpose.msrb.mxu1 %v9563_v54 }
 0x321   :  { %v1526_v18 = vsub.f32 %v1524_v13, %v1525_v16 }
 0x322   :  { %1322 = vmatmul.f32.vlgmr.msrb.gmra.mxu0 %v1321_v0 }
 0x323   :  { %1522 = vmatpush.xpose.msra.mxu2 %v1521_v58  ;;  %1591 = vmatpush.xpose.msrb.mxu0 %v1555_v59  ;;  %v1527_v19 = vand.u32 4294901760, %v1526_v18 }
 0x324   :  { %1623 = vmatpush.xpose.msrb.mxu1 %v1521_v58 }
 0x325   :  { %1252 = vmatmul.f32.gmra.mxu2 %v9548_v28 }
 0x326   :  { %1365 = vmatmul.f32.gmra.mxu1 %v1325_v57  ;;  %1275 = vmatmul.f32.vlgmr.msra.gmra.mxu3 %v9536_v6  ;;  %v1499_v6 = vsel %vm366_vm1, %v1492_v12, 0 }
 0x327   :  { %1594 = vmatpush.xpose.msrb.mxu0 %v1561_v42  ;;  %1559 = vmatpush.xpose.msra.mxu3 %v1558_v5  ;;  %v1531_v14 = vand.u32 4294901760, %v1499_v6 }
 0x329   :  { %v1532_v17 = vsub.f32 %v1499_v6, %v1531_v14 }
 0x32a   :  { %1330 = vmatmul.f32.gmra.mxu0 %v1329_v8 }
 0x32b   :  { %1565 = vmatpush.xpose.msra.mxu3 %v1564_v9  ;;  %v1533_v20 = vand.u32 4294901760, %v1532_v17 }
 0x32d   :  { %1391 = vmatmul.f32.vlgmr.msrb.gmra.mxu2 %v9559_v50  ;;  %v1534_v21 = vsub.f32 %v1532_v17, %v1533_v20 }
 0x32e   :  { %1481 = vmatmul.f32.vlgmr.msra.gmra.mxu1 %v9552_v37  ;;  %1654 = vmatpush.xpose.msrb.mxu2 %v1556_v63 }
 0x32f   :  { %1279 = vmatmul.f32.gmra.mxu3 %v9548_v28  ;;  %v1535_v22 = vand.u32 4294901760, %v1534_v21 }
 0x332   :  { %1454 = vmatmul.f32.vlgmr.msra.gmra.mxu0 %v9552_v37  ;;  %1658 = vmatpush.xpose.msrb.mxu2 %v1562_v1 }
 0x335   :  { %1396 = vmatmul.f32.gmra.mxu2 %v1326_v61 }
 0x336   :  { %1485 = vmatmul.f32.gmra.mxu1 %v1325_v57 }
 0x337   :  { %1421 = vmatmul.f32.vlgmr.msrb.gmra.mxu3 %v1319_v56 }
 0x338   :  { %1683 = vmatpush.xpose.msrb.mxu3 %v9563_v54 }
 0x33a   :  { %1458 = vmatmul.f32.gmra.mxu0 %v1325_v57 }
 0x33c   :  { %1685 = vmatpush.xpose.msrb.mxu3 %v1521_v58 }
 0x33d   :  { %1528 = vmatmul.f32.vlgmr.msra.gmra.mxu2 %v1527_v19 }
 0x33e   :  { %1627 = vmatmul.f32.vlgmr.msrb.gmra.mxu1 %v1525_v16 }
 0x33f   :  { %1427 = vmatmul.f32.gmra.mxu3 %v1327_v62 }
 0x342   :  { %1597 = vmatmul.f32.vlgmr.msrb.gmra.mxu0 %v1524_v13 }
 0x345   :  { %1536 = vmatmul.f32.gmra.mxu2 %v1535_v22 }
 0x346   :  { %1633 = vmatmul.f32.gmra.mxu1 %v1533_v20 }
 0x347   :  { %1567 = vmatmul.f32.vlgmr.msra.gmra.mxu3 %v1523_v11 }
 0x34a   :  { %1602 = vmatmul.f32.gmra.mxu0 %v1532_v17 }
 0x34d   :  { %1660 = vmatmul.f32.vlgmr.msrb.gmra.mxu2 %v1523_v11 }
 0x34f   :  { %1571 = vmatmul.f32.gmra.mxu3 %v1531_v14 }
 0x355   :  { %1664 = vmatmul.f32.gmra.mxu2 %v1531_v14 }
 0x357   :  { %1687 = vmatmul.f32.vlgmr.msrb.gmra.mxu3 %v1523_v11 }
 0x35f   :  { %1691 = vmatmul.f32.gmra.mxu3 %v1531_v14 }
 0x366   :  { %v9588_v23 = vpop.f32.mrf.mxu1 }
 0x36e   :  { %v9590_v25 = vpop.f32.mrf.mxu0  ;;  %v9594_v27 = vpop.f32.mrf.mxu1 }
 0x36f   :  { %v9596_v28 = vpop.f32.mrf.mxu2 }
 0x370   :  { %v9602_v32 = vpop.f32.mrf.mxu3 }
 0x376   :  { %v9592_v26 = vpop.f32.mrf.mxu0  ;;  %v9600_v30 = vpop.f32.mrf.mxu1 }
 0x377   :  { %v9604_v52 = vpop.f32.mrf.mxu2 }
 0x378   :  { %v9612_v38 = vpop.f32.mrf.mxu3 }
 0x37e   :  { %v9598_v29 = vpop.f32.mrf.mxu0  ;;  %v9608_v35 = vpop.f32.mrf.mxu1 }
 0x386   :  { %v9606_v33 = vpop.f32.mrf.mxu0 }
 0x38a   :  { %v9616_v39 = vpop.f32.mrf.mxu1 }
 0x38f   :  { %v9614_v37 = vpop.f32.mrf.mxu0 }
 0x390   :  { %v9610_v31 = vpop.f32.mrf.mxu2 }
 0x393   :  { %v9624_v45 = vpop.f32.mrf.mxu1 }
 0x397   :  { %v9622_v43 = vpop.f32.mrf.mxu0 }
 0x398   :  { %v9618_v40 = vpop.f32.mrf.mxu2 }
 0x399   :  { %v9620_v41 = vpop.f32.mrf.mxu3 }
 0x39b   :  { %v1362_v50 = vpop.f32.mrf.mxu1 }
 0x39f   :  { %v1323_v48 = vpop.f32.mrf.mxu0 }
 0x3a0   :  { %v9626_v46 = vpop.f32.mrf.mxu2  ;;  %v1363_v58 = vadd.f32 %v1362_v50, %v1323_v48 }
 0x3a1   :  { %v9628_v47 = vpop.f32.mrf.mxu3 }
 0x3a3   :  { %v1366_v56 = vpop.f32.mrf.mxu1 }
 0x3a7   :  { %v1331_v54 = vpop.f32.mrf.mxu0 }
 0x3a8   :  { %v9630_v51 = vpop.f32.mrf.mxu2  ;;  %v1367_v1 = vadd.f32 %v1366_v56, %v1331_v54 }
 0x3a9   :  { %v9632_v53 = vpop.f32.mrf.mxu3 }
 0x3ab   :  { %v1482_v0 = vpop.f32.mrf.mxu1 }
 0x3af   :  { %v1455_v61 = vpop.f32.mrf.mxu0 }
 0x3b0   :  { %v1392_v55 = vpop.f32.mrf.mxu2 }
 0x3b1   :  { %v1393_v60 = vadd.f32 %v1392_v55, %v1363_v58 }
 0x3b2   :  { %v9634_v57 = vpop.f32.mrf.mxu3 }
 0x3b3   :  { %v1486_v13 = vpop.f32.mrf.mxu1 }
 0x3b7   :  { %v1459_v9 = vpop.f32.mrf.mxu0 }
 0x3b8   :  { %v1397_v59 = vpop.f32.mrf.mxu2 }
 0x3b9   :  { %v1398_v4 = vadd.f32 %v1397_v59, %v1367_v1 }
 0x3ba   :  { %v1422_v42 = vpop.f32.mrf.mxu3 }
 0x3bb   :  { %v1423_v63 = vadd.f32 %v1422_v42, %v1393_v60  ;;  %v1628_v50 = vpop.f32.mrf.mxu1 }
 0x3bd   :  { %v1456_v62 = vadd.f32 %v1455_v61, %v1423_v63 }
 0x3bf   :  { %v1483_v2 = vadd.f32 %v1482_v0, %v1456_v62  ;;  %v1598_v21 = vpop.f32.mrf.mxu0 }
 0x3c0   :  { %v1529_v3 = vpop.f32.mrf.mxu2 }
 0x3c1   :  { %v1695_v5 = vmul.f32 0.25, %v1483_v2 }
 0x3c2   :  { %v1428_v7 = vpop.f32.mrf.mxu3 }
 0x3c3   :  { %v1429_v49 = vadd.f32 %v1428_v7, %v1398_v4  ;;  %v1699_v8 = vadd.f32 %v9448_v44, %v1695_v5  ;;  %v1634_v0 = vpop.f32.mrf.mxu1 }
 0x3c5   :  { %v1460_v11 = vadd.f32 %v1459_v9, %v1429_v49  ;;  %v1703_v12 = vsel %vm366_vm1, %v1699_v8, -inf }
 0x3c6   :  { %1704 = vmax.xlane.f32.xlu1 %v1703_v12 }
 0x3c7   :  { %v1487_v6 = vadd.f32 %v1486_v13, %v1460_v11  ;;  %v1603_v59 = vpop.f32.mrf.mxu0 }
 0x3c8   :  { %v1537_v16 = vpop.f32.mrf.mxu2 }
 0x3c9   :  { %v1696_v14 = vmul.f32 0.25, %v1487_v6 }
 0x3ca   :  { %v1568_v17 = vpop.f32.mrf.mxu3 }
 0x3cb   :  { %v1700_v18 = vadd.f32 %v9448_v44, %v1696_v14  ;;  %v1569_v20 = vadd.f32 %v1568_v17, %v1529_v3 }
 0x3cd   :  { %v1706_v19 = vsel %vm366_vm1, %v1700_v18, -inf  ;;  %v1599_v48 = vadd.f32 %v1598_v21, %v1569_v20 }
 0x3ce   :  { %1707 = vmax.xlane.f32.xlu0 %v1706_v19 }
 0x3cf   :  { %v1629_v56 = vadd.f32 %v1628_v50, %v1599_v48 }
 0x3d0   :  { %v1661_v54 = vpop.f32.mrf.mxu2 }
 0x3d1   :  { %v1662_v58 = vadd.f32 %v1661_v54, %v1629_v56 }
 0x3d2   :  { %v1572_v22 = vpop.f32.mrf.mxu3 }
 0x3d3   :  { %v1573_v55 = vadd.f32 %v1572_v22, %v1537_v16 }
 0x3d5   :  { %v1604_v61 = vadd.f32 %v1603_v59, %v1573_v55 }
 0x3d7   :  { %v1635_v44 = vadd.f32 %v1634_v0, %v1604_v61 }
 0x3d8   :  { %v1665_v62 = vpop.f32.mrf.mxu2 }
 0x3d9   :  { %v1666_v2 = vadd.f32 %v1665_v62, %v1635_v44 }
 0x3da   :  { %v1688_v60 = vpop.f32.mrf.mxu3 }
 0x3db   :  { %v1689_v42 = vadd.f32 %v1688_v60, %v1662_v58 }
 0x3dd   :  { %v1697_v63 = vmul.f32 0.25, %v1689_v42 }
 0x3df   :  { %v1701_v1 = vadd.f32 %v9457_v10, %v1697_v63 }
 0x3e1   :  { %v1709_v3 = vsel %vm366_vm1, %v1701_v1, -inf }
 0x3e2   :  { %1801 = vrot.lane.b32.xlu0 %v9403_v15, %s9218_s29  ;;  %v1692_v4 = vpop.f32.mrf.mxu3  ;;  %1710 = vmax.xlane.f32.xlu2 %v1709_v3 }
 0x3e3   :  { %v1693_v5 = vadd.f32 %v1692_v4, %v1666_v2 }
 0x3e5   :  { %v1698_v7 = vmul.f32 0.25, %v1693_v5 }
 0x3e7   :  { %v1702_v49 = vadd.f32 %v9457_v10, %v1698_v7 }
 0x3e9   :  { %v1712_v9 = vsel %vm366_vm1, %v1702_v49, -inf }
 0x3ea   :  { %1713 = vmax.xlane.f32.xlu1 %v1712_v9 }
 0x439   :  { %v1705_v11 = vpop.xlane.xlu1 %1704 }
 0x43a   :  { %v1715_v12 = vsub.f32 %v1699_v8, %v1705_v11 }
 0x43c   :  { %v1719_v13 = vmul.f32 1.442695, %v1715_v12 }
 0x43e   :  { %9100 = vpow2.f32 %v1719_v13 }
 0x441   :  { %v1708_v6 = vpop.xlane.xlu0 %1707 }
 0x442   :  { %v1716_v14 = vsub.f32 %v1700_v18, %v1708_v6 }
 0x444   :  { %v9101_v16 = vpop.eup %9100  ;;  %v1721_v17 = vmul.f32 1.442695, %v1716_v14 }
 0x445   :  { %v1727_v19 = vsel %vm366_vm1, %v9101_v16, 0.0 }
 0x446   :  { %9102 = vpow2.f32 %v1721_v17  ;;  %1728 = vadd.xlane.f32.xlu0 %v1727_v19 }
 0x44c   :  { %v9647_v15 = vpop.eup %9102 }
 0x44d   :  { %v1730_v10 = vsel %vm366_vm1, %v9647_v15, 0.0 }
 0x44e   :  { %1731 = vadd.xlane.f32.xlu2 %v1730_v10 }
 0x454   :  { %v1802_v20 = vpop.permute.xlu0 %1801 }
 0x455   :  { %v9651_v21 = vand.u32 4294901760, %v1802_v20  ;;  %v1711_v8 = vpop.xlane.xlu2 %1710 }
 0x456   :  { %v1717_v22 = vsub.f32 %v1701_v1, %v1711_v8 }
 0x457   :  { %v9654_v48 = vsub.f32 %v1802_v20, %v9651_v21  ;;  %1826 = vmatpush.msra.mxu0 %v9651_v21  ;;  %1927 = vmatpush.msra.mxu3 %v9651_v21 }
 0x458   :  { %v1723_v18 = vmul.f32 1.442695, %v1717_v22 }
 0x459   :  { %v1862_v50 = vand.u32 4294901760, %v9654_v48  ;;  %1897 = vmatpush.msra.mxu2 %v9654_v48 }
 0x45a   :  { %9104 = vpow2.f32 %v1723_v18  ;;  %2001 = vrot.lane.b32.xlu0 %v9415_v36, %s9218_s29 }
 0x45b   :  { %v1863_v54 = vsub.f32 %v9654_v48, %v1862_v50 }
 0x45d   :  { %v1864_v55 = vand.u32 4294901760, %v1863_v54  ;;  %v1714_v56 = vpop.xlane.xlu1 %1713 }
 0x45e   :  { %v1718_v58 = vsub.f32 %v1702_v49, %v1714_v56 }
 0x45f   :  { %1865 = vmatpush.msra.mxu1 %v1864_v55 }
 0x460   :  { %v9665_v59 = vpop.eup %9104  ;;  %v1725_v60 = vmul.f32 1.442695, %v1718_v58 }
 0x461   :  { %v1733_v61 = vsel %vm366_vm1, %v9665_v59, 0.0 }
 0x462   :  { %9106 = vpow2.f32 %v1725_v60  ;;  %1734 = vadd.xlane.f32.xlu1 %v1733_v61 }
 0x468   :  { %v9669_v42 = vpop.eup %9106 }
 0x469   :  { %v1736_v36 = vsel %vm366_vm1, %v9669_v42, 0.0 }
 0x46a   :  { %1737 = vadd.xlane.f32.xlu2 %v1736_v36 }
 0x47b   :  { %1799 = vrot.lane.b32.xlu1 %v9407_v24, %s9218_s29 }
 0x482   :  { %2003 = vrot.lane.b32.xlu2 %v9411_v34, %s9218_s29 }
 0x4b9   :  { %v1729_v63 = vpop.xlane.xlu0 %1728 }
 0x4ba   :  { %9108 = vrcp.f32 %v1729_v63  ;;  %v1750_v7 = vand.u32 2147483648, %v1729_v63  ;;  %vm1744_vm5 = vweird.f32 %v1729_v63  ;;  %v1748_v49 = vand.u32 2147483647, %v1729_v63 }
 0x4bc   :  { %v1751_v11 = vor.u32 1.1754944e-38, %v1750_v7  ;;  %vm1749_vm7 = vcmp.eq.f32.partialorder %v1748_v49, 8.507059e+37 }
 0x4c0   :  { %v9109_v0 = vpop.eup %9108 }
 0x4c1   :  { %v1740_v62 = vmul.f32 %v9109_v0, %v1729_v63  ;;  %v1732_v44 = vpop.xlane.xlu2 %1731  ;;  %vm1745_vm4 = vweird.f32 %v9109_v0 }
 0x4c2   :  { %9110 = vrcp.f32 %v1732_v44  ;;  %vm1746_vm6 = vmor %vm1744_vm5, %vm1745_vm4  ;;  %v1765_v17 = vand.u32 2147483648, %v1732_v44  ;;  %vm1759_vm9 = vweird.f32 %v1732_v44  ;;  %v1763_v19 = vand.u32 2147483647, %v1732_v44 }
 0x4c3   :  { %v1741_v1 = vsub.f32 1.0, %v1740_v62 }
 0x4c4   :  { %v1766_v22 = vor.u32 1.1754944e-38, %v1765_v17  ;;  %vm1764_vm11 = vcmp.eq.f32.partialorder %v1763_v19, 8.507059e+37 }
 0x4c5   :  { %v1742_v3 = vmul.f32 %v9109_v0, %v1741_v1 }
 0x4c7   :  { %v1743_v5 = vadd.f32 %v9109_v0, %v1742_v3 }
 0x4c8   :  { %v9111_v2 = vpop.eup %9110 }
 0x4c9   :  { %v1755_v4 = vmul.f32 %v9111_v2, %v1732_v44  ;;  %v1747_v24 = vsel %vm1746_vm6, %v9109_v0, %v1743_v5  ;;  %vm1760_vm8 = vweird.f32 %v9111_v2 }
 0x4ca   :  { %v1752_v12 = vsel %vm1749_vm7, %v1751_v11, %v1747_v24  ;;  %vm1761_vm10 = vmor %vm1759_vm9, %vm1760_vm8 }
 0x4cb   :  { %v1756_v9 = vsub.f32 1.0, %v1755_v4  ;;  %v1753_v6 = vmul.f32 %v9101_v16, %v1752_v12 }
 0x4cc   :  { %v2002_v58 = vpop.permute.xlu0 %2001 }
 0x4cd   :  { %v1757_v34 = vmul.f32 %v9111_v2, %v1756_v9  ;;  %v1806_v20 = vsel %vm366_vm1, %v1753_v6, 0  ;;  %v9681_v36 = vand.u32 4294901760, %v2002_v58 }
 0x4ce   :  { %v9678_v55 = vand.u32 4294901760, %v1806_v20 }
 0x4cf   :  { %v1758_v14 = vadd.f32 %v9111_v2, %v1757_v34  ;;  %v2069_v7 = vsub.f32 %v2002_v58, %v9681_v36 }
 0x4d0   :  { %v1830_v0 = vsub.f32 %v1806_v20, %v9678_v55 }
 0x4d1   :  { %v1762_v10 = vsel %vm1761_vm10, %v9111_v2, %v1758_v14  ;;  %v2070_v6 = vand.u32 4294901760, %v2069_v7 }
 0x4d2   :  { %v1767_v56 = vsel %vm1764_vm11, %v1766_v22, %v1762_v10 }
 0x4d3   :  { %v1768_v61 = vmul.f32 %v9647_v15, %v1767_v56  ;;  %v1831_v15 = vand.u32 4294901760, %v1830_v0 }
 0x4d5   :  { %v1735_v13 = vpop.xlane.xlu1 %1734  ;;  %v1809_v5 = vsel %vm366_vm1, %v1768_v61, 0  ;;  %v1832_v19 = vsub.f32 %v1830_v0, %v1831_v15 }
 0x4d6   :  { %9112 = vrcp.f32 %v1735_v13  ;;  %v1780_v63 = vand.u32 2147483648, %v1735_v13  ;;  %vm1774_vm13 = vweird.f32 %v1735_v13  ;;  %v1778_v44 = vand.u32 2147483647, %v1735_v13 }
 0x4d7   :  { %v9689_v12 = vand.u32 4294901760, %v1809_v5 }
 0x4d8   :  { %v1781_v49 = vor.u32 1.1754944e-38, %v1780_v63  ;;  %vm1779_vm15 = vcmp.eq.f32.partialorder %v1778_v44, 8.507059e+37  ;;  %v2071_v63 = vsub.f32 %v2069_v7, %v2070_v6 }
 0x4dc   :  { %v9113_v8 = vpop.eup %9112 }
 0x4dd   :  { %v1770_v18 = vmul.f32 %v9113_v8, %v1735_v13  ;;  %v1738_v54 = vpop.xlane.xlu2 %1737  ;;  %vm1775_vm12 = vweird.f32 %v9113_v8 }
 0x4de   :  { %9114 = vrcp.f32 %v1738_v54  ;;  %vm1776_vm14 = vmor %vm1774_vm13, %vm1775_vm12  ;;  %v1795_v14 = vand.u32 2147483648, %v1738_v54  ;;  %vm1789_vm3 = vweird.f32 %v1738_v54 }
 0x4df   :  { %v1771_v16 = vsub.f32 1.0, %v1770_v18  ;;  %v1838_v18 = vsub.f32 %v1809_v5, %v9689_v12 }
 0x4e1   :  { %v1772_v60 = vmul.f32 %v9113_v8, %v1771_v16  ;;  %v1796_v16 = vor.u32 1.1754944e-38, %v1795_v14 }
 0x4e3   :  { %v1773_v62 = vadd.f32 %v9113_v8, %v1772_v60 }
 0x4e4   :  { %v9115_v1 = vpop.eup %9114 }
 0x4e5   :  { %v1777_v2 = vsel %vm1776_vm14, %v9113_v8, %v1773_v62  ;;  %v1785_v3 = vmul.f32 %v9115_v1, %v1738_v54  ;;  %v2004_v4 = vpop.permute.xlu2 %2003  ;;  %vm1790_vm2 = vweird.f32 %v9115_v1  ;;  %v1793_v8 = vand.u32 2147483647, %v1738_v54 }
 0x4e6   :  { %v9686_v9 = vand.u32 4294901760, %v2004_v4  ;;  %v1782_v11 = vsel %vm1779_vm15, %v1781_v49, %v1777_v2  ;;  %vm1791_vm4 = vmor %vm1789_vm3, %vm1790_vm2  ;;  %v1833_v62 = vand.u32 4294901760, %v1832_v19  ;;  %v2072_v54 = vand.u32 4294901760, %v2071_v63 }
 0x4e7   :  { %v1786_v24 = vsub.f32 1.0, %v1785_v3  ;;  %v1783_v10 = vmul.f32 %v9665_v59, %v1782_v11  ;;  %vm1794_vm5 = vcmp.eq.f32.partialorder %v1793_v8, 8.507059e+37  ;;  %v1839_v59 = vand.u32 4294901760, %v1838_v18 }
 0x4e8   :  { %v2063_v34 = vsub.f32 %v2004_v4, %v9686_v9  ;;  %vm2664_vm14 = vcmask 1043456   ;;  %vm2708_vm3 = vcmask 1045504  }
 0x4e9   :  { %v1787_v13 = vmul.f32 %v9115_v1, %v1786_v24  ;;  %v2008_v44 = vsel %vm366_vm1, %v1783_v10, 0  ;;  %v1840_v24 = vsub.f32 %v1838_v18, %v1839_v59 }
 0x4ea   :  { %v2064_v17 = vand.u32 4294901760, %v2063_v34  ;;  %v2031_v4 = vand.u32 4294901760, %v2008_v44 }
 0x4eb   :  { %v1788_v20 = vadd.f32 %v9115_v1, %v1787_v13 }
 0x4ec   :  { %v2065_v22 = vsub.f32 %v2063_v34, %v2064_v17  ;;  %v2032_v48 = vsub.f32 %v2008_v44, %v2031_v4 }
 0x4ed   :  { %v1792_v56 = vsel %vm1791_vm4, %v9115_v1, %v1788_v20  ;;  %v1800_v58 = vpop.permute.xlu1 %1799  ;;  %vm2685_vm4 = vcmask 1046528  }
 0x4ee   :  { %v2066_v60 = vand.u32 4294901760, %v2065_v22  ;;  %v1827_v61 = vand.u32 4294901760, %v1800_v58  ;;  %v1797_v2 = vsel %vm1794_vm5, %v1796_v16, %v1792_v56 }
 0x4ef   :  { %v1798_v5 = vmul.f32 %v9669_v42, %v1797_v2  ;;  %v1841_v42 = vand.u32 4294901760, %v1840_v24 }
 0x4f0   :  { %v1867_v3 = vsub.f32 %v1800_v58, %v1827_v61  ;;  %1828 = vmatpush.msra.mxu0 %v1827_v61  ;;  %1929 = vmatpush.msra.mxu3 %v1827_v61 }
 0x4f1   :  { %1834 = vmatmul.f32.vlgmr.msra.gmra.mxu0 %v1833_v62  ;;  %1933 = vmatmul.f32.vlgmr.msra.gmra.mxu3 %v1831_v15 }
 0x4f2   :  { %1960 = vmatpush.msrb.mxu0 %v1862_v50  ;;  %2067 = vmatpush.msrb.mxu3 %v2066_v60  ;;  %v1868_v1 = vand.u32 4294901760, %v1867_v3  ;;  %v2011_v50 = vsel %vm366_vm1, %v1798_v5, 0 }
 0x4f3   :  { %1900 = vmatpush.msra.mxu2 %v1867_v3  ;;  %v2039_v11 = vand.u32 4294901760, %v2011_v50 }
 0x4f4   :  { %1903 = vmatmul.f32.vlgmr.msra.gmra.mxu2 %v1830_v0  ;;  %2073 = vmatpush.msrb.mxu3 %v2072_v54  ;;  %v1869_v49 = vsub.f32 %v1867_v3, %v1868_v1  ;;  %v2033_v0 = vand.u32 4294901760, %v2032_v48 }
 0x4f5   :  { %2028 = vmatpush.msrb.mxu2 %v9686_v9  ;;  %1964 = vmatpush.msrb.mxu0 %v1868_v1  ;;  %v2040_v13 = vsub.f32 %v2011_v50, %v2039_v11 }
 0x4f6   :  { %2191 = vmatpush.msra.mxu3 %v9686_v9  ;;  %v1870_v15 = vand.u32 4294901760, %v1869_v49 }
 0x4f7   :  { %2099 = vmatpush.msra.mxu0 %v2063_v34  ;;  %2030 = vmatpush.msrb.mxu2 %v9681_v36  ;;  %v2034_v34 = vsub.f32 %v2032_v48, %v2033_v0 }
 0x4f8   :  { %2193 = vmatpush.msra.mxu3 %v9681_v36  ;;  %1871 = vmatpush.msra.mxu1 %v1870_v15 }
 0x4f9   :  { %2162 = vmatpush.msra.mxu2 %v2064_v17  ;;  %2102 = vmatpush.msra.mxu0 %v2069_v7  ;;  %v2035_v7 = vand.u32 4294901760, %v2034_v34 }
 0x4fa   :  { %1842 = vmatmul.f32.gmra.mxu0 %v1841_v42  ;;  %1873 = vmatmul.f32.vlgmr.msra.gmra.mxu1 %v9678_v55 }
 0x4fb   :  { %2166 = vmatpush.msra.mxu2 %v2070_v6  ;;  %1939 = vmatmul.f32.gmra.mxu3 %v1839_v59  ;;  %v2041_v6 = vand.u32 4294901760, %v2040_v13 }
 0x4fc   :  { %1989 = vmatpush.msrb.mxu1 %v9651_v21  ;;  %1908 = vmatmul.f32.gmra.mxu2 %v1838_v18 }
 0x4fd   :  { %v2042_v14 = vsub.f32 %v2040_v13, %v2041_v6 }
 0x4fe   :  { %1991 = vmatpush.msrb.mxu1 %v1827_v61 }
 0x4ff   :  { %v2043_v21 = vand.u32 4294901760, %v2042_v14 }
 0x500   :  { %2129 = vmatpush.msra.mxu1 %v9686_v9 }
 0x502   :  { %2131 = vmatpush.msra.mxu1 %v9681_v36  ;;  %1966 = vmatmul.f32.vlgmr.msrb.gmra.mxu0 %v9678_v55 }
 0x503   :  { %1877 = vmatmul.f32.gmra.mxu1 %v9689_v12  ;;  %2075 = vmatmul.f32.vlgmr.msrb.gmra.mxu3 %v2031_v4 }
 0x504   :  { %2036 = vmatmul.f32.vlgmr.msrb.gmra.mxu2 %v2035_v7 }
 0x50a   :  { %1970 = vmatmul.f32.gmra.mxu0 %v9689_v12 }
 0x50b   :  { %1993 = vmatmul.f32.vlgmr.msrb.gmra.mxu1 %v9678_v55  ;;  %2079 = vmatmul.f32.gmra.mxu3 %v2039_v11 }
 0x50c   :  { %2044 = vmatmul.f32.gmra.mxu2 %v2043_v21 }
 0x512   :  { %2105 = vmatmul.f32.vlgmr.msra.gmra.mxu0 %v2032_v48 }
 0x513   :  { %1997 = vmatmul.f32.gmra.mxu1 %v9689_v12  ;;  %2195 = vmatmul.f32.vlgmr.msra.gmra.mxu3 %v2031_v4 }
 0x514   :  { %2168 = vmatmul.f32.vlgmr.msra.gmra.mxu2 %v2031_v4 }
 0x51a   :  { %2110 = vmatmul.f32.gmra.mxu0 %v2040_v13 }
 0x51b   :  { %2135 = vmatmul.f32.vlgmr.msra.gmra.mxu1 %v2033_v0  ;;  %2199 = vmatmul.f32.gmra.mxu3 %v2039_v11 }
 0x51c   :  { %2172 = vmatmul.f32.gmra.mxu2 %v2039_v11 }
 0x523   :  { %2141 = vmatmul.f32.gmra.mxu1 %v2041_v6 }
 0x56e   :  { %v1835_v36 = vpop.f32.mrf.mxu0 }
 0x574   :  { %v1934_v9 = vpop.f32.mrf.mxu3 }
 0x577   :  { %v1843_v17 = vpop.f32.mrf.mxu0  ;;  %v1904_v19 = vpop.f32.mrf.mxu2 }
 0x578   :  { %v1874_v10 = vpop.f32.mrf.mxu1 }
 0x579   :  { %v1875_v20 = vadd.f32 %v1874_v10, %v1835_v36  ;;  %v2226_v10 = vld [vmem:[%s12585_s5 + $0x18] sm:$0xff] }
 0x57b   :  { %v1905_v56 = vadd.f32 %v1904_v19, %v1875_v20  ;;  %v2255_v20 = vand.u32 4294901760, %v2226_v10 }
 0x57d   :  { %v1935_v12 = vadd.f32 %v1934_v9, %v1905_v56  ;;  %2407 = vmatpush.msrb.mxu3 %v2255_v20  ;;  %2256 = vmatpush.msrb.mxu0 %v2255_v20 }
 0x57e   :  { %v1940_v8 = vpop.f32.mrf.mxu3 }
 0x57f   :  { %v1909_v55 = vpop.f32.mrf.mxu2  ;;  %v1967_v22 = vpop.f32.mrf.mxu0 }
 0x580   :  { %v1878_v18 = vpop.f32.mrf.mxu1  ;;  %v1968_v60 = vadd.f32 %v1967_v22, %v1935_v12 }
 0x581   :  { %v1879_v58 = vadd.f32 %v1878_v18, %v1843_v17  ;;  %v2224_v18 = vld [vmem:[%s12585_s5 + $0x8] sm:$0xff] }
 0x582   :  { %v2259_v12 = vand.u32 4294901760, %v2224_v18 }
 0x583   :  { %v1910_v44 = vadd.f32 %v1909_v55, %v1879_v58  ;;  %v2309_v55 = vsub.f32 %v2226_v10, %v2255_v20 }
 0x585   :  { %v1941_v3 = vadd.f32 %v1940_v8, %v1910_v44  ;;  %v2225_v8 = vld [vmem:[%s12585_s5 + $0x10] sm:$0xff]  ;;  %v2310_v56 = vand.u32 4294901760, %v2309_v55  ;;  %2363 = vmatpush.msrb.mxu2 %v2309_v55 }
 0x586   :  { %v2076_v16 = vpop.f32.mrf.mxu3  ;;  %v2257_v22 = vand.u32 4294901760, %v2225_v8 }
 0x587   :  { %v2037_v61 = vpop.f32.mrf.mxu2  ;;  %v1971_v63 = vpop.f32.mrf.mxu0 }
 0x588   :  { %v1994_v62 = vpop.f32.mrf.mxu1  ;;  %v1972_v59 = vadd.f32 %v1971_v63, %v1941_v3  ;;  %v2077_v24 = vadd.f32 %v2076_v16, %v2037_v61  ;;  %v2315_v58 = vsub.f32 %v2225_v8, %v2257_v22  ;;  %2409 = vmatpush.msrb.mxu3 %v2257_v22  ;;  %v2223_v16 = vld [vmem:[%s12585_s5] sm:$0xff]  ;;  %2258 = vmatpush.msrb.mxu0 %v2257_v22 }
 0x589   :  { %v1995_v2 = vadd.f32 %v1994_v62, %v1968_v60  ;;  %v2311_v60 = vsub.f32 %v2309_v55, %v2310_v56  ;;  %v2321_v63 = vsub.f32 %v2224_v18, %v2259_v12  ;;  %v2261_v62 = vand.u32 4294901760, %v2223_v16 }
 0x58a   :  { %v2316_v61 = vand.u32 4294901760, %v2315_v58  ;;  %2366 = vmatpush.msrb.mxu2 %v2315_v58  ;;  %2411 = vmatpush.msrb.mxu3 %v2259_v12 }
 0x58b   :  { %2207 = vrot.lane.b32.xlu0 %v1995_v2, %s9219_s30  ;;  %2260 = vmatpush.msrb.mxu0 %v2259_v12  ;;  %v2312_v44 = vand.u32 4294901760, %v2311_v60  ;;  %v2322_v3 = vand.u32 4294901760, %v2321_v63 }
 0x58c   :  { %v2317_v2 = vsub.f32 %v2315_v58, %v2316_v61  ;;  %2369 = vmatpush.msrb.mxu2 %v2321_v63  ;;  %2413 = vmatpush.msrb.mxu3 %v2261_v62 }
 0x58d   :  { %2262 = vmatpush.msrb.mxu0 %v2261_v62  ;;  %2313 = vmatpush.msrb.mxu1 %v2312_v44 }
 0x58e   :  { %v2080_v1 = vpop.f32.mrf.mxu3 }
 0x58f   :  { %v2045_v54 = vpop.f32.mrf.mxu2  ;;  %v2106_v49 = vpop.f32.mrf.mxu0  ;;  %2454 = vmatpush.msra.mxu0 %v2310_v56 }
 0x590   :  { %v1998_v4 = vpop.f32.mrf.mxu1  ;;  %v2107_v15 = vadd.f32 %v2106_v49, %v2077_v24  ;;  %v2081_v13 = vadd.f32 %v2080_v1, %v2045_v54  ;;  %v2318_v54 = vand.u32 4294901760, %v2317_v2  ;;  %v2323_v1 = vsub.f32 %v2321_v63, %v2322_v3 }
 0x591   :  { %v1999_v5 = vadd.f32 %v1998_v4, %v1972_v59  ;;  %v2327_v59 = vsub.f32 %v2223_v16, %v2261_v62  ;;  %2458 = vmatpush.msra.mxu0 %v2316_v61 }
 0x592   :  { %2319 = vmatpush.msrb.mxu1 %v2318_v54 }
 0x593   :  { %2209 = vrot.lane.b32.xlu1 %v1999_v5, %s9219_s30  ;;  %v2328_v4 = vand.u32 4294901760, %v2327_v59  ;;  %2372 = vmatpush.msrb.mxu2 %v2327_v59  ;;  %v2324_v5 = vand.u32 4294901760, %v2323_v1 }
 0x594   :  { %2462 = vmatpush.msra.mxu0 %v2322_v3 }
 0x595   :  { %v2329_v49 = vsub.f32 %v2327_v59, %v2328_v4  ;;  %2325 = vmatpush.msrb.mxu1 %v2324_v5  ;;  %v9069_v59 = vld [vmem:[%s12586_s6] ss:$0 sm:$0xff] }
 0x596   :  { %v2196_v0 = vpop.f32.mrf.mxu3  ;;  %2466 = vmatpush.msra.mxu0 %v2328_v4 }
 0x597   :  { %v2169_v50 = vpop.f32.mrf.mxu2  ;;  %v2111_v34 = vpop.f32.mrf.mxu0  ;;  %v2330_v24 = vand.u32 4294901760, %v2329_v49 }
 0x598   :  { %v2136_v48 = vpop.f32.mrf.mxu1  ;;  %v2112_v6 = vadd.f32 %v2111_v34, %v2081_v13 }
 0x599   :  { %v2137_v42 = vadd.f32 %v2136_v48, %v2107_v15  ;;  %2331 = vmatpush.msrb.mxu1 %v2330_v24  ;;  %v955_v15 = vadd.f32 %v9588_v23, %v9590_v25 }
 0x59b   :  { %v2170_v11 = vadd.f32 %v2169_v50, %v2137_v42  ;;  %2497 = vmatpush.msra.mxu1 %v2255_v20  ;;  %v985_v48 = vadd.f32 %v9596_v28, %v955_v15  ;;  %v1157_v50 = vadd.f32 %v9620_v41, %v9610_v31 }
 0x59d   :  { %v2197_v7 = vadd.f32 %v2196_v0, %v2170_v11  ;;  %2499 = vmatpush.msra.mxu1 %v2257_v22  ;;  %v1015_v42 = vadd.f32 %v9602_v32, %v985_v48  ;;  %v959_v0 = vadd.f32 %v9594_v27, %v9592_v26  ;;  %v1187_v34 = vadd.f32 %v9614_v37, %v1157_v50 }
 0x59e   :  { %v2200_v17 = vpop.f32.mrf.mxu3 }
 0x59f   :  { %2211 = vrot.lane.b32.xlu2 %v2197_v7, %s9219_s30  ;;  %v2173_v36 = vpop.f32.mrf.mxu2  ;;  %2501 = vmatpush.msra.mxu1 %v2259_v12  ;;  %v1048_v11 = vadd.f32 %v9598_v29, %v1015_v42  ;;  %v990_v13 = vadd.f32 %v9604_v52, %v959_v0  ;;  %v1217_v23 = vadd.f32 %v9616_v39, %v1187_v34 }
 0x5a0   :  { %v2142_v14 = vpop.f32.mrf.mxu1 }
 0x5a1   :  { %v2143_v21 = vadd.f32 %v2142_v14, %v2112_v6  ;;  %2503 = vmatpush.msra.mxu1 %v2261_v62  ;;  %v1075_v7 = vadd.f32 %v9600_v30, %v1048_v11  ;;  %v1021_v28 = vadd.f32 %v9612_v38, %v990_v13  ;;  %v1250_v31 = vadd.f32 %v9626_v46, %v1217_v23 }
 0x5a2   :  { %v9220_v23 = vmov 0  }
 0x5a3   :  { %v2174_v9 = vadd.f32 %v2173_v36, %v2143_v21  ;;  %v1052_v27 = vadd.f32 %v9606_v33, %v1021_v28  ;;  %v1277_v29 = vadd.f32 %v9632_v53, %v1250_v31  ;;  %9064 = vset.pattern.permute.xlu1 %v9220_v23  ;;  %9063 = vset.pattern.permute.xlu0 %v9220_v23 }
 0x5a4   :  { %9065 = vset.pattern.permute.xlu2 %v9220_v23 }
 0x5a5   :  { %v2201_v19 = vadd.f32 %v2200_v17, %v2174_v9  ;;  %v1079_v39 = vadd.f32 %v9608_v35, %v1052_v27  ;;  %v1161_v35 = vadd.f32 %v9628_v47, %v9618_v40 }
 0x5a7   :  { %2213 = vrot.lane.b32.xlu0 %v2201_v19, %s9219_s30  ;;  %v1192_v8 = vadd.f32 %v9622_v43, %v1161_v35 }
 0x5a9   :  { %v1223_v18 = vadd.f32 %v9624_v45, %v1192_v8 }
 0x5ab   :  { %v1254_v58 = vadd.f32 %v9630_v51, %v1223_v18 }
 0x5ad   :  { %v1281_v40 = vadd.f32 %v9634_v57, %v1254_v58 }
 0x5f9   :  { %v2212_v41 = vpop.permute.xlu2 %2211 }
 0x5fa   :  { %v2221_v52 = vsel %vm366_vm1, %v1277_v29, %v2212_v41  ;;  %v9182_v41 = vld [vmem:[%s12580_s0] sm:$0xff] }
 0x5fb   :  { %v2238_v38 = vsel %vm69_vm0, %v2221_v52, 0 }
 0x5fc   :  { %v2279_v36 = vand.u32 4294901760, %v2238_v38 }
 0x5fd   :  { %v2208_v25 = vpop.permute.xlu0 %2207 }
 0x5fe   :  { %v2219_v32 = vsel %vm366_vm1, %v1075_v7, %v2208_v25  ;;  %v2280_v19 = vsub.f32 %v2238_v38, %v2279_v36 }
 0x5ff   :  { %v2232_v26 = vsel %vm69_vm0, %v2219_v32, 0 }
 0x600   :  { %v2263_v37 = vand.u32 4294901760, %v2232_v26  ;;  %v2281_v22 = vand.u32 4294901760, %v2280_v19 }
 0x602   :  { %v2264_v30 = vsub.f32 %v2232_v26, %v2263_v37  ;;  %2333 = vmatmul.f32.vlgmr.msrb.gmra.mxu1 %v2263_v37  ;;  %v2282_v56 = vsub.f32 %v2280_v19, %v2281_v22 }
 0x604   :  { %v2265_v6 = vand.u32 4294901760, %v2264_v30  ;;  %2375 = vmatmul.f32.vlgmr.msrb.gmra.mxu2 %v2264_v30  ;;  %v2283_v47 = vand.u32 4294901760, %v2282_v56 }
 0x605   :  { %v2210_v46 = vpop.permute.xlu1 %2209 }
 0x606   :  { %v2266_v14 = vsub.f32 %v2264_v30, %v2265_v6  ;;  %v2220_v21 = vsel %vm366_vm1, %v1079_v39, %v2210_v46  ;;  %2417 = vmatmul.f32.vlgmr.msrb.gmra.mxu3 %v2265_v6 }
 0x607   :  { %v2235_v33 = vsel %vm69_vm0, %v2220_v21, 0  ;;  %v9183_v21 = vld [vmem:[%s12580_s0 + $0x8] sm:$0xff] }
 0x608   :  { %v2267_v53 = vand.u32 4294901760, %v2266_v14  ;;  %v2271_v9 = vand.u32 4294901760, %v2235_v33 }
 0x60a   :  { %v2272_v17 = vsub.f32 %v2235_v33, %v2271_v9  ;;  %2268 = vmatmul.f32.vlgmr.msrb.gmra.mxu0 %v2267_v53  ;;  %2337 = vmatmul.f32.gmra.mxu1 %v2271_v9 }
 0x60c   :  { %2380 = vmatmul.f32.gmra.mxu2 %v2272_v17  ;;  %v2273_v10 = vand.u32 4294901760, %v2272_v17 }
 0x60e   :  { %2423 = vmatmul.f32.gmra.mxu3 %v2273_v10  ;;  %v2274_v20 = vsub.f32 %v2272_v17, %v2273_v10 }
 0x610   :  { %v2275_v55 = vand.u32 4294901760, %v2274_v20 }
 0x612   :  { %2276 = vmatmul.f32.gmra.mxu0 %v2275_v55  ;;  %2341 = vmatmul.f32.gmra.mxu1 %v2279_v36 }
 0x614   :  { %2385 = vmatmul.f32.gmra.mxu2 %v2280_v19 }
 0x616   :  { %2429 = vmatmul.f32.gmra.mxu3 %v2281_v22  ;;  %v9184_v22 = vld [vmem:[%s12580_s0 + $0x10] sm:$0xff] }
 0x619   :  { %v2214_v12 = vpop.permute.xlu0 %2213 }
 0x61a   :  { %v2222_v16 = vsel %vm366_vm1, %v1281_v40, %v2214_v12  ;;  %2284 = vmatmul.f32.gmra.mxu0 %v2283_v47 }
 0x61b   :  { %v2241_v43 = vsel %vm69_vm0, %v2222_v16, 0 }
 0x61c   :  { %v2287_v60 = vand.u32 4294901760, %v2241_v43 }
 0x61e   :  { %v2288_v61 = vsub.f32 %v2241_v43, %v2287_v60  ;;  %2345 = vmatmul.f32.gmra.mxu1 %v2287_v60 }
 0x620   :  { %2390 = vmatmul.f32.gmra.mxu2 %v2288_v61  ;;  %v2289_v63 = vand.u32 4294901760, %v2288_v61 }
 0x622   :  { %2435 = vmatmul.f32.gmra.mxu3 %v2289_v63  ;;  %v2290_v45 = vsub.f32 %v2288_v61, %v2289_v63 }
 0x624   :  { %v2291_v62 = vand.u32 4294901760, %v2290_v45  ;;  %v58_v45 = vld [vmem:[%s12582_s2 + $0x8] sm:$0xff] }
 0x626   :  { %2292 = vmatmul.f32.gmra.mxu0 %v2291_v62  ;;  %2505 = vmatmul.f32.vlgmr.msra.gmra.mxu1 %v2263_v37  ;;  %v9221_v62 = vmov 32.0  }
 0x627   :  { %9116 = vrcp.f32 %v9221_v62 }
 0x62e   :  { %2468 = vmatmul.f32.vlgmr.msra.gmra.mxu0 %v2263_v37  ;;  %2509 = vmatmul.f32.gmra.mxu1 %v2271_v9 }
 0x636   :  { %2472 = vmatmul.f32.gmra.mxu0 %v2271_v9  ;;  %2513 = vmatmul.f32.gmra.mxu1 %v2279_v36 }
 0x63e   :  { %2476 = vmatmul.f32.gmra.mxu0 %v2279_v36  ;;  %2517 = vmatmul.f32.gmra.mxu1 %v2287_v60 }
 0x646   :  { %2480 = vmatmul.f32.gmra.mxu0 %v2287_v60  ;;  %v9185_v60 = vld [vmem:[%s12580_s0 + $0x18] sm:$0xff] }
 0x67f   :  { %v2334_v51 = vpop.f32.mrf.mxu1 }
 0x687   :  { %v2269_v57 = vpop.f32.mrf.mxu0  ;;  %v2338_v44 = vpop.f32.mrf.mxu1 }
 0x688   :  { %v2270_v4 = vadd.f32 %v9069_v59, %v2269_v57  ;;  %v2376_v5 = vpop.f32.mrf.mxu2 }
 0x689   :  { %v2418_v15 = vpop.f32.mrf.mxu3 }
 0x68a   :  { %v2335_v49 = vadd.f32 %v2334_v51, %v2270_v4  ;;  %v9117_v51 = vpop.eup %9116 }
 0x68b   :  { %v2540_v57 = vmul.f32 32.0, %v9117_v51  ;;  %vm2544_vm6 = vweird.f32 %v9117_v51 }
 0x68c   :  { %v2377_v48 = vadd.f32 %v2376_v5, %v2335_v49 }
 0x68e   :  { %v2419_v0 = vadd.f32 %v2418_v15, %v2377_v48 }
 0x68f   :  { %v2277_v2 = vpop.f32.mrf.mxu0  ;;  %v2342_v3 = vpop.f32.mrf.mxu1 }
 0x690   :  { %v2278_v50 = vadd.f32 %v9069_v59, %v2277_v2  ;;  %v2381_v34 = vpop.f32.mrf.mxu2 }
 0x691   :  { %v2424_v32 = vpop.f32.mrf.mxu3 }
 0x692   :  { %v2339_v11 = vadd.f32 %v2338_v44, %v2278_v50  ;;  %v2541_v44 = vsub.f32 1.0, %v2540_v57 }
 0x694   :  { %v2382_v25 = vadd.f32 %v2381_v34, %v2339_v11  ;;  %v2542_v2 = vmul.f32 %v9117_v51, %v2541_v44 }
 0x696   :  { %v2425_v29 = vadd.f32 %v2424_v32, %v2382_v25 }
 0x697   :  { %v2285_v54 = vpop.f32.mrf.mxu0 }
 0x698   :  { %v2286_v28 = vadd.f32 %v9069_v59, %v2285_v54  ;;  %v2386_v6 = vpop.f32.mrf.mxu2 }
 0x699   :  { %v2430_v36 = vpop.f32.mrf.mxu3 }
 0x69a   :  { %v2343_v37 = vadd.f32 %v2342_v3, %v2286_v28  ;;  %v2543_v3 = vadd.f32 %v9117_v51, %v2542_v2 }
 0x69b   :  { %v2346_v1 = vpop.f32.mrf.mxu1 }
 0x69c   :  { %v2387_v38 = vadd.f32 %v2386_v6, %v2343_v37 }
 0x69e   :  { %v2431_v53 = vadd.f32 %v2430_v36, %v2387_v38 }
 0x6a3   :  { %v2293_v24 = vpop.f32.mrf.mxu0  ;;  %v2506_v42 = vpop.f32.mrf.mxu1 }
 0x6a4   :  { %v2294_v46 = vadd.f32 %v9069_v59, %v2293_v24  ;;  %v2391_v20 = vpop.f32.mrf.mxu2  ;;  %v9781_v59 = vsel %vm2544_vm6, %v9117_v51, %v2543_v3 }
 0x6a5   :  { %v2436_v56 = vpop.f32.mrf.mxu3  ;;  %12654 = vst [vmem:[#allocation5_spill] sm:$0xff] %v9781_v59 }
 0x6a6   :  { %v2347_v9 = vadd.f32 %v2346_v1, %v2294_v46 }
 0x6a8   :  { %v2392_v8 = vadd.f32 %v2391_v20, %v2347_v9  ;;  %v9820_v20 = vld [vmem:[%s12587_s7] ss:$0 sm:$0xff] }
 0x6aa   :  { %v2437_v58 = vadd.f32 %v2436_v56, %v2392_v8 }
 0x6ab   :  { %v2469_v13 = vpop.f32.mrf.mxu0  ;;  %v2510_v27 = vpop.f32.mrf.mxu1 }
 0x6ac   :  { %v2470_v7 = vadd.f32 %v2469_v13, %v2419_v0 }
 0x6ae   :  { %v2507_v31 = vadd.f32 %v2506_v42, %v2470_v7 }
 0x6b0   :  { %v2521_v26 = vadd.f32 %v9182_v41, %v2507_v31  ;;  %v57_v41 = vld [vmem:[%s12582_s2] sm:$0xff] }
 0x6b2   :  { %v2527_v52 = vsel %vm69_vm0, %v2521_v26, 0.0 }
 0x6b3   :  { %v2473_v30 = vpop.f32.mrf.mxu0  ;;  %2528 = vadd.xlane.f32.xlu1 %v2527_v52  ;;  %v2514_v35 = vpop.f32.mrf.mxu1 }
 0x6b4   :  { %v2474_v39 = vadd.f32 %v2473_v30, %v2425_v29 }
 0x6b6   :  { %v2511_v14 = vadd.f32 %v2510_v27, %v2474_v39  ;;  %v59_v27 = vld [vmem:[%s12582_s2 + $0x10] sm:$0xff] }
 0x6b8   :  { %v2522_v33 = vadd.f32 %v9183_v21, %v2511_v14 }
 0x6ba   :  { %v2530_v17 = vsel %vm69_vm0, %v2522_v33, 0.0 }
 0x6bb   :  { %v2477_v19 = vpop.f32.mrf.mxu0  ;;  %2531 = vadd.xlane.f32.xlu2 %v2530_v17  ;;  %v2518_v16 = vpop.f32.mrf.mxu1 }
 0x6bc   :  { %v2478_v10 = vadd.f32 %v2477_v19, %v2431_v53 }
 0x6be   :  { %v2515_v55 = vadd.f32 %v2514_v35, %v2478_v10 }
 0x6c0   :  { %v2523_v18 = vadd.f32 %v9184_v22, %v2515_v55 }
 0x6c2   :  { %v2533_v40 = vsel %vm69_vm0, %v2523_v18, 0.0 }
 0x6c3   :  { %v2481_v47 = vpop.f32.mrf.mxu0  ;;  %2534 = vadd.xlane.f32.xlu0 %v2533_v40 }
 0x6c4   :  { %v2482_v12 = vadd.f32 %v2481_v47, %v2437_v58 }
 0x6c6   :  { %v2519_v43 = vadd.f32 %v2518_v16, %v2482_v12 }
 0x6c8   :  { %v2524_v61 = vadd.f32 %v9185_v60, %v2519_v43 }
 0x6ca   :  { %v2536_v63 = vsel %vm69_vm0, %v2524_v61, 0.0 }
 0x6cb   :  { %2537 = vadd.xlane.f32.xlu1 %v2536_v63 }
 0x6e4   :  { %2643 = vperm.xlu1 %9064, %v58_v45  }
 0x726   :  { %v2529_v54 = vpop.xlane.xlu1 %2528 }
 0x727   :  { %v2546_v1 = vmul.f32 %v9781_v59, %v2529_v54 }
 0x729   :  { %v2550_v4 = vsub.f32 %v2521_v26, %v2546_v1  ;;  %v60_v26 = vld [vmem:[%s12582_s2 + $0x18] sm:$0xff] }
 0x72b   :  { %v2554_v5 = vmul.f32 %v2550_v4, %v2550_v4 }
 0x72d   :  { %v2558_v49 = vsel %vm69_vm0, %v2554_v5, 0.0 }
 0x72e   :  { %2559 = vadd.xlane.f32.xlu2 %v2558_v49  ;;  %v2532_v24 = vpop.xlane.xlu2 %2531 }
 0x72f   :  { %v2547_v15 = vmul.f32 %v9781_v59, %v2532_v24 }
 0x731   :  { %v9786_v48 = vsub.f32 %v2522_v33, %v2547_v15 }
 0x733   :  { %v2555_v50 = vmul.f32 %v9786_v48, %v9786_v48 }
 0x735   :  { %v2561_v42 = vsel %vm69_vm0, %v2555_v50, 0.0 }
 0x736   :  { %v2535_v0 = vpop.xlane.xlu0 %2534  ;;  %2562 = vadd.xlane.f32.xlu0 %v2561_v42 }
 0x737   :  { %v2548_v11 = vmul.f32 %v9781_v59, %v2535_v0 }
 0x739   :  { %v9792_v34 = vsub.f32 %v2523_v18, %v2548_v11  ;;  %v9825_v18 = vld [vmem:[%s12588_s8] ss:$0 sm:$0xff] }
 0x73b   :  { %v2556_v13 = vmul.f32 %v9792_v34, %v9792_v34 }
 0x73d   :  { %v2564_v7 = vsel %vm69_vm0, %v2556_v13, 0.0 }
 0x73e   :  { %v2538_v23 = vpop.xlane.xlu1 %2537  ;;  %2565 = vadd.xlane.f32.xlu1 %v2564_v7 }
 0x73f   :  { %v2549_v25 = vmul.f32 %v9781_v59, %v2538_v23 }
 0x741   :  { %v9798_v28 = vsub.f32 %v2524_v61, %v2549_v25 }
 0x743   :  { %v2557_v31 = vmul.f32 %v9798_v28, %v9798_v28 }
 0x745   :  { %v2567_v32 = vsel %vm69_vm0, %v2557_v31, 0.0 }
 0x746   :  { %2568 = vadd.xlane.f32.xlu2 %v2567_v32 }
 0x74a   :  { %2638 = vperm.xlu0 %9063, %v57_v41  }
 0x756   :  { %v9813_v30 = vpop.permute.xlu1 %2643 }
 0x757   :  { %2653 = vperm.xlu1 %9064, %v60_v26   ;;  %12655 = vst [vmem:[#allocation6_spill] sm:$0xff] %v9813_v30 }
 0x75e   :  { %2648 = vperm.xlu2 %9065, %v59_v27  }
 0x7a1   :  { %v2560_v29 = vpop.xlane.xlu2 %2559 }
 0x7a2   :  { %v2570_v37 = vmul.f32 %v2560_v29, %v9781_v59 }
 0x7a4   :  { %v2574_v52 = vadd.f32 1e-05, %v2570_v37 }
 0x7a6   :  { %9118 = vrsqrt.f32 %v2574_v52  ;;  %vm2584_vm8 = vweird.f32 %v2574_v52 }
 0x7a9   :  { %v2563_v39 = vpop.xlane.xlu0 %2562 }
 0x7aa   :  { %v2571_v6 = vmul.f32 %v2563_v39, %v9781_v59 }
 0x7ac   :  { %v9119_v38 = vpop.eup %9118  ;;  %v2575_v46 = vadd.f32 1e-05, %v2571_v6 }
 0x7ad   :  { %v2579_v14 = vmul.f32 %v9119_v38, %v2574_v52  ;;  %vm2585_vm7 = vweird.f32 %v9119_v38 }
 0x7ae   :  { %9120 = vrsqrt.f32 %v2575_v46  ;;  %vm2586_vm9 = vmor %vm2584_vm8, %vm2585_vm7  ;;  %vm2594_vm11 = vweird.f32 %v2575_v46  ;;  %vm2731_vm8 = vcmask 1044480  }
 0x7af   :  { %v2580_v21 = vmul.f32 %v9119_v38, %v2579_v14 }
 0x7b1   :  { %v2581_v33 = vmul.f32 0.5, %v2580_v21  ;;  %v2566_v36 = vpop.xlane.xlu1 %2565 }
 0x7b2   :  { %v2572_v53 = vmul.f32 %v2566_v36, %v9781_v59 }
 0x7b3   :  { %v2582_v9 = vsub.f32 1.5, %v2581_v33 }
 0x7b4   :  { %v9121_v17 = vpop.eup %9120  ;;  %v2576_v35 = vadd.f32 1e-05, %v2572_v53 }
 0x7b5   :  { %v2583_v19 = vmul.f32 %v9119_v38, %v2582_v9  ;;  %v2589_v10 = vmul.f32 %v9121_v17, %v2575_v46  ;;  %vm2595_vm10 = vweird.f32 %v9121_v17 }
 0x7b6   :  { %9122 = vrsqrt.f32 %v2576_v35  ;;  %vm2596_vm12 = vmor %vm2594_vm11, %vm2595_vm10  ;;  %vm2604_vm15 = vweird.f32 %v2576_v35  ;;  %vm2768_vm10 = vcmask 1042432   ;;  %vm2814_vm11 = vcmask 1040384  }
 0x7b7   :  { %v2587_v8 = vsel %vm2586_vm9, %v9119_v38, %v2583_v19  ;;  %v2590_v55 = vmul.f32 %v9121_v17, %v2589_v10  ;;  %vm2791_vm9 = vcmask 1041408  }
 0x7b8   :  { %v2618_v22 = vmul.f32 %v2587_v8, %v2550_v4 }
 0x7b9   :  { %v2591_v56 = vmul.f32 0.5, %v2590_v55  ;;  %v2569_v58 = vpop.xlane.xlu2 %2568 }
 0x7ba   :  { %v2573_v40 = vmul.f32 %v2569_v58, %v9781_v59  ;;  %v2625_v47 = vmul.f32 %v9820_v20, %v2618_v22 }
 0x7bb   :  { %v2592_v12 = vsub.f32 1.5, %v2591_v56 }
 0x7bc   :  { %v9123_v16 = vpop.eup %9122  ;;  %v2577_v43 = vadd.f32 1e-05, %v2573_v40  ;;  %v9829_v60 = vpop.permute.xlu0 %2638  ;;  %v2632_v61 = vadd.f32 %v9825_v18, %v2625_v47 }
 0x7bd   :  { %12656 = vst [vmem:[#allocation7_spill] sm:$0xff] %v9829_v60  ;;  %v2593_v63 = vmul.f32 %v9121_v17, %v2592_v12  ;;  %v2599_v45 = vmul.f32 %v9123_v16, %v2576_v35  ;;  %vm2605_vm13 = vweird.f32 %v9123_v16 }
 0x7be   :  { %9124 = vrsqrt.f32 %v2577_v43  ;;  %v9833_v62 = vmul.f32 %v9829_v60, %v2632_v61  ;;  %vm2606_vm2 = vmor %vm2604_vm15, %vm2605_vm13  ;;  %vm2614_vm6 = vweird.f32 %v2577_v43  ;;  %vm12622_vm13 = vcmask 785408  }
 0x7bf   :  { %v2597_v51 = vsel %vm2596_vm12, %v9121_v17, %v2593_v63  ;;  %v2600_v57 = vmul.f32 %v9123_v16, %v2599_v45  ;;  %vm12623_vm12 = vcmask 523264  }
 0x7c0   :  { %v2619_v44 = vmul.f32 %v2597_v51, %v9786_v48  ;;  %v2665_v54 = vrot.slane %v9833_v62, 4 }
 0x7c1   :  { %v2601_v2 = vmul.f32 0.5, %v2600_v57  ;;  %v9860_v52 = vpop.permute.xlu2 %2648 }
 0x7c2   :  { %v2626_v3 = vmul.f32 %v9820_v20, %v2619_v44  ;;  %v9843_v48 = vsel %vm2664_vm14, 0.0, %v2665_v54  ;;  %12657 = vst [vmem:[#allocation8_spill] sm:$0xff] %v9860_v52 }
 0x7c3   :  { %v2602_v1 = vsub.f32 1.5, %v2601_v2  ;;  %v2709_v7 = vrot.slane %v9843_v48, 2  ;;  %v2686_v23 = vrot.slane %v9843_v48, 1  ;;  %v2732_v35 = vrot.slane %v9843_v48, 3 }
 0x7c4   :  { %v9125_v4 = vpop.eup %9124  ;;  %v2633_v5 = vadd.f32 %v9825_v18, %v2626_v3 }
 0x7c5   :  { %v2603_v49 = vmul.f32 %v9123_v16, %v2602_v1  ;;  %v2609_v24 = vmul.f32 %v9125_v4, %v2577_v43  ;;  %vm2615_vm5 = vweird.f32 %v9125_v4 }
 0x7c6   :  { %v9840_v15 = vmul.f32 %v9813_v30, %v2633_v5  ;;  %vm2616_vm7 = vmor %vm2614_vm6, %vm2615_vm5  ;;  %v2792_v5 = vrot.slane %v9843_v48, 6 }
 0x7c7   :  { %v2607_v50 = vsel %vm2606_vm2, %v9123_v16, %v2603_v49  ;;  %v2610_v42 = vmul.f32 %v9125_v4, %v2609_v24  ;;  %v2769_v49 = vrot.slane %v9843_v48, 5 }
 0x7c8   :  { %v2620_v0 = vmul.f32 %v2607_v50, %v9792_v34  ;;  %v2666_v11 = vrot.slane %v9840_v15, 4 }
 0x7c9   :  { %v2611_v13 = vmul.f32 0.5, %v2610_v42  ;;  %v9879_v19 = vpop.permute.xlu1 %2653 }
 0x7ca   :  { %v9850_v25 = vsel %vm2664_vm14, %v2666_v11, 0.0  ;;  %v9853_v31 = vsel %vm2664_vm14, %v2665_v54, %v2666_v11  ;;  %v2627_v32 = vmul.f32 %v9820_v20, %v2620_v0  ;;  %12658 = vst [vmem:[#allocation9_spill] sm:$0xff] %v9879_v19  ;;  %v2878_v0 = vld [vmem:[%s12589_s9 + $0x78] sm:$0xff]  ;;  %v2877_v11 = vld [vmem:[%s12589_s9 + $0x70] sm:$0xff] }
 0x7cb   :  { %v2612_v41 = vsub.f32 1.5, %v2611_v13  ;;  %v2710_v34 = vrot.slane %v9853_v31, 2  ;;  %v2687_v26 = vrot.slane %v9853_v31, 1  ;;  %v2689_v27 = vrot.slane %v9850_v25, 1 }
 0x7cc   :  { %v2634_v29 = vadd.f32 %v9825_v18, %v2627_v32  ;;  %v2712_v33 = vrot.slane %v9850_v25, 2  ;;  %v2733_v53 = vrot.slane %v9853_v31, 3  ;;  %v2793_v54 = vrot.slane %v9853_v31, 6 }
 0x7cd   :  { %v2613_v37 = vmul.f32 %v9125_v4, %v2612_v41  ;;  %v2711_v39 = vsel %vm2708_vm3, %v2709_v7, %v2710_v34  ;;  %v2690_v6 = vsel %vm2685_vm4, %v2687_v26, %v2689_v27  ;;  %v2688_v38 = vsel %vm2685_vm4, %v2686_v23, %v2687_v26 }
 0x7ce   :  { %2719 = vrot.lane.b32.xlu1 %v2711_v39, %s9215_s26  ;;  %2698 = vrot.lane.b32.xlu0 %v2690_v6, %s9222_s17  ;;  %v9871_v21 = vmul.f32 %v9860_v52, %v2634_v29  ;;  %v2770_v1 = vrot.slane %v9853_v31, 5  ;;  %v2794_v24 = vsel %vm2791_vm9, %v2792_v5, %v2793_v54  ;;  %v9936_v13 = vand.u32 4294901760, %v2878_v0 }
 0x7cf   :  { %v2617_v46 = vsel %vm2616_vm7, %v9125_v4, %v2613_v37  ;;  %2696 = vrot.lane.b32.xlu2 %v2688_v38, %s9222_s17  ;;  %v9938_v7 = vand.u32 4294901760, %v2877_v11  ;;  %v2795_v23 = vrot.slane %v9850_v25, 6  ;;  %v2772_v32 = vrot.slane %v9850_v25, 5 }
 0x7d0   :  { %v2621_v14 = vmul.f32 %v2617_v46, %v9798_v28  ;;  %v2668_v17 = vrot.slane %v9871_v21, 4  ;;  %v2713_v28 = vsel %vm2708_vm3, %v2710_v34, %v2712_v33  ;;  %v2771_v50 = vsel %vm2768_vm10, %v2769_v49, %v2770_v1  ;;  %3159 = vmatpush.msrb.mxu1 %v9936_v13  ;;  %2912 = vmatpush.msra.mxu2 %v9936_v13 }
 0x7d1   :  { %v2816_v41 = vrot.slane %v9853_v31, 7  ;;  %v9944_v34 = vsub.f32 %v2878_v0, %v9936_v13  ;;  %v9947_v26 = vsub.f32 %v2877_v11, %v9938_v7  ;;  %v2815_v27 = vrot.slane %v9843_v48, 7 }
 0x7d2   :  { %v2628_v36 = vmul.f32 %v9820_v20, %v2621_v14  ;;  %v2734_v20 = vsel %vm2731_vm8, %v2732_v35, %v2733_v53  ;;  %v9890_v55 = vsel %vm2664_vm14, 0.0, %v2668_v17  ;;  %3161 = vmatpush.msrb.mxu1 %v9938_v7  ;;  %v2796_v39 = vsel %vm2791_vm9, %v2793_v54, %v2795_v23  ;;  %2914 = vmatpush.msra.mxu2 %v9938_v7  ;;  %v2873_v54 = vld [vmem:[%s12589_s9 + $0x50] sm:$0xff]  ;;  %v2872_v23 = vld [vmem:[%s12589_s9 + $0x48] sm:$0xff] }
 0x7d3   :  { %v2714_v56 = vrot.slane %v9890_v55, 2  ;;  %v2691_v40 = vrot.slane %v9890_v55, 1  ;;  %v2737_v57 = vrot.slane %v9890_v55, 3  ;;  %v2978_v29 = vand.u32 4294901760, %v9944_v34  ;;  %3091 = vmatpush.msrb.mxu0 %v9944_v34 }
 0x7d4   :  { %v2635_v9 = vadd.f32 %v9825_v18, %v2628_v36  ;;  %v2735_v18 = vrot.slane %v9850_v25, 3  ;;  %v2984_v37 = vand.u32 4294901760, %v9947_v26  ;;  %v2773_v6 = vsel %vm2768_vm10, %v2770_v1, %v2772_v32 }
 0x7d5   :  { %v2817_v38 = vsel %vm2814_vm11, %v2815_v27, %v2816_v41  ;;  %v2979_v46 = vsub.f32 %v9944_v34, %v2978_v29  ;;  %3094 = vmatpush.msrb.mxu0 %v9947_v26  ;;  %v2797_v35 = vrot.slane %v9890_v55, 6  ;;  %v10020_v49 = vand.u32 4294901760, %v2873_v54  ;;  %v2892_v34 = vld [vmem:[%s12589_s9 + $0xe8] sm:$0xff] }
 0x7d6   :  { %v9883_v10 = vmul.f32 %v9879_v19, %v2635_v9  ;;  %2721 = vrot.lane.b32.xlu1 %v2713_v28, %s9215_s26  ;;  %v2736_v61 = vsel %vm2731_vm8, %v2733_v53, %v2735_v18  ;;  %v2985_v14 = vsub.f32 %v9947_v26, %v2984_v37  ;;  %v2774_v28 = vrot.slane %v9890_v55, 5 }
 0x7d7   :  { %2742 = vrot.lane.b32.xlu2 %v2734_v20, %s9214_s21  ;;  %v2980_v33 = vand.u32 4294901760, %v2979_v46  ;;  %v10033_v0 = vsub.f32 %v2873_v54, %v10020_v49 }
 0x7d8   :  { %v2669_v8 = vrot.slane %v9883_v10, 4  ;;  %v2986_v36 = vand.u32 4294901760, %v2985_v14 }
 0x7d9   :  { %2981 = vmatpush.msra.mxu3 %v2980_v33 }
 0x7da   :  { %v9893_v22 = vsel %vm2664_vm14, %v2668_v17, %v2669_v8  ;;  %v9903_v43 = vsel %vm2664_vm14, %v2669_v8, 0.0  ;;  %v2818_v17 = vrot.slane %v9850_v25, 7 }
 0x7db   :  { %v2715_v58 = vrot.slane %v9893_v22, 2  ;;  %v2692_v47 = vrot.slane %v9893_v22, 1  ;;  %v2717_v63 = vrot.slane %v9903_v43, 2  ;;  %v2694_v45 = vrot.slane %v9903_v43, 1  ;;  %2987 = vmatpush.msra.mxu3 %v2986_v36 }
 0x7dc   :  { %v2738_v51 = vrot.slane %v9893_v22, 3  ;;  %v2740_v4 = vrot.slane %v9903_v43, 3  ;;  %v2798_v53 = vrot.slane %v9893_v22, 6  ;;  %v2775_v9 = vrot.slane %v9893_v22, 5 }
 0x7dd   :  { %v2716_v12 = vsel %vm2708_vm3, %v2714_v56, %v2715_v58  ;;  %v2693_v16 = vsel %vm2685_vm4, %v2691_v40, %v2692_v47  ;;  %v2718_v44 = vsel %vm2708_vm3, %v2715_v58, %v2717_v63  ;;  %v2695_v2 = vsel %vm2685_vm4, %v2692_v47, %v2694_v45  ;;  %v2876_v63 = vld [vmem:[%s12589_s9 + $0x68] sm:$0xff] }
 0x7de   :  { %2723 = vrot.lane.b32.xlu1 %v2716_v12, %s9215_s26  ;;  %2700 = vrot.lane.b32.xlu0 %v2693_v16, %s9222_s17  ;;  %v2739_v3 = vsel %vm2731_vm8, %v2737_v57, %v2738_v51  ;;  %v2741_v42 = vsel %vm2731_vm8, %v2738_v51, %v2740_v4  ;;  %v2799_v20 = vsel %vm2791_vm9, %v2797_v35, %v2798_v53  ;;  %v2800_v56 = vrot.slane %v9903_v43, 6  ;;  %v2875_v51 = vld [vmem:[%s12589_s9 + $0x60] sm:$0xff] }
 0x7df   :  { %2744 = vrot.lane.b32.xlu2 %v2736_v61, %s9214_s21  ;;  %v2776_v8 = vsel %vm2768_vm10, %v2774_v28, %v2775_v9  ;;  %v2819_v18 = vsel %vm2814_vm11, %v2816_v41, %v2818_v17  ;;  %v2777_v58 = vrot.slane %v9903_v43, 5  ;;  %v2821_v40 = vrot.slane %v9893_v22, 7 }
 0x7e0   :  { %v2820_v47 = vrot.slane %v9890_v55, 7  ;;  %v2801_v12 = vsel %vm2791_vm9, %v2798_v53, %v2800_v56  ;;  %v9994_v45 = vand.u32 4294901760, %v2876_v63  ;;  %v2870_v53 = vld [vmem:[%s12589_s9 + $0x38] sm:$0xff] }
 0x7e1   :  { %v2778_v16 = vsel %vm2768_vm10, %v2775_v9, %v2777_v58  ;;  %v2869_v9 = vld [vmem:[%s12589_s9 + $0x30] sm:$0xff]  ;;  %v10073_v35 = vand.u32 4294901760, %v2870_v53 }
 0x7e2   :  { %v2822_v61 = vsel %vm2814_vm11, %v2820_v47, %v2821_v40  ;;  %v10000_v57 = vsub.f32 %v2876_v63, %v9994_v45  ;;  %3163 = vmatpush.msrb.mxu1 %v9994_v45  ;;  %2916 = vmatpush.msra.mxu2 %v9994_v45  ;;  %v10076_v28 = vand.u32 4294901760, %v2869_v9  ;;  %v2868_v63 = vld [vmem:[%s12589_s9 + $0x28] sm:$0xff] }
 0x7e3   :  { %v10085_v58 = vsub.f32 %v2870_v53, %v10073_v35 }
 0x7e4   :  { %v2990_v1 = vand.u32 4294901760, %v10000_v57  ;;  %3097 = vmatpush.msrb.mxu0 %v10000_v57 }
 0x7e6   :  { %2725 = vrot.lane.b32.xlu1 %v2718_v44, %s9215_s26  ;;  %2702 = vrot.lane.b32.xlu0 %v2695_v2, %s9222_s17  ;;  %v10002_v44 = vand.u32 4294901760, %v2875_v51  ;;  %v2823_v2 = vrot.slane %v9903_v43, 7 }
 0x7e7   :  { %2746 = vrot.lane.b32.xlu2 %v2739_v3, %s9214_s21  ;;  %v2874_v3 = vld [vmem:[%s12589_s9 + $0x58] sm:$0xff] }
 0x7e8   :  { %v10015_v4 = vsub.f32 %v2875_v51, %v10002_v44  ;;  %v10018_v5 = vand.u32 4294901760, %v2874_v3  ;;  %3165 = vmatpush.msrb.mxu1 %v10002_v44  ;;  %2918 = vmatpush.msra.mxu2 %v10002_v44  ;;  %v2824_v11 = vsel %vm2814_vm11, %v2821_v40, %v2823_v2  ;;  %v10088_v40 = vsub.f32 %v2869_v9, %v10076_v28 }
 0x7e9   :  { %v10106_v2 = vand.u32 4294901760, %v2868_v63 }
 0x7ea   :  { %3100 = vmatpush.msrb.mxu0 %v10015_v4  ;;  %3167 = vmatpush.msrb.mxu1 %v10018_v5 }
 0x7eb   :  { %2920 = vmatpush.msra.mxu2 %v10018_v5 }
 0x7ec   :  { %3169 = vmatpush.msrb.mxu1 %v10020_v49 }
 0x7ed   :  { %2922 = vmatpush.msra.mxu2 %v10020_v49 }
 0x7ee   :  { %2802 = vrot.lane.b32.xlu1 %v2794_v24, %s9215_s26  ;;  %2779 = vrot.lane.b32.xlu0 %v2771_v50, %s9222_s17  ;;  %v2991_v24 = vsub.f32 %v10000_v57, %v2990_v1  ;;  %v2996_v50 = vand.u32 4294901760, %v10015_v4 }
 0x7ef   :  { %2748 = vrot.lane.b32.xlu2 %v2741_v42, %s9214_s21  ;;  %v10029_v42 = vsub.f32 %v2874_v3, %v10018_v5 }
 0x7f0   :  { %v2992_v32 = vand.u32 4294901760, %v2991_v24  ;;  %v2997_v41 = vsub.f32 %v10015_v4, %v2996_v50 }
 0x7f1   :  { %v3002_v27 = vand.u32 4294901760, %v10029_v42  ;;  %3103 = vmatpush.msrb.mxu0 %v10029_v42 }
 0x7f2   :  { %2993 = vmatpush.msra.mxu3 %v2992_v32  ;;  %v2998_v46 = vand.u32 4294901760, %v2997_v41  ;;  %v10121_v32 = vsub.f32 %v2868_v63, %v10106_v2 }
 0x7f3   :  { %v3003_v14 = vsub.f32 %v10029_v42, %v3002_v27  ;;  %3106 = vmatpush.msrb.mxu0 %v10033_v0  ;;  %v2889_v42 = vld [vmem:[%s12589_s9 + $0xd0] sm:$0xff] }
 0x7f4   :  { %2999 = vmatpush.msra.mxu3 %v2998_v46  ;;  %v2865_v46 = vld [vmem:[%s12589_s9 + $0x10] sm:$0xff]  ;;  %v12596_v9 = vand.u32 4294901760, %v10121_v32 }
 0x7f5   :  { %v10135_v53 = vand.u32 4294901760, %v2865_v46 }
 0x7f6   :  { %2804 = vrot.lane.b32.xlu1 %v2796_v39, %s9215_s26  ;;  %2781 = vrot.lane.b32.xlu0 %v2773_v6, %s9222_s17  ;;  %v3008_v39 = vand.u32 4294901760, %v10033_v0  ;;  %v10048_v6 = vand.u32 4294901760, %v2872_v23 }
 0x7f7   :  { %2825 = vrot.lane.b32.xlu2 %v2817_v38, %s9214_s21  ;;  %v2871_v38 = vld [vmem:[%s12589_s9 + $0x40] sm:$0xff]  ;;  %v10148_v63 = vsub.f32 %v2865_v46, %v10135_v53 }
 0x7f8   :  { %v3009_v33 = vsub.f32 %v10033_v0, %v3008_v39  ;;  %v10062_v36 = vand.u32 4294901760, %v2871_v38  ;;  %v10071_v17 = vsub.f32 %v2872_v23, %v10048_v6  ;;  %3171 = vmatpush.msrb.mxu1 %v10048_v6  ;;  %2924 = vmatpush.msra.mxu2 %v10048_v6  ;;  %v2888_v0 = vld [vmem:[%s12589_s9 + $0xc8] sm:$0xff] }
 0x7fa   :  { %v3014_v56 = vand.u32 4294901760, %v10071_v17  ;;  %3109 = vmatpush.msrb.mxu0 %v10071_v17  ;;  %3173 = vmatpush.msrb.mxu1 %v10062_v36 }
 0x7fb   :  { %2926 = vmatpush.msra.mxu2 %v10062_v36 }
 0x7fc   :  { %3175 = vmatpush.msrb.mxu1 %v10073_v35 }
 0x7fd   :  { %2928 = vmatpush.msra.mxu2 %v10073_v35 }
 0x7fe   :  { %2806 = vrot.lane.b32.xlu1 %v2799_v20, %s9215_s26  ;;  %2783 = vrot.lane.b32.xlu0 %v2776_v8, %s9222_s17  ;;  %v3004_v20 = vand.u32 4294901760, %v3003_v14  ;;  %v3010_v8 = vand.u32 4294901760, %v3009_v33 }
 0x7ff   :  { %2827 = vrot.lane.b32.xlu2 %v2819_v18, %s9214_s21  ;;  %v10080_v18 = vsub.f32 %v2871_v38, %v10062_v36  ;;  %3177 = vmatpush.msrb.mxu1 %v10076_v28  ;;  %v2866_v38 = vld [vmem:[%s12589_s9 + $0x18] sm:$0xff] }
 0x800   :  { %3005 = vmatpush.msra.mxu3 %v3004_v20  ;;  %2930 = vmatpush.msra.mxu2 %v10076_v28  ;;  %v10133_v33 = vand.u32 4294901760, %v2866_v38 }
 0x801   :  { %v12604_v47 = vand.u32 4294901760, %v10080_v18  ;;  %3112 = vmatpush.msrb.mxu0 %v10080_v18  ;;  %3179 = vmatpush.msrb.mxu1 %v10106_v2 }
 0x802   :  { %3011 = vmatpush.msra.mxu3 %v3010_v8  ;;  %2932 = vmatpush.msra.mxu2 %v10106_v2 }
 0x803   :  { %v3021_v51 = vsub.f32 %v10080_v18, %v12604_v47  ;;  %3115 = vmatpush.msrb.mxu0 %v10085_v58 }
 0x805   :  { %v3022_v23 = vand.u32 4294901760, %v3021_v51  ;;  %3118 = vmatpush.msrb.mxu0 %v10088_v40  ;;  %v3039_v51 = vsub.f32 %v10121_v32, %v12596_v9 }
 0x806   :  { %2808 = vrot.lane.b32.xlu1 %v2801_v12, %s9215_s26  ;;  %2785 = vrot.lane.b32.xlu0 %v2778_v16, %s9222_s17  ;;  %v3015_v12 = vsub.f32 %v10071_v17, %v3014_v56  ;;  %v12599_v16 = vand.u32 4294901760, %v10085_v58  ;;  %v12659_v17 = vand.u32 4294901760, %v10080_v18 }
 0x807   :  { %2829 = vrot.lane.b32.xlu2 %v2822_v61, %s9214_s21  ;;  %v12598_v61 = vand.u32 4294901760, %v10088_v40  ;;  %3121 = vmatpush.msrb.mxu0 %v10121_v32 }
 0x808   :  { %v3016_v3 = vand.u32 4294901760, %v3015_v12  ;;  %v3027_v54 = vsub.f32 %v10085_v58, %v12599_v16  ;;  %v10145_v12 = vsub.f32 %v2866_v38, %v10133_v33 }
 0x809   :  { %v3033_v24 = vsub.f32 %v10088_v40, %v12598_v61 }
 0x80a   :  { %3017 = vmatpush.msra.mxu3 %v3016_v3  ;;  %v3028_v14 = vand.u32 4294901760, %v3027_v54  ;;  %v12601_v54 = vand.u32 4294901760, %v10145_v12 }
 0x80b   :  { %v3034_v8 = vand.u32 4294901760, %v3033_v24  ;;  %v12600_v24 = vand.u32 4294901760, %v10148_v63 }
 0x80c   :  { %3023 = vmatpush.msra.mxu3 %v3022_v23  ;;  %v3040_v23 = vand.u32 4294901760, %v3039_v51  ;;  %v2863_v51 = vld [vmem:[%s12589_s9] sm:$0xff] }
 0x80d   :  { %v3057_v9 = vsub.f32 %v10148_v63, %v12600_v24  ;;  %v10182_v16 = vand.u32 4294901760, %v2863_v51 }
 0x80e   :  { %3029 = vmatpush.msra.mxu3 %v3028_v14  ;;  %v3051_v14 = vsub.f32 %v10145_v12, %v12601_v54 }
 0x80f   :  { %2831 = vrot.lane.b32.xlu2 %v2824_v11, %s9214_s21  ;;  %v2867_v11 = vld [vmem:[%s12589_s9 + $0x20] sm:$0xff]  ;;  %v10189_v54 = vsub.f32 %v2863_v51, %v10182_v16 }
 0x810   :  { %v10123_v41 = vand.u32 4294901760, %v2867_v11  ;;  %3035 = vmatpush.msra.mxu3 %v3034_v8  ;;  %v3052_v8 = vand.u32 4294901760, %v3051_v14 }
 0x812   :  { %v10139_v20 = vsub.f32 %v2867_v11, %v10123_v41  ;;  %3181 = vmatpush.msrb.mxu1 %v10123_v41  ;;  %2934 = vmatpush.msra.mxu2 %v10123_v41  ;;  %v2864_v11 = vld [vmem:[%s12589_s9 + $0x8] sm:$0xff] }
 0x813   :  { %v10165_v46 = vand.u32 4294901760, %v2864_v11  ;;  %3041 = vmatpush.msra.mxu3 %v3040_v23 }
 0x814   :  { %v12597_v3 = vand.u32 4294901760, %v10139_v20  ;;  %3124 = vmatpush.msrb.mxu0 %v10139_v20  ;;  %3183 = vmatpush.msrb.mxu1 %v10133_v33 }
 0x815   :  { %2936 = vmatpush.msra.mxu2 %v10133_v33  ;;  %v10180_v61 = vsub.f32 %v2864_v11, %v10165_v46  ;;  %v3058_v11 = vand.u32 4294901760, %v3057_v9 }
 0x816   :  { %v3045_v38 = vsub.f32 %v10139_v20, %v12597_v3  ;;  %3127 = vmatpush.msrb.mxu0 %v10145_v12  ;;  %3185 = vmatpush.msrb.mxu1 %v10135_v53 }
 0x817   :  { %2938 = vmatpush.msra.mxu2 %v10135_v53  ;;  %v12602_v24 = vand.u32 4294901760, %v10180_v61 }
 0x818   :  { %v3046_v3 = vand.u32 4294901760, %v3045_v38  ;;  %3130 = vmatpush.msrb.mxu0 %v10148_v63  ;;  %3187 = vmatpush.msrb.mxu1 %v10165_v46  ;;  %v12603_v38 = vand.u32 4294901760, %v10189_v54 }
 0x819   :  { %2940 = vmatpush.msra.mxu2 %v10165_v46  ;;  %v3063_v23 = vsub.f32 %v10180_v61, %v12602_v24 }
 0x81a   :  { %3047 = vmatpush.msra.mxu3 %v3046_v3  ;;  %3133 = vmatpush.msrb.mxu0 %v10180_v61  ;;  %v3069_v9 = vsub.f32 %v10189_v54, %v12603_v38  ;;  %v2894_v3 = vld [vmem:[%s12589_s9 + $0xf8] sm:$0xff] }
 0x81b   :  { %3189 = vmatpush.msrb.mxu1 %v10182_v16  ;;  %2942 = vmatpush.msra.mxu2 %v10182_v16  ;;  %v3064_v14 = vand.u32 4294901760, %v3063_v23  ;;  %v10209_v51 = vand.u32 4294901760, %v2894_v3  ;;  %v2893_v23 = vld [vmem:[%s12589_s9 + $0xf0] sm:$0xff] }
 0x81c   :  { %3053 = vmatpush.msra.mxu3 %v3052_v8  ;;  %3136 = vmatpush.msrb.mxu0 %v10189_v54  ;;  %v3070_v8 = vand.u32 4294901760, %v3069_v9  ;;  %v10221_v47 = vand.u32 4294901760, %v2893_v23 }
 0x81d   :  { %3218 = vmatpush.msrb.mxu2 %v2978_v29  ;;  %v10219_v38 = vsub.f32 %v2894_v3, %v10209_v51 }
 0x81e   :  { %3059 = vmatpush.msra.mxu3 %v3058_v11  ;;  %3346 = vmatpush.msra.mxu0 %v10209_v51  ;;  %v10231_v26 = vsub.f32 %v2893_v23, %v10221_v47  ;;  %v2891_v11 = vld [vmem:[%s12589_s9 + $0xe0] sm:$0xff] }
 0x81f   :  { %3222 = vmatpush.msrb.mxu2 %v2984_v37  ;;  %v12613_v29 = vand.u32 4294901760, %v10219_v38  ;;  %v10233_v37 = vand.u32 4294901760, %v2892_v34  ;;  %v10249_v9 = vand.u32 4294901760, %v2891_v11 }
 0x820   :  { %3065 = vmatpush.msra.mxu3 %v3064_v14  ;;  %3348 = vmatpush.msra.mxu0 %v10221_v47 }
 0x821   :  { %3226 = vmatpush.msrb.mxu2 %v2990_v1  ;;  %v3413_v57 = vsub.f32 %v10219_v38, %v12613_v29  ;;  %v12609_v1 = vand.u32 4294901760, %v10231_v26  ;;  %v10247_v14 = vsub.f32 %v2892_v34, %v10233_v37 }
 0x822   :  { %3071 = vmatpush.msra.mxu3 %v3070_v8  ;;  %3350 = vmatpush.msra.mxu0 %v10233_v37  ;;  %v10263_v8 = vsub.f32 %v2891_v11, %v10249_v9  ;;  %v10278_v11 = vand.u32 4294901760, %v2889_v42 }
 0x823   :  { %3230 = vmatpush.msrb.mxu2 %v2996_v50  ;;  %v3414_v4 = vand.u32 4294901760, %v3413_v57  ;;  %v3419_v50 = vsub.f32 %v10231_v26, %v12609_v1  ;;  %v12605_v3 = vand.u32 4294901760, %v10247_v14 }
 0x824   :  { %3297 = vmatpush.msrb.mxu3 %v9936_v13  ;;  %v2890_v13 = vld [vmem:[%s12589_s9 + $0xd8] sm:$0xff]  ;;  %3352 = vmatpush.msra.mxu0 %v10249_v9  ;;  %v12606_v34 = vand.u32 4294901760, %v10263_v8 }
 0x825   :  { %3234 = vmatpush.msrb.mxu2 %v3002_v27  ;;  %3415 = vmatpush.msra.mxu1 %v3414_v4  ;;  %v3420_v27 = vand.u32 4294901760, %v3419_v50  ;;  %v3425_v23 = vsub.f32 %v10247_v14, %v12605_v3  ;;  %v10294_v50 = vsub.f32 %v2889_v42, %v10278_v11  ;;  %v10296_v3 = vand.u32 4294901760, %v2888_v0 }
 0x826   :  { %3299 = vmatpush.msrb.mxu3 %v9938_v7  ;;  %v10267_v7 = vand.u32 4294901760, %v2890_v13  ;;  %v3431_v4 = vsub.f32 %v10263_v8, %v12606_v34 }
 0x827   :  { %3238 = vmatpush.msrb.mxu2 %v3008_v39  ;;  %3421 = vmatpush.msra.mxu1 %v3420_v27  ;;  %v3426_v39 = vand.u32 4294901760, %v3425_v23  ;;  %v12607_v42 = vand.u32 4294901760, %v10294_v50  ;;  %v10308_v23 = vsub.f32 %v2888_v0, %v10296_v3 }
 0x828   :  { %3301 = vmatpush.msrb.mxu3 %v9994_v45  ;;  %v10284_v57 = vsub.f32 %v2890_v13, %v10267_v7  ;;  %3354 = vmatpush.msra.mxu0 %v10267_v7  ;;  %v2887_v13 = vld [vmem:[%s12589_s9 + $0xc0] sm:$0xff]  ;;  %v3432_v27 = vand.u32 4294901760, %v3431_v4  ;;  %v12660_v4 = vand.u32 4294901760, %v10085_v58  ;;  %v12661_v58 = vand.u32 4294901760, %v10088_v40 }
 0x829   :  { %v10211_v24 = vpop.permute.xlu2 %2696  ;;  %3242 = vmatpush.msrb.mxu2 %v3014_v56  ;;  %3427 = vmatpush.msra.mxu1 %v3426_v39  ;;  %v10310_v34 = vand.u32 4294901760, %v2887_v13  ;;  %v2886_v56 = vld [vmem:[%s12589_s9 + $0xb8] sm:$0xff]  ;;  %v3443_v0 = vsub.f32 %v10294_v50, %v12607_v42  ;;  %v12611_v18 = vand.u32 4294901760, %v10308_v23 }
 0x82a   :  { %3303 = vmatpush.msrb.mxu3 %v10002_v44  ;;  %v12608_v44 = vand.u32 4294901760, %v10284_v57  ;;  %3356 = vmatpush.msra.mxu0 %v10278_v11 }
 0x82b   :  { %3246 = vmatpush.msrb.mxu2 %v12659_v17  ;;  %3433 = vmatpush.msra.mxu1 %v3432_v27  ;;  %v10327_v39 = vsub.f32 %v2887_v13, %v10310_v34  ;;  %v2885_v27 = vld [vmem:[%s12589_s9 + $0xb0] sm:$0xff]  ;;  %v3444_v42 = vand.u32 4294901760, %v3443_v0  ;;  %v3449_v13 = vsub.f32 %v10308_v23, %v12611_v18 }
 0x82c   :  { %3305 = vmatpush.msrb.mxu3 %v10018_v5  ;;  %v3437_v5 = vsub.f32 %v10284_v57, %v12608_v44  ;;  %3358 = vmatpush.msra.mxu0 %v10296_v3 }
 0x82d   :  { %3250 = vmatpush.msrb.mxu2 %v12660_v4  ;;  %v12610_v44 = vand.u32 4294901760, %v10327_v39  ;;  %v3450_v0 = vand.u32 4294901760, %v3449_v13 }
 0x82e   :  { %3307 = vmatpush.msrb.mxu3 %v10020_v49  ;;  %v10329_v49 = vand.u32 4294901760, %v2886_v56  ;;  %v3438_v17 = vand.u32 4294901760, %v3437_v5  ;;  %3360 = vmatpush.msra.mxu0 %v10310_v34  ;;  %v2884_v5 = vld [vmem:[%s12589_s9 + $0xa8] sm:$0xff] }
 0x82f   :  { %3254 = vmatpush.msrb.mxu2 %v12661_v58  ;;  %v3455_v4 = vsub.f32 %v10327_v39, %v12610_v44  ;;  %v10358_v40 = vand.u32 4294901760, %v2884_v5 }
 0x830   :  { %3309 = vmatpush.msrb.mxu3 %v10048_v6  ;;  %v10343_v1 = vsub.f32 %v2886_v56, %v10329_v49  ;;  %3439 = vmatpush.msra.mxu1 %v3438_v17  ;;  %v10348_v6 = vand.u32 4294901760, %v2885_v27  ;;  %v12662_v17 = vand.u32 4294901760, %v10121_v32  ;;  %v2883_v32 = vld [vmem:[%s12589_s9 + $0xa0] sm:$0xff] }
 0x831   :  { %v10280_v45 = vpop.permute.xlu2 %2742  ;;  %3362 = vmatpush.msra.mxu0 %v10329_v49  ;;  %v3456_v58 = vand.u32 4294901760, %v3455_v4  ;;  %v10372_v18 = vsub.f32 %v2884_v5, %v10358_v40  ;;  %v2837_v5 = vsel %vm69_vm0, %v9843_v48, %v10211_v24 }
 0x832   :  { %3311 = vmatpush.msrb.mxu3 %v10062_v36  ;;  %v12612_v56 = vand.u32 4294901760, %v10343_v1  ;;  %3258 = vmatpush.msrb.mxu2 %v12662_v17  ;;  %v10366_v13 = vsub.f32 %v2885_v27, %v10348_v6  ;;  %v10382_v27 = vand.u32 4294901760, %v2883_v32 }
 0x833   :  { %3445 = vmatpush.msra.mxu1 %v3444_v42  ;;  %3364 = vmatpush.msra.mxu0 %v10348_v6 }
 0x834   :  { %3313 = vmatpush.msrb.mxu3 %v10073_v35  ;;  %v3461_v44 = vsub.f32 %v10343_v1, %v12612_v56  ;;  %v12663_v35 = vand.u32 4294901760, %v10139_v20  ;;  %v12615_v42 = vand.u32 4294901760, %v10366_v13  ;;  %v12614_v56 = vand.u32 4294901760, %v10372_v18  ;;  %v2882_v20 = vld [vmem:[%s12589_s9 + $0x98] sm:$0xff] }
 0x835   :  { %3451 = vmatpush.msra.mxu1 %v3450_v0  ;;  %3366 = vmatpush.msra.mxu0 %v10358_v40 }
 0x836   :  { %3262 = vmatpush.msrb.mxu2 %v12663_v35  ;;  %3315 = vmatpush.msrb.mxu3 %v10076_v28  ;;  %v3462_v17 = vand.u32 4294901760, %v3461_v44  ;;  %v12664_v28 = vand.u32 4294901760, %v10145_v12  ;;  %v3467_v24 = vsub.f32 %v10366_v13, %v12615_v42  ;;  %v10399_v44 = vand.u32 4294901760, %v2882_v20 }
 0x837   :  { %3457 = vmatpush.msra.mxu1 %v3456_v58  ;;  %v3473_v29 = vsub.f32 %v10372_v18, %v12614_v56  ;;  %v10407_v12 = vsub.f32 %v2883_v32, %v10382_v27  ;;  %3368 = vmatpush.msra.mxu0 %v10382_v27  ;;  %v12665_v58 = vand.u32 4294901760, %v10148_v63  ;;  %v2880_v63 = vld [vmem:[%s12589_s9 + $0x88] sm:$0xff] }
 0x838   :  { %3266 = vmatpush.msrb.mxu2 %v12664_v28  ;;  %3317 = vmatpush.msrb.mxu3 %v10106_v2  ;;  %v2881_v2 = vld [vmem:[%s12589_s9 + $0x90] sm:$0xff] }
 0x839   :  { %v10362_v36 = vpop.permute.xlu2 %2744  ;;  %3463 = vmatpush.msra.mxu1 %v3462_v17  ;;  %v10421_v32 = vand.u32 4294901760, %v2881_v2  ;;  %v3474_v28 = vand.u32 4294901760, %v3473_v29  ;;  %3370 = vmatpush.msra.mxu0 %v10399_v44 }
 0x83a   :  { %3270 = vmatpush.msrb.mxu2 %v12665_v58  ;;  %3319 = vmatpush.msrb.mxu3 %v10123_v41  ;;  %v12666_v58 = vand.u32 4294901760, %v10180_v61 }
 0x83b   :  { %v10434_v29 = vsub.f32 %v2881_v2, %v10421_v32  ;;  %3372 = vmatpush.msra.mxu0 %v10421_v32 }
 0x83c   :  { %3274 = vmatpush.msrb.mxu2 %v12666_v58  ;;  %3321 = vmatpush.msrb.mxu3 %v10133_v33 }
 0x83e   :  { %3323 = vmatpush.msrb.mxu3 %v10135_v53 }
 0x840   :  { %v2720_v4 = vpop.permute.xlu1 %2719  ;;  %v2699_v17 = vpop.permute.xlu0 %2698  ;;  %3325 = vmatpush.msrb.mxu3 %v10165_v46 }
 0x841   :  { %v2842_v0 = vsel %vm12623_vm12, %v2837_v5, %v2720_v4  ;;  %v10419_v4 = vsub.f32 %v2882_v20, %v10399_v44  ;;  %v2747_v58 = vpop.permute.xlu2 %2746  ;;  %v2838_v33 = vsel %vm69_vm0, %v9853_v31, %v2699_v17  ;;  %v12668_v17 = vand.u32 4294901760, %v10189_v54 }
 0x842   :  { %v2847_v35 = vsel %vm12622_vm13, %v2842_v0, %v10280_v45  ;;  %v3468_v45 = vand.u32 4294901760, %v3467_v24  ;;  %v12616_v0 = vand.u32 4294901760, %v10407_v12  ;;  %v10436_v24 = vand.u32 4294901760, %v2880_v63  ;;  %3327 = vmatpush.msrb.mxu3 %v10182_v16 }
 0x843   :  { %v10415_v5 = vand.u32 4294901760, %v2847_v35  ;;  %v12619_v20 = vand.u32 4294901760, %v10419_v4  ;;  %3278 = vmatpush.msrb.mxu2 %v12668_v17 }
 0x844   :  { %3469 = vmatpush.msra.mxu1 %v3468_v45  ;;  %v3479_v61 = vsub.f32 %v10407_v12, %v12616_v0  ;;  %v10448_v56 = vsub.f32 %v2880_v63, %v10436_v24  ;;  %3374 = vmatpush.msra.mxu0 %v10436_v24  ;;  %v12667_v63 = vand.u32 4294901760, %v10434_v29 }
 0x845   :  { %v2944_v41 = vsub.f32 %v2847_v35, %v10415_v5  ;;  %3073 = vmatmul.f32.vlgmr.msra.gmra.mxu3 %v10415_v5  ;;  %v3485_v45 = vsub.f32 %v10419_v4, %v12619_v20 }
 0x846   :  { %3475 = vmatpush.msra.mxu1 %v3474_v28  ;;  %v3480_v0 = vand.u32 4294901760, %v3479_v61  ;;  %v2879_v28 = vld [vmem:[%s12589_s9 + $0x80] sm:$0xff]  ;;  %v3491_v52 = vsub.f32 %v10434_v29, %v12667_v63  ;;  %v3496_v61 = vand.u32 4294901760, %v10448_v56  ;;  %3593 = vmatpush.msra.mxu3 %v10209_v51 }
 0x847   :  { %v2945_v35 = vand.u32 4294901760, %v2944_v41  ;;  %3139 = vmatmul.f32.vlgmr.msrb.gmra.mxu0 %v2944_v41  ;;  %v3486_v2 = vand.u32 4294901760, %v3485_v45 }
 0x848   :  { %v2722_v42 = vpop.permute.xlu1 %2721  ;;  %3481 = vmatpush.msra.mxu1 %v3480_v0  ;;  %v3492_v45 = vand.u32 4294901760, %v3491_v52  ;;  %v3497_v54 = vsub.f32 %v10448_v56, %v3496_v61  ;;  %3595 = vmatpush.msra.mxu3 %v10221_v47 }
 0x849   :  { %v2946_v19 = vsub.f32 %v2944_v41, %v2945_v35  ;;  %v2843_v20 = vsel %vm12623_vm12, %v2838_v33, %v2722_v42  ;;  %3193 = vmatmul.f32.vlgmr.msrb.gmra.mxu1 %v2945_v35  ;;  %v10467_v41 = vand.u32 4294901760, %v2879_v28  ;;  %v2749_v33 = vpop.permute.xlu2 %2748 }
 0x84a   :  { %v2848_v53 = vsel %vm12622_vm13, %v2843_v20, %v10362_v36  ;;  %3487 = vmatpush.msra.mxu1 %v3486_v2  ;;  %3597 = vmatpush.msra.mxu3 %v10233_v37 }
 0x84b   :  { %v2947_v42 = vand.u32 4294901760, %v2946_v19  ;;  %v10469_v35 = vand.u32 4294901760, %v2848_v53  ;;  %v10476_v36 = vsub.f32 %v2879_v28, %v10467_v41  ;;  %v3498_v19 = vand.u32 4294901760, %v3497_v54  ;;  %3376 = vmatpush.msra.mxu0 %v10467_v41 }
 0x84c   :  { %3493 = vmatpush.msra.mxu1 %v3492_v45  ;;  %3599 = vmatpush.msra.mxu3 %v10249_v9 }
 0x84d   :  { %2948 = vmatmul.f32.vlgmr.msra.gmra.mxu2 %v2947_v42  ;;  %3077 = vmatmul.f32.gmra.mxu3 %v10469_v35  ;;  %v2952_v46 = vsub.f32 %v2848_v53, %v10469_v35  ;;  %v3502_v52 = vand.u32 4294901760, %v10476_v36  ;;  %v12669_v42 = vand.u32 4294901760, %v10219_v38 }
 0x84e   :  { %3525 = vmatpush.msra.mxu2 %v10219_v38  ;;  %3499 = vmatpush.msra.mxu1 %v3498_v19  ;;  %v12670_v38 = vand.u32 4294901760, %v10231_v26 }
 0x84f   :  { %3144 = vmatmul.f32.gmra.mxu0 %v2952_v46  ;;  %v2953_v16 = vand.u32 4294901760, %v2952_v46  ;;  %v3503_v2 = vsub.f32 %v10476_v36, %v3502_v52  ;;  %3601 = vmatpush.msra.mxu3 %v10267_v7 }
 0x850   :  { %v2724_v0 = vpop.permute.xlu1 %2723  ;;  %v2701_v20 = vpop.permute.xlu0 %2700  ;;  %3652 = vmatpush.msrb.mxu0 %v12669_v42  ;;  %3528 = vmatpush.msra.mxu2 %v10231_v26 }
 0x851   :  { %v2839_v28 = vsel %vm69_vm0, %v9890_v55, %v2701_v20  ;;  %3199 = vmatmul.f32.gmra.mxu1 %v2953_v16  ;;  %v2954_v63 = vsub.f32 %v2952_v46, %v2953_v16  ;;  %v3504_v53 = vand.u32 4294901760, %v3503_v2  ;;  %3603 = vmatpush.msra.mxu3 %v10278_v11  ;;  %v2826_v2 = vpop.permute.xlu2 %2825 }
 0x852   :  { %v2844_v17 = vsel %vm12623_vm12, %v2839_v28, %v2724_v0  ;;  %3656 = vmatpush.msrb.mxu0 %v12670_v38  ;;  %3531 = vmatpush.msra.mxu2 %v10247_v14  ;;  %v12674_v38 = vand.u32 4294901760, %v10294_v50 }
 0x853   :  { %v2849_v45 = vsel %vm12622_vm13, %v2844_v17, %v2747_v58  ;;  %v2955_v54 = vand.u32 4294901760, %v2954_v63  ;;  %3505 = vmatpush.msra.mxu1 %v3504_v53  ;;  %3605 = vmatpush.msra.mxu3 %v10296_v3  ;;  %v12672_v53 = vand.u32 4294901760, %v10263_v8 }
 0x854   :  { %v10496_v19 = vand.u32 4294901760, %v2849_v45  ;;  %3534 = vmatpush.msra.mxu2 %v10263_v8 }
 0x855   :  { %2956 = vmatmul.f32.gmra.mxu2 %v2955_v54  ;;  %3731 = vmatpush.msrb.mxu1 %v10209_v51  ;;  %v12673_v54 = vand.u32 4294901760, %v10284_v57 }
 0x856   :  { %3081 = vmatmul.f32.gmra.mxu3 %v10496_v19  ;;  %v2960_v46 = vsub.f32 %v2849_v45, %v10496_v19  ;;  %3537 = vmatpush.msra.mxu2 %v10284_v57  ;;  %v2757_v57 = vrot.slane %v9850_v25, 4 }
 0x857   :  { %3733 = vmatpush.msrb.mxu1 %v10221_v47  ;;  %v12671_v47 = vand.u32 4294901760, %v10247_v14  ;;  %3607 = vmatpush.msra.mxu3 %v10310_v34  ;;  %v2754_v14 = vrot.slane %v9843_v48, 4 }
 0x858   :  { %v2726_v58 = vpop.permute.xlu1 %2725  ;;  %v2703_v16 = vpop.permute.xlu0 %2702  ;;  %3149 = vmatmul.f32.gmra.mxu0 %v2960_v46  ;;  %v2961_v0 = vand.u32 4294901760, %v2960_v46  ;;  %3540 = vmatpush.msra.mxu2 %v10294_v50 }
 0x859   :  { %v2840_v51 = vsel %vm69_vm0, %v9893_v22, %v2703_v16  ;;  %3735 = vmatpush.msrb.mxu1 %v10233_v37  ;;  %3660 = vmatpush.msrb.mxu0 %v12671_v47  ;;  %v2755_v37 = vrot.slane %v9853_v31, 4 }
 0x85a   :  { %v2845_v26 = vsel %vm12623_vm12, %v2840_v51, %v2726_v58  ;;  %3205 = vmatmul.f32.gmra.mxu1 %v2961_v0  ;;  %v2962_v20 = vsub.f32 %v2960_v46, %v2961_v0  ;;  %3609 = vmatpush.msra.mxu3 %v10329_v49  ;;  %v12675_v0 = vand.u32 4294901760, %v10308_v23 }
 0x85b   :  { %v2850_v28 = vsel %vm12622_vm13, %v2845_v26, %v2749_v33  ;;  %3737 = vmatpush.msrb.mxu1 %v10249_v9  ;;  %3664 = vmatpush.msrb.mxu0 %v12672_v53  ;;  %v2756_v42 = vsel %vm2664_vm14, %v2754_v14, %v2755_v37  ;;  %v2758_v26 = vsel %vm2664_vm14, %v2755_v37, %v2757_v57  ;;  %v2760_v37 = vrot.slane %v9893_v22, 4 }
 0x85c   :  { %v10517_v63 = vand.u32 4294901760, %v2850_v28  ;;  %v2963_v17 = vand.u32 4294901760, %v2962_v20  ;;  %3611 = vmatpush.msra.mxu3 %v10348_v6  ;;  %3543 = vmatpush.msra.mxu2 %v10308_v23  ;;  %v12676_v23 = vand.u32 4294901760, %v10327_v39  ;;  %v12678_v53 = vand.u32 4294901760, %v10366_v13 }
 0x85d   :  { %3739 = vmatpush.msrb.mxu1 %v10267_v7  ;;  %3668 = vmatpush.msrb.mxu0 %v12673_v54  ;;  %v2762_v54 = vrot.slane %v9903_v43, 4 }
 0x85e   :  { %2964 = vmatmul.f32.gmra.mxu2 %v2963_v17  ;;  %3085 = vmatmul.f32.gmra.mxu3 %v10517_v63  ;;  %v2968_v9 = vsub.f32 %v2850_v28, %v10517_v63 }
 0x85f   :  { %3741 = vmatpush.msrb.mxu1 %v10278_v11  ;;  %3672 = vmatpush.msrb.mxu0 %v12674_v38 }
 0x860   :  { %v2803_v33 = vpop.permute.xlu1 %2802  ;;  %v2780_v8 = vpop.permute.xlu0 %2779  ;;  %3154 = vmatmul.f32.gmra.mxu0 %v2968_v9  ;;  %v2969_v45 = vand.u32 4294901760, %v2968_v9  ;;  %3613 = vmatpush.msra.mxu3 %v10358_v40 }
 0x861   :  { %v2851_v7 = vsel %vm69_vm0, %v2756_v42, %v2780_v8  ;;  %3743 = vmatpush.msrb.mxu1 %v10296_v3  ;;  %v2828_v3 = vpop.permute.xlu2 %2827  ;;  %3676 = vmatpush.msrb.mxu0 %v12675_v0 }
 0x862   :  { %v2855_v48 = vsel %vm12623_vm12, %v2851_v7, %v2803_v33  ;;  %3211 = vmatmul.f32.gmra.mxu1 %v2969_v45  ;;  %v2970_v11 = vsub.f32 %v2968_v9, %v2969_v45  ;;  %3546 = vmatpush.msra.mxu2 %v10327_v39  ;;  %v12677_v39 = vand.u32 4294901760, %v10343_v1 }
 0x863   :  { %v2859_v46 = vsel %vm12622_vm13, %v2855_v48, %v2826_v2  ;;  %3745 = vmatpush.msrb.mxu1 %v10310_v34  ;;  %3615 = vmatpush.msra.mxu3 %v10382_v27  ;;  %v12681_v48 = vand.u32 4294901760, %v10419_v4 }
 0x864   :  { %v10542_v58 = vand.u32 4294901760, %v2859_v46  ;;  %v2971_v16 = vand.u32 4294901760, %v2970_v11  ;;  %3680 = vmatpush.msrb.mxu0 %v12676_v23  ;;  %3549 = vmatpush.msra.mxu2 %v10343_v1  ;;  %v2759_v1 = vrot.slane %v9890_v55, 4  ;;  %v2896_v23 = vld [vmem:[%s12589_s9 + $0x108] sm:$0xff] }
 0x865   :  { %3747 = vmatpush.msrb.mxu1 %v10329_v49  ;;  %3617 = vmatpush.msra.mxu3 %v10399_v44 }
 0x866   :  { %v10551_v51 = vsub.f32 %v2859_v46, %v10542_v58  ;;  %2972 = vmatmul.f32.gmra.mxu2 %v2971_v16  ;;  %3329 = vmatmul.f32.vlgmr.msrb.gmra.mxu3 %v10415_v5  ;;  %v2761_v33 = vsel %vm2664_vm14, %v2759_v1, %v2760_v37 }
 0x867   :  { %3749 = vmatpush.msrb.mxu1 %v10348_v6  ;;  %3684 = vmatpush.msrb.mxu0 %v12677_v39 }
 0x868   :  { %v3379_v34 = vand.u32 4294901760, %v10551_v51  ;;  %v2805_v50 = vpop.permute.xlu1 %2804  ;;  %v2782_v20 = vpop.permute.xlu0 %2781  ;;  %3552 = vmatpush.msra.mxu2 %v10366_v13  ;;  %3619 = vmatpush.msra.mxu3 %v10421_v32 }
 0x869   :  { %v2852_v47 = vsel %vm69_vm0, %v2758_v26, %v2782_v20  ;;  %3751 = vmatpush.msrb.mxu1 %v10358_v40  ;;  %3688 = vmatpush.msrb.mxu0 %v12678_v53  ;;  %v2830_v40 = vpop.permute.xlu2 %2829 }
 0x86a   :  { %v3380_v49 = vsub.f32 %v10551_v51, %v3379_v34  ;;  %v2856_v2 = vsel %vm12623_vm12, %v2852_v47, %v2805_v50  ;;  %3507 = vmatmul.f32.vlgmr.msra.gmra.mxu1 %v10542_v58  ;;  %3555 = vmatpush.msra.mxu2 %v10372_v18  ;;  %v2897_v50 = vld [vmem:[%s12589_s9 + $0x110] sm:$0xff]  ;;  %v2895_v47 = vld [vmem:[%s12589_s9 + $0x100] sm:$0xff] }
 0x86b   :  { %v2860_v28 = vsel %vm12622_vm13, %v2856_v2, %v2828_v3  ;;  %3753 = vmatpush.msrb.mxu1 %v10382_v27  ;;  %3621 = vmatpush.msra.mxu3 %v10436_v24  ;;  %v12679_v27 = vand.u32 4294901760, %v10372_v18  ;;  %v12680_v18 = vand.u32 4294901760, %v10407_v12  ;;  %v3795_v2 = vand.u32 4294901760, %v2896_v23 }
 0x86c   :  { %v10574_v6 = vand.u32 4294901760, %v2860_v28  ;;  %v3381_v17 = vand.u32 4294901760, %v3380_v49  ;;  %3558 = vmatpush.msra.mxu2 %v10407_v12 }
 0x86d   :  { %3692 = vmatpush.msrb.mxu0 %v12679_v27  ;;  %3755 = vmatpush.msrb.mxu1 %v10399_v44  ;;  %v3857_v53 = vsub.f32 %v2896_v23, %v3795_v2 }
 0x86e   :  { %v10583_v14 = vsub.f32 %v2860_v28, %v10574_v6  ;;  %3280 = vmatmul.f32.vlgmr.msrb.gmra.mxu2 %v10415_v5  ;;  %3333 = vmatmul.f32.gmra.mxu3 %v10469_v35  ;;  %v3797_v28 = vand.u32 4294901760, %v2895_v47 }
 0x86f   :  { %3382 = vmatmul.f32.vlgmr.msra.gmra.mxu0 %v3381_v17  ;;  %3623 = vmatpush.msra.mxu3 %v10467_v41 }
 0x870   :  { %v2807_v9 = vpop.permute.xlu1 %2806  ;;  %v2784_v13 = vpop.permute.xlu0 %2783  ;;  %v3387_v42 = vand.u32 4294901760, %v10583_v14  ;;  %3696 = vmatpush.msrb.mxu0 %v12680_v18  ;;  %3757 = vmatpush.msrb.mxu1 %v10421_v32  ;;  %v2763_v32 = vsel %vm2664_vm14, %v2760_v37, %v2762_v54  ;;  %v3863_v1 = vsub.f32 %v2895_v47, %v3797_v28  ;;  %v2907_v18 = vsel %vm69_vm0, %v9893_v22, 0 }
 0x871   :  { %v2853_v5 = vsel %vm69_vm0, %v2761_v33, %v2784_v13  ;;  %3561 = vmatpush.msra.mxu2 %v10419_v4  ;;  %v12682_v4 = vand.u32 4294901760, %v10434_v29  ;;  %v3858_v33 = vand.u32 4294901760, %v3857_v53  ;;  %v3815_v54 = vand.u32 4294901760, %v2907_v18 }
 0x872   :  { %v2857_v55 = vsel %vm12623_vm12, %v2853_v5, %v2807_v9  ;;  %3511 = vmatmul.f32.gmra.mxu1 %v10574_v6  ;;  %v3388_v8 = vsub.f32 %v10583_v14, %v3387_v42  ;;  %3700 = vmatpush.msrb.mxu0 %v12681_v48  ;;  %v3864_v13 = vand.u32 4294901760, %v3863_v1 }
 0x873   :  { %v2861_v45 = vsel %vm12622_vm13, %v2857_v55, %v2830_v40  ;;  %3759 = vmatpush.msrb.mxu1 %v10436_v24  ;;  %3564 = vmatpush.msra.mxu2 %v10434_v29  ;;  %v3859_v5 = vsub.f32 %v3857_v53, %v3858_v33  ;;  %v3816_v48 = vsub.f32 %v2907_v18, %v3815_v54 }
 0x874   :  { %v10607_v44 = vand.u32 4294901760, %v2861_v45  ;;  %v3389_v7 = vand.u32 4294901760, %v3388_v8  ;;  %3704 = vmatpush.msrb.mxu0 %v12682_v4  ;;  %v3865_v55 = vsub.f32 %v3863_v1, %v3864_v13 }
 0x875   :  { %3761 = vmatpush.msrb.mxu1 %v10467_v41  ;;  %3567 = vmatpush.msra.mxu2 %v10448_v56  ;;  %v2898_v56 = vld [vmem:[%s12589_s9 + $0x118] sm:$0xff] }
 0x876   :  { %v10615_v11 = vsub.f32 %v2861_v45, %v10607_v44  ;;  %3284 = vmatmul.f32.gmra.mxu2 %v10469_v35  ;;  %3337 = vmatmul.f32.gmra.mxu3 %v10496_v19  ;;  %v2832_v35 = vpop.permute.xlu2 %2831  ;;  %v3866_v8 = vand.u32 4294901760, %v3865_v55 }
 0x877   :  { %3390 = vmatmul.f32.gmra.mxu0 %v3389_v7  ;;  %3570 = vmatpush.msra.mxu2 %v10476_v36 }
 0x878   :  { %v2809_v12 = vpop.permute.xlu1 %2808  ;;  %v2786_v46 = vpop.permute.xlu0 %2785  ;;  %v3395_v38 = vand.u32 4294901760, %v10615_v11  ;;  %3708 = vmatpush.msrb.mxu0 %v3496_v61  ;;  %v3791_v61 = vand.u32 4294901760, %v2898_v56 }
 0x879   :  { %v2854_v24 = vsel %vm69_vm0, %v2763_v32, %v2786_v46  ;;  %v3817_v32 = vand.u32 4294901760, %v3816_v48 }
 0x87a   :  { %v2858_v16 = vsel %vm12623_vm12, %v2854_v24, %v2809_v12  ;;  %3515 = vmatmul.f32.gmra.mxu1 %v10607_v44  ;;  %v3396_v57 = vsub.f32 %v10615_v11, %v3395_v38  ;;  %3712 = vmatpush.msrb.mxu0 %v3502_v52  ;;  %v3793_v52 = vand.u32 4294901760, %v2897_v50  ;;  %v3845_v26 = vsub.f32 %v2898_v56, %v3791_v61 }
 0x87b   :  { %v2862_v29 = vsel %vm12622_vm13, %v2858_v16, %v2832_v35  ;;  %3792 = vmatpush.msrb.mxu2 %v3791_v61  ;;  %3943 = vmatpush.msra.mxu1 %v3791_v61  ;;  %v3818_v22 = vsub.f32 %v3816_v48, %v3817_v32 }
 0x87c   :  { %v10636_v41 = vand.u32 4294901760, %v2862_v29  ;;  %v3397_v3 = vand.u32 4294901760, %v3396_v57  ;;  %v3851_v20 = vsub.f32 %v2897_v50, %v3793_v52  ;;  %v3846_v49 = vand.u32 4294901760, %v3845_v26  ;;  %3899 = vmatpush.msra.mxu0 %v3845_v26 }
 0x87d   :  { %3945 = vmatpush.msra.mxu1 %v3793_v52  ;;  %3794 = vmatpush.msrb.mxu2 %v3793_v52  ;;  %v3819_v4 = vand.u32 4294901760, %v3818_v22 }
 0x87e   :  { %v10641_v0 = vsub.f32 %v2862_v29, %v10636_v41  ;;  %3288 = vmatmul.f32.gmra.mxu2 %v10496_v19  ;;  %3341 = vmatmul.f32.gmra.mxu3 %v10517_v63  ;;  %v3852_v17 = vand.u32 4294901760, %v3851_v20  ;;  %v3847_v37 = vsub.f32 %v3845_v26, %v3846_v49 }
 0x87f   :  { %3398 = vmatmul.f32.gmra.mxu0 %v3397_v3  ;;  %3947 = vmatpush.msra.mxu1 %v3795_v2 }
 0x880   :  { %v3403_v36 = vand.u32 4294901760, %v10641_v0  ;;  %3902 = vmatpush.msra.mxu0 %v3851_v20  ;;  %v3853_v40 = vsub.f32 %v3851_v20, %v3852_v17  ;;  %v3848_v9 = vand.u32 4294901760, %v3847_v37  ;;  %3796 = vmatpush.msrb.mxu2 %v3795_v2 }
 0x881   :  { %3949 = vmatpush.msra.mxu1 %v3797_v28 }
 0x882   :  { %3519 = vmatmul.f32.gmra.mxu1 %v10636_v41  ;;  %v3404_v19 = vsub.f32 %v10641_v0, %v3403_v36  ;;  %v3854_v27 = vand.u32 4294901760, %v3853_v40  ;;  %3905 = vmatpush.msra.mxu0 %v3857_v53 }
 0x883   :  { %3849 = vmatpush.msrb.mxu3 %v3848_v9  ;;  %3798 = vmatpush.msrb.mxu2 %v3797_v28 }
 0x884   :  { %v3405_v39 = vand.u32 4294901760, %v3404_v19  ;;  %3908 = vmatpush.msra.mxu0 %v3863_v1 }
 0x885   :  { %3855 = vmatpush.msrb.mxu3 %v3854_v27 }
 0x886   :  { %3292 = vmatmul.f32.gmra.mxu2 %v10517_v63  ;;  %3627 = vmatmul.f32.vlgmr.msra.gmra.mxu3 %v3379_v34  ;;  %v3860_v63 = vand.u32 4294901760, %v3859_v5 }
 0x887   :  { %3406 = vmatmul.f32.gmra.mxu0 %v3405_v39 }
 0x888   :  { %3861 = vmatpush.msrb.mxu3 %v3860_v63 }
 0x88a   :  { %3763 = vmatmul.f32.vlgmr.msrb.gmra.mxu1 %v10542_v58  ;;  %3867 = vmatpush.msrb.mxu3 %v3866_v8 }
 0x88c   :  { %4033 = vmatpush.msra.mxu3 %v3791_v61 }
 0x88e   :  { %3573 = vmatmul.f32.vlgmr.msra.gmra.mxu2 %v10551_v51  ;;  %3633 = vmatmul.f32.gmra.mxu3 %v3387_v42 }
 0x88f   :  { %3714 = vmatmul.f32.vlgmr.msrb.gmra.mxu0 %v10542_v58  ;;  %3990 = vmatpush.msra.mxu2 %v3846_v49  ;;  %v2903_v58 = vsel %vm69_vm0, %v9853_v31, 0 }
 0x890   :  { %4035 = vmatpush.msra.mxu3 %v3793_v52  ;;  %v3799_v51 = vand.u32 4294901760, %v2903_v58 }
 0x891   :  { %3994 = vmatpush.msra.mxu2 %v3852_v17 }
 0x892   :  { %3767 = vmatmul.f32.gmra.mxu1 %v10574_v6  ;;  %4037 = vmatpush.msra.mxu3 %v3795_v2  ;;  %v3800_v34 = vsub.f32 %v2903_v58, %v3799_v51 }
 0x893   :  { %3998 = vmatpush.msra.mxu2 %v3858_v33 }
 0x894   :  { %4039 = vmatpush.msra.mxu3 %v3797_v28 }
 0x895   :  { %4002 = vmatpush.msra.mxu2 %v3864_v13 }
 0x896   :  { %3578 = vmatmul.f32.gmra.mxu2 %v10583_v14  ;;  %3639 = vmatmul.f32.gmra.mxu3 %v3395_v38  ;;  %v2905_v14 = vsel %vm69_vm0, %v9850_v25, 0 }
 0x897   :  { %3718 = vmatmul.f32.gmra.mxu0 %v10574_v6  ;;  %v3801_v6 = vand.u32 4294901760, %v3800_v34  ;;  %v3807_v42 = vand.u32 4294901760, %v2905_v14 }
 0x899   :  { %v3802_v31 = vsub.f32 %v3800_v34, %v3801_v6  ;;  %v3808_v45 = vsub.f32 %v2905_v14, %v3807_v42 }
 0x89a   :  { %3771 = vmatmul.f32.gmra.mxu1 %v10607_v44 }
 0x89b   :  { %v3809_v7 = vand.u32 4294901760, %v3808_v45 }
 0x89d   :  { %v3810_v25 = vsub.f32 %v3808_v45, %v3809_v7 }
 0x89e   :  { %3583 = vmatmul.f32.gmra.mxu2 %v10615_v11  ;;  %3645 = vmatmul.f32.gmra.mxu3 %v3403_v36  ;;  %v2909_v11 = vsel %vm69_vm0, %v9903_v43, 0 }
 0x89f   :  { %3722 = vmatmul.f32.gmra.mxu0 %v10607_v44  ;;  %v3803_v44 = vand.u32 4294901760, %v3802_v31  ;;  %v3811_v12 = vand.u32 4294901760, %v3810_v25  ;;  %v3823_v46 = vand.u32 4294901760, %v2909_v11 }
 0x8a1   :  { %v3824_v38 = vsub.f32 %v2909_v11, %v3823_v46 }
 0x8a2   :  { %3775 = vmatmul.f32.gmra.mxu1 %v10636_v41 }
 0x8a3   :  { %v3825_v24 = vand.u32 4294901760, %v3824_v38 }
 0x8a5   :  { %v3826_v35 = vsub.f32 %v3824_v38, %v3825_v24 }
 0x8a6   :  { %3588 = vmatmul.f32.gmra.mxu2 %v10641_v0  ;;  %3869 = vmatmul.f32.vlgmr.msrb.gmra.mxu3 %v3799_v51 }
 0x8a7   :  { %3726 = vmatmul.f32.gmra.mxu0 %v10636_v41  ;;  %v3827_v16 = vand.u32 4294901760, %v3826_v35 }
 0x8aa   :  { %3953 = vmatmul.f32.vlgmr.msra.gmra.mxu1 %v3801_v6 }
 0x8ae   :  { %3804 = vmatmul.f32.vlgmr.msrb.gmra.mxu2 %v3803_v44  ;;  %3873 = vmatmul.f32.gmra.mxu3 %v3807_v42 }
 0x8af   :  { %3911 = vmatmul.f32.vlgmr.msra.gmra.mxu0 %v3800_v34 }
 0x8b2   :  { %3959 = vmatmul.f32.gmra.mxu1 %v3809_v7 }
 0x8b6   :  { %3812 = vmatmul.f32.gmra.mxu2 %v3811_v12  ;;  %3877 = vmatmul.f32.gmra.mxu3 %v3815_v54 }
 0x8b7   :  { %3916 = vmatmul.f32.gmra.mxu0 %v3808_v45 }
 0x8ba   :  { %3965 = vmatmul.f32.gmra.mxu1 %v3817_v32 }
 0x8be   :  { %3820 = vmatmul.f32.gmra.mxu2 %v3819_v4  ;;  %3881 = vmatmul.f32.gmra.mxu3 %v3823_v46 }
 0x8bf   :  { %3921 = vmatmul.f32.gmra.mxu0 %v3816_v48 }
 0x8c2   :  { %3971 = vmatmul.f32.gmra.mxu1 %v3825_v24 }
 0x8c4   :  { %v3140_v57 = vpop.f32.mrf.mxu0 }
 0x8c6   :  { %3828 = vmatmul.f32.gmra.mxu2 %v3827_v16  ;;  %4041 = vmatmul.f32.vlgmr.msra.gmra.mxu3 %v3799_v51  ;;  %v3194_v29 = vpop.f32.mrf.mxu1 }
 0x8c7   :  { %3926 = vmatmul.f32.gmra.mxu0 %v3824_v38 }
 0x8c8   :  { %v3074_v43 = vpop.f32.mrf.mxu3 }
 0x8cc   :  { %v3145_v0 = vpop.f32.mrf.mxu0 }
 0x8ce   :  { %4004 = vmatmul.f32.vlgmr.msra.gmra.mxu2 %v3799_v51  ;;  %4045 = vmatmul.f32.gmra.mxu3 %v3807_v42  ;;  %v3200_v50 = vpop.f32.mrf.mxu1  ;;  %v9072_v51 = vld [vmem:[%s12590_s10] ss:$0 sm:$0xff] }
 0x8d0   :  { %v2949_v41 = vpop.f32.mrf.mxu2  ;;  %v3078_v3 = vpop.f32.mrf.mxu3 }
 0x8d5   :  { %v3150_v26 = vpop.f32.mrf.mxu0 }
 0x8d6   :  { %4008 = vmatmul.f32.gmra.mxu2 %v3807_v42  ;;  %4049 = vmatmul.f32.gmra.mxu3 %v3815_v54  ;;  %v2950_v42 = vadd.f32 %v9072_v51, %v2949_v41 }
 0x8d7   :  { %v10693_v19 = vpop.f32.mrf.mxu1 }
 0x8d8   :  { %v2957_v56 = vpop.f32.mrf.mxu2  ;;  %v3075_v45 = vadd.f32 %v3074_v43, %v2950_v42  ;;  %v4068_v43 = vld [vmem:[%s12591_s11 + $0x38] sm:$0xff] }
 0x8d9   :  { %v3082_v61 = vpop.f32.mrf.mxu3  ;;  %v10763_v41 = vand.u32 4294901760, %v4068_v43 }
 0x8da   :  { %v3141_v25 = vadd.f32 %v3140_v57, %v3075_v45  ;;  %v4067_v57 = vld [vmem:[%s12591_s11 + $0x30] sm:$0xff] }
 0x8db   :  { %4277 = vmatpush.msrb.mxu3 %v10763_v41  ;;  %4094 = vmatpush.msrb.mxu0 %v10763_v41 }
 0x8dc   :  { %v3195_v11 = vadd.f32 %v3194_v29, %v3141_v25  ;;  %v4066_v29 = vld [vmem:[%s12591_s11 + $0x28] sm:$0xff] }
 0x8dd   :  { %v10697_v47 = vpop.f32.mrf.mxu0 }
 0x8de   :  { %4012 = vmatmul.f32.gmra.mxu2 %v3815_v54  ;;  %4053 = vmatmul.f32.gmra.mxu3 %v3823_v46  ;;  %v2958_v54 = vadd.f32 %v9072_v51, %v2957_v56 }
 0x8df   :  { %v10699_v49 = vpop.f32.mrf.mxu1 }
 0x8e0   :  { %v3079_v48 = vadd.f32 %v3078_v3, %v2958_v54  ;;  %v10765_v3 = vand.u32 4294901760, %v4067_v57 }
 0x8e1   :  { %v2965_v36 = vpop.f32.mrf.mxu2  ;;  %v10691_v52 = vpop.f32.mrf.mxu3 }
 0x8e2   :  { %v2966_v32 = vadd.f32 %v9072_v51, %v2965_v36  ;;  %v3146_v4 = vadd.f32 %v3145_v0, %v3079_v48  ;;  %v10767_v0 = vand.u32 4294901760, %v4066_v29  ;;  %v10773_v36 = vsub.f32 %v4067_v57, %v10765_v3  ;;  %4279 = vmatpush.msrb.mxu3 %v10765_v3  ;;  %4096 = vmatpush.msrb.mxu0 %v10765_v3 }
 0x8e4   :  { %v3083_v35 = vadd.f32 %v3082_v61, %v2966_v32  ;;  %v3201_v56 = vadd.f32 %v3200_v50, %v3146_v4  ;;  %v10770_v61 = vsub.f32 %v4068_v43, %v10763_v41  ;;  %4281 = vmatpush.msrb.mxu3 %v10767_v0  ;;  %4098 = vmatpush.msrb.mxu0 %v10767_v0 }
 0x8e6   :  { %4016 = vmatmul.f32.gmra.mxu2 %v3823_v46  ;;  %v3151_v42 = vadd.f32 %v3150_v26, %v3083_v35  ;;  %v4152_v48 = vand.u32 4294901760, %v10770_v61 }
 0x8e7   :  { %v10703_v17 = vpop.f32.mrf.mxu1  ;;  %4225 = vmatpush.msrb.mxu2 %v10770_v61 }
 0x8e8   :  { %v4153_v26 = vsub.f32 %v10770_v61, %v4152_v48 }
 0x8e9   :  { %v10695_v20 = vpop.f32.mrf.mxu2  ;;  %v3330_v23 = vpop.f32.mrf.mxu3  ;;  %4228 = vmatpush.msrb.mxu2 %v10773_v36 }
 0x8ec   :  { %v3383_v39 = vpop.f32.mrf.mxu0 }
 0x8ef   :  { %v10713_v33 = vpop.f32.mrf.mxu1 }
 0x8f1   :  { %v3281_v2 = vpop.f32.mrf.mxu2  ;;  %v10701_v28 = vpop.f32.mrf.mxu3 }
 0x8f2   :  { %v3282_v46 = vadd.f32 %v3281_v2, %v3195_v11  ;;  %v4158_v11 = vand.u32 4294901760, %v10773_v36 }
 0x8f4   :  { %v10707_v1 = vpop.f32.mrf.mxu0  ;;  %v3331_v16 = vadd.f32 %v3330_v23, %v3282_v46  ;;  %v10776_v23 = vsub.f32 %v4066_v29, %v10767_v0 }
 0x8f6   :  { %v3384_v45 = vadd.f32 %v3383_v39, %v3331_v16  ;;  %v4164_v32 = vand.u32 4294901760, %v10776_v23  ;;  %v4159_v39 = vsub.f32 %v10773_v36, %v4158_v11  ;;  %v4154_v16 = vand.u32 4294901760, %v4153_v26  ;;  %4231 = vmatpush.msrb.mxu2 %v10776_v23 }
 0x8f7   :  { %v10721_v55 = vpop.f32.mrf.mxu1 }
 0x8f8   :  { %v4165_v46 = vsub.f32 %v10776_v23, %v4164_v32  ;;  %v3509_v4 = vadd.f32 %v10703_v17, %v3384_v45  ;;  %v4160_v43 = vand.u32 4294901760, %v4159_v39  ;;  %4155 = vmatpush.msrb.mxu1 %v4154_v16  ;;  %v4065_v17 = vld [vmem:[%s12591_s11 + $0x20] sm:$0xff] }
 0x8f9   :  { %v3285_v37 = vpop.f32.mrf.mxu2  ;;  %v10705_v53 = vpop.f32.mrf.mxu3  ;;  %v10822_v45 = vand.u32 4294901760, %v4065_v17 }
 0x8fa   :  { %v3286_v2 = vadd.f32 %v3285_v37, %v3201_v56  ;;  %v2974_v37 = vadd.f32 %v9072_v51, %v10695_v20  ;;  %v3207_v51 = vadd.f32 %v10693_v19, %v3151_v42  ;;  %4161 = vmatpush.msrb.mxu1 %v4160_v43  ;;  %v4062_v43 = vld [vmem:[%s12591_s11 + $0x8] sm:$0xff] }
 0x8fb   :  { %v10833_v26 = vsub.f32 %v4065_v17, %v10822_v45  ;;  %4283 = vmatpush.msrb.mxu3 %v10822_v45  ;;  %4100 = vmatpush.msrb.mxu0 %v10822_v45 }
 0x8fc   :  { %v10715_v13 = vpop.f32.mrf.mxu0  ;;  %v3335_v20 = vadd.f32 %v10701_v28, %v3286_v2  ;;  %v3087_v57 = vadd.f32 %v10691_v52, %v2974_v37  ;;  %v4166_v28 = vand.u32 4294901760, %v4165_v46 }
 0x8fd   :  { %4234 = vmatpush.msrb.mxu2 %v10833_v26 }
 0x8fe   :  { %v3392_v19 = vadd.f32 %v10707_v1, %v3335_v20  ;;  %v4064_v1 = vld [vmem:[%s12591_s11 + $0x18] sm:$0xff]  ;;  %4167 = vmatpush.msrb.mxu1 %v4166_v28 }
 0x8ff   :  { %v10732_v34 = vpop.f32.mrf.mxu1  ;;  %v10835_v39 = vand.u32 4294901760, %v4064_v1 }
 0x901   :  { %v10709_v40 = vpop.f32.mrf.mxu2  ;;  %v10711_v9 = vpop.f32.mrf.mxu3  ;;  %v10845_v46 = vsub.f32 %v4064_v1, %v10835_v39  ;;  %4285 = vmatpush.msrb.mxu3 %v10835_v39  ;;  %4102 = vmatpush.msrb.mxu0 %v10835_v39 }
 0x902   :  { %v3290_v29 = vadd.f32 %v10709_v40, %v3207_v51  ;;  %v3156_v40 = vadd.f32 %v10697_v47, %v3087_v57  ;;  %v4063_v47 = vld [vmem:[%s12591_s11 + $0x10] sm:$0xff] }
 0x903   :  { %v10848_v20 = vand.u32 4294901760, %v4063_v47  ;;  %4237 = vmatpush.msrb.mxu2 %v10845_v46 }
 0x904   :  { %v10727_v58 = vpop.f32.mrf.mxu0  ;;  %v3339_v52 = vadd.f32 %v10705_v53, %v3290_v29  ;;  %v3513_v53 = vadd.f32 %v10713_v33, %v3392_v19  ;;  %v3213_v51 = vadd.f32 %v10699_v49, %v3156_v40  ;;  %v4176_v49 = vand.u32 4294901760, %v10845_v46 }
 0x905   :  { %4287 = vmatpush.msrb.mxu3 %v10848_v20  ;;  %4104 = vmatpush.msrb.mxu0 %v10848_v20 }
 0x906   :  { %v4177_v17 = vsub.f32 %v10845_v46, %v4176_v49 }
 0x907   :  { %v10740_v18 = vpop.f32.mrf.mxu1 }
 0x908   :  { %v4178_v46 = vand.u32 4294901760, %v4177_v17 }
 0x909   :  { %v10717_v27 = vpop.f32.mrf.mxu2  ;;  %v10719_v5 = vpop.f32.mrf.mxu3 }
 0x90c   :  { %v10738_v31 = vpop.f32.mrf.mxu0 }
 0x90f   :  { %v10752_v24 = vpop.f32.mrf.mxu1 }
 0x911   :  { %v10723_v63 = vpop.f32.mrf.mxu2  ;;  %v10725_v8 = vpop.f32.mrf.mxu3 }
 0x912   :  { %v3575_v56 = vadd.f32 %v10723_v63, %v3509_v4  ;;  %v3400_v4 = vadd.f32 %v10715_v13, %v3339_v52  ;;  %v10869_v13 = vand.u32 4294901760, %v4062_v43 }
 0x914   :  { %v10746_v12 = vpop.f32.mrf.mxu0  ;;  %v3629_v63 = vadd.f32 %v10719_v5, %v3575_v56  ;;  %v4170_v5 = vand.u32 4294901760, %v10833_v26  ;;  %v4061_v56 = vld [vmem:[%s12591_s11] sm:$0xff]  ;;  %v4187_v40 = vsub.f32 %v4062_v43, %v10869_v13  ;;  %4289 = vmatpush.msrb.mxu3 %v10869_v13  ;;  %4106 = vmatpush.msrb.mxu0 %v10869_v13 }
 0x915   :  { %v10886_v1 = vand.u32 4294901760, %v4061_v56 }
 0x916   :  { %v3716_v16 = vadd.f32 %v10738_v31, %v3629_v63  ;;  %v4171_v29 = vsub.f32 %v10833_v26, %v4170_v5  ;;  %v3294_v31 = vadd.f32 %v10717_v27, %v3213_v51  ;;  %v4188_v43 = vand.u32 4294901760, %v4187_v40 }
 0x917   :  { %v10808_v35 = vpop.f32.mrf.mxu1  ;;  %4291 = vmatpush.msrb.mxu3 %v10886_v1  ;;  %4108 = vmatpush.msrb.mxu0 %v10886_v1 }
 0x918   :  { %v4172_v19 = vand.u32 4294901760, %v4171_v29  ;;  %v3765_v63 = vadd.f32 %v10740_v18, %v3716_v16  ;;  %v3343_v29 = vadd.f32 %v10711_v9, %v3294_v31  ;;  %v4193_v18 = vsub.f32 %v4061_v56, %v10886_v1 }
 0x919   :  { %v10734_v14 = vpop.f32.mrf.mxu2  ;;  %v10736_v6 = vpop.f32.mrf.mxu3  ;;  %4328 = vmatpush.msra.mxu0 %v4152_v48 }
 0x91a   :  { %v3580_v33 = vadd.f32 %v10734_v14, %v3513_v53  ;;  %v10866_v14 = vsub.f32 %v4063_v47, %v10848_v20  ;;  %v3517_v53 = vadd.f32 %v10721_v55, %v3400_v4  ;;  %4173 = vmatpush.msrb.mxu1 %v4172_v19  ;;  %v4189_v4 = vsub.f32 %v4187_v40, %v4188_v43 }
 0x91b   :  { %v4194_v9 = vand.u32 4294901760, %v4193_v18  ;;  %4332 = vmatpush.msra.mxu0 %v4158_v11  ;;  %v3408_v31 = vadd.f32 %v10727_v58, %v3343_v29 }
 0x91c   :  { %v10780_v54 = vpop.f32.mrf.mxu0  ;;  %v4182_v52 = vand.u32 4294901760, %v10866_v14  ;;  %4240 = vmatpush.msrb.mxu2 %v10866_v14  ;;  %v3635_v27 = vadd.f32 %v10725_v8, %v3580_v33  ;;  %4179 = vmatpush.msrb.mxu1 %v4178_v46 }
 0x91d   :  { %v4195_v19 = vsub.f32 %v4193_v18, %v4194_v9  ;;  %4336 = vmatpush.msra.mxu0 %v4164_v32  ;;  %v3521_v36 = vadd.f32 %v10732_v34, %v3408_v31 }
 0x91e   :  { %v4183_v51 = vsub.f32 %v10866_v14, %v4182_v52  ;;  %4243 = vmatpush.msrb.mxu2 %v4187_v40  ;;  %v3720_v14 = vadd.f32 %v10746_v12, %v3635_v27 }
 0x91f   :  { %v10859_v57 = vpop.f32.mrf.mxu1  ;;  %v4196_v61 = vand.u32 4294901760, %v4195_v19  ;;  %4340 = vmatpush.msra.mxu0 %v4170_v5 }
 0x920   :  { %v4184_v55 = vand.u32 4294901760, %v4183_v51  ;;  %4246 = vmatpush.msrb.mxu2 %v4193_v18  ;;  %v3769_v12 = vadd.f32 %v10752_v24, %v3720_v14 }
 0x921   :  { %v10742_v44 = vpop.f32.mrf.mxu2  ;;  %v10744_v7 = vpop.f32.mrf.mxu3  ;;  %4344 = vmatpush.msra.mxu0 %v4176_v49 }
 0x922   :  { %v3585_v16 = vadd.f32 %v10742_v44, %v3517_v53  ;;  %4185 = vmatpush.msrb.mxu1 %v4184_v55 }
 0x923   :  { %4348 = vmatpush.msra.mxu0 %v4182_v52 }
 0x924   :  { %v10830_v37 = vpop.f32.mrf.mxu0  ;;  %v3641_v44 = vadd.f32 %v10736_v6, %v3585_v16 }
 0x925   :  { %4352 = vmatpush.msra.mxu0 %v4188_v43 }
 0x926   :  { %v3724_v6 = vadd.f32 %v10780_v54, %v3641_v44 }
 0x927   :  { %v3954_v17 = vpop.f32.mrf.mxu1  ;;  %4356 = vmatpush.msra.mxu0 %v4194_v9 }
 0x929   :  { %v10748_v22 = vpop.f32.mrf.mxu2  ;;  %v10750_v38 = vpop.f32.mrf.mxu3 }
 0x92a   :  { %v3590_v23 = vadd.f32 %v10748_v22, %v3521_v36 }
 0x92c   :  { %v3912_v33 = vpop.f32.mrf.mxu0 }
 0x92f   :  { %v3960_v5 = vpop.f32.mrf.mxu1 }
 0x931   :  { %v10782_v25 = vpop.f32.mrf.mxu2  ;;  %v10784_v50 = vpop.f32.mrf.mxu3 }
 0x932   :  { %v3806_v8 = vadd.f32 %v10782_v25, %v3765_v63  ;;  %v4190_v25 = vand.u32 4294901760, %v4189_v4 }
 0x934   :  { %v3871_v56 = vadd.f32 %v10750_v38, %v3806_v8  ;;  %4191 = vmatpush.msrb.mxu1 %v4190_v25  ;;  %v3917_v11 = vpop.f32.mrf.mxu0 }
 0x936   :  { %v3913_v38 = vadd.f32 %v3912_v33, %v3871_v56  ;;  %4197 = vmatpush.msrb.mxu1 %v4196_v61 }
 0x938   :  { %4383 = vmatpush.msra.mxu1 %v10763_v41  ;;  %v3955_v32 = vadd.f32 %v3954_v17, %v3913_v38  ;;  %v3773_v41 = vadd.f32 %v10808_v35, %v3724_v6 }
 0x939   :  { %v10818_v2 = vpop.f32.mrf.mxu2  ;;  %v10820_v42 = vpop.f32.mrf.mxu3 }
 0x93a   :  { %v3814_v58 = vadd.f32 %v10818_v2, %v3769_v12  ;;  %4385 = vmatpush.msra.mxu1 %v10765_v3  ;;  %v3647_v2 = vadd.f32 %v10744_v7, %v3590_v23 }
 0x93c   :  { %v3875_v24 = vadd.f32 %v10784_v50, %v3814_v58  ;;  %4387 = vmatpush.msra.mxu1 %v10767_v0  ;;  %v3728_v50 = vadd.f32 %v10830_v37, %v3647_v2  ;;  %v3922_v27 = vpop.f32.mrf.mxu0 }
 0x93e   :  { %4389 = vmatpush.msra.mxu1 %v10822_v45  ;;  %v3918_v54 = vadd.f32 %v3917_v11, %v3875_v24 }
 0x940   :  { %4391 = vmatpush.msra.mxu1 %v10835_v39  ;;  %v3961_v52 = vadd.f32 %v3960_v5, %v3918_v54 }
 0x941   :  { %v10877_v28 = vpop.f32.mrf.mxu2  ;;  %v10890_v47 = vpop.f32.mrf.mxu3 }
 0x942   :  { %v3822_v22 = vadd.f32 %v10877_v28, %v3773_v41  ;;  %4393 = vmatpush.msra.mxu1 %v10848_v20  ;;  %v3777_v28 = vadd.f32 %v10859_v57, %v3728_v50 }
 0x944   :  { %v3879_v7 = vadd.f32 %v10820_v42, %v3822_v22  ;;  %4395 = vmatpush.msra.mxu1 %v10869_v13  ;;  %v3966_v42 = vpop.f32.mrf.mxu1  ;;  %v3927_v14 = vpop.f32.mrf.mxu0 }
 0x946   :  { %v3923_v46 = vadd.f32 %v3922_v27, %v3879_v7  ;;  %4397 = vmatpush.msra.mxu1 %v10886_v1 }
 0x948   :  { %v3967_v8 = vadd.f32 %v3966_v42, %v3923_v46 }
 0x949   :  { %v3829_v40 = vpop.f32.mrf.mxu2  ;;  %v4042_v48 = vpop.f32.mrf.mxu3 }
 0x94a   :  { %v3830_v53 = vadd.f32 %v3829_v40, %v3777_v28 }
 0x94c   :  { %v3883_v13 = vadd.f32 %v10890_v47, %v3830_v53  ;;  %v3972_v19 = vpop.f32.mrf.mxu1 }
 0x94e   :  { %v3928_v25 = vadd.f32 %v3927_v14, %v3883_v13 }
 0x950   :  { %v3973_v40 = vadd.f32 %v3972_v19, %v3928_v25 }
 0x951   :  { %v4005_v34 = vpop.f32.mrf.mxu2  ;;  %v4046_v0 = vpop.f32.mrf.mxu3 }
 0x952   :  { %v4006_v26 = vadd.f32 %v4005_v34, %v3955_v32 }
 0x954   :  { %v4043_v3 = vadd.f32 %v4042_v48, %v4006_v26 }
 0x956   :  { %v4057_v49 = vmax.f32 %v4043_v3, 0.0 }
 0x958   :  { %v4074_v35 = vsel %vm12623_vm12, %v4057_v49, 0 }
 0x959   :  { %v10929_v45 = vand.u32 4294901760, %v4074_v35  ;;  %v4009_v63 = vpop.f32.mrf.mxu2  ;;  %v4050_v33 = vpop.f32.mrf.mxu3 }
 0x95a   :  { %v4010_v39 = vadd.f32 %v4009_v63, %v3961_v52 }
 0x95b   :  { %v4110_v37 = vsub.f32 %v4074_v35, %v10929_v45  ;;  %4199 = vmatmul.f32.vlgmr.msrb.gmra.mxu1 %v10929_v45 }
 0x95c   :  { %v4047_v20 = vadd.f32 %v4046_v0, %v4010_v39  ;;  %v9073_v0 = vld [vmem:[%s12592_s12] ss:$0 sm:$0xff] }
 0x95d   :  { %v4111_v51 = vand.u32 4294901760, %v4110_v37  ;;  %4249 = vmatmul.f32.vlgmr.msrb.gmra.mxu2 %v4110_v37 }
 0x95e   :  { %v4058_v43 = vmax.f32 %v4047_v20, 0.0 }
 0x95f   :  { %v4112_v29 = vsub.f32 %v4110_v37, %v4111_v51  ;;  %4295 = vmatmul.f32.vlgmr.msrb.gmra.mxu3 %v4111_v51 }
 0x960   :  { %v4077_v57 = vsel %vm12623_vm12, %v4058_v43, 0 }
 0x961   :  { %v4117_v18 = vand.u32 4294901760, %v4077_v57  ;;  %v4013_v55 = vpop.f32.mrf.mxu2  ;;  %v4113_v4 = vand.u32 4294901760, %v4112_v29  ;;  %v4054_v58 = vpop.f32.mrf.mxu3 }
 0x962   :  { %v4014_v16 = vadd.f32 %v4013_v55, %v3967_v8 }
 0x963   :  { %4114 = vmatmul.f32.vlgmr.msrb.gmra.mxu0 %v4113_v4  ;;  %4203 = vmatmul.f32.gmra.mxu1 %v4117_v18  ;;  %v4118_v1 = vsub.f32 %v4077_v57, %v4117_v18 }
 0x964   :  { %v4051_v9 = vadd.f32 %v4050_v33, %v4014_v16 }
 0x965   :  { %4254 = vmatmul.f32.gmra.mxu2 %v4118_v1  ;;  %v4119_v31 = vand.u32 4294901760, %v4118_v1 }
 0x966   :  { %v4059_v56 = vmax.f32 %v4051_v9, 0.0 }
 0x967   :  { %4301 = vmatmul.f32.gmra.mxu3 %v4119_v31  ;;  %v4120_v47 = vsub.f32 %v4118_v1, %v4119_v31 }
 0x968   :  { %v4080_v17 = vsel %vm12623_vm12, %v4059_v56, 0 }
 0x969   :  { %v4125_v44 = vand.u32 4294901760, %v4080_v17  ;;  %v4017_v12 = vpop.f32.mrf.mxu2  ;;  %v4121_v61 = vand.u32 4294901760, %v4120_v47 }
 0x96a   :  { %v4018_v36 = vadd.f32 %v4017_v12, %v3973_v40 }
 0x96b   :  { %4122 = vmatmul.f32.gmra.mxu0 %v4121_v61  ;;  %4207 = vmatmul.f32.gmra.mxu1 %v4125_v44  ;;  %v4126_v38 = vsub.f32 %v4080_v17, %v4125_v44 }
 0x96c   :  { %v4055_v48 = vadd.f32 %v4054_v58, %v4018_v36 }
 0x96d   :  { %4259 = vmatmul.f32.gmra.mxu2 %v4126_v38  ;;  %v4127_v23 = vand.u32 4294901760, %v4126_v38 }
 0x96e   :  { %v4060_v6 = vmax.f32 %v4055_v48, 0.0 }
 0x96f   :  { %4307 = vmatmul.f32.gmra.mxu3 %v4127_v23  ;;  %v4128_v11 = vsub.f32 %v4126_v38, %v4127_v23 }
 0x970   :  { %v4083_v24 = vsel %vm12623_vm12, %v4060_v6, 0 }
 0x971   :  { %v4133_v32 = vand.u32 4294901760, %v4083_v24  ;;  %v4129_v34 = vand.u32 4294901760, %v4128_v11 }
 0x973   :  { %4130 = vmatmul.f32.gmra.mxu0 %v4129_v34  ;;  %4211 = vmatmul.f32.gmra.mxu1 %v4133_v32  ;;  %v4134_v2 = vsub.f32 %v4083_v24, %v4133_v32 }
 0x975   :  { %4264 = vmatmul.f32.gmra.mxu2 %v4134_v2  ;;  %v4135_v41 = vand.u32 4294901760, %v4134_v2 }
 0x977   :  { %4313 = vmatmul.f32.gmra.mxu3 %v4135_v41  ;;  %v4136_v26 = vsub.f32 %v4134_v2, %v4135_v41 }
 0x979   :  { %v4137_v5 = vand.u32 4294901760, %v4136_v26 }
 0x97b   :  { %4138 = vmatmul.f32.gmra.mxu0 %v4137_v5  ;;  %4399 = vmatmul.f32.vlgmr.msra.gmra.mxu1 %v10929_v45 }
 0x983   :  { %4358 = vmatmul.f32.vlgmr.msra.gmra.mxu0 %v10929_v45  ;;  %4403 = vmatmul.f32.gmra.mxu1 %v4117_v18 }
 0x98b   :  { %4362 = vmatmul.f32.gmra.mxu0 %v4117_v18  ;;  %4407 = vmatmul.f32.gmra.mxu1 %v4125_v44 }
 0x993   :  { %4366 = vmatmul.f32.gmra.mxu0 %v4125_v44  ;;  %4411 = vmatmul.f32.gmra.mxu1 %v4133_v32 }
 0x99b   :  { %4370 = vmatmul.f32.gmra.mxu0 %v4133_v32 }
 0x9d8   :  { %v4200_v22 = vpop.f32.mrf.mxu1 }
 0x9e0   :  { %v4115_v3 = vpop.f32.mrf.mxu0  ;;  %v4204_v54 = vpop.f32.mrf.mxu1 }
 0x9e1   :  { %v4116_v52 = vadd.f32 %v9073_v0, %v4115_v3  ;;  %v4250_v27 = vpop.f32.mrf.mxu2 }
 0x9e2   :  { %v4296_v63 = vpop.f32.mrf.mxu3 }
 0x9e3   :  { %v4201_v45 = vadd.f32 %v4200_v22, %v4116_v52 }
 0x9e5   :  { %v4251_v39 = vadd.f32 %v4250_v27, %v4201_v45 }
 0x9e7   :  { %v4297_v46 = vadd.f32 %v4296_v63, %v4251_v39 }
 0x9e8   :  { %v4123_v50 = vpop.f32.mrf.mxu0  ;;  %v4208_v49 = vpop.f32.mrf.mxu1 }
 0x9e9   :  { %v4124_v37 = vadd.f32 %v9073_v0, %v4123_v50  ;;  %v4255_v20 = vpop.f32.mrf.mxu2 }
 0x9ea   :  { %v4302_v29 = vpop.f32.mrf.mxu3 }
 0x9eb   :  { %v4205_v42 = vadd.f32 %v4204_v54, %v4124_v37 }
 0x9ed   :  { %v4256_v13 = vadd.f32 %v4255_v20, %v4205_v42  ;;  %v8986_v42 = vld [vmem:[%s12583_s3 + $0x38] sm:$0xff] }
 0x9ef   :  { %v4303_v55 = vadd.f32 %v4302_v29, %v4256_v13  ;;  %v8985_v29 = vld [vmem:[%s12583_s3 + $0x30] sm:$0xff] }
 0x9f0   :  { %v4131_v7 = vpop.f32.mrf.mxu0  ;;  %v4212_v35 = vpop.f32.mrf.mxu1 }
 0x9f1   :  { %v4132_v57 = vadd.f32 %v9073_v0, %v4131_v7  ;;  %v4260_v14 = vpop.f32.mrf.mxu2 }
 0x9f2   :  { %v4308_v19 = vpop.f32.mrf.mxu3 }
 0x9f3   :  { %v4209_v4 = vadd.f32 %v4208_v49, %v4132_v57  ;;  %v10986_v57 = vand.u32 4294901760, %v8985_v29 }
 0x9f5   :  { %v4261_v25 = vadd.f32 %v4260_v14, %v4209_v4  ;;  %v8983_v4 = vld [vmem:[%s12583_s3 + $0x20] sm:$0xff] }
 0x9f7   :  { %v4309_v17 = vadd.f32 %v4308_v19, %v4261_v25  ;;  %v4567_v25 = vand.u32 4294901760, %v8983_v4 }
 0x9f8   :  { %v4139_v28 = vpop.f32.mrf.mxu0  ;;  %v4400_v53 = vpop.f32.mrf.mxu1 }
 0x9f9   :  { %v4140_v31 = vadd.f32 %v9073_v0, %v4139_v28  ;;  %v4265_v36 = vpop.f32.mrf.mxu2 }
 0x9fa   :  { %v4314_v23 = vpop.f32.mrf.mxu3 }
 0x9fb   :  { %v4213_v40 = vadd.f32 %v4212_v35, %v4140_v31 }
 0x9fd   :  { %v4266_v58 = vadd.f32 %v4265_v36, %v4213_v40 }
 0x9ff   :  { %v4315_v6 = vadd.f32 %v4314_v23, %v4266_v58 }
 0xa00   :  { %v4359_v51 = vpop.f32.mrf.mxu0  ;;  %v4404_v33 = vpop.f32.mrf.mxu1 }
 0xa01   :  { %v4360_v43 = vadd.f32 %v4359_v51, %v4297_v46  ;;  %v4561_v51 = vand.u32 4294901760, %v8986_v42 }
 0xa03   :  { %v4401_v8 = vadd.f32 %v4400_v53, %v4360_v43  ;;  %v4615_v13 = vsub.f32 %v8986_v42, %v4561_v51  ;;  %4562 = vmatpush.msra.mxu2 %v4561_v51  ;;  %4713 = vmatpush.msrb.mxu1 %v4561_v51 }
 0xa05   :  { %v4415_v18 = vadd.f32 %v4401_v8, %v9833_v62  ;;  %v8984_v8 = vld [vmem:[%s12583_s3 + $0x28] sm:$0xff]  ;;  %4669 = vmatpush.msrb.mxu0 %v4615_v13  ;;  %4715 = vmatpush.msrb.mxu1 %v10986_v57 }
 0xa06   :  { %4564 = vmatpush.msra.mxu2 %v10986_v57 }
 0xa07   :  { %v4421_v16 = vsel %vm69_vm0, %v4415_v18, 0.0 }
 0xa08   :  { %v4363_v1 = vpop.f32.mrf.mxu0  ;;  %4422 = vadd.xlane.f32.xlu0 %v4421_v16  ;;  %v4408_v62 = vpop.f32.mrf.mxu1 }
 0xa09   :  { %v4364_v9 = vadd.f32 %v4363_v1, %v4303_v55  ;;  %v4565_v55 = vand.u32 4294901760, %v8984_v8 }
 0xa0b   :  { %v4405_v56 = vadd.f32 %v4404_v33, %v4364_v9  ;;  %v4621_v33 = vsub.f32 %v8985_v29, %v10986_v57  ;;  %v4627_v9 = vsub.f32 %v8984_v8, %v4565_v55  ;;  %4717 = vmatpush.msrb.mxu1 %v4565_v55  ;;  %4566 = vmatpush.msra.mxu2 %v4565_v55 }
 0xa0d   :  { %v4416_v47 = vadd.f32 %v4405_v56, %v9840_v15  ;;  %v4622_v1 = vand.u32 4294901760, %v4621_v33  ;;  %4672 = vmatpush.msrb.mxu0 %v4621_v33  ;;  %4719 = vmatpush.msrb.mxu1 %v4567_v25 }
 0xa0e   :  { %4568 = vmatpush.msra.mxu2 %v4567_v25 }
 0xa0f   :  { %v4424_v44 = vsel %vm69_vm0, %v4416_v47, 0.0  ;;  %v4623_v19 = vsub.f32 %v4621_v33, %v4622_v1  ;;  %4675 = vmatpush.msrb.mxu0 %v4627_v9 }
 0xa10   :  { %v4367_v12 = vpop.f32.mrf.mxu0  ;;  %4425 = vadd.xlane.f32.xlu1 %v4424_v44  ;;  %v4412_v32 = vpop.f32.mrf.mxu1 }
 0xa11   :  { %v4368_v61 = vadd.f32 %v4367_v12, %v4309_v17  ;;  %v4633_v17 = vsub.f32 %v8983_v4, %v4567_v25  ;;  %v4624_v12 = vand.u32 4294901760, %v4623_v19 }
 0xa13   :  { %v4409_v38 = vadd.f32 %v4408_v62, %v4368_v61  ;;  %4678 = vmatpush.msrb.mxu0 %v4633_v17  ;;  %v4634_v36 = vand.u32 4294901760, %v4633_v17 }
 0xa15   :  { %v4417_v48 = vadd.f32 %v4409_v38, %v9871_v21 }
 0xa17   :  { %v4427_v11 = vsel %vm69_vm0, %v4417_v48, 0.0 }
 0xa18   :  { %v4371_v24 = vpop.f32.mrf.mxu0  ;;  %4428 = vadd.xlane.f32.xlu2 %v4427_v11 }
 0xa19   :  { %v4372_v15 = vadd.f32 %v4371_v24, %v4315_v6 }
 0xa1b   :  { %v4413_v34 = vadd.f32 %v4412_v32, %v4372_v15 }
 0xa1d   :  { %v4418_v2 = vadd.f32 %v4413_v34, %v9883_v10 }
 0xa1f   :  { %v4430_v41 = vsel %vm69_vm0, %v4418_v2, 0.0 }
 0xa20   :  { %4431 = vadd.xlane.f32.xlu0 %v4430_v41 }
 0xa7b   :  { %v4423_v26 = vpop.xlane.xlu0 %4422 }
 0xa7c   :  { %v4433_v5 = vmul.f32 %v4423_v26, %v9781_v59  ;;  %v11005_v26 = vld [vmem:[%s12593_s13] ss:$0 sm:$0xff] }
 0xa7e   :  { %v10954_v22 = vsub.f32 %v4415_v18, %v4433_v5  ;;  %v4616_v18 = vand.u32 4294901760, %v4615_v13 }
 0xa80   :  { %v4441_v21 = vmul.f32 %v10954_v22, %v10954_v22  ;;  %v4617_v14 = vsub.f32 %v4615_v13, %v4616_v18  ;;  %4760 = vmatpush.msrb.mxu2 %v4616_v18 }
 0xa82   :  { %v4445_v3 = vsel %vm69_vm0, %v4441_v21, 0.0  ;;  %v4618_v56 = vand.u32 4294901760, %v4617_v14  ;;  %4764 = vmatpush.msrb.mxu2 %v4622_v1 }
 0xa83   :  { %v4426_v54 = vpop.xlane.xlu1 %4425  ;;  %4446 = vadd.xlane.f32.xlu1 %v4445_v3  ;;  %v11011_v3 = vld [vmem:[%s12594_s14] ss:$0 sm:$0xff] }
 0xa84   :  { %v4434_v50 = vmul.f32 %v4426_v54, %v9781_v59  ;;  %4619 = vmatpush.msra.mxu3 %v4618_v56 }
 0xa86   :  { %v10960_v49 = vsub.f32 %v4416_v47, %v4434_v50  ;;  %v4628_v47 = vand.u32 4294901760, %v4627_v9  ;;  %4625 = vmatpush.msra.mxu3 %v4624_v12 }
 0xa88   :  { %v4442_v10 = vmul.f32 %v10960_v49, %v10960_v49  ;;  %v4629_v61 = vsub.f32 %v4627_v9, %v4628_v47  ;;  %4768 = vmatpush.msrb.mxu2 %v4628_v47 }
 0xa8a   :  { %v4448_v0 = vsel %vm69_vm0, %v4442_v10, 0.0  ;;  %v4630_v38 = vand.u32 4294901760, %v4629_v61  ;;  %4772 = vmatpush.msrb.mxu2 %v4634_v36 }
 0xa8b   :  { %v4429_v7 = vpop.xlane.xlu2 %4428  ;;  %4449 = vadd.xlane.f32.xlu2 %v4448_v0 }
 0xa8c   :  { %v4435_v35 = vmul.f32 %v4429_v7, %v9781_v59  ;;  %4631 = vmatpush.msra.mxu3 %v4630_v38 }
 0xa8e   :  { %v10966_v52 = vsub.f32 %v4417_v48, %v4435_v35  ;;  %v4635_v48 = vsub.f32 %v4633_v17, %v4634_v36 }
 0xa90   :  { %v4443_v27 = vmul.f32 %v10966_v52, %v10966_v52  ;;  %v4636_v24 = vand.u32 4294901760, %v4635_v48 }
 0xa92   :  { %v4451_v45 = vsel %vm69_vm0, %v4443_v27, 0.0  ;;  %4637 = vmatpush.msra.mxu3 %v4636_v24 }
 0xa93   :  { %4452 = vadd.xlane.f32.xlu0 %v4451_v45  ;;  %v4432_v63 = vpop.xlane.xlu0 %4431 }
 0xa94   :  { %v4436_v28 = vmul.f32 %v4432_v63, %v9781_v59  ;;  %4803 = vmatpush.msrb.mxu3 %v4561_v51 }
 0xa96   :  { %v10972_v39 = vsub.f32 %v4418_v2, %v4436_v28  ;;  %4805 = vmatpush.msrb.mxu3 %v10986_v57 }
 0xa98   :  { %v4444_v37 = vmul.f32 %v10972_v39, %v10972_v39  ;;  %4807 = vmatpush.msrb.mxu3 %v4565_v55 }
 0xa9a   :  { %v4454_v53 = vsel %vm69_vm0, %v4444_v37, 0.0  ;;  %4809 = vmatpush.msrb.mxu3 %v4567_v25 }
 0xa9b   :  { %4455 = vadd.xlane.f32.xlu1 %v4454_v53 }
 0xaf6   :  { %v4447_v20 = vpop.xlane.xlu1 %4446 }
 0xaf7   :  { %v4457_v46 = vmul.f32 %v4447_v20, %v9781_v59 }
 0xaf9   :  { %v10981_v43 = vadd.f32 1e-05, %v4457_v46 }
 0xafb   :  { %9126 = vrsqrt.f32 %v10981_v43  ;;  %vm4471_vm2 = vweird.f32 %v10981_v43 }
 0xafe   :  { %v4450_v16 = vpop.xlane.xlu2 %4449 }
 0xaff   :  { %v4458_v31 = vmul.f32 %v4450_v16, %v9781_v59 }
 0xb01   :  { %v9127_v40 = vpop.eup %9126  ;;  %v4462_v44 = vadd.f32 1e-05, %v4458_v31 }
 0xb02   :  { %v4466_v62 = vmul.f32 %v9127_v40, %v10981_v43  ;;  %vm4472_vm15 = vweird.f32 %v9127_v40 }
 0xb03   :  { %9128 = vrsqrt.f32 %v4462_v44  ;;  %vm4473_vm5 = vmor %vm4471_vm2, %vm4472_vm15  ;;  %vm4481_vm7 = vweird.f32 %v4462_v44 }
 0xb04   :  { %v4467_v58 = vmul.f32 %v9127_v40, %v4466_v62 }
 0xb06   :  { %v4468_v23 = vmul.f32 0.5, %v4467_v58  ;;  %v4453_v6 = vpop.xlane.xlu0 %4452 }
 0xb07   :  { %v4459_v11 = vmul.f32 %v4453_v6, %v9781_v59 }
 0xb08   :  { %v4469_v15 = vsub.f32 1.5, %v4468_v23 }
 0xb09   :  { %v9129_v32 = vpop.eup %9128  ;;  %v4463_v34 = vadd.f32 1e-05, %v4459_v11 }
 0xb0a   :  { %v4470_v2 = vmul.f32 %v9127_v40, %v4469_v15  ;;  %v4476_v41 = vmul.f32 %v9129_v32, %v4462_v44  ;;  %vm4482_vm6 = vweird.f32 %v9129_v32 }
 0xb0b   :  { %9130 = vrsqrt.f32 %v4463_v34  ;;  %vm4483_vm15 = vmor %vm4481_vm7, %vm4482_vm6 }
 0xb0c   :  { %v4474_v5 = vsel %vm4473_vm5, %v9127_v40, %v4470_v2  ;;  %v4477_v21 = vmul.f32 %v9129_v32, %v4476_v41  ;;  %vm4491_vm5 = vweird.f32 %v4463_v34 }
 0xb0d   :  { %v4505_v54 = vmul.f32 %v4474_v5, %v10954_v22 }
 0xb0e   :  { %v4478_v50 = vmul.f32 0.5, %v4477_v21  ;;  %v4456_v10 = vpop.xlane.xlu1 %4455 }
 0xb0f   :  { %v4512_v0 = vmul.f32 %v11005_v26, %v4505_v54  ;;  %v4460_v7 = vmul.f32 %v4456_v10, %v9781_v59 }
 0xb10   :  { %v4479_v35 = vsub.f32 1.5, %v4478_v50 }
 0xb11   :  { %v9131_v27 = vpop.eup %9130  ;;  %v4519_v45 = vadd.f32 %v11011_v3, %v4512_v0  ;;  %v4464_v63 = vadd.f32 1e-05, %v4460_v7 }
 0xb12   :  { %v4480_v28 = vmul.f32 %v9129_v32, %v4479_v35  ;;  %v4486_v37 = vmul.f32 %v9131_v27, %v4463_v34  ;;  %vm4492_vm2 = vweird.f32 %v9131_v27  ;;  %v12684_v34 = vld [vmem:[#allocation9_spill] sm:$0xff] }
 0xb13   :  { %9132 = vrsqrt.f32 %v4464_v63  ;;  %v11018_v22 = vmul.f32 %v4519_v45, %v9829_v60  ;;  %vm4493_vm6 = vmor %vm4491_vm5, %vm4492_vm2  ;;  %v9076_v45 = vld [vmem:[%s12584_s4 + $0x1] ss:$0 sm:$0xff] }
 0xb14   :  { %v4484_v53 = vsel %vm4483_vm15, %v9129_v32, %v4480_v28  ;;  %v4487_v20 = vmul.f32 %v9131_v27, %v4486_v37  ;;  %vm4501_vm15 = vweird.f32 %v4464_v63 }
 0xb15   :  { %v4506_v46 = vmul.f32 %v4484_v53, %v10960_v49  ;;  %v4538_v42 = vsel %vm69_vm0, %v11018_v22, 0 }
 0xb16   :  { %v4488_v51 = vmul.f32 0.5, %v4487_v20  ;;  %v11023_v43 = vand.u32 4294901760, %v4538_v42 }
 0xb17   :  { %v4513_v29 = vmul.f32 %v11005_v26, %v4506_v46 }
 0xb18   :  { %v4489_v13 = vsub.f32 1.5, %v4488_v51  ;;  %4639 = vmatmul.f32.vlgmr.msra.gmra.mxu3 %v11023_v43  ;;  %v4570_v57 = vsub.f32 %v4538_v42, %v11023_v43 }
 0xb19   :  { %v9133_v8 = vpop.eup %9132  ;;  %v4520_v18 = vadd.f32 %v11011_v3, %v4513_v29 }
 0xb1a   :  { %v4490_v33 = vmul.f32 %v9131_v27, %v4489_v13  ;;  %v4496_v49 = vmul.f32 %v9133_v8, %v4464_v63  ;;  %4681 = vmatmul.f32.vlgmr.msrb.gmra.mxu0 %v4570_v57  ;;  %v4571_v55 = vand.u32 4294901760, %v4570_v57  ;;  %vm4502_vm7 = vweird.f32 %v9133_v8 }
 0xb1b   :  { %v11030_v4 = vmul.f32 %v4520_v18, %v9813_v30  ;;  %vm4503_vm2 = vmor %vm4501_vm15, %vm4502_vm7 }
 0xb1c   :  { %v4494_v16 = vsel %vm4493_vm6, %v9131_v27, %v4490_v33  ;;  %v4497_v14 = vmul.f32 %v9133_v8, %v4496_v49  ;;  %4723 = vmatmul.f32.vlgmr.msrb.gmra.mxu1 %v4571_v55  ;;  %v4572_v1 = vsub.f32 %v4570_v57, %v4571_v55 }
 0xb1d   :  { %v4507_v9 = vmul.f32 %v4494_v16, %v10966_v52  ;;  %v4541_v25 = vsel %vm69_vm0, %v11030_v4, 0  ;;  %v12683_v52 = vld [vmem:[#allocation8_spill] sm:$0xff] }
 0xb1e   :  { %v4498_v31 = vmul.f32 0.5, %v4497_v14  ;;  %v4573_v56 = vand.u32 4294901760, %v4572_v1  ;;  %v4577_v19 = vand.u32 4294901760, %v4541_v25 }
 0xb1f   :  { %v4514_v47 = vmul.f32 %v11005_v26, %v4507_v9 }
 0xb20   :  { %v4499_v17 = vsub.f32 1.5, %v4498_v31  ;;  %4574 = vmatmul.f32.vlgmr.msra.gmra.mxu2 %v4573_v56  ;;  %4643 = vmatmul.f32.gmra.mxu3 %v4577_v19  ;;  %v4578_v40 = vsub.f32 %v4541_v25, %v4577_v19 }
 0xb21   :  { %v4521_v44 = vadd.f32 %v11011_v3, %v4514_v47 }
 0xb22   :  { %v4500_v62 = vmul.f32 %v9133_v8, %v4499_v17  ;;  %4686 = vmatmul.f32.gmra.mxu0 %v4578_v40  ;;  %v4579_v12 = vand.u32 4294901760, %v4578_v40 }
 0xb23   :  { %v11038_v61 = vmul.f32 %v4521_v44, %v12683_v52 }
 0xb24   :  { %v4504_v36 = vsel %vm4503_vm2, %v9133_v8, %v4500_v62  ;;  %4729 = vmatmul.f32.gmra.mxu1 %v4579_v12  ;;  %v4580_v58 = vsub.f32 %v4578_v40, %v4579_v12 }
 0xb25   :  { %v4508_v38 = vmul.f32 %v4504_v36, %v10972_v39  ;;  %v4544_v48 = vsel %vm69_vm0, %v11038_v61, 0 }
 0xb26   :  { %v4581_v23 = vand.u32 4294901760, %v4580_v58  ;;  %v4585_v6 = vand.u32 4294901760, %v4544_v48 }
 0xb27   :  { %v4515_v11 = vmul.f32 %v11005_v26, %v4508_v38 }
 0xb28   :  { %4582 = vmatmul.f32.gmra.mxu2 %v4581_v23  ;;  %4647 = vmatmul.f32.gmra.mxu3 %v4585_v6  ;;  %v4586_v24 = vsub.f32 %v4544_v48, %v4585_v6 }
 0xb29   :  { %v4522_v15 = vadd.f32 %v11011_v3, %v4515_v11 }
 0xb2a   :  { %4691 = vmatmul.f32.gmra.mxu0 %v4586_v24  ;;  %v4587_v32 = vand.u32 4294901760, %v4586_v24 }
 0xb2b   :  { %v11046_v2 = vmul.f32 %v4522_v15, %v12684_v34 }
 0xb2c   :  { %4735 = vmatmul.f32.gmra.mxu1 %v4587_v32  ;;  %v4588_v41 = vsub.f32 %v4586_v24, %v4587_v32 }
 0xb2d   :  { %v4547_v39 = vsel %vm69_vm0, %v11046_v2, 0 }
 0xb2e   :  { %v4589_v5 = vand.u32 4294901760, %v4588_v41  ;;  %v4593_v21 = vand.u32 4294901760, %v4547_v39 }
 0xb30   :  { %4590 = vmatmul.f32.gmra.mxu2 %v4589_v5  ;;  %4651 = vmatmul.f32.gmra.mxu3 %v4593_v21  ;;  %v4594_v26 = vsub.f32 %v4547_v39, %v4593_v21 }
 0xb32   :  { %4696 = vmatmul.f32.gmra.mxu0 %v4594_v26  ;;  %v4595_v54 = vand.u32 4294901760, %v4594_v26 }
 0xb34   :  { %4741 = vmatmul.f32.gmra.mxu1 %v4595_v54  ;;  %v4596_v50 = vsub.f32 %v4594_v26, %v4595_v54 }
 0xb36   :  { %v4597_v3 = vand.u32 4294901760, %v4596_v50 }
 0xb38   :  { %4598 = vmatmul.f32.gmra.mxu2 %v4597_v3  ;;  %4811 = vmatmul.f32.vlgmr.msrb.gmra.mxu3 %v11023_v43 }
 0xb40   :  { %4774 = vmatmul.f32.vlgmr.msrb.gmra.mxu2 %v11023_v43  ;;  %4815 = vmatmul.f32.gmra.mxu3 %v4577_v19 }
 0xb48   :  { %4778 = vmatmul.f32.gmra.mxu2 %v4577_v19  ;;  %4819 = vmatmul.f32.gmra.mxu3 %v4585_v6 }
 0xb50   :  { %4782 = vmatmul.f32.gmra.mxu2 %v4585_v6  ;;  %4823 = vmatmul.f32.gmra.mxu3 %v4593_v21 }
 0xb58   :  { %4786 = vmatmul.f32.gmra.mxu2 %v4593_v21 }
 0xb97   :  { %v4682_v53 = vpop.f32.mrf.mxu0 }
 0xb99   :  { %v4724_v46 = vpop.f32.mrf.mxu1 }
 0xb9b   :  { %v4640_v10 = vpop.f32.mrf.mxu3 }
 0xb9f   :  { %v4687_v13 = vpop.f32.mrf.mxu0 }
 0xba1   :  { %v4730_v49 = vpop.f32.mrf.mxu1 }
 0xba3   :  { %v4575_v0 = vpop.f32.mrf.mxu2  ;;  %v4644_v7 = vpop.f32.mrf.mxu3 }
 0xba4   :  { %v4576_v37 = vadd.f32 %v9076_v45, %v4575_v0 }
 0xba6   :  { %v4641_v20 = vadd.f32 %v4640_v10, %v4576_v37 }
 0xba7   :  { %v4692_v31 = vpop.f32.mrf.mxu0 }
 0xba8   :  { %v4683_v43 = vadd.f32 %v4682_v53, %v4641_v20 }
 0xba9   :  { %v4736_v44 = vpop.f32.mrf.mxu1 }
 0xbaa   :  { %v4725_v8 = vadd.f32 %v4724_v46, %v4683_v43 }
 0xbab   :  { %v4583_v35 = vpop.f32.mrf.mxu2  ;;  %v4648_v27 = vpop.f32.mrf.mxu3 }
 0xbac   :  { %v4584_v51 = vadd.f32 %v9076_v45, %v4583_v35 }
 0xbae   :  { %v4645_v57 = vadd.f32 %v4644_v7, %v4584_v51 }
 0xbaf   :  { %v4697_v48 = vpop.f32.mrf.mxu0 }
 0xbb0   :  { %v4688_v14 = vadd.f32 %v4687_v13, %v4645_v57 }
 0xbb1   :  { %v4742_v11 = vpop.f32.mrf.mxu1 }
 0xbb2   :  { %v4731_v25 = vadd.f32 %v4730_v49, %v4688_v14 }
 0xbb3   :  { %v4591_v63 = vpop.f32.mrf.mxu2  ;;  %v4652_v28 = vpop.f32.mrf.mxu3 }
 0xbb4   :  { %v4592_v55 = vadd.f32 %v9076_v45, %v4591_v63 }
 0xbb6   :  { %v4649_v9 = vadd.f32 %v4648_v27, %v4592_v55 }
 0xbb8   :  { %v4693_v40 = vadd.f32 %v4692_v31, %v4649_v9 }
 0xbba   :  { %v4737_v12 = vadd.f32 %v4736_v44, %v4693_v40 }
 0xbbb   :  { %v4599_v42 = vpop.f32.mrf.mxu2  ;;  %v4812_v29 = vpop.f32.mrf.mxu3 }
 0xbbc   :  { %v4600_v47 = vadd.f32 %v9076_v45, %v4599_v42 }
 0xbbe   :  { %v4653_v62 = vadd.f32 %v4652_v28, %v4600_v47 }
 0xbc0   :  { %v4698_v6 = vadd.f32 %v4697_v48, %v4653_v62 }
 0xbc2   :  { %v4743_v24 = vadd.f32 %v4742_v11, %v4698_v6 }
 0xbc3   :  { %v4775_v18 = vpop.f32.mrf.mxu2  ;;  %v4816_v1 = vpop.f32.mrf.mxu3 }
 0xbc4   :  { %v4776_v33 = vadd.f32 %v4775_v18, %v4725_v8 }
 0xbc6   :  { %v11055_v16 = vadd.f32 %v4812_v29, %v4776_v33 }
 0xbc8   :  { %4829 = vrot.lane.b32.xlu0 %v11055_v16, %s9214_s21  ;;  %v4833_v54 = vsel %vm366_vm1, %v11055_v16, 0 }
 0xbc9   :  { %v4859_v3 = vand.u32 4294901760, %v4833_v54 }
 0xbcb   :  { %v4779_v56 = vpop.f32.mrf.mxu2  ;;  %v4820_v36 = vpop.f32.mrf.mxu3  ;;  %v4860_v7 = vsub.f32 %v4833_v54, %v4859_v3 }
 0xbcc   :  { %v4780_v19 = vadd.f32 %v4779_v56, %v4731_v25 }
 0xbcd   :  { %v4861_v45 = vand.u32 4294901760, %v4860_v7 }
 0xbce   :  { %v11059_v17 = vadd.f32 %v4816_v1, %v4780_v19 }
 0xbcf   :  { %v4862_v53 = vsub.f32 %v4860_v7, %v4861_v45 }
 0xbd0   :  { %4831 = vrot.lane.b32.xlu2 %v11059_v17, %s9214_s21  ;;  %v4835_v27 = vsel %vm366_vm1, %v11059_v17, 0 }
 0xbd1   :  { %v11076_v63 = vand.u32 4294901760, %v4835_v27  ;;  %v4863_v51 = vand.u32 4294901760, %v4862_v53 }
 0xbd3   :  { %v4783_v58 = vpop.f32.mrf.mxu2  ;;  %v4824_v41 = vpop.f32.mrf.mxu3  ;;  %v4868_v20 = vsub.f32 %v4835_v27, %v11076_v63 }
 0xbd4   :  { %v4784_v38 = vadd.f32 %v4783_v58, %v4737_v12 }
 0xbd5   :  { %v4869_v43 = vand.u32 4294901760, %v4868_v20 }
 0xbd6   :  { %v11063_v23 = vadd.f32 %v4820_v36, %v4784_v38 }
 0xbd7   :  { %v4870_v57 = vsub.f32 %v4868_v20, %v4869_v43 }
 0xbd8   :  { %5033 = vrot.lane.b32.xlu2 %v11063_v23, %s9214_s21  ;;  %v5037_v33 = vsel %vm366_vm1, %v11063_v23, 0 }
 0xbd9   :  { %v4871_v18 = vand.u32 4294901760, %v4870_v57  ;;  %v5063_v55 = vand.u32 4294901760, %v5037_v33 }
 0xbdb   :  { %v4787_v15 = vpop.f32.mrf.mxu2  ;;  %v5064_v1 = vsub.f32 %v5037_v33, %v5063_v55 }
 0xbdc   :  { %v4788_v32 = vadd.f32 %v4787_v15, %v4743_v24 }
 0xbdd   :  { %v5065_v19 = vand.u32 4294901760, %v5064_v1 }
 0xbde   :  { %v11067_v39 = vadd.f32 %v4824_v41, %v4788_v32 }
 0xbdf   :  { %v5066_v12 = vsub.f32 %v5064_v1, %v5065_v19 }
 0xbe0   :  { %5035 = vrot.lane.b32.xlu1 %v11067_v39, %s9214_s21  ;;  %v5039_v25 = vsel %vm366_vm1, %v11067_v39, 0 }
 0xbe1   :  { %v5071_v47 = vand.u32 4294901760, %v5039_v25  ;;  %v5067_v6 = vand.u32 4294901760, %v5066_v12 }
 0xbe3   :  { %v5072_v36 = vsub.f32 %v5039_v25, %v5071_v47 }
 0xbe5   :  { %v5073_v11 = vand.u32 4294901760, %v5072_v36 }
 0xbe7   :  { %v5074_v32 = vsub.f32 %v5072_v36, %v5073_v11 }
 0xc2a   :  { %v4832_v5 = vpop.permute.xlu2 %4831 }
 0xc2b   :  { %v4839_v21 = vsel %vm366_vm1, %v4832_v5, 0  ;;  %v5075_v5 = vand.u32 4294901760, %v5074_v32 }
 0xc2c   :  { %v4855_v26 = vand.u32 4294901760, %v4839_v21 }
 0xc2e   :  { %v4891_v50 = vsub.f32 %v4839_v21, %v4855_v26  ;;  %4856 = vmatpush.xpose.msra.mxu0 %v4855_v26  ;;  %4957 = vmatpush.xpose.msra.mxu3 %v4855_v26 }
 0xc30   :  { %v4892_v10 = vand.u32 4294901760, %v4891_v50  ;;  %4927 = vmatpush.xpose.msra.mxu2 %v4891_v50 }
 0xc32   :  { %v4893_v0 = vsub.f32 %v4891_v50, %v4892_v10  ;;  %v5034_v49 = vpop.permute.xlu2 %5033 }
 0xc33   :  { %v5041_v14 = vsel %vm366_vm1, %v5034_v49, 0 }
 0xc34   :  { %v4894_v35 = vand.u32 4294901760, %v4893_v0  ;;  %v5061_v9 = vand.u32 4294901760, %v5041_v14 }
 0xc36   :  { %4895 = vmatpush.xpose.msra.mxu1 %v4894_v35  ;;  %v5101_v40 = vsub.f32 %v5041_v14, %v5061_v9 }
 0xc38   :  { %v5102_v38 = vand.u32 4294901760, %v5101_v40 }
 0xc3a   :  { %v4830_v28 = vpop.permute.xlu0 %4829  ;;  %v5103_v15 = vsub.f32 %v5101_v40, %v5102_v38 }
 0xc3b   :  { %v4837_v37 = vsel %vm366_vm1, %v4830_v28, 0 }
 0xc3c   :  { %v4857_v46 = vand.u32 4294901760, %v4837_v37  ;;  %v5104_v41 = vand.u32 4294901760, %v5103_v15 }
 0xc3e   :  { %v4897_v42 = vsub.f32 %v4837_v37, %v4857_v46  ;;  %4858 = vmatpush.xpose.msra.mxu0 %v4857_v46  ;;  %4959 = vmatpush.xpose.msra.mxu3 %v4857_v46 }
 0xc40   :  { %4930 = vmatpush.xpose.msra.mxu2 %v4897_v42  ;;  %v4898_v29 = vand.u32 4294901760, %v4897_v42 }
 0xc41   :  { %4864 = vmatmul.f32.vlgmr.msra.gmra.mxu0 %v4863_v51  ;;  %4963 = vmatmul.f32.vlgmr.msra.gmra.mxu3 %v4861_v45 }
 0xc42   :  { %4990 = vmatpush.xpose.msrb.mxu0 %v4892_v10  ;;  %v4899_v13 = vsub.f32 %v4897_v42, %v4898_v29 }
 0xc43   :  { %4933 = vmatmul.f32.vlgmr.msra.gmra.mxu2 %v4860_v7 }
 0xc44   :  { %v4900_v8 = vand.u32 4294901760, %v4899_v13 }
 0xc46   :  { %4994 = vmatpush.xpose.msrb.mxu0 %v4898_v29  ;;  %4901 = vmatpush.xpose.msra.mxu1 %v4900_v8  ;;  %v11092_v29 = vld [vmem:[%s12581_s1] ss:$0 sm:$0xff] }
 0xc49   :  { %4872 = vmatmul.f32.gmra.mxu0 %v4871_v18  ;;  %4903 = vmatmul.f32.vlgmr.msra.gmra.mxu1 %v4859_v3 }
 0xc4a   :  { %5019 = vmatpush.xpose.msrb.mxu1 %v4855_v26  ;;  %4969 = vmatmul.f32.gmra.mxu3 %v4869_v43 }
 0xc4b   :  { %4938 = vmatmul.f32.gmra.mxu2 %v4868_v20 }
 0xc4e   :  { %5021 = vmatpush.xpose.msrb.mxu1 %v4857_v46 }
 0xc51   :  { %4907 = vmatmul.f32.gmra.mxu1 %v11076_v63  ;;  %4996 = vmatmul.f32.vlgmr.msrb.gmra.mxu0 %v4859_v3 }
 0xc52   :  { %v5036_v31 = vpop.permute.xlu1 %5035 }
 0xc53   :  { %v5043_v56 = vsel %vm366_vm1, %v5036_v31, 0 }
 0xc54   :  { %v5059_v44 = vand.u32 4294901760, %v5043_v56 }
 0xc56   :  { %v5095_v62 = vsub.f32 %v5043_v56, %v5059_v44  ;;  %5060 = vmatpush.xpose.msrb.mxu2 %v5059_v44  ;;  %5161 = vmatpush.xpose.msra.mxu1 %v5059_v44 }
 0xc58   :  { %v5096_v58 = vand.u32 4294901760, %v5095_v62  ;;  %5131 = vmatpush.xpose.msra.mxu0 %v5095_v62 }
 0xc59   :  { %5000 = vmatmul.f32.gmra.mxu0 %v11076_v63  ;;  %5023 = vmatmul.f32.vlgmr.msrb.gmra.mxu1 %v4859_v3 }
 0xc5a   :  { %v5097_v48 = vsub.f32 %v5095_v62, %v5096_v58  ;;  %5062 = vmatpush.xpose.msrb.mxu2 %v5061_v9  ;;  %5163 = vmatpush.xpose.msra.mxu1 %v5061_v9 }
 0xc5c   :  { %v5098_v24 = vand.u32 4294901760, %v5097_v48  ;;  %5134 = vmatpush.xpose.msra.mxu0 %v5101_v40 }
 0xc5d   :  { %5068 = vmatmul.f32.vlgmr.msrb.gmra.mxu2 %v5067_v6 }
 0xc5e   :  { %5194 = vmatpush.xpose.msra.mxu2 %v5096_v58  ;;  %5099 = vmatpush.xpose.msrb.mxu3 %v5098_v24 }
 0xc61   :  { %5027 = vmatmul.f32.gmra.mxu1 %v11076_v63  ;;  %5137 = vmatmul.f32.vlgmr.msra.gmra.mxu0 %v5064_v1 }
 0xc62   :  { %5198 = vmatpush.xpose.msra.mxu2 %v5102_v38  ;;  %5105 = vmatpush.xpose.msrb.mxu3 %v5104_v41  ;;  %v11101_v41 = vld [vmem:[%s12581_s1 + $0x1] ss:$0 sm:$0xff] }
 0xc65   :  { %5076 = vmatmul.f32.gmra.mxu2 %v5075_v5  ;;  %5107 = vmatmul.f32.vlgmr.msrb.gmra.mxu3 %v5063_v55 }
 0xc66   :  { %5223 = vmatpush.xpose.msra.mxu3 %v5059_v44 }
 0xc69   :  { %5142 = vmatmul.f32.gmra.mxu0 %v5072_v36  ;;  %5167 = vmatmul.f32.vlgmr.msra.gmra.mxu1 %v5065_v19 }
 0xc6a   :  { %5225 = vmatpush.xpose.msra.mxu3 %v5061_v9 }
 0xc6d   :  { %5111 = vmatmul.f32.gmra.mxu3 %v5071_v47  ;;  %5200 = vmatmul.f32.vlgmr.msra.gmra.mxu2 %v5063_v55 }
 0xc71   :  { %5173 = vmatmul.f32.gmra.mxu1 %v5073_v11 }
 0xc75   :  { %5204 = vmatmul.f32.gmra.mxu2 %v5071_v47  ;;  %5227 = vmatmul.f32.vlgmr.msra.gmra.mxu3 %v5063_v55 }
 0xc7d   :  { %5231 = vmatmul.f32.gmra.mxu3 %v5071_v47 }
 0xcbe   :  { %v4865_v21 = vpop.f32.mrf.mxu0 }
 0xcc4   :  { %v4964_v7 = vpop.f32.mrf.mxu3 }
 0xcc6   :  { %v4873_v26 = vpop.f32.mrf.mxu0  ;;  %v4904_v54 = vpop.f32.mrf.mxu1 }
 0xcc7   :  { %v4905_v50 = vadd.f32 %v4904_v54, %v4865_v21  ;;  %v4934_v3 = vpop.f32.mrf.mxu2 }
 0xcc9   :  { %v4935_v0 = vadd.f32 %v4934_v3, %v4905_v50 }
 0xccb   :  { %v4965_v45 = vadd.f32 %v4964_v7, %v4935_v0 }
 0xccd   :  { %v4970_v42 = vpop.f32.mrf.mxu3 }
 0xcce   :  { %v4908_v10 = vpop.f32.mrf.mxu1  ;;  %v4997_v35 = vpop.f32.mrf.mxu0 }
 0xccf   :  { %v4909_v27 = vadd.f32 %v4908_v10, %v4873_v26  ;;  %v4998_v63 = vadd.f32 %v4997_v35, %v4965_v45  ;;  %v4939_v28 = vpop.f32.mrf.mxu2 }
 0xcd1   :  { %v4940_v53 = vadd.f32 %v4939_v28, %v4909_v27 }
 0xcd3   :  { %v4971_v43 = vadd.f32 %v4970_v42, %v4940_v53 }
 0xcd6   :  { %v5024_v37 = vpop.f32.mrf.mxu1  ;;  %v5001_v51 = vpop.f32.mrf.mxu0 }
 0xcd7   :  { %v5025_v20 = vadd.f32 %v5024_v37, %v4998_v63  ;;  %v5002_v57 = vadd.f32 %v5001_v51, %v4971_v43 }
 0xcd9   :  { %v5235_v46 = vmul.f32 0.25, %v5025_v20 }
 0xcdb   :  { %v5239_v13 = vadd.f32 %v11092_v29, %v5235_v46 }
 0xcdd   :  { %v5243_v8 = vsel %vm366_vm1, %v5239_v13, -inf }
 0xcde   :  { %v5028_v18 = vpop.f32.mrf.mxu1  ;;  %5244 = vmax.xlane.f32.xlu0 %v5243_v8  ;;  %v5138_v56 = vpop.f32.mrf.mxu0 }
 0xcdf   :  { %v5029_v33 = vadd.f32 %v5028_v18, %v5002_v57 }
 0xce0   :  { %v5069_v49 = vpop.f32.mrf.mxu2 }
 0xce1   :  { %v5236_v55 = vmul.f32 0.25, %v5029_v33 }
 0xce3   :  { %v5240_v14 = vadd.f32 %v11092_v29, %v5236_v55 }
 0xce5   :  { %v5246_v1 = vsel %vm366_vm1, %v5240_v14, -inf }
 0xce6   :  { %5247 = vmax.xlane.f32.xlu2 %v5246_v1  ;;  %v5168_v40 = vpop.f32.mrf.mxu1  ;;  %v5143_v58 = vpop.f32.mrf.mxu0 }
 0xce8   :  { %v5077_v9 = vpop.f32.mrf.mxu2  ;;  %v5108_v25 = vpop.f32.mrf.mxu3 }
 0xce9   :  { %v5109_v31 = vadd.f32 %v5108_v25, %v5069_v49 }
 0xceb   :  { %v5139_v47 = vadd.f32 %v5138_v56, %v5109_v31 }
 0xced   :  { %v5169_v12 = vadd.f32 %v5168_v40, %v5139_v47 }
 0xcee   :  { %v5174_v24 = vpop.f32.mrf.mxu1 }
 0xcf0   :  { %v5112_v19 = vpop.f32.mrf.mxu3  ;;  %v5201_v44 = vpop.f32.mrf.mxu2 }
 0xcf1   :  { %v5113_v62 = vadd.f32 %v5112_v19, %v5077_v9  ;;  %v5202_v36 = vadd.f32 %v5201_v44, %v5169_v12 }
 0xcf3   :  { %v5144_v48 = vadd.f32 %v5143_v58, %v5113_v62 }
 0xcf5   :  { %v5175_v32 = vadd.f32 %v5174_v24, %v5144_v48 }
 0xcf8   :  { %v5228_v38 = vpop.f32.mrf.mxu3  ;;  %v5205_v15 = vpop.f32.mrf.mxu2 }
 0xcf9   :  { %v5229_v6 = vadd.f32 %v5228_v38, %v5202_v36  ;;  %v5206_v21 = vadd.f32 %v5205_v15, %v5175_v32 }
 0xcfb   :  { %v5237_v11 = vmul.f32 0.25, %v5229_v6 }
 0xcfd   :  { %v5241_v5 = vadd.f32 %v11101_v41, %v5237_v11 }
 0xcfe   :  { %5341 = vrot.lane.b32.xlu2 %v11059_v17, %s9215_s26 }
 0xcff   :  { %v5249_v26 = vsel %vm366_vm1, %v5241_v5, -inf }
 0xd00   :  { %v5232_v54 = vpop.f32.mrf.mxu3  ;;  %5250 = vmax.xlane.f32.xlu1 %v5249_v26 }
 0xd01   :  { %v5233_v50 = vadd.f32 %v5232_v54, %v5206_v21 }
 0xd03   :  { %v5238_v3 = vmul.f32 0.25, %v5233_v50 }
 0xd05   :  { %v5242_v10 = vadd.f32 %v11101_v41, %v5238_v3 }
 0xd07   :  { %v5252_v0 = vsel %vm366_vm1, %v5242_v10, -inf }
 0xd08   :  { %5253 = vmax.xlane.f32.xlu0 %v5252_v0 }
 0xd51   :  { %v5245_v7 = vpop.xlane.xlu0 %5244 }
 0xd52   :  { %v5255_v35 = vsub.f32 %v5239_v13, %v5245_v7 }
 0xd54   :  { %v5259_v27 = vmul.f32 1.442695, %v5255_v35 }
 0xd56   :  { %9134 = vpow2.f32 %v5259_v27 }
 0xd59   :  { %v5248_v45 = vpop.xlane.xlu2 %5247 }
 0xd5a   :  { %v5256_v63 = vsub.f32 %v5240_v14, %v5248_v45 }
 0xd5c   :  { %v11109_v28 = vpop.eup %9134  ;;  %v5261_v37 = vmul.f32 1.442695, %v5256_v63 }
 0xd5d   :  { %v5267_v53 = vsel %vm366_vm1, %v11109_v28, 0.0 }
 0xd5e   :  { %9136 = vpow2.f32 %v5261_v37  ;;  %5268 = vadd.xlane.f32.xlu2 %v5267_v53 }
 0xd61   :  { %v5342_v20 = vpop.permute.xlu2 %5341 }
 0xd62   :  { %v11113_v46 = vand.u32 4294901760, %v5342_v20 }
 0xd64   :  { %v11115_v42 = vpop.eup %9136  ;;  %v11118_v51 = vsub.f32 %v5342_v20, %v11113_v46  ;;  %5366 = vmatpush.msrb.mxu0 %v11113_v46  ;;  %5467 = vmatpush.msrb.mxu3 %v11113_v46 }
 0xd65   :  { %v5270_v43 = vsel %vm366_vm1, %v11115_v42, 0.0 }
 0xd66   :  { %v5402_v13 = vand.u32 4294901760, %v11118_v51  ;;  %5437 = vmatpush.msrb.mxu2 %v11118_v51  ;;  %5271 = vadd.xlane.f32.xlu0 %v5270_v43 }
 0xd68   :  { %v5403_v57 = vsub.f32 %v11118_v51, %v5402_v13 }
 0xd6a   :  { %v5404_v8 = vand.u32 4294901760, %v5403_v57 }
 0xd6c   :  { %5405 = vmatpush.msrb.mxu1 %v5404_v8 }
 0xd73   :  { %v5251_v18 = vpop.xlane.xlu1 %5250 }
 0xd74   :  { %v5257_v33 = vsub.f32 %v5241_v5, %v5251_v18 }
 0xd76   :  { %v5263_v49 = vmul.f32 1.442695, %v5257_v33  ;;  %5541 = vrot.lane.b32.xlu2 %v11063_v23, %s9215_s26 }
 0xd78   :  { %9138 = vpow2.f32 %v5263_v49 }
 0xd7b   :  { %v5254_v55 = vpop.xlane.xlu0 %5253 }
 0xd7c   :  { %v5258_v14 = vsub.f32 %v5242_v10, %v5254_v55 }
 0xd7e   :  { %v11131_v1 = vpop.eup %9138  ;;  %v5265_v9 = vmul.f32 1.442695, %v5258_v14  ;;  %5743 = vrot.lane.b32.xlu2 %v11055_v16, %s9216_s27 }
 0xd7f   :  { %v5273_v25 = vsel %vm366_vm1, %v11131_v1, 0.0 }
 0xd80   :  { %9140 = vpow2.f32 %v5265_v9  ;;  %5274 = vadd.xlane.f32.xlu1 %v5273_v25 }
 0xd86   :  { %v11137_v31 = vpop.eup %9140  ;;  %5953 = vrot.lane.b32.xlu2 %v11063_v23, %s9217_s28 }
 0xd87   :  { %v5276_v56 = vsel %vm366_vm1, %v11137_v31, 0.0 }
 0xd88   :  { %5277 = vadd.xlane.f32.xlu0 %v5276_v56 }
 0xd99   :  { %5339 = vrot.lane.b32.xlu1 %v11055_v16, %s9215_s26 }
 0xd9c   :  { %5543 = vrot.lane.b32.xlu0 %v11067_v39, %s9215_s26 }
 0xda1   :  { %5749 = vrot.lane.b32.xlu1 %v11059_v17, %s9217_s28 }
 0xda4   :  { %5747 = vrot.lane.b32.xlu0 %v11055_v16, %s9217_s28 }
 0xda9   :  { %5745 = vrot.lane.b32.xlu1 %v11059_v17, %s9216_s27 }
 0xdac   :  { %5955 = vrot.lane.b32.xlu0 %v11067_v39, %s9217_s28 }
 0xdb1   :  { %5949 = vrot.lane.b32.xlu1 %v11063_v23, %s9216_s27 }
 0xdb4   :  { %5951 = vrot.lane.b32.xlu0 %v11067_v39, %s9216_s27 }
 0xdd1   :  { %v5269_v19 = vpop.xlane.xlu2 %5268 }
 0xdd2   :  { %9142 = vrcp.f32 %v5269_v19  ;;  %v5290_v6 = vand.u32 2147483648, %v5269_v19  ;;  %vm5284_vm6 = vweird.f32 %v5269_v19  ;;  %v5288_v11 = vand.u32 2147483647, %v5269_v19 }
 0xdd4   :  { %v5291_v32 = vor.u32 1.1754944e-38, %v5290_v6  ;;  %vm5289_vm15 = vcmp.eq.f32.partialorder %v5288_v11, 8.507059e+37 }
 0xdd8   :  { %v9143_v40 = vpop.eup %9142 }
 0xdd9   :  { %v5272_v47 = vpop.xlane.xlu0 %5271  ;;  %v5280_v44 = vmul.f32 %v9143_v40, %v5269_v19  ;;  %vm5285_vm5 = vweird.f32 %v9143_v40  ;;  %v5542_v19 = vpop.permute.xlu2 %5541 }
 0xdda   :  { %9144 = vrcp.f32 %v5272_v47  ;;  %vm5286_vm7 = vmor %vm5284_vm6, %vm5285_vm5  ;;  %v5305_v54 = vand.u32 2147483648, %v5272_v47  ;;  %vm5299_vm13 = vweird.f32 %v5272_v47  ;;  %v5303_v3 = vand.u32 2147483647, %v5272_v47 }
 0xddb   :  { %v5281_v62 = vsub.f32 1.0, %v5280_v44  ;;  %v11168_v44 = vand.u32 4294901760, %v5542_v19 }
 0xddc   :  { %v5306_v0 = vor.u32 1.1754944e-38, %v5305_v54  ;;  %vm5304_vm5 = vcmp.eq.f32.partialorder %v5303_v3, 8.507059e+37 }
 0xddd   :  { %v5282_v36 = vmul.f32 %v9143_v40, %v5281_v62 }
 0xddf   :  { %v5283_v38 = vadd.f32 %v9143_v40, %v5282_v36 }
 0xde0   :  { %v9145_v12 = vpop.eup %9144 }
 0xde1   :  { %v5295_v58 = vmul.f32 %v9145_v12, %v5272_v47  ;;  %v5287_v24 = vsel %vm5286_vm7, %v9143_v40, %v5283_v38  ;;  %vm5300_vm2 = vweird.f32 %v9145_v12 }
 0xde2   :  { %v5292_v5 = vsel %vm5289_vm15, %v5291_v32, %v5287_v24  ;;  %vm5301_vm12 = vmor %vm5299_vm13, %vm5300_vm2  ;;  %v5609_v24 = vsub.f32 %v5542_v19, %v11168_v44 }
 0xde3   :  { %v5296_v48 = vsub.f32 1.0, %v5295_v58  ;;  %v5293_v50 = vmul.f32 %v11109_v28, %v5292_v5 }
 0xde5   :  { %v5297_v15 = vmul.f32 %v9145_v12, %v5296_v48  ;;  %v5346_v7 = vsel %vm366_vm1, %v5293_v50, 0 }
 0xde6   :  { %v11161_v37 = vand.u32 4294901760, %v5346_v7 }
 0xde7   :  { %v5298_v21 = vadd.f32 %v9145_v12, %v5297_v15 }
 0xde8   :  { %v5370_v28 = vsub.f32 %v5346_v7, %v11161_v37 }
 0xde9   :  { %v5302_v10 = vsel %vm5301_vm12, %v9145_v12, %v5298_v21 }
 0xdea   :  { %v5307_v27 = vsel %vm5304_vm5, %v5306_v0, %v5302_v10  ;;  %v5371_v25 = vand.u32 4294901760, %v5370_v28 }
 0xdeb   :  { %v5308_v20 = vmul.f32 %v11115_v42, %v5307_v27  ;;  %v5610_v27 = vand.u32 4294901760, %v5609_v24 }
 0xdec   :  { %v5372_v12 = vsub.f32 %v5370_v28, %v5371_v25 }
 0xded   :  { %v5349_v33 = vsel %vm366_vm1, %v5308_v20, 0 }
 0xdee   :  { %v11166_v56 = vand.u32 4294901760, %v5349_v33  ;;  %v5373_v5 = vand.u32 4294901760, %v5372_v12 }
 0xdf0   :  { %v5378_v36 = vsub.f32 %v5349_v33, %v11166_v56 }
 0xdf2   :  { %v5379_v21 = vand.u32 4294901760, %v5378_v36 }
 0xdf3   :  { %v5275_v26 = vpop.xlane.xlu1 %5274 }
 0xdf4   :  { %9146 = vrcp.f32 %v5275_v26  ;;  %v5320_v57 = vand.u32 2147483648, %v5275_v26  ;;  %vm5314_vm12 = vweird.f32 %v5275_v26  ;;  %v5318_v18 = vand.u32 2147483647, %v5275_v26 }
 0xdf6   :  { %v5321_v9 = vor.u32 1.1754944e-38, %v5320_v57  ;;  %vm5319_vm7 = vcmp.eq.f32.partialorder %v5318_v18, 8.507059e+37 }
 0xdfa   :  { %v9147_v35 = vpop.eup %9146 }
 0xdfb   :  { %v5310_v45 = vmul.f32 %v9147_v35, %v5275_v26  ;;  %v5278_v63 = vpop.xlane.xlu0 %5277  ;;  %vm5315_vm6 = vweird.f32 %v9147_v35 }
 0xdfc   :  { %9148 = vrcp.f32 %v5278_v63  ;;  %vm5316_vm13 = vmor %vm5314_vm12, %vm5315_vm6  ;;  %v5335_v62 = vand.u32 2147483648, %v5278_v63  ;;  %vm5329_vm2 = vweird.f32 %v5278_v63  ;;  %v5333_v48 = vand.u32 2147483647, %v5278_v63 }
 0xdfd   :  { %v5311_v53 = vsub.f32 1.0, %v5310_v45 }
 0xdfe   :  { %v5336_v15 = vor.u32 1.1754944e-38, %v5335_v62  ;;  %vm5334_vm6 = vcmp.eq.f32.partialorder %v5333_v48, 8.507059e+37 }
 0xdff   :  { %v5312_v43 = vmul.f32 %v9147_v35, %v5311_v53  ;;  %v11179_v53 = vpop.permute.xlu2 %5743 }
 0xe01   :  { %v5313_v8 = vadd.f32 %v9147_v35, %v5312_v43 }
 0xe02   :  { %v9149_v49 = vpop.eup %9148 }
 0xe03   :  { %v5317_v55 = vsel %vm5316_vm13, %v9147_v35, %v5313_v8  ;;  %v5325_v14 = vmul.f32 %v9149_v49, %v5278_v63  ;;  %vm5330_vm15 = vweird.f32 %v9149_v49  ;;  %v5380_v35 = vsub.f32 %v5378_v36, %v5379_v21 }
 0xe04   :  { %v5322_v47 = vsel %vm5319_vm7, %v5321_v9, %v5317_v55  ;;  %vm5331_vm5 = vmor %vm5329_vm2, %vm5330_vm15  ;;  %v5611_v8 = vsub.f32 %v5609_v24, %v5610_v27 }
 0xe05   :  { %v5326_v42 = vsub.f32 1.0, %v5325_v14  ;;  %v5323_v58 = vmul.f32 %v11131_v1, %v5322_v47 }
 0xe06   :  { %v5612_v19 = vand.u32 4294901760, %v5611_v8 }
 0xe07   :  { %v5327_v40 = vmul.f32 %v9149_v49, %v5326_v42  ;;  %v5548_v26 = vsel %vm366_vm1, %v5323_v58, 0  ;;  %v5954_v62 = vpop.permute.xlu2 %5953 }
 0xe08   :  { %v11176_v0 = vand.u32 4294901760, %v5548_v26  ;;  %v5961_v48 = vsel %vm366_vm1, %v5954_v62, 0 }
 0xe09   :  { %v5328_v38 = vadd.f32 %v9149_v49, %v5327_v40 }
 0xe0a   :  { %v11184_v57 = vsub.f32 %v5548_v26, %v11176_v0 }
 0xe0b   :  { %v5332_v6 = vsel %vm5331_vm5, %v9149_v49, %v5328_v38  ;;  %v5340_v11 = vpop.permute.xlu1 %5339 }
 0xe0c   :  { %v5367_v32 = vand.u32 4294901760, %v5340_v11  ;;  %v5337_v54 = vsel %vm5334_vm6, %v5336_v15, %v5332_v6  ;;  %v5573_v9 = vand.u32 4294901760, %v11184_v57 }
 0xe0d   :  { %v5338_v45 = vmul.f32 %v11137_v31, %v5337_v54  ;;  %v5381_v31 = vand.u32 4294901760, %v5380_v35 }
 0xe0e   :  { %v5407_v50 = vsub.f32 %v5340_v11, %v5367_v32  ;;  %5368 = vmatpush.msrb.mxu0 %v5367_v32  ;;  %5469 = vmatpush.msrb.mxu3 %v5367_v32  ;;  %v5544_v1 = vpop.permute.xlu0 %5543 }
 0xe0f   :  { %v5567_v3 = vand.u32 4294901760, %v5544_v1  ;;  %5374 = vmatmul.f32.vlgmr.msrb.gmra.mxu0 %v5373_v5  ;;  %5473 = vmatmul.f32.vlgmr.msrb.gmra.mxu3 %v5371_v25  ;;  %v5551_v18 = vsel %vm366_vm1, %v5338_v45, 0 }
 0xe10   :  { %5500 = vmatpush.msra.mxu0 %v5402_v13  ;;  %5440 = vmatpush.msrb.mxu2 %v5407_v50  ;;  %v5408_v10 = vand.u32 4294901760, %v5407_v50  ;;  %v11193_v25 = vand.u32 4294901760, %v5551_v18 }
 0xe11   :  { %v5603_v7 = vsub.f32 %v5544_v1, %v5567_v3  ;;  %5443 = vmatmul.f32.vlgmr.msrb.gmra.mxu2 %v5370_v28 }
 0xe12   :  { %5568 = vmatpush.msra.mxu2 %v5567_v3  ;;  %5504 = vmatpush.msra.mxu0 %v5408_v10  ;;  %v5409_v63 = vsub.f32 %v5407_v50, %v5408_v10  ;;  %v11202_v40 = vsub.f32 %v5551_v18, %v11193_v25  ;;  %v5751_v10 = vsel %vm366_vm1, %v11179_v53, 0 }
 0xe13   :  { %v5604_v20 = vand.u32 4294901760, %v5603_v7  ;;  %v5750_v43 = vpop.permute.xlu1 %5749  ;;  %v11229_v45 = vand.u32 4294901760, %v5751_v10 }
 0xe14   :  { %5639 = vmatpush.msrb.mxu0 %v5603_v7  ;;  %v5757_v51 = vsel %vm366_vm1, %v5750_v43, 0  ;;  %5570 = vmatpush.msra.mxu2 %v11168_v44  ;;  %v5410_v13 = vand.u32 4294901760, %v5409_v63 }
 0xe15   :  { %v5605_v28 = vsub.f32 %v5603_v7, %v5604_v20  ;;  %v11187_v55 = vand.u32 4294901760, %v5757_v51 }
 0xe16   :  { %5642 = vmatpush.msrb.mxu0 %v5609_v24  ;;  %5702 = vmatpush.msrb.mxu2 %v5604_v20  ;;  %v5748_v33 = vpop.permute.xlu0 %5747  ;;  %v11217_v24 = vand.u32 4294901760, %v5961_v48 }
 0xe17   :  { %5411 = vmatpush.msrb.mxu1 %v5410_v13  ;;  %v5606_v49 = vand.u32 4294901760, %v5605_v28  ;;  %5382 = vmatmul.f32.gmra.mxu0 %v5381_v31  ;;  %v5755_v14 = vsel %vm366_vm1, %v5748_v33, 0  ;;  %v5809_v42 = vsub.f32 %v5757_v51, %v11187_v55 }
 0xe18   :  { %5413 = vmatmul.f32.vlgmr.msrb.gmra.mxu1 %v11161_v37  ;;  %5479 = vmatmul.f32.gmra.mxu3 %v5379_v21  ;;  %v11196_v47 = vand.u32 4294901760, %v5755_v14  ;;  %v6021_v26 = vsub.f32 %v5961_v48, %v11217_v24 }
 0xe19   :  { %5529 = vmatpush.msra.mxu1 %v11113_v46  ;;  %5706 = vmatpush.msrb.mxu2 %v5610_v27  ;;  %v5574_v46 = vsub.f32 %v11184_v57, %v5573_v9 }
 0xe1a   :  { %5607 = vmatpush.msra.mxu3 %v5606_v49  ;;  %5448 = vmatmul.f32.gmra.mxu2 %v5378_v36  ;;  %v5810_v36 = vand.u32 4294901760, %v5809_v42  ;;  %v5815_v58 = vsub.f32 %v5755_v14, %v11196_v47  ;;  %v6022_v7 = vand.u32 4294901760, %v6021_v26 }
 0xe1b   :  { %5531 = vmatpush.msra.mxu1 %v5367_v32  ;;  %v5575_v11 = vand.u32 4294901760, %v5574_v46  ;;  %v5746_v63 = vpop.permute.xlu1 %5745 }
 0xe1c   :  { %5613 = vmatpush.msra.mxu3 %v5612_v19  ;;  %v5811_v15 = vsub.f32 %v5809_v42, %v5810_v36  ;;  %v5816_v32 = vand.u32 4294901760, %v5815_v58  ;;  %v6023_v43 = vsub.f32 %v6021_v26, %v6022_v7  ;;  %v5753_v53 = vsel %vm366_vm1, %v5746_v63, 0 }
 0xe1d   :  { %5669 = vmatpush.msrb.mxu1 %v5567_v3  ;;  %v5785_v28 = vand.u32 4294901760, %v5753_v53 }
 0xe1e   :  { %5731 = vmatpush.msrb.mxu3 %v5567_v3  ;;  %v5956_v12 = vpop.permute.xlu0 %5955  ;;  %v5812_v54 = vand.u32 4294901760, %v5811_v15  ;;  %v5817_v1 = vsub.f32 %v5815_v58, %v5816_v32  ;;  %v6024_v51 = vand.u32 4294901760, %v6023_v43 }
 0xe1f   :  { %5671 = vmatpush.msrb.mxu1 %v11168_v44  ;;  %v5963_v38 = vsel %vm366_vm1, %v5956_v12, 0  ;;  %5506 = vmatmul.f32.vlgmr.msra.gmra.mxu0 %v11161_v37  ;;  %v5786_v31 = vsub.f32 %v5753_v53, %v5785_v28 }
 0xe20   :  { %5733 = vmatpush.msrb.mxu3 %v11168_v44  ;;  %5417 = vmatmul.f32.gmra.mxu1 %v11166_v56  ;;  %v11211_v6 = vand.u32 4294901760, %v5963_v38  ;;  %v5581_v44 = vand.u32 4294901760, %v11202_v40  ;;  %v5818_v27 = vand.u32 4294901760, %v5817_v1 }
 0xe21   :  { %5615 = vmatmul.f32.vlgmr.msra.gmra.mxu3 %v11176_v0  ;;  %5774 = vmatpush.xpose.msra.mxu0 %v11187_v55  ;;  %v5787_v18 = vand.u32 4294901760, %v5786_v31 }
 0xe22   :  { %5875 = vmatpush.xpose.msra.mxu3 %v11187_v55  ;;  %5576 = vmatmul.f32.vlgmr.msra.gmra.mxu2 %v5575_v11  ;;  %v6015_v5 = vsub.f32 %v5963_v38, %v11211_v6  ;;  %v5582_v21 = vsub.f32 %v11202_v40, %v5581_v44 }
 0xe23   :  { %5845 = vmatpush.xpose.msra.mxu2 %v5809_v42 }
 0xe24   :  { %v6016_v50 = vand.u32 4294901760, %v6015_v5  ;;  %v5583_v3 = vand.u32 4294901760, %v5582_v21 }
 0xe25   :  { %5776 = vmatpush.xpose.msra.mxu0 %v11196_v47 }
 0xe26   :  { %5877 = vmatpush.xpose.msra.mxu3 %v11196_v47  ;;  %v6017_v35 = vsub.f32 %v6015_v5, %v6016_v50  ;;  %v5952_v14 = vpop.permute.xlu0 %5951 }
 0xe27   :  { %5848 = vmatpush.xpose.msra.mxu2 %v5815_v58  ;;  %5510 = vmatmul.f32.gmra.mxu0 %v11166_v56 }
 0xe28   :  { %5533 = vmatmul.f32.vlgmr.msra.gmra.mxu1 %v11161_v37  ;;  %v6018_v20 = vand.u32 4294901760, %v6017_v35  ;;  %v5778_v37 = vsub.f32 %v5751_v10, %v11229_v45 }
 0xe29   :  { %5619 = vmatmul.f32.gmra.mxu3 %v11193_v25  ;;  %5813 = vmatpush.xpose.msra.mxu1 %v5812_v54 }
 0xe2a   :  { %5584 = vmatmul.f32.gmra.mxu2 %v5583_v3  ;;  %v5779_v13 = vand.u32 4294901760, %v5778_v37 }
 0xe2d   :  { %5819 = vmatpush.xpose.msra.mxu1 %v5818_v27 }
 0xe2f   :  { %5645 = vmatmul.f32.vlgmr.msrb.gmra.mxu0 %v11184_v57  ;;  %v5788_v57 = vsub.f32 %v5786_v31, %v5787_v18 }
 0xe30   :  { %5537 = vmatmul.f32.gmra.mxu1 %v11166_v56  ;;  %5908 = vmatpush.xpose.msrb.mxu0 %v5810_v36  ;;  %v5780_v56 = vsub.f32 %v5778_v37, %v5779_v13 }
 0xe31   :  { %5735 = vmatmul.f32.vlgmr.msrb.gmra.mxu3 %v11176_v0 }
 0xe32   :  { %6019 = vmatpush.xpose.msrb.mxu3 %v6018_v20  ;;  %5708 = vmatmul.f32.vlgmr.msrb.gmra.mxu2 %v11176_v0  ;;  %v5950_v0 = vpop.permute.xlu1 %5949  ;;  %v5781_v8 = vand.u32 4294901760, %v5780_v56 }
 0xe33   :  { %5980 = vmatpush.xpose.msrb.mxu2 %v11211_v6  ;;  %v5957_v33 = vsel %vm366_vm1, %v5950_v0, 0 }
 0xe34   :  { %5912 = vmatpush.xpose.msrb.mxu0 %v5816_v32  ;;  %v5983_v49 = vand.u32 4294901760, %v5957_v33 }
 0xe36   :  { %6025 = vmatpush.xpose.msrb.mxu3 %v6024_v51 }
 0xe37   :  { %5982 = vmatpush.xpose.msrb.mxu2 %v11217_v24  ;;  %5650 = vmatmul.f32.gmra.mxu0 %v11202_v40 }
 0xe38   :  { %5675 = vmatmul.f32.vlgmr.msrb.gmra.mxu1 %v5573_v9  ;;  %v5959_v9 = vsel %vm366_vm1, %v5952_v14, 0 }
 0xe39   :  { %5739 = vmatmul.f32.gmra.mxu3 %v11193_v25  ;;  %5937 = vmatpush.xpose.msrb.mxu1 %v11187_v55  ;;  %v5984_v55 = vsub.f32 %v5957_v33, %v5983_v49  ;;  %v5991_v42 = vand.u32 4294901760, %v5959_v9 }
 0xe3a   :  { %5712 = vmatmul.f32.gmra.mxu2 %v11193_v25  ;;  %v5789_v25 = vand.u32 4294901760, %v5788_v57 }
 0xe3b   :  { %v5985_v19 = vand.u32 4294901760, %v5984_v55  ;;  %v5992_v46 = vsub.f32 %v5959_v9, %v5991_v42 }
 0xe3d   :  { %5939 = vmatpush.xpose.msrb.mxu1 %v11196_v47  ;;  %v5986_v47 = vsub.f32 %v5984_v55, %v5985_v19  ;;  %v5993_v62 = vand.u32 4294901760, %v5992_v46 }
 0xe3f   :  { %5782 = vmatmul.f32.vlgmr.msra.gmra.mxu0 %v5781_v8  ;;  %v5987_v40 = vand.u32 4294901760, %v5986_v47  ;;  %v5994_v12 = vsub.f32 %v5992_v46, %v5993_v62 }
 0xe40   :  { %5681 = vmatmul.f32.gmra.mxu1 %v5581_v44  ;;  %6051 = vmatpush.xpose.msra.mxu0 %v6015_v5 }
 0xe41   :  { %5881 = vmatmul.f32.vlgmr.msra.gmra.mxu3 %v5779_v13  ;;  %v5995_v36 = vand.u32 4294901760, %v5994_v12 }
 0xe42   :  { %6143 = vmatpush.xpose.msra.mxu3 %v11211_v6  ;;  %5851 = vmatmul.f32.vlgmr.msra.gmra.mxu2 %v5778_v37 }
 0xe43   :  { %6114 = vmatpush.xpose.msra.mxu2 %v6016_v50 }
 0xe44   :  { %6054 = vmatpush.xpose.msra.mxu0 %v6021_v26 }
 0xe46   :  { %6145 = vmatpush.xpose.msra.mxu3 %v11217_v24 }
 0xe47   :  { %6118 = vmatpush.xpose.msra.mxu2 %v6022_v7  ;;  %5790 = vmatmul.f32.gmra.mxu0 %v5789_v25 }
 0xe48   :  { %5821 = vmatmul.f32.vlgmr.msra.gmra.mxu1 %v11229_v45 }
 0xe49   :  { %5887 = vmatmul.f32.gmra.mxu3 %v5787_v18  ;;  %6081 = vmatpush.xpose.msra.mxu1 %v11211_v6 }
 0xe4a   :  { %5856 = vmatmul.f32.gmra.mxu2 %v5786_v31 }
 0xe4d   :  { %6083 = vmatpush.xpose.msra.mxu1 %v11217_v24 }
 0xe4f   :  { %5914 = vmatmul.f32.vlgmr.msrb.gmra.mxu0 %v11229_v45 }
 0xe50   :  { %5825 = vmatmul.f32.gmra.mxu1 %v5785_v28 }
 0xe51   :  { %6027 = vmatmul.f32.vlgmr.msrb.gmra.mxu3 %v5983_v49 }
 0xe52   :  { %5988 = vmatmul.f32.vlgmr.msrb.gmra.mxu2 %v5987_v40 }
 0xe57   :  { %5918 = vmatmul.f32.gmra.mxu0 %v5785_v28 }
 0xe58   :  { %5941 = vmatmul.f32.vlgmr.msrb.gmra.mxu1 %v11229_v45 }
 0xe59   :  { %6031 = vmatmul.f32.gmra.mxu3 %v5991_v42 }
 0xe5a   :  { %5996 = vmatmul.f32.gmra.mxu2 %v5995_v36 }
 0xe5f   :  { %6057 = vmatmul.f32.vlgmr.msra.gmra.mxu0 %v5984_v55 }
 0xe60   :  { %5945 = vmatmul.f32.gmra.mxu1 %v5785_v28 }
 0xe61   :  { %6147 = vmatmul.f32.vlgmr.msra.gmra.mxu3 %v5983_v49 }
 0xe62   :  { %6120 = vmatmul.f32.vlgmr.msra.gmra.mxu2 %v5983_v49 }
 0xe67   :  { %6062 = vmatmul.f32.gmra.mxu0 %v5992_v46 }
 0xe68   :  { %6087 = vmatmul.f32.vlgmr.msra.gmra.mxu1 %v5985_v19 }
 0xe69   :  { %6151 = vmatmul.f32.gmra.mxu3 %v5991_v42 }
 0xe6a   :  { %6124 = vmatmul.f32.gmra.mxu2 %v5991_v42 }
 0xe70   :  { %6093 = vmatmul.f32.gmra.mxu1 %v5993_v62 }
 0xe8c   :  { %v11255_v58 = vpop.f32.mrf.mxu0 }
 0xe92   :  { %v11257_v38 = vpop.f32.mrf.mxu3 }
 0xe94   :  { %v11259_v48 = vpop.f32.mrf.mxu0  ;;  %v11263_v11 = vpop.f32.mrf.mxu2 }
 0xe95   :  { %v11261_v6 = vpop.f32.mrf.mxu1 }
 0xe9b   :  { %v11265_v44 = vpop.f32.mrf.mxu3 }
 0xe9c   :  { %v11269_v15 = vpop.f32.mrf.mxu0 }
 0xe9d   :  { %v11267_v24 = vpop.f32.mrf.mxu1  ;;  %v11271_v32 = vpop.f32.mrf.mxu2 }
 0xea4   :  { %v11273_v5 = vpop.f32.mrf.mxu3  ;;  %v11275_v21 = vpop.f32.mrf.mxu0 }
 0xea5   :  { %v11277_v26 = vpop.f32.mrf.mxu1  ;;  %v11279_v54 = vpop.f32.mrf.mxu2 }
 0xeac   :  { %v11281_v50 = vpop.f32.mrf.mxu3  ;;  %v11283_v1 = vpop.f32.mrf.mxu0 }
 0xead   :  { %v11285_v3 = vpop.f32.mrf.mxu1  ;;  %v11287_v10 = vpop.f32.mrf.mxu2 }
 0xeb4   :  { %v11289_v7 = vpop.f32.mrf.mxu3  ;;  %v11291_v35 = vpop.f32.mrf.mxu0 }
 0xeb5   :  { %v11293_v27 = vpop.f32.mrf.mxu1  ;;  %v11295_v45 = vpop.f32.mrf.mxu2 }
 0xebc   :  { %v11297_v63 = vpop.f32.mrf.mxu3  ;;  %v5783_v20 = vpop.f32.mrf.mxu0 }
 0xebd   :  { %v11299_v43 = vpop.f32.mrf.mxu1  ;;  %v11301_v37 = vpop.f32.mrf.mxu2 }
 0xec4   :  { %v5882_v53 = vpop.f32.mrf.mxu3  ;;  %v5791_v51 = vpop.f32.mrf.mxu0 }
 0xec5   :  { %v5822_v13 = vpop.f32.mrf.mxu1  ;;  %v5852_v28 = vpop.f32.mrf.mxu2 }
 0xec6   :  { %v5823_v56 = vadd.f32 %v5822_v13, %v5783_v20 }
 0xec8   :  { %v5853_v33 = vadd.f32 %v5852_v28, %v5823_v56 }
 0xeca   :  { %v5883_v57 = vadd.f32 %v5882_v53, %v5853_v33 }
 0xecc   :  { %v5888_v31 = vpop.f32.mrf.mxu3  ;;  %v5915_v0 = vpop.f32.mrf.mxu0 }
 0xecd   :  { %v5826_v8 = vpop.f32.mrf.mxu1  ;;  %v5857_v18 = vpop.f32.mrf.mxu2  ;;  %v5916_v55 = vadd.f32 %v5915_v0, %v5883_v57 }
 0xece   :  { %v5827_v49 = vadd.f32 %v5826_v8, %v5791_v51 }
 0xed0   :  { %v5858_v42 = vadd.f32 %v5857_v18, %v5827_v49 }
 0xed2   :  { %v5889_v40 = vadd.f32 %v5888_v31, %v5858_v42 }
 0xed4   :  { %v6028_v14 = vpop.f32.mrf.mxu3  ;;  %v5919_v9 = vpop.f32.mrf.mxu0 }
 0xed5   :  { %v5942_v25 = vpop.f32.mrf.mxu1  ;;  %v5989_v19 = vpop.f32.mrf.mxu2  ;;  %v5920_v12 = vadd.f32 %v5919_v9, %v5889_v40 }
 0xed6   :  { %v5943_v47 = vadd.f32 %v5942_v25, %v5916_v55  ;;  %v6029_v0 = vadd.f32 %v6028_v14, %v5989_v19 }
 0xed8   :  { %v6155_v46 = vmul.f32 0.25, %v5943_v47 }
 0xeda   :  { %v6159_v62 = vadd.f32 %v11092_v29, %v6155_v46 }
 0xedc   :  { %v6032_v36 = vpop.f32.mrf.mxu3  ;;  %v6163_v20 = vsel %vm366_vm1, %v6159_v62, -inf  ;;  %v6058_v53 = vpop.f32.mrf.mxu0 }
 0xedd   :  { %v5946_v13 = vpop.f32.mrf.mxu1  ;;  %6164 = vmax.xlane.f32.xlu2 %v6163_v20  ;;  %v5997_v28 = vpop.f32.mrf.mxu2  ;;  %v6059_v33 = vadd.f32 %v6058_v53, %v6029_v0 }
 0xede   :  { %v5947_v51 = vadd.f32 %v5946_v13, %v5920_v12  ;;  %v6033_v42 = vadd.f32 %v6032_v36, %v5997_v28 }
 0xee0   :  { %v6156_v56 = vmul.f32 0.25, %v5947_v51 }
 0xee2   :  { %v6160_v8 = vadd.f32 %v11092_v29, %v6156_v56 }
 0xee4   :  { %v6166_v18 = vsel %vm366_vm1, %v6160_v8, -inf  ;;  %v6148_v55 = vpop.f32.mrf.mxu3  ;;  %v6063_v25 = vpop.f32.mrf.mxu0 }
 0xee5   :  { %6167 = vmax.xlane.f32.xlu1 %v6166_v18  ;;  %v6088_v31 = vpop.f32.mrf.mxu1  ;;  %v6121_v49 = vpop.f32.mrf.mxu2  ;;  %v6064_v46 = vadd.f32 %v6063_v25, %v6033_v42 }
 0xee6   :  { %v6089_v57 = vadd.f32 %v6088_v31, %v6059_v33 }
 0xee8   :  { %v6122_v9 = vadd.f32 %v6121_v49, %v6089_v57 }
 0xeea   :  { %v6149_v47 = vadd.f32 %v6148_v55, %v6122_v9 }
 0xeec   :  { %v6157_v40 = vmul.f32 0.25, %v6149_v47  ;;  %v6152_v51 = vpop.f32.mrf.mxu3 }
 0xeed   :  { %v6094_v12 = vpop.f32.mrf.mxu1  ;;  %v6125_v19 = vpop.f32.mrf.mxu2 }
 0xeee   :  { %v6095_v20 = vadd.f32 %v6094_v12, %v6064_v46  ;;  %v6161_v14 = vadd.f32 %v11101_v41, %v6157_v40 }
 0xef0   :  { %v6126_v29 = vadd.f32 %v6125_v19, %v6095_v20  ;;  %v6169_v13 = vsel %vm366_vm1, %v6161_v14, -inf }
 0xef1   :  { %6170 = vmax.xlane.f32.xlu0 %v6169_v13 }
 0xef2   :  { %v6153_v53 = vadd.f32 %v6152_v51, %v6126_v29 }
 0xef4   :  { %v6158_v56 = vmul.f32 0.25, %v6153_v53 }
 0xef6   :  { %v6162_v0 = vadd.f32 %v11101_v41, %v6158_v56 }
 0xef8   :  { %v6172_v33 = vsel %vm366_vm1, %v6162_v0, -inf }
 0xef9   :  { %6173 = vmax.xlane.f32.xlu2 %v6172_v33 }
 0xefe   :  { %6261 = vrot.lane.b32.xlu1 %v11059_v17, %s9218_s29 }
 0xf50   :  { %v6165_v36 = vpop.xlane.xlu2 %6164 }
 0xf51   :  { %v6175_v28 = vsub.f32 %v6159_v62, %v6165_v36 }
 0xf53   :  { %v6179_v18 = vmul.f32 1.442695, %v6175_v28 }
 0xf55   :  { %9150 = vpow2.f32 %v6179_v18 }
 0xf58   :  { %v6168_v31 = vpop.xlane.xlu1 %6167 }
 0xf59   :  { %v6176_v49 = vsub.f32 %v6160_v8, %v6168_v31 }
 0xf5b   :  { %v9151_v57 = vpop.eup %9150  ;;  %v6181_v55 = vmul.f32 1.442695, %v6176_v49 }
 0xf5c   :  { %v6187_v9 = vsel %vm366_vm1, %v9151_v57, 0.0 }
 0xf5d   :  { %9152 = vpow2.f32 %v6181_v55  ;;  %6188 = vadd.xlane.f32.xlu1 %v6187_v9 }
 0xf63   :  { %v11314_v25 = vpop.eup %9152 }
 0xf64   :  { %v6171_v41 = vpop.xlane.xlu0 %6170  ;;  %v6190_v42 = vsel %vm366_vm1, %v11314_v25, 0.0 }
 0xf65   :  { %v6177_v47 = vsub.f32 %v6161_v14, %v6171_v41  ;;  %6191 = vadd.xlane.f32.xlu0 %v6190_v42 }
 0xf67   :  { %v6183_v17 = vmul.f32 1.442695, %v6177_v47 }
 0xf69   :  { %9154 = vpow2.f32 %v6183_v17 }
 0xf6c   :  { %v6174_v62 = vpop.xlane.xlu2 %6173 }
 0xf6d   :  { %v6178_v46 = vsub.f32 %v6162_v0, %v6174_v62 }
 0xf6f   :  { %v11318_v40 = vpop.eup %9154  ;;  %v6185_v8 = vmul.f32 1.442695, %v6178_v46 }
 0xf70   :  { %v6262_v12 = vpop.permute.xlu1 %6261  ;;  %v6193_v20 = vsel %vm366_vm1, %v11318_v40, 0.0 }
 0xf71   :  { %9156 = vpow2.f32 %v6185_v8  ;;  %v11322_v19 = vand.u32 4294901760, %v6262_v12  ;;  %6194 = vadd.xlane.f32.xlu2 %v6193_v20 }
 0xf73   :  { %v11325_v29 = vsub.f32 %v6262_v12, %v11322_v19  ;;  %6286 = vmatpush.msrb.mxu0 %v11322_v19  ;;  %6387 = vmatpush.msrb.mxu3 %v11322_v19 }
 0xf75   :  { %v6322_v14 = vand.u32 4294901760, %v11325_v29  ;;  %6357 = vmatpush.msrb.mxu2 %v11325_v29 }
 0xf76   :  { %6461 = vrot.lane.b32.xlu1 %v11063_v23, %s9218_s29 }
 0xf77   :  { %v11333_v13 = vpop.eup %9156  ;;  %v6323_v51 = vsub.f32 %v11325_v29, %v6322_v14 }
 0xf78   :  { %v6196_v53 = vsel %vm366_vm1, %v11333_v13, 0.0 }
 0xf79   :  { %v6324_v56 = vand.u32 4294901760, %v6323_v51  ;;  %6197 = vadd.xlane.f32.xlu0 %v6196_v53 }
 0xf7b   :  { %6325 = vmatpush.msrb.mxu1 %v6324_v56 }
 0xf89   :  { %6259 = vrot.lane.b32.xlu2 %v11055_v16, %s9218_s29 }
 0xf8d   :  { %6463 = vrot.lane.b32.xlu0 %v11067_v39, %s9218_s29 }
 0xfd0   :  { %v6189_v0 = vpop.xlane.xlu1 %6188 }
 0xfd1   :  { %9158 = vrcp.f32 %v6189_v0  ;;  %v6210_v18 = vand.u32 2147483648, %v6189_v0  ;;  %v6208_v49 = vand.u32 2147483647, %v6189_v0  ;;  %vm6204_vm13 = vweird.f32 %v6189_v0 }
 0xfd3   :  { %v6211_v41 = vor.u32 1.1754944e-38, %v6210_v18  ;;  %vm6209_vm15 = vcmp.eq.f32.partialorder %v6208_v49, 8.507059e+37 }
 0xfd7   :  { %v9159_v23 = vpop.eup %9158 }
 0xfd8   :  { %v6200_v33 = vmul.f32 %v9159_v23, %v6189_v0  ;;  %v6192_v36 = vpop.xlane.xlu0 %6191  ;;  %vm6205_vm12 = vweird.f32 %v9159_v23 }
 0xfd9   :  { %9160 = vrcp.f32 %v6192_v36  ;;  %vm6206_vm7 = vmor %vm6204_vm13, %vm6205_vm12  ;;  %v6225_v62 = vand.u32 2147483648, %v6192_v36  ;;  %v6223_v12 = vand.u32 2147483647, %v6192_v36  ;;  %vm6219_vm5 = vweird.f32 %v6192_v36 }
 0xfda   :  { %v6201_v28 = vsub.f32 1.0, %v6200_v33 }
 0xfdb   :  { %v6226_v0 = vor.u32 1.1754944e-38, %v6225_v62  ;;  %vm6224_vm12 = vcmp.eq.f32.partialorder %v6223_v12, 8.507059e+37 }
 0xfdc   :  { %v6202_v31 = vmul.f32 %v9159_v23, %v6201_v28 }
 0xfde   :  { %v6203_v55 = vadd.f32 %v9159_v23, %v6202_v31 }
 0xfdf   :  { %v9161_v9 = vpop.eup %9160 }
 0xfe0   :  { %v6207_v16 = vsel %vm6206_vm7, %v9159_v23, %v6203_v55  ;;  %v6215_v42 = vmul.f32 %v9161_v9, %v6192_v36  ;;  %vm6220_vm2 = vweird.f32 %v9161_v9 }
 0xfe1   :  { %v6212_v39 = vsel %vm6209_vm15, %v6211_v41, %v6207_v16  ;;  %vm6221_vm6 = vmor %vm6219_vm5, %vm6220_vm2 }
 0xfe2   :  { %v6213_v47 = vmul.f32 %v9151_v57, %v6212_v39  ;;  %v6216_v17 = vsub.f32 1.0, %v6215_v42 }
 0xfe4   :  { %v6266_v46 = vsel %vm366_vm1, %v6213_v47, 0  ;;  %v6217_v8 = vmul.f32 %v9161_v9, %v6216_v17  ;;  %v6195_v20 = vpop.xlane.xlu2 %6194 }
 0xfe5   :  { %v11345_v51 = vand.u32 4294901760, %v6266_v46  ;;  %9162 = vrcp.f32 %v6195_v20  ;;  %v6238_v17 = vand.u32 2147483647, %v6195_v20  ;;  %vm6234_vm7 = vweird.f32 %v6195_v20 }
 0xfe6   :  { %v6218_v53 = vadd.f32 %v9161_v9, %v6217_v8 }
 0xfe7   :  { %v6290_v56 = vsub.f32 %v6266_v46, %v11345_v51  ;;  %vm6239_vm2 = vcmp.eq.f32.partialorder %v6238_v17, 8.507059e+37 }
 0xfe8   :  { %v6222_v23 = vsel %vm6221_vm6, %v9161_v9, %v6218_v53  ;;  %v6240_v9 = vand.u32 2147483648, %v6195_v20  ;;  %v6462_v29 = vpop.permute.xlu1 %6461 }
 0xfe9   :  { %v6227_v57 = vsel %vm6224_vm12, %v6226_v0, %v6222_v23  ;;  %v6291_v33 = vand.u32 4294901760, %v6290_v56 }
 0xfea   :  { %v6228_v28 = vmul.f32 %v11314_v25, %v6227_v57  ;;  %v6241_v23 = vor.u32 1.1754944e-38, %v6240_v9 }
 0xfeb   :  { %v9163_v18 = vpop.eup %9162  ;;  %v6292_v31 = vsub.f32 %v6290_v56, %v6291_v33 }
 0xfec   :  { %v6230_v49 = vmul.f32 %v9163_v18, %v6195_v20  ;;  %v6198_v55 = vpop.xlane.xlu0 %6197  ;;  %v6260_v41 = vpop.permute.xlu2 %6259  ;;  %v6269_v16 = vsel %vm366_vm1, %v6228_v28, 0  ;;  %vm6235_vm13 = vweird.f32 %v9163_v18 }
 0xfed   :  { %9164 = vrcp.f32 %v6198_v55  ;;  %v6287_v36 = vand.u32 4294901760, %v6260_v41  ;;  %v6293_v39 = vand.u32 4294901760, %v6292_v31  ;;  %v11350_v47 = vand.u32 4294901760, %v6269_v16  ;;  %vm6236_vm15 = vmor %vm6234_vm7, %vm6235_vm13 }
 0xfee   :  { %v6231_v42 = vsub.f32 1.0, %v6230_v49  ;;  %v6253_v9 = vand.u32 2147483647, %v6198_v55  ;;  %vm6249_vm6 = vweird.f32 %v6198_v55 }
 0xfef   :  { %v6327_v46 = vsub.f32 %v6260_v41, %v6287_v36  ;;  %6288 = vmatpush.msrb.mxu0 %v6287_v36  ;;  %6389 = vmatpush.msrb.mxu3 %v6287_v36  ;;  %v6298_v25 = vsub.f32 %v6269_v16, %v11350_v47 }
 0xff0   :  { %v6232_v62 = vmul.f32 %v9163_v18, %v6231_v42  ;;  %6294 = vmatmul.f32.vlgmr.msrb.gmra.mxu0 %v6293_v39  ;;  %6393 = vmatmul.f32.vlgmr.msrb.gmra.mxu3 %v6291_v33  ;;  %vm6254_vm13 = vcmp.eq.f32.partialorder %v6253_v9, 8.507059e+37 }
 0xff1   :  { %6420 = vmatpush.msra.mxu0 %v6322_v14  ;;  %6360 = vmatpush.msrb.mxu2 %v6327_v46  ;;  %v6328_v12 = vand.u32 4294901760, %v6327_v46  ;;  %v6299_v53 = vand.u32 4294901760, %v6298_v25  ;;  %v6255_v14 = vand.u32 2147483648, %v6198_v55 }
 0xff2   :  { %v6233_v8 = vadd.f32 %v9163_v18, %v6232_v62  ;;  %6363 = vmatmul.f32.vlgmr.msrb.gmra.mxu2 %v6290_v56 }
 0xff3   :  { %v9165_v0 = vpop.eup %9164  ;;  %6424 = vmatpush.msra.mxu0 %v6328_v12  ;;  %v6329_v31 = vsub.f32 %v6327_v46, %v6328_v12  ;;  %v6300_v41 = vsub.f32 %v6298_v25, %v6299_v53  ;;  %v6256_v46 = vor.u32 1.1754944e-38, %v6255_v14 }
 0xff4   :  { %v6237_v57 = vsel %vm6236_vm15, %v9163_v18, %v6233_v8  ;;  %v6245_v28 = vmul.f32 %v9165_v0, %v6198_v55  ;;  %vm6250_vm5 = vweird.f32 %v9165_v0  ;;  %v6489_v18 = vand.u32 4294901760, %v6462_v29 }
 0xff5   :  { %v6242_v49 = vsel %vm6239_vm2, %v6241_v23, %v6237_v57  ;;  %v6330_v16 = vand.u32 4294901760, %v6329_v31  ;;  %v6301_v42 = vand.u32 4294901760, %v6300_v41  ;;  %vm6251_vm12 = vmor %vm6249_vm6, %vm6250_vm5 }
 0xff6   :  { %v6243_v33 = vmul.f32 %v11318_v40, %v6242_v49  ;;  %v6246_v20 = vsub.f32 1.0, %v6245_v28  ;;  %v6529_v57 = vsub.f32 %v6462_v29, %v6489_v18 }
 0xff7   :  { %6331 = vmatpush.msrb.mxu1 %v6330_v16 }
 0xff8   :  { %v6468_v39 = vsel %vm366_vm1, %v6243_v33, 0  ;;  %v6247_v62 = vmul.f32 %v9165_v0, %v6246_v20  ;;  %6302 = vmatmul.f32.gmra.mxu0 %v6301_v42  ;;  %6333 = vmatmul.f32.vlgmr.msrb.gmra.mxu1 %v11345_v51 }
 0xff9   :  { %v6491_v56 = vand.u32 4294901760, %v6468_v39  ;;  %6399 = vmatmul.f32.gmra.mxu3 %v6299_v53  ;;  %6449 = vmatpush.msra.mxu1 %v11322_v19 }
 0xffa   :  { %v6248_v17 = vadd.f32 %v9165_v0, %v6247_v62  ;;  %6368 = vmatmul.f32.gmra.mxu2 %v6298_v25  ;;  %v6530_v25 = vand.u32 4294901760, %v6529_v57 }
 0xffb   :  { %v6492_v40 = vsub.f32 %v6468_v39, %v6491_v56  ;;  %6451 = vmatpush.msra.mxu1 %v6287_v36 }
 0xffc   :  { %v6252_v8 = vsel %vm6251_vm12, %v9165_v0, %v6248_v17  ;;  %v6531_v16 = vsub.f32 %v6529_v57, %v6530_v25 }
 0xffd   :  { %v6257_v12 = vsel %vm6254_vm13, %v6256_v46, %v6252_v8  ;;  %v6493_v23 = vand.u32 4294901760, %v6492_v40 }
 0xffe   :  { %v6258_v28 = vmul.f32 %v11333_v13, %v6257_v12  ;;  %v6532_v42 = vand.u32 4294901760, %v6531_v16 }
 0xfff   :  { %v6464_v31 = vpop.permute.xlu0 %6463  ;;  %v6494_v49 = vsub.f32 %v6492_v40, %v6493_v23 }
0x1000   :  { %v6487_v41 = vand.u32 4294901760, %v6464_v31  ;;  %v6471_v55 = vsel %vm366_vm1, %v6258_v28, 0  ;;  %6337 = vmatmul.f32.gmra.mxu1 %v11350_v47  ;;  %6426 = vmatmul.f32.vlgmr.msra.gmra.mxu0 %v11345_v51 }
0x1001   :  { %v6499_v19 = vand.u32 4294901760, %v6471_v55  ;;  %v6495_v36 = vand.u32 4294901760, %v6494_v49 }
0x1002   :  { %v6523_v53 = vsub.f32 %v6464_v31, %v6487_v41  ;;  %6488 = vmatpush.msra.mxu2 %v6487_v41  ;;  %6589 = vmatpush.msrb.mxu1 %v6487_v41 }
0x1003   :  { %v6500_v0 = vsub.f32 %v6471_v55, %v6499_v19 }
0x1004   :  { %v6524_v33 = vand.u32 4294901760, %v6523_v53  ;;  %6490 = vmatpush.msra.mxu2 %v6489_v18  ;;  %6559 = vmatpush.msrb.mxu0 %v6523_v53 }
0x1005   :  { %6591 = vmatpush.msrb.mxu1 %v6489_v18  ;;  %6496 = vmatmul.f32.vlgmr.msra.gmra.mxu2 %v6495_v36  ;;  %v6501_v13 = vand.u32 4294901760, %v6500_v0  ;;  %v8990_v36 = vld [vmem:[%s12585_s5 + $0x30] sm:$0xff] }
0x1006   :  { %v6525_v20 = vsub.f32 %v6523_v53, %v6524_v33  ;;  %6562 = vmatpush.msrb.mxu0 %v6529_v57  ;;  %6622 = vmatpush.msrb.mxu2 %v6524_v33  ;;  %v11375_v33 = vand.u32 4294901760, %v8990_v36 }
0x1007   :  { %v6502_v29 = vsub.f32 %v6500_v0, %v6501_v13 }
0x1008   :  { %v6526_v14 = vand.u32 4294901760, %v6525_v20  ;;  %6626 = vmatpush.msrb.mxu2 %v6530_v25  ;;  %6430 = vmatmul.f32.gmra.mxu0 %v11350_v47  ;;  %v8991_v25 = vld [vmem:[%s12585_s5 + $0x38] sm:$0xff] }
0x1009   :  { %6453 = vmatmul.f32.vlgmr.msra.gmra.mxu1 %v11345_v51  ;;  %v6503_v39 = vand.u32 4294901760, %v6502_v29  ;;  %v6777_v29 = vsub.f32 %v8990_v36, %v11375_v33 }
0x100a   :  { %6527 = vmatpush.msra.mxu3 %v6526_v14 }
0x100c   :  { %6533 = vmatpush.msra.mxu3 %v6532_v42 }
0x100d   :  { %6504 = vmatmul.f32.gmra.mxu2 %v6503_v39  ;;  %6535 = vmatmul.f32.vlgmr.msra.gmra.mxu3 %v6491_v56 }
0x100e   :  { %6651 = vmatpush.msrb.mxu3 %v6487_v41 }
0x1010   :  { %6653 = vmatpush.msrb.mxu3 %v6489_v18  ;;  %6565 = vmatmul.f32.vlgmr.msrb.gmra.mxu0 %v6492_v40 }
0x1011   :  { %6457 = vmatmul.f32.gmra.mxu1 %v11350_v47 }
0x1015   :  { %6539 = vmatmul.f32.gmra.mxu3 %v6499_v19  ;;  %6628 = vmatmul.f32.vlgmr.msrb.gmra.mxu2 %v6491_v56 }
0x1018   :  { %6570 = vmatmul.f32.gmra.mxu0 %v6500_v0  ;;  %v11373_v0 = vand.u32 4294901760, %v8991_v25 }
0x1019   :  { %6595 = vmatmul.f32.vlgmr.msrb.gmra.mxu1 %v6493_v23 }
0x101a   :  { %v6771_v16 = vsub.f32 %v8991_v25, %v11373_v0  ;;  %6869 = vmatpush.msra.mxu3 %v11373_v0  ;;  %6718 = vmatpush.msra.mxu0 %v11373_v0 }
0x101c   :  { %6825 = vmatpush.msra.mxu2 %v6771_v16  ;;  %6871 = vmatpush.msra.mxu3 %v11375_v33 }
0x101d   :  { %6632 = vmatmul.f32.gmra.mxu2 %v6499_v19  ;;  %6655 = vmatmul.f32.vlgmr.msrb.gmra.mxu3 %v6491_v56 }
0x101e   :  { %6720 = vmatpush.msra.mxu0 %v11375_v33  ;;  %6828 = vmatpush.msra.mxu2 %v6777_v29 }
0x1021   :  { %6601 = vmatmul.f32.gmra.mxu1 %v6501_v13 }
0x1025   :  { %6659 = vmatmul.f32.gmra.mxu3 %v6499_v19 }
0x106d   :  { %v6295_v51 = vpop.f32.mrf.mxu0 }
0x1073   :  { %v6394_v8 = vpop.f32.mrf.mxu3 }
0x1075   :  { %v6303_v62 = vpop.f32.mrf.mxu0  ;;  %v6334_v9 = vpop.f32.mrf.mxu1 }
0x1076   :  { %v6364_v17 = vpop.f32.mrf.mxu2  ;;  %v6335_v46 = vadd.f32 %v6334_v9, %v6295_v51  ;;  %v6772_v51 = vand.u32 4294901760, %v6771_v16 }
0x1078   :  { %v6365_v57 = vadd.f32 %v6364_v17, %v6335_v46  ;;  %v6773_v9 = vsub.f32 %v6771_v16, %v6772_v51 }
0x107a   :  { %v6395_v40 = vadd.f32 %v6394_v8, %v6365_v57 }
0x107c   :  { %v6400_v55 = vpop.f32.mrf.mxu3 }
0x107d   :  { %v6338_v12 = vpop.f32.mrf.mxu1  ;;  %v6427_v28 = vpop.f32.mrf.mxu0 }
0x107e   :  { %v6369_v18 = vpop.f32.mrf.mxu2  ;;  %v6339_v47 = vadd.f32 %v6338_v12, %v6303_v62  ;;  %v6428_v31 = vadd.f32 %v6427_v28, %v6395_v40  ;;  %v6778_v62 = vand.u32 4294901760, %v6777_v29  ;;  %v6774_v12 = vand.u32 4294901760, %v6773_v9 }
0x1080   :  { %v6370_v41 = vadd.f32 %v6369_v18, %v6339_v47  ;;  %v6779_v17 = vsub.f32 %v6777_v29, %v6778_v62  ;;  %6775 = vmatpush.msra.mxu1 %v6774_v12  ;;  %v8989_v29 = vld [vmem:[%s12585_s5 + $0x28] sm:$0xff] }
0x1082   :  { %v6401_v53 = vadd.f32 %v6400_v55, %v6370_v41  ;;  %v6780_v57 = vand.u32 4294901760, %v6779_v17 }
0x1084   :  { %6781 = vmatpush.msra.mxu1 %v6780_v57 }
0x1085   :  { %v6431_v19 = vpop.f32.mrf.mxu0 }
0x1086   :  { %v6454_v49 = vpop.f32.mrf.mxu1  ;;  %v6432_v13 = vadd.f32 %v6431_v19, %v6401_v53 }
0x1087   :  { %v6455_v23 = vadd.f32 %v6454_v49, %v6428_v31 }
0x1088   :  { %v6497_v56 = vpop.f32.mrf.mxu2 }
0x1089   :  { %6667 = vrot.lane.b32.xlu2 %v6455_v23, %s9219_s30 }
0x108d   :  { %v6566_v8 = vpop.f32.mrf.mxu0 }
0x108e   :  { %v6458_v20 = vpop.f32.mrf.mxu1 }
0x108f   :  { %v6459_v14 = vadd.f32 %v6458_v20, %v6432_v13 }
0x1090   :  { %v6505_v42 = vpop.f32.mrf.mxu2  ;;  %v6536_v39 = vpop.f32.mrf.mxu3 }
0x1091   :  { %6669 = vrot.lane.b32.xlu0 %v6459_v14, %s9219_s30  ;;  %v6537_v46 = vadd.f32 %v6536_v39, %v6497_v56  ;;  %v6721_v14 = vand.u32 4294901760, %v8989_v29 }
0x1093   :  { %v6567_v28 = vadd.f32 %v6566_v8, %v6537_v46  ;;  %v6783_v39 = vsub.f32 %v8989_v29, %v6721_v14  ;;  %6873 = vmatpush.msra.mxu3 %v6721_v14  ;;  %6722 = vmatpush.msra.mxu0 %v6721_v14 }
0x1095   :  { %v6571_v41 = vpop.f32.mrf.mxu0  ;;  %v6784_v17 = vand.u32 4294901760, %v6783_v39  ;;  %6831 = vmatpush.msra.mxu2 %v6783_v39 }
0x1096   :  { %v6596_v18 = vpop.f32.mrf.mxu1 }
0x1097   :  { %v6597_v31 = vadd.f32 %v6596_v18, %v6567_v28  ;;  %v6785_v8 = vsub.f32 %v6783_v39, %v6784_v17 }
0x1098   :  { %v6540_v47 = vpop.f32.mrf.mxu3  ;;  %v6629_v40 = vpop.f32.mrf.mxu2 }
0x1099   :  { %v6541_v49 = vadd.f32 %v6540_v47, %v6505_v42  ;;  %v6630_v23 = vadd.f32 %v6629_v40, %v6597_v31  ;;  %v8988_v42 = vld [vmem:[%s12585_s5 + $0x20] sm:$0xff]  ;;  %v6786_v57 = vand.u32 4294901760, %v6785_v8  ;;  %v5415_v47 = vadd.f32 %v11261_v6, %v11255_v58 }
0x109a   :  { %v6723_v9 = vand.u32 4294901760, %v8988_v42 }
0x109b   :  { %v6572_v55 = vadd.f32 %v6571_v41, %v6541_v49  ;;  %6787 = vmatpush.msra.mxu1 %v6786_v57  ;;  %v5445_v40 = vadd.f32 %v11263_v11, %v5415_v47 }
0x109c   :  { %v6789_v46 = vsub.f32 %v8988_v42, %v6723_v9  ;;  %6875 = vmatpush.msra.mxu3 %v6723_v9  ;;  %6724 = vmatpush.msra.mxu0 %v6723_v9 }
0x109e   :  { %v6602_v19 = vpop.f32.mrf.mxu1  ;;  %v6790_v12 = vand.u32 4294901760, %v6789_v46  ;;  %6834 = vmatpush.msra.mxu2 %v6789_v46  ;;  %6916 = vmatpush.msrb.mxu0 %v6772_v51  ;;  %v5475_v51 = vadd.f32 %v11257_v38, %v5445_v40  ;;  %v5419_v38 = vadd.f32 %v11267_v24, %v11259_v48  ;;  %v5617_v48 = vadd.f32 %v11273_v5, %v11279_v54 }
0x109f   :  { %v6603_v36 = vadd.f32 %v6602_v19, %v6572_v55 }
0x10a0   :  { %v6656_v53 = vpop.f32.mrf.mxu3  ;;  %v6633_v56 = vpop.f32.mrf.mxu2  ;;  %v6791_v18 = vsub.f32 %v6789_v46, %v6790_v12  ;;  %6920 = vmatpush.msrb.mxu0 %v6778_v62  ;;  %v5508_v62 = vadd.f32 %v11269_v15, %v5475_v51  ;;  %v5450_v15 = vadd.f32 %v11271_v32, %v5419_v38  ;;  %v5647_v32 = vadd.f32 %v11283_v1, %v5617_v48  ;;  %v9077_v51 = vld [vmem:[%s12586_s6 + $0x1] ss:$0 sm:$0xff] }
0x10a1   :  { %v6657_v25 = vadd.f32 %v6656_v53, %v6630_v23  ;;  %v6634_v13 = vadd.f32 %v6633_v56, %v6603_v36 }
0x10a2   :  { %v6792_v28 = vand.u32 4294901760, %v6791_v18  ;;  %6924 = vmatpush.msrb.mxu0 %v6784_v17  ;;  %v5535_v31 = vadd.f32 %v11277_v26, %v5508_v62  ;;  %v5481_v26 = vadd.f32 %v11265_v44, %v5450_v15 }
0x10a3   :  { %6671 = vrot.lane.b32.xlu1 %v6657_v25, %s9219_s30  ;;  %v5621_v25 = vadd.f32 %v11281_v50, %v11287_v10  ;;  %v5677_v50 = vadd.f32 %v11293_v27, %v5647_v32 }
0x10a4   :  { %6793 = vmatpush.msra.mxu1 %v6792_v28  ;;  %6928 = vmatpush.msrb.mxu0 %v6790_v12  ;;  %v5512_v55 = vadd.f32 %v11275_v21, %v5481_v26 }
0x10a5   :  { %v5710_v29 = vadd.f32 %v11295_v45, %v5677_v50 }
0x10a6   :  { %6959 = vmatpush.msrb.mxu1 %v11373_v0  ;;  %v5539_v19 = vadd.f32 %v11285_v3, %v5512_v55 }
0x10a8   :  { %v6660_v20 = vpop.f32.mrf.mxu3  ;;  %6961 = vmatpush.msrb.mxu1 %v11375_v33 }
0x10a9   :  { %v6661_v16 = vadd.f32 %v6660_v20, %v6634_v13  ;;  %v5652_v13 = vadd.f32 %v11291_v35, %v5621_v25 }
0x10aa   :  { %6963 = vmatpush.msrb.mxu1 %v6721_v14 }
0x10ab   :  { %6673 = vrot.lane.b32.xlu2 %v6661_v16, %s9219_s30  ;;  %v5683_v44 = vadd.f32 %v11299_v43, %v5652_v13  ;;  %v5737_v43 = vadd.f32 %v11289_v7, %v5710_v29 }
0x10ac   :  { %6965 = vmatpush.msrb.mxu1 %v6723_v9 }
0x10ad   :  { %v5714_v3 = vadd.f32 %v11301_v37, %v5683_v44 }
0x10af   :  { %v5741_v5 = vadd.f32 %v11297_v63, %v5714_v3 }
0x10e3   :  { %v6668_v49 = vpop.permute.xlu2 %6667 }
0x10e4   :  { %v6679_v41 = vsel %vm366_vm1, %v5535_v31, %v6668_v49 }
0x10e5   :  { %v6694_v58 = vsel %vm69_vm0, %v6679_v41, 0 }
0x10e6   :  { %v6725_v6 = vand.u32 4294901760, %v6694_v58 }
0x10e8   :  { %v6726_v23 = vsub.f32 %v6694_v58, %v6725_v6  ;;  %6795 = vmatmul.f32.vlgmr.msra.gmra.mxu1 %v6725_v6 }
0x10ea   :  { %v6727_v0 = vand.u32 4294901760, %v6726_v23  ;;  %6837 = vmatmul.f32.vlgmr.msra.gmra.mxu2 %v6726_v23 }
0x10ec   :  { %v6728_v33 = vsub.f32 %v6726_v23, %v6727_v0  ;;  %6879 = vmatmul.f32.vlgmr.msra.gmra.mxu3 %v6727_v0 }
0x10ee   :  { %v6729_v11 = vand.u32 4294901760, %v6728_v33 }
0x10f0   :  { %6730 = vmatmul.f32.vlgmr.msra.gmra.mxu0 %v6729_v11 }
0x1103   :  { %v6670_v53 = vpop.permute.xlu0 %6669 }
0x1104   :  { %v6680_v36 = vsel %vm366_vm1, %v5539_v19, %v6670_v53 }
0x1105   :  { %v6697_v56 = vsel %vm69_vm0, %v6680_v36, 0  ;;  %v6674_v35 = vpop.permute.xlu2 %6673 }
0x1106   :  { %v6733_v20 = vand.u32 4294901760, %v6697_v56  ;;  %v6682_v54 = vsel %vm366_vm1, %v5741_v5, %v6674_v35 }
0x1107   :  { %v6703_v1 = vsel %vm69_vm0, %v6682_v54, 0 }
0x1108   :  { %v6734_v24 = vsub.f32 %v6697_v56, %v6733_v20  ;;  %6799 = vmatmul.f32.gmra.mxu1 %v6733_v20  ;;  %v6749_v42 = vand.u32 4294901760, %v6703_v1 }
0x110a   :  { %6842 = vmatmul.f32.gmra.mxu2 %v6734_v24  ;;  %v6735_v21 = vand.u32 4294901760, %v6734_v24  ;;  %v6750_v17 = vsub.f32 %v6703_v1, %v6749_v42 }
0x110c   :  { %6885 = vmatmul.f32.gmra.mxu3 %v6735_v21  ;;  %v6736_v10 = vsub.f32 %v6734_v24, %v6735_v21  ;;  %v6751_v8 = vand.u32 4294901760, %v6750_v17 }
0x110e   :  { %v6737_v16 = vand.u32 4294901760, %v6736_v10  ;;  %v6752_v7 = vsub.f32 %v6750_v17, %v6751_v8 }
0x1110   :  { %6738 = vmatmul.f32.gmra.mxu0 %v6737_v16  ;;  %v6753_v12 = vand.u32 4294901760, %v6752_v7 }
0x1115   :  { %v6672_v14 = vpop.permute.xlu1 %6671 }
0x1116   :  { %v6681_v27 = vsel %vm366_vm1, %v5737_v43, %v6672_v14 }
0x1117   :  { %v6700_v37 = vsel %vm69_vm0, %v6681_v27, 0 }
0x1118   :  { %v6741_v39 = vand.u32 4294901760, %v6700_v37 }
0x111a   :  { %v6742_v9 = vsub.f32 %v6700_v37, %v6741_v39  ;;  %6803 = vmatmul.f32.gmra.mxu1 %v6741_v39 }
0x111c   :  { %6847 = vmatmul.f32.gmra.mxu2 %v6742_v9  ;;  %v6743_v45 = vand.u32 4294901760, %v6742_v9 }
0x111e   :  { %6891 = vmatmul.f32.gmra.mxu3 %v6743_v45  ;;  %v6744_v63 = vsub.f32 %v6742_v9, %v6743_v45 }
0x1120   :  { %v6745_v46 = vand.u32 4294901760, %v6744_v63 }
0x1122   :  { %6746 = vmatmul.f32.gmra.mxu0 %v6745_v46  ;;  %6807 = vmatmul.f32.gmra.mxu1 %v6749_v42 }
0x1124   :  { %6852 = vmatmul.f32.gmra.mxu2 %v6750_v17 }
0x1126   :  { %6897 = vmatmul.f32.gmra.mxu3 %v6751_v8 }
0x112a   :  { %6754 = vmatmul.f32.gmra.mxu0 %v6753_v12  ;;  %6967 = vmatmul.f32.vlgmr.msrb.gmra.mxu1 %v6725_v6 }
0x1132   :  { %6930 = vmatmul.f32.vlgmr.msrb.gmra.mxu0 %v6725_v6  ;;  %6971 = vmatmul.f32.gmra.mxu1 %v6733_v20 }
0x113a   :  { %6934 = vmatmul.f32.gmra.mxu0 %v6733_v20  ;;  %6975 = vmatmul.f32.gmra.mxu1 %v6741_v39 }
0x1142   :  { %6938 = vmatmul.f32.gmra.mxu0 %v6741_v39  ;;  %6979 = vmatmul.f32.gmra.mxu1 %v6749_v42 }
0x114a   :  { %6942 = vmatmul.f32.gmra.mxu0 %v6749_v42 }
0x1165   :  { %v6796_v57 = vpop.f32.mrf.mxu1 }
0x116d   :  { %v6731_v18 = vpop.f32.mrf.mxu0  ;;  %v6838_v58 = vpop.f32.mrf.mxu2 }
0x116e   :  { %v6732_v49 = vadd.f32 %v9077_v51, %v6731_v18 }
0x116f   :  { %v6880_v33 = vpop.f32.mrf.mxu3 }
0x1170   :  { %v6797_v41 = vadd.f32 %v6796_v57, %v6732_v49 }
0x1172   :  { %v6839_v23 = vadd.f32 %v6838_v58, %v6797_v41 }
0x1174   :  { %v6881_v38 = vadd.f32 %v6880_v33, %v6839_v23 }
0x1185   :  { %v6800_v28 = vpop.f32.mrf.mxu1 }
0x118d   :  { %v6739_v47 = vpop.f32.mrf.mxu0  ;;  %v6843_v26 = vpop.f32.mrf.mxu2 }
0x118e   :  { %v6740_v0 = vadd.f32 %v9077_v51, %v6739_v47 }
0x118f   :  { %v6886_v56 = vpop.f32.mrf.mxu3 }
0x1190   :  { %v6801_v15 = vadd.f32 %v6800_v28, %v6740_v0 }
0x1192   :  { %v6844_v53 = vadd.f32 %v6843_v26, %v6801_v15 }
0x1194   :  { %v6887_v48 = vadd.f32 %v6886_v56, %v6844_v53 }
0x1197   :  { %v6804_v40 = vpop.f32.mrf.mxu1 }
0x119f   :  { %v6747_v62 = vpop.f32.mrf.mxu0  ;;  %v6808_v31 = vpop.f32.mrf.mxu1 }
0x11a0   :  { %v6748_v25 = vadd.f32 %v9077_v51, %v6747_v62  ;;  %v6848_v32 = vpop.f32.mrf.mxu2 }
0x11a1   :  { %v6892_v35 = vpop.f32.mrf.mxu3 }
0x11a2   :  { %v6805_v44 = vadd.f32 %v6804_v40, %v6748_v25 }
0x11a4   :  { %v6849_v3 = vadd.f32 %v6848_v32, %v6805_v44 }
0x11a6   :  { %v6893_v5 = vadd.f32 %v6892_v35, %v6849_v3 }
0x11a7   :  { %v6755_v6 = vpop.f32.mrf.mxu0  ;;  %v6968_v11 = vpop.f32.mrf.mxu1 }
0x11a8   :  { %v6756_v10 = vadd.f32 %v9077_v51, %v6755_v6  ;;  %v6853_v27 = vpop.f32.mrf.mxu2 }
0x11a9   :  { %v6898_v9 = vpop.f32.mrf.mxu3 }
0x11aa   :  { %v6809_v54 = vadd.f32 %v6808_v31, %v6756_v10 }
0x11ac   :  { %v6854_v37 = vadd.f32 %v6853_v27, %v6809_v54 }
0x11ae   :  { %v6899_v17 = vadd.f32 %v6898_v9, %v6854_v37 }
0x11af   :  { %v6931_v55 = vpop.f32.mrf.mxu0  ;;  %v6972_v20 = vpop.f32.mrf.mxu1 }
0x11b0   :  { %v6932_v19 = vadd.f32 %v6931_v55, %v6881_v38 }
0x11b2   :  { %v6969_v36 = vadd.f32 %v6968_v11, %v6932_v19 }
0x11b4   :  { %v6983_v13 = vadd.f32 %v6969_v36, %v11018_v22 }
0x11b6   :  { %v6991_v24 = vsel %vm69_vm0, %v6983_v13, 0.0 }
0x11b7   :  { %v6935_v21 = vpop.f32.mrf.mxu0  ;;  %6992 = vadd.xlane.f32.xlu0 %v6991_v24  ;;  %v6976_v22 = vpop.f32.mrf.mxu1 }
0x11b8   :  { %v6936_v50 = vadd.f32 %v6935_v21, %v6887_v48 }
0x11ba   :  { %v6973_v16 = vadd.f32 %v6972_v20, %v6936_v50 }
0x11bc   :  { %v6984_v29 = vadd.f32 %v6973_v16, %v11030_v4  ;;  %v11459_v16 = vld [vmem:[%s12587_s7 + $0x1] ss:$0 sm:$0xff] }
0x11be   :  { %v6994_v43 = vsel %vm69_vm0, %v6984_v29, 0.0 }
0x11bf   :  { %v6939_v1 = vpop.f32.mrf.mxu0  ;;  %6995 = vadd.xlane.f32.xlu1 %v6994_v43  ;;  %v6980_v46 = vpop.f32.mrf.mxu1 }
0x11c0   :  { %v6940_v14 = vadd.f32 %v6939_v1, %v6893_v5  ;;  %v11464_v5 = vld [vmem:[%s12588_s8 + $0x1] ss:$0 sm:$0xff] }
0x11c2   :  { %v6977_v42 = vadd.f32 %v6976_v22, %v6940_v14 }
0x11c4   :  { %v6985_v39 = vadd.f32 %v6977_v42, %v11038_v61 }
0x11c6   :  { %v6997_v45 = vsel %vm69_vm0, %v6985_v39, 0.0 }
0x11c7   :  { %v6943_v63 = vpop.f32.mrf.mxu0  ;;  %6998 = vadd.xlane.f32.xlu2 %v6997_v45 }
0x11c8   :  { %v6944_v4 = vadd.f32 %v6943_v63, %v6899_v17 }
0x11ca   :  { %v6981_v8 = vadd.f32 %v6980_v46, %v6944_v4 }
0x11cc   :  { %v6986_v7 = vadd.f32 %v6981_v8, %v11046_v2 }
0x11ce   :  { %v7000_v12 = vsel %vm69_vm0, %v6986_v7, 0.0 }
0x11cf   :  { %7001 = vadd.xlane.f32.xlu0 %v7000_v12 }
0x122a   :  { %v6993_v57 = vpop.xlane.xlu0 %6992 }
0x122b   :  { %v7003_v18 = vmul.f32 %v6993_v57, %v9781_v59 }
0x122d   :  { %v7007_v28 = vsub.f32 %v6983_v13, %v7003_v18 }
0x122f   :  { %v7011_v47 = vmul.f32 %v7007_v28, %v7007_v28 }
0x1231   :  { %v7015_v61 = vsel %vm69_vm0, %v7011_v47, 0.0 }
0x1232   :  { %7016 = vadd.xlane.f32.xlu1 %v7015_v61  ;;  %v6996_v40 = vpop.xlane.xlu1 %6995 }
0x1233   :  { %v7004_v51 = vmul.f32 %v6996_v40, %v9781_v59 }
0x1235   :  { %v7008_v62 = vsub.f32 %v6984_v29, %v7004_v51 }
0x1237   :  { %v7012_v31 = vmul.f32 %v7008_v62, %v7008_v62 }
0x1239   :  { %v7018_v49 = vsel %vm69_vm0, %v7012_v31, 0.0 }
0x123a   :  { %v6999_v41 = vpop.xlane.xlu2 %6998  ;;  %7019 = vadd.xlane.f32.xlu2 %v7018_v49 }
0x123b   :  { %v7005_v2 = vmul.f32 %v6999_v41, %v9781_v59 }
0x123d   :  { %v11442_v58 = vsub.f32 %v6985_v39, %v7005_v2 }
0x123f   :  { %v7013_v6 = vmul.f32 %v11442_v58, %v11442_v58 }
0x1241   :  { %v7021_v23 = vsel %vm69_vm0, %v7013_v6, 0.0 }
0x1242   :  { %v7002_v0 = vpop.xlane.xlu0 %7001  ;;  %7022 = vadd.xlane.f32.xlu0 %v7021_v23 }
0x1243   :  { %v7006_v33 = vmul.f32 %v7002_v0, %v9781_v59 }
0x1245   :  { %v11448_v11 = vsub.f32 %v6986_v7, %v7006_v33 }
0x1247   :  { %v7014_v38 = vmul.f32 %v11448_v11, %v11448_v11 }
0x1249   :  { %v7024_v15 = vsel %vm69_vm0, %v7014_v38, 0.0 }
0x124a   :  { %7025 = vadd.xlane.f32.xlu1 %v7024_v15 }
0x12a5   :  { %v7017_v26 = vpop.xlane.xlu1 %7016 }
0x12a6   :  { %v7027_v55 = vmul.f32 %v7017_v26, %v9781_v59 }
0x12a8   :  { %v7031_v19 = vadd.f32 1e-05, %v7027_v55 }
0x12aa   :  { %9166 = vrsqrt.f32 %v7031_v19  ;;  %vm7041_vm7 = vweird.f32 %v7031_v19 }
0x12ad   :  { %v7020_v53 = vpop.xlane.xlu2 %7019 }
0x12ae   :  { %v7028_v25 = vmul.f32 %v7020_v53, %v9781_v59 }
0x12b0   :  { %v9167_v36 = vpop.eup %9166  ;;  %v7032_v56 = vadd.f32 1e-05, %v7028_v25 }
0x12b1   :  { %v7036_v13 = vmul.f32 %v9167_v36, %v7031_v19  ;;  %vm7042_vm1 = vweird.f32 %v9167_v36 }
0x12b2   :  { %9168 = vrsqrt.f32 %v7032_v56  ;;  %vm7043_vm15 = vmor %vm7041_vm7, %vm7042_vm1  ;;  %vm7051_vm5 = vweird.f32 %v7032_v56 }
0x12b3   :  { %v7037_v20 = vmul.f32 %v9167_v36, %v7036_v13 }
0x12b5   :  { %v7038_v48 = vmul.f32 0.5, %v7037_v20  ;;  %v7023_v44 = vpop.xlane.xlu0 %7022 }
0x12b6   :  { %v7029_v24 = vmul.f32 %v7023_v44, %v9781_v59 }
0x12b7   :  { %v7039_v32 = vsub.f32 1.5, %v7038_v48 }
0x12b8   :  { %v9169_v21 = vpop.eup %9168  ;;  %v7033_v50 = vadd.f32 1e-05, %v7029_v24 }
0x12b9   :  { %v7040_v3 = vmul.f32 %v9167_v36, %v7039_v32  ;;  %v7046_v10 = vmul.f32 %v9169_v21, %v7032_v56  ;;  %vm7052_vm2 = vweird.f32 %v9169_v21 }
0x12ba   :  { %9170 = vrsqrt.f32 %v7033_v50  ;;  %vm7053_vm6 = vmor %vm7051_vm5, %vm7052_vm2  ;;  %vm7061_vm13 = vweird.f32 %v7033_v50 }
0x12bb   :  { %v7044_v35 = vsel %vm7043_vm15, %v9167_v36, %v7040_v3  ;;  %v7047_v29 = vmul.f32 %v9169_v21, %v7046_v10 }
0x12bc   :  { %v7075_v54 = vmul.f32 %v7044_v35, %v7007_v28 }
0x12bd   :  { %v7048_v43 = vmul.f32 0.5, %v7047_v29  ;;  %v7026_v22 = vpop.xlane.xlu1 %7025 }
0x12be   :  { %v7082_v1 = vmul.f32 %v11459_v16, %v7075_v54  ;;  %v7030_v14 = vmul.f32 %v7026_v22, %v9781_v59 }
0x12bf   :  { %v7049_v27 = vsub.f32 1.5, %v7048_v43 }
0x12c0   :  { %v9171_v37 = vpop.eup %9170  ;;  %v7089_v42 = vadd.f32 %v11464_v5, %v7082_v1  ;;  %v7034_v39 = vadd.f32 1e-05, %v7030_v14 }
0x12c1   :  { %v7050_v9 = vmul.f32 %v9169_v21, %v7049_v27  ;;  %v7056_v17 = vmul.f32 %v9171_v37, %v7033_v50  ;;  %vm7062_vm12 = vweird.f32 %v9171_v37 }
0x12c2   :  { %v11470_v45 = vmul.f32 %v7089_v42, %v9829_v60  ;;  %9172 = vrsqrt.f32 %v7034_v39  ;;  %vm7063_vm1 = vmor %vm7061_vm13, %vm7062_vm12  ;;  %vm7071_vm15 = vweird.f32 %v7034_v39 }
0x12c3   :  { %v7054_v63 = vsel %vm7053_vm6, %v9169_v21, %v7050_v9  ;;  %v7057_v4 = vmul.f32 %v9171_v37, %v7056_v17 }
0x12c4   :  { %v7076_v46 = vmul.f32 %v7054_v63, %v7008_v62  ;;  %v7101_v7 = vrot.slane %v11470_v45, 4 }
0x12c5   :  { %v7058_v8 = vmul.f32 0.5, %v7057_v4 }
0x12c6   :  { %v7083_v12 = vmul.f32 %v11459_v16, %v7076_v46  ;;  %v11476_v40 = vsel %vm2664_vm14, 0.0, %v7101_v7 }
0x12c7   :  { %v7059_v57 = vsub.f32 1.5, %v7058_v8  ;;  %v7165_v6 = vrot.slane %v11476_v40, 3  ;;  %v7143_v23 = vrot.slane %v11476_v40, 2  ;;  %v7121_v38 = vrot.slane %v11476_v40, 1 }
0x12c8   :  { %v9173_v18 = vpop.eup %9172  ;;  %v7090_v28 = vadd.f32 %v11464_v5, %v7083_v12 }
0x12c9   :  { %v7060_v47 = vmul.f32 %v9171_v37, %v7059_v57  ;;  %v7066_v61 = vmul.f32 %v9173_v18, %v7034_v39  ;;  %vm7072_vm7 = vweird.f32 %v9173_v18 }
0x12ca   :  { %v11479_v51 = vmul.f32 %v7090_v28, %v9813_v30  ;;  %vm7073_vm2 = vmor %vm7071_vm15, %vm7072_vm7  ;;  %v9009_v28 = vld [vmem:[%s12589_s9 + $0x190] sm:$0xff] }
0x12cb   :  { %v7064_v62 = vsel %vm7063_vm1, %v9171_v37, %v7060_v47  ;;  %v7067_v31 = vmul.f32 %v9173_v18, %v7066_v61  ;;  %v11561_v61 = vand.u32 4294901760, %v9009_v28 }
0x12cc   :  { %v7102_v49 = vrot.slane %v11479_v51, 4  ;;  %v7077_v41 = vmul.f32 %v7064_v62, %v11442_v58 }
0x12cd   :  { %v7068_v2 = vmul.f32 0.5, %v7067_v31 }
0x12ce   :  { %v11486_v0 = vsel %vm2664_vm14, %v7101_v7, %v7102_v49  ;;  %v7084_v33 = vmul.f32 %v11459_v16, %v7077_v41  ;;  %v11498_v13 = vsel %vm2664_vm14, %v7102_v49, 0.0 }
0x12cf   :  { %v7069_v15 = vsub.f32 1.5, %v7068_v2  ;;  %v7166_v26 = vrot.slane %v11486_v0, 3  ;;  %v7144_v55 = vrot.slane %v11486_v0, 2  ;;  %v7122_v58 = vrot.slane %v11486_v0, 1 }
0x12d0   :  { %v7091_v19 = vadd.f32 %v11464_v5, %v7084_v33  ;;  %v7168_v24 = vrot.slane %v11498_v13, 3  ;;  %v7124_v32 = vrot.slane %v11498_v13, 1  ;;  %v7146_v50 = vrot.slane %v11498_v13, 2 }
0x12d1   :  { %v7070_v53 = vmul.f32 %v9173_v18, %v7069_v15  ;;  %v7167_v25 = vsel %vm2731_vm8, %v7165_v6, %v7166_v26  ;;  %v7145_v36 = vsel %vm2708_vm3, %v7143_v23, %v7144_v55  ;;  %v7123_v56 = vsel %vm2685_vm4, %v7121_v38, %v7122_v58 }
0x12d2   :  { %7175 = vrot.lane.b32.xlu1 %v7167_v25, %s9214_s21  ;;  %7153 = vrot.lane.b32.xlu0 %v7145_v36, %s9215_s26  ;;  %v11503_v20 = vmul.f32 %v7091_v19, %v12683_v52  ;;  %v7169_v35 = vsel %vm2731_vm8, %v7166_v26, %v7168_v24  ;;  %v7125_v29 = vsel %vm2685_vm4, %v7122_v58, %v7124_v32  ;;  %v7246_v62 = vrot.slane %v11486_v0, 7 }
0x12d3   :  { %v7074_v48 = vsel %vm7073_vm2, %v9173_v18, %v7070_v53  ;;  %7131 = vrot.lane.b32.xlu2 %v7123_v56, %s9222_s17  ;;  %v9010_v18 = vld [vmem:[%s12589_s9 + $0x198] sm:$0xff]  ;;  %v7202_v31 = vrot.slane %v11486_v0, 5  ;;  %v7224_v49 = vrot.slane %v11486_v0, 6  ;;  %v11570_v2 = vsub.f32 %v9009_v28, %v11561_v61 }
0x12d4   :  { %v7078_v44 = vmul.f32 %v7074_v48, %v11448_v11  ;;  %v7104_v3 = vrot.slane %v11503_v20, 4  ;;  %v7147_v11 = vsel %vm2708_vm3, %v7144_v55, %v7146_v50  ;;  %v11559_v47 = vand.u32 4294901760, %v9010_v18 }
0x12d5   :  { %v7245_v6 = vrot.slane %v11476_v40, 7  ;;  %v7201_v23 = vrot.slane %v11476_v40, 5  ;;  %v7223_v33 = vrot.slane %v11476_v40, 6  ;;  %v7414_v15 = vand.u32 4294901760, %v11570_v2 }
0x12d6   :  { %v7085_v21 = vmul.f32 %v11459_v16, %v7078_v44  ;;  %v11522_v16 = vsel %vm2664_vm14, 0.0, %v7104_v3  ;;  %v11567_v41 = vsub.f32 %v9010_v18, %v11559_v47  ;;  %7589 = vmatpush.msra.mxu1 %v11559_v47  ;;  %7342 = vmatpush.msrb.mxu2 %v11559_v47  ;;  %v7248_v56 = vrot.slane %v11498_v13, 7 }
0x12d7   :  { %v7170_v22 = vrot.slane %v11522_v16, 3  ;;  %v7148_v1 = vrot.slane %v11522_v16, 2  ;;  %v7126_v37 = vrot.slane %v11522_v16, 1  ;;  %v7247_v26 = vsel %vm2814_vm11, %v7245_v6, %v7246_v62 }
0x12d8   :  { %v7092_v10 = vadd.f32 %v11464_v5, %v7085_v21  ;;  %v7408_v38 = vand.u32 4294901760, %v11567_v41  ;;  %7521 = vmatpush.msra.mxu0 %v11567_v41  ;;  %7591 = vmatpush.msra.mxu1 %v11561_v61  ;;  %v7203_v55 = vsel %vm2768_vm10, %v7201_v23, %v7202_v31  ;;  %v7225_v58 = vsel %vm2791_vm9, %v7223_v33, %v7224_v49 }
0x12d9   :  { %7344 = vmatpush.msrb.mxu2 %v11561_v61  ;;  %v7415_v53 = vsub.f32 %v11570_v2, %v7414_v15  ;;  %v7204_v48 = vrot.slane %v11498_v13, 5  ;;  %v7226_v44 = vrot.slane %v11498_v13, 6  ;;  %v7249_v24 = vsel %vm2814_vm11, %v7246_v62, %v7248_v56 }
0x12da   :  { %v11516_v54 = vmul.f32 %v7092_v10, %v12684_v34  ;;  %7177 = vrot.lane.b32.xlu1 %v7169_v35, %s9214_s21  ;;  %7133 = vrot.lane.b32.xlu0 %v7125_v29, %s9222_s17  ;;  %v7409_v19 = vsub.f32 %v11567_v41, %v7408_v38  ;;  %v7250_v35 = vrot.slane %v11522_v16, 7  ;;  %v7206_v29 = vrot.slane %v11522_v16, 5 }
0x12db   :  { %7155 = vrot.lane.b32.xlu2 %v7147_v11, %s9215_s26  ;;  %7524 = vmatpush.msra.mxu0 %v11570_v2  ;;  %v7416_v36 = vand.u32 4294901760, %v7415_v53  ;;  %v7205_v32 = vsel %vm2768_vm10, %v7202_v31, %v7204_v48  ;;  %v7227_v21 = vsel %vm2791_vm9, %v7224_v49, %v7226_v44  ;;  %v7228_v11 = vrot.slane %v11522_v16, 6  ;;  %v9004_v53 = vld [vmem:[%s12589_s9 + $0x168] sm:$0xff] }
0x12dc   :  { %12685 = vst [vmem:[#allocation10_spill] sm:$0xff] %v11516_v54  ;;  %v7105_v5 = vrot.slane %v11516_v54, 4  ;;  %v7410_v25 = vand.u32 4294901760, %v7409_v19  ;;  %v11686_v56 = vand.u32 4294901760, %v9004_v53 }
0x12de   :  { %v11527_v43 = vsel %vm2664_vm14, %v7104_v3, %v7105_v5  ;;  %v11539_v63 = vsel %vm2664_vm14, %v7105_v5, 0.0  ;;  %7411 = vmatpush.msrb.mxu3 %v7410_v25  ;;  %v9003_v25 = vld [vmem:[%s12589_s9 + $0x160] sm:$0xff] }
0x12df   :  { %v7171_v14 = vrot.slane %v11527_v43, 3  ;;  %v7149_v27 = vrot.slane %v11527_v43, 2  ;;  %v7127_v42 = vrot.slane %v11527_v43, 1  ;;  %v7173_v4 = vrot.slane %v11539_v63, 3 }
0x12e0   :  { %v7129_v46 = vrot.slane %v11539_v63, 1  ;;  %v7151_v8 = vrot.slane %v11539_v63, 2  ;;  %7417 = vmatpush.msrb.mxu3 %v7416_v36  ;;  %v7251_v50 = vrot.slane %v11527_v43, 7  ;;  %v7207_v3 = vrot.slane %v11527_v43, 5  ;;  %v9002_v36 = vld [vmem:[%s12589_s9 + $0x158] sm:$0xff] }
0x12e1   :  { %v7172_v39 = vsel %vm2731_vm8, %v7170_v22, %v7171_v14  ;;  %v7150_v9 = vsel %vm2708_vm3, %v7148_v1, %v7149_v27  ;;  %v7128_v17 = vsel %vm2685_vm4, %v7126_v37, %v7127_v42  ;;  %v7174_v7 = vsel %vm2731_vm8, %v7171_v14, %v7173_v4  ;;  %v9007_v4 = vld [vmem:[%s12589_s9 + $0x180] sm:$0xff] }
0x12e2   :  { %7179 = vrot.lane.b32.xlu1 %v7172_v39, %s9214_s21  ;;  %7135 = vrot.lane.b32.xlu0 %v7128_v17, %s9222_s17  ;;  %v7130_v12 = vsel %vm2685_vm4, %v7127_v42, %v7129_v46  ;;  %v7152_v57 = vsel %vm2708_vm3, %v7149_v27, %v7151_v8  ;;  %v7229_v10 = vrot.slane %v11527_v43, 6  ;;  %v7252_v5 = vsel %vm2814_vm11, %v7250_v35, %v7251_v50  ;;  %v9008_v17 = vld [vmem:[%s12589_s9 + $0x188] sm:$0xff]  ;;  %v9006_v46 = vld [vmem:[%s12589_s9 + $0x178] sm:$0xff] }
0x12e3   :  { %7157 = vrot.lane.b32.xlu2 %v7150_v9, %s9215_s26  ;;  %v7208_v22 = vsel %vm2768_vm10, %v7206_v29, %v7207_v3  ;;  %v7253_v14 = vrot.slane %v11539_v63, 7  ;;  %v7209_v27 = vrot.slane %v11539_v63, 5  ;;  %v7231_v37 = vrot.slane %v11539_v63, 6 }
0x12e4   :  { %v7230_v1 = vsel %vm2791_vm9, %v7228_v11, %v7229_v10  ;;  %v11634_v8 = vand.u32 4294901760, %v9008_v17  ;;  %v11688_v48 = vand.u32 4294901760, %v9003_v25  ;;  %v11691_v44 = vand.u32 4294901760, %v9002_v36 }
0x12e5   :  { %v7254_v42 = vsel %vm2814_vm11, %v7251_v50, %v7253_v14  ;;  %v7210_v39 = vsel %vm2768_vm10, %v7207_v3, %v7209_v27  ;;  %v7232_v9 = vsel %vm2791_vm9, %v7229_v10, %v7231_v37  ;;  %v11704_v10 = vsub.f32 %v9004_v53, %v11686_v56 }
0x12e6   :  { %v11646_v28 = vsub.f32 %v9008_v17, %v11634_v8  ;;  %7593 = vmatpush.msra.mxu1 %v11634_v8  ;;  %7346 = vmatpush.msrb.mxu2 %v11634_v8  ;;  %v11707_v35 = vsub.f32 %v9003_v25, %v11688_v48  ;;  %v11710_v29 = vsub.f32 %v9002_v36, %v11691_v44  ;;  %v9000_v17 = vld [vmem:[%s12589_s9 + $0x148] sm:$0xff]  ;;  %vm12690_vm3 = vcmask 523264  }
0x12e7   :  { %vm12691_vm4 = vcmask 785408   ;;  %vm12695_vm8 = vmmov %vm12690_vm3 }
0x12e8   :  { %v7420_v6 = vand.u32 4294901760, %v11646_v28  ;;  %7527 = vmatpush.msra.mxu0 %v11646_v28  ;;  %v12630_v14 = vand.u32 4294901760, %v11710_v29  ;;  %vm12696_vm9 = vmmov %vm12691_vm4 }
0x12e9   :  { %vm12699_vm10 = vmmov %vm12690_vm3 }
0x12ea   :  { %7181 = vrot.lane.b32.xlu1 %v7174_v7, %s9214_s21  ;;  %7137 = vrot.lane.b32.xlu0 %v7130_v12, %s9222_s17  ;;  %v11636_v7 = vand.u32 4294901760, %v9007_v4  ;;  %v11638_v12 = vand.u32 4294901760, %v9006_v46  ;;  %vm12701_vm11 = vmmov %vm12691_vm4 }
0x12eb   :  { %7159 = vrot.lane.b32.xlu2 %v7152_v57, %s9215_s26  ;;  %v9005_v57 = vld [vmem:[%s12589_s9 + $0x170] sm:$0xff]  ;;  %vm12703_vm5 = vmmov %vm12690_vm3 }
0x12ec   :  { %v11643_v18 = vand.u32 4294901760, %v9005_v57  ;;  %v11649_v62 = vsub.f32 %v9007_v4, %v11636_v7  ;;  %v11652_v31 = vsub.f32 %v9006_v46, %v11638_v12  ;;  %7595 = vmatpush.msra.mxu1 %v11636_v7  ;;  %7348 = vmatpush.msrb.mxu2 %v11636_v7  ;;  %v8999_v4 = vld [vmem:[%s12589_s9 + $0x140] sm:$0xff]  ;;  %v8998_v46 = vld [vmem:[%s12589_s9 + $0x138] sm:$0xff]  ;;  %vm12705_vm6 = vmmov %vm12691_vm4 }
0x12ed   :  { %v11756_v25 = vand.u32 4294901760, %v8999_v4  ;;  %v11758_v36 = vand.u32 4294901760, %v8998_v46  ;;  %vm12707_vm12 = vmmov %vm12690_vm3 }
0x12ee   :  { %v11657_v49 = vsub.f32 %v9005_v57, %v11643_v18  ;;  %v7426_v23 = vand.u32 4294901760, %v11649_v62  ;;  %v7432_v33 = vand.u32 4294901760, %v11652_v31  ;;  %7530 = vmatpush.msra.mxu0 %v11649_v62  ;;  %7597 = vmatpush.msra.mxu1 %v11638_v12  ;;  %vm12709_vm13 = vmmov %vm12691_vm4 }
0x12ef   :  { %7350 = vmatpush.msrb.mxu2 %v11638_v12  ;;  %vm12712_vm1 = vmmov %vm12690_vm3 }
0x12f0   :  { %v7433_v19 = vsub.f32 %v11652_v31, %v7432_v33  ;;  %7533 = vmatpush.msra.mxu0 %v11652_v31  ;;  %7599 = vmatpush.msra.mxu1 %v11643_v18  ;;  %vm12713_vm7 = vmmov %vm12691_vm4 }
0x12f1   :  { %7352 = vmatpush.msrb.mxu2 %v11643_v18  ;;  %vm12717_vm15 = vmmov %vm12712_vm1 }
0x12f2   :  { %7255 = vrot.lane.b32.xlu1 %v7247_v26, %s9214_s21  ;;  %7211 = vrot.lane.b32.xlu0 %v7203_v55, %s9222_s17  ;;  %v7438_v26 = vand.u32 4294901760, %v11657_v49  ;;  %v7421_v55 = vsub.f32 %v11646_v28, %v7420_v6  ;;  %v7434_v11 = vand.u32 4294901760, %v7433_v19  ;;  %v8997_v19 = vld [vmem:[%s12589_s9 + $0x130] sm:$0xff]  ;;  %vm12718_vm2 = vmmov %vm12691_vm4 }
0x12f3   :  { %7233 = vrot.lane.b32.xlu2 %v7225_v58, %s9215_s26  ;;  %v7427_v58 = vsub.f32 %v11649_v62, %v7426_v23  ;;  %7536 = vmatpush.msra.mxu0 %v11657_v49  ;;  %v9023_v62 = vld [vmem:[%s12589_s9 + $0x200] sm:$0xff] }
0x12f4   :  { %v7439_v50 = vsub.f32 %v11657_v49, %v7438_v26  ;;  %7601 = vmatpush.msra.mxu1 %v11686_v56  ;;  %7354 = vmatpush.msrb.mxu2 %v11686_v56  ;;  %v12686_v49 = vand.u32 4294901760, %v11704_v10 }
0x12f5   :  { %7539 = vmatpush.msra.mxu0 %v11704_v10 }
0x12f6   :  { %v7440_v27 = vand.u32 4294901760, %v7439_v50  ;;  %7603 = vmatpush.msra.mxu1 %v11688_v48  ;;  %7356 = vmatpush.msrb.mxu2 %v11688_v48  ;;  %v11769_v50 = vsub.f32 %v8999_v4, %v11756_v25 }
0x12f7   :  { %7542 = vmatpush.msra.mxu0 %v11707_v35 }
0x12f8   :  { %7605 = vmatpush.msra.mxu1 %v11691_v44  ;;  %7358 = vmatpush.msrb.mxu2 %v11691_v44 }
0x12f9   :  { %7545 = vmatpush.msra.mxu0 %v11710_v29 }
0x12fa   :  { %7257 = vrot.lane.b32.xlu1 %v7249_v24, %s9214_s21  ;;  %7213 = vrot.lane.b32.xlu0 %v7205_v32, %s9222_s17  ;;  %v9001_v24 = vld [vmem:[%s12589_s9 + $0x150] sm:$0xff]  ;;  %v7422_v32 = vand.u32 4294901760, %v7421_v55 }
0x12fb   :  { %7235 = vrot.lane.b32.xlu2 %v7227_v21, %s9215_s26  ;;  %v7428_v21 = vand.u32 4294901760, %v7427_v58  ;;  %v11701_v3 = vand.u32 4294901760, %v9001_v24  ;;  %v11748_v58 = vand.u32 4294901760, %v9000_v17 }
0x12fc   :  { %7423 = vmatpush.msrb.mxu3 %v7422_v32 }
0x12fd   :  { %v11763_v32 = vsub.f32 %v9000_v17, %v11748_v58  ;;  %7607 = vmatpush.msra.mxu1 %v11701_v3  ;;  %7360 = vmatpush.msrb.mxu2 %v11701_v3 }
0x12fe   :  { %7429 = vmatpush.msrb.mxu3 %v7428_v21 }
0x12ff   :  { %7609 = vmatpush.msra.mxu1 %v11748_v58  ;;  %7362 = vmatpush.msrb.mxu2 %v11748_v58 }
0x1300   :  { %7435 = vmatpush.msrb.mxu3 %v7434_v11  ;;  %v11772_v11 = vsub.f32 %v8998_v46, %v11758_v36 }
0x1301   :  { %7611 = vmatpush.msra.mxu1 %v11756_v25  ;;  %7364 = vmatpush.msrb.mxu2 %v11756_v25 }
0x1302   :  { %7259 = vrot.lane.b32.xlu1 %v7252_v5, %s9214_s21  ;;  %7215 = vrot.lane.b32.xlu0 %v7208_v22, %s9222_s17  ;;  %v11715_v5 = vsub.f32 %v9001_v24, %v11701_v3  ;;  %v12632_v22 = vand.u32 4294901760, %v11704_v10  ;;  %v11760_v24 = vand.u32 4294901760, %v8997_v19  ;;  %v12624_v17 = vand.u32 4294901760, %v11772_v11 }
0x1303   :  { %7237 = vrot.lane.b32.xlu2 %v7230_v1, %s9215_s26  ;;  %v12631_v1 = vand.u32 4294901760, %v11707_v35  ;;  %7441 = vmatpush.msrb.mxu3 %v7440_v27 }
0x1304   :  { %v12629_v37 = vand.u32 4294901760, %v11715_v5  ;;  %7548 = vmatpush.msra.mxu0 %v11715_v5  ;;  %v11775_v27 = vsub.f32 %v8997_v19, %v11760_v24  ;;  %7613 = vmatpush.msra.mxu1 %v11758_v36 }
0x1305   :  { %7366 = vmatpush.msrb.mxu2 %v11758_v36 }
0x1306   :  { %v7463_v55 = vsub.f32 %v11715_v5, %v12629_v37  ;;  %7551 = vmatpush.msra.mxu0 %v11763_v32  ;;  %v12625_v4 = vand.u32 4294901760, %v11775_v27  ;;  %7615 = vmatpush.msra.mxu1 %v11760_v24 }
0x1307   :  { %7368 = vmatpush.msrb.mxu2 %v11760_v24 }
0x1308   :  { %7554 = vmatpush.msra.mxu0 %v11769_v50 }
0x130a   :  { %7261 = vrot.lane.b32.xlu1 %v7254_v42, %s9214_s21  ;;  %7217 = vrot.lane.b32.xlu0 %v7210_v39, %s9222_s17  ;;  %v7445_v42 = vsub.f32 %v11704_v10, %v12632_v22  ;;  %v7451_v39 = vsub.f32 %v11707_v35, %v12631_v1 }
0x130b   :  { %7239 = vrot.lane.b32.xlu2 %v7232_v9, %s9215_s26  ;;  %v7457_v9 = vsub.f32 %v11710_v29, %v12630_v14  ;;  %7557 = vmatpush.msra.mxu0 %v11772_v11 }
0x130c   :  { %v7446_v57 = vand.u32 4294901760, %v7445_v42  ;;  %v7452_v53 = vand.u32 4294901760, %v7451_v39  ;;  %v12628_v42 = vand.u32 4294901760, %v11763_v32  ;;  %v7464_v39 = vand.u32 4294901760, %v7463_v55 }
0x130d   :  { %v7458_v21 = vand.u32 4294901760, %v7457_v9  ;;  %v12626_v9 = vand.u32 4294901760, %v11769_v50  ;;  %v7481_v55 = vsub.f32 %v11772_v11, %v12624_v17  ;;  %7560 = vmatpush.msra.mxu0 %v11775_v27 }
0x130e   :  { %7447 = vmatpush.msrb.mxu3 %v7446_v57  ;;  %v7469_v46 = vsub.f32 %v11763_v32, %v12628_v42 }
0x130f   :  { %v7475_v57 = vsub.f32 %v11769_v50, %v12626_v9  ;;  %v7482_v17 = vand.u32 4294901760, %v7481_v55 }
0x1310   :  { %7453 = vmatpush.msrb.mxu3 %v7452_v53  ;;  %v7470_v19 = vand.u32 4294901760, %v7469_v46 }
0x1311   :  { %v7476_v53 = vand.u32 4294901760, %v7475_v57 }
0x1312   :  { %7459 = vmatpush.msrb.mxu3 %v7458_v21  ;;  %v7487_v21 = vsub.f32 %v11775_v27, %v12625_v4  ;;  %v8995_v4 = vld [vmem:[%s12589_s9 + $0x120] sm:$0xff] }
0x1314   :  { %7465 = vmatpush.msrb.mxu3 %v7464_v39  ;;  %v7488_v46 = vand.u32 4294901760, %v7487_v21  ;;  %v8996_v39 = vld [vmem:[%s12589_s9 + $0x128] sm:$0xff] }
0x1315   :  { %v11808_v57 = vand.u32 4294901760, %v8996_v39 }
0x1316   :  { %7471 = vmatpush.msrb.mxu3 %v7470_v19  ;;  %v11816_v19 = vand.u32 4294901760, %v8995_v4 }
0x1317   :  { %v11814_v9 = vsub.f32 %v8996_v39, %v11808_v57  ;;  %7617 = vmatpush.msra.mxu1 %v11808_v57  ;;  %7370 = vmatpush.msrb.mxu2 %v11808_v57  ;;  %v9024_v39 = vld [vmem:[%s12589_s9 + $0x208] sm:$0xff] }
0x1318   :  { %7477 = vmatpush.msrb.mxu3 %v7476_v53  ;;  %v11822_v53 = vsub.f32 %v8995_v4, %v11816_v19  ;;  %v9025_v4 = vld [vmem:[%s12589_s9 + $0x210] sm:$0xff]  ;;  %v11847_v37 = vand.u32 4294901760, %v9024_v39 }
0x1319   :  { %v12627_v55 = vand.u32 4294901760, %v11814_v9  ;;  %7563 = vmatpush.msra.mxu0 %v11814_v9  ;;  %7619 = vmatpush.msra.mxu1 %v11816_v19  ;;  %v11845_v42 = vand.u32 4294901760, %v9025_v4 }
0x131a   :  { %7483 = vmatpush.msrb.mxu3 %v7482_v17  ;;  %7372 = vmatpush.msrb.mxu2 %v11816_v19  ;;  %v12633_v21 = vand.u32 4294901760, %v11822_v53  ;;  %v11862_v22 = vsub.f32 %v9024_v39, %v11847_v37  ;;  %v11895_v39 = vand.u32 4294901760, %v9023_v62 }
0x131b   :  { %v7493_v17 = vsub.f32 %v11814_v9, %v12627_v55  ;;  %7566 = vmatpush.msra.mxu0 %v11822_v53 }
0x131c   :  { %7489 = vmatpush.msrb.mxu3 %v7488_v46  ;;  %v9026_v46 = vld [vmem:[%s12589_s9 + $0x218] sm:$0xff]  ;;  %7648 = vmatpush.msra.mxu2 %v7408_v38  ;;  %v7499_v1 = vsub.f32 %v11822_v53, %v12633_v21  ;;  %v11858_v38 = vsub.f32 %v9025_v4, %v11845_v42  ;;  %v11910_v31 = vsub.f32 %v9023_v62, %v11895_v39 }
0x131d   :  { %v11843_v55 = vand.u32 4294901760, %v9026_v46  ;;  %v7494_v14 = vand.u32 4294901760, %v7493_v17 }
0x131e   :  { %7652 = vmatpush.msra.mxu2 %v7414_v15  ;;  %v7500_v17 = vand.u32 4294901760, %v7499_v1  ;;  %v12635_v15 = vand.u32 4294901760, %v11858_v38 }
0x131f   :  { %v11855_v41 = vsub.f32 %v9026_v46, %v11843_v55  ;;  %7776 = vmatpush.msrb.mxu0 %v11843_v55  ;;  %7495 = vmatpush.msrb.mxu3 %v7494_v14  ;;  %v12634_v46 = vand.u32 4294901760, %v11862_v22 }
0x1320   :  { %7656 = vmatpush.msra.mxu2 %v7420_v6  ;;  %v7849_v6 = vsub.f32 %v11858_v38, %v12635_v15 }
0x1321   :  { %v12636_v2 = vand.u32 4294901760, %v11855_v41  ;;  %7778 = vmatpush.msrb.mxu0 %v11845_v42  ;;  %7501 = vmatpush.msrb.mxu3 %v7500_v17  ;;  %v7855_v1 = vsub.f32 %v11862_v22, %v12634_v46  ;;  %v9020_v17 = vld [vmem:[%s12589_s9 + $0x1e8] sm:$0xff] }
0x1322   :  { %7660 = vmatpush.msra.mxu2 %v7426_v23  ;;  %v9021_v23 = vld [vmem:[%s12589_s9 + $0x1f0] sm:$0xff]  ;;  %v7850_v4 = vand.u32 4294901760, %v7849_v6 }
0x1323   :  { %7727 = vmatpush.msra.mxu3 %v11559_v47  ;;  %v7843_v28 = vsub.f32 %v11855_v41, %v12636_v2  ;;  %7780 = vmatpush.msrb.mxu0 %v11847_v37  ;;  %v9022_v47 = vld [vmem:[%s12589_s9 + $0x1f8] sm:$0xff]  ;;  %v11902_v15 = vand.u32 4294901760, %v9021_v23  ;;  %v11904_v2 = vand.u32 4294901760, %v9020_v17 }
0x1324   :  { %7664 = vmatpush.msra.mxu2 %v7432_v33  ;;  %v11900_v46 = vand.u32 4294901760, %v9022_v47 }
0x1325   :  { %7729 = vmatpush.msra.mxu3 %v11561_v61  ;;  %v7844_v14 = vand.u32 4294901760, %v7843_v28  ;;  %v7856_v61 = vand.u32 4294901760, %v7855_v1  ;;  %7782 = vmatpush.msrb.mxu0 %v11895_v39  ;;  %v11917_v28 = vsub.f32 %v9021_v23, %v11902_v15  ;;  %v11920_v6 = vsub.f32 %v9020_v17, %v11904_v2  ;;  %v9017_v17 = vld [vmem:[%s12589_s9 + $0x1d0] sm:$0xff] }
0x1326   :  { %7668 = vmatpush.msra.mxu2 %v7438_v26  ;;  %v11913_v33 = vsub.f32 %v9022_v47, %v11900_v46  ;;  %v12687_v47 = vand.u32 4294901760, %v11707_v35 }
0x1327   :  { %7731 = vmatpush.msra.mxu3 %v11634_v8  ;;  %7845 = vmatpush.msrb.mxu1 %v7844_v14  ;;  %v12640_v8 = vand.u32 4294901760, %v11910_v31  ;;  %v12638_v1 = vand.u32 4294901760, %v11917_v28  ;;  %v12637_v62 = vand.u32 4294901760, %v11920_v6 }
0x1328   :  { %7672 = vmatpush.msra.mxu2 %v12686_v49  ;;  %v12639_v26 = vand.u32 4294901760, %v11913_v33  ;;  %7784 = vmatpush.msrb.mxu0 %v11900_v46 }
0x1329   :  { %7733 = vmatpush.msra.mxu3 %v11636_v7  ;;  %7851 = vmatpush.msrb.mxu1 %v7850_v4  ;;  %v7861_v7 = vsub.f32 %v11910_v31, %v12640_v8  ;;  %v7873_v14 = vsub.f32 %v11917_v28, %v12638_v1  ;;  %v7879_v35 = vsub.f32 %v11920_v6, %v12637_v62  ;;  %v9018_v4 = vld [vmem:[%s12589_s9 + $0x1d8] sm:$0xff]  ;;  %v11964_v1 = vand.u32 4294901760, %v9017_v17 }
0x132a   :  { %7676 = vmatpush.msra.mxu2 %v12687_v47  ;;  %v7867_v10 = vsub.f32 %v11913_v33, %v12639_v26  ;;  %7786 = vmatpush.msrb.mxu0 %v11902_v15  ;;  %v11962_v62 = vand.u32 4294901760, %v9018_v4  ;;  %v9016_v26 = vld [vmem:[%s12589_s9 + $0x1c8] sm:$0xff] }
0x132b   :  { %7735 = vmatpush.msra.mxu3 %v11638_v12  ;;  %7857 = vmatpush.msrb.mxu1 %v7856_v61  ;;  %v9019_v12 = vld [vmem:[%s12589_s9 + $0x1e0] sm:$0xff]  ;;  %v12688_v61 = vand.u32 4294901760, %v11710_v29  ;;  %v7862_v49 = vand.u32 4294901760, %v7861_v7  ;;  %v12689_v7 = vand.u32 4294901760, %v11715_v5  ;;  %v7874_v30 = vand.u32 4294901760, %v7873_v14 }
0x132c   :  { %v11960_v47 = vand.u32 4294901760, %v9019_v12  ;;  %v7868_v29 = vand.u32 4294901760, %v7867_v10  ;;  %7788 = vmatpush.msrb.mxu0 %v11904_v2  ;;  %v11987_v59 = vsub.f32 %v9017_v17, %v11964_v1 }
0x132d   :  { %v7132_v21 = vpop.permute.xlu2 %7131  ;;  %7680 = vmatpush.msra.mxu2 %v12688_v61  ;;  %7737 = vmatpush.msra.mxu3 %v11643_v18  ;;  %v11972_v18 = vand.u32 4294901760, %v9016_v26 }
0x132e   :  { %v7267_v8 = vsel %vm69_vm0, %v11476_v40, %v7132_v21  ;;  %7863 = vmatpush.msrb.mxu1 %v7862_v49  ;;  %v11979_v60 = vsub.f32 %v9019_v12, %v11960_v47  ;;  %v11982_v21 = vsub.f32 %v9018_v4, %v11962_v62  ;;  %7790 = vmatpush.msrb.mxu0 %v11960_v47  ;;  %v12647_v12 = vand.u32 4294901760, %v11987_v59 }
0x132f   :  { %7684 = vmatpush.msra.mxu2 %v12689_v7  ;;  %7739 = vmatpush.msra.mxu3 %v11686_v56  ;;  %v11990_v5 = vsub.f32 %v9016_v26, %v11972_v18  ;;  %v12693_v4 = vand.u32 4294901760, %v11769_v50 }
0x1330   :  { %7869 = vmatpush.msrb.mxu1 %v7868_v29  ;;  %v12650_v14 = vand.u32 4294901760, %v11979_v60  ;;  %7792 = vmatpush.msrb.mxu0 %v11962_v62  ;;  %v7897_v50 = vsub.f32 %v11987_v59, %v12647_v12 }
0x1331   :  { %7741 = vmatpush.msra.mxu3 %v11688_v48  ;;  %v12648_v26 = vand.u32 4294901760, %v11990_v5 }
0x1332   :  { %7875 = vmatpush.msrb.mxu1 %v7874_v30  ;;  %v7885_v48 = vsub.f32 %v11979_v60, %v12650_v14  ;;  %7794 = vmatpush.msrb.mxu0 %v11964_v1  ;;  %v9015_v30 = vld [vmem:[%s12589_s9 + $0x1c0] sm:$0xff] }
0x1333   :  { %7743 = vmatpush.msra.mxu3 %v11691_v44  ;;  %v12022_v7 = vand.u32 4294901760, %v9015_v30 }
0x1334   :  { %v7886_v29 = vand.u32 4294901760, %v7885_v48  ;;  %7796 = vmatpush.msrb.mxu0 %v11972_v18 }
0x1335   :  { %v11932_v23 = vpop.permute.xlu2 %7155  ;;  %7745 = vmatpush.msra.mxu3 %v11701_v3  ;;  %v12035_v48 = vsub.f32 %v9015_v30, %v12022_v7 }
0x1336   :  { %7798 = vmatpush.msrb.mxu0 %v12022_v7 }
0x1337   :  { %7747 = vmatpush.msra.mxu3 %v11748_v58 }
0x1339   :  { %7749 = vmatpush.msra.mxu3 %v11756_v25 }
0x133b   :  { %7751 = vmatpush.msra.mxu3 %v11758_v36 }
0x133d   :  { %v12020_v17 = vpop.permute.xlu2 %7157  ;;  %7753 = vmatpush.msra.mxu3 %v11760_v24 }
0x133f   :  { %7755 = vmatpush.msra.mxu3 %v11808_v57 }
0x1341   :  { %7757 = vmatpush.msra.mxu3 %v11816_v19 }
0x1344   :  { %v7154_v34 = vpop.permute.xlu0 %7153  ;;  %v7176_v52 = vpop.permute.xlu1 %7175 }
0x1345   :  { %v7271_v61 = vsel %vm12690_vm3, %v7267_v8, %v7154_v34  ;;  %v12692_v34 = vand.u32 4294901760, %v11763_v32  ;;  %v7880_v8 = vand.u32 4294901760, %v7879_v35  ;;  %v7160_v36 = vpop.permute.xlu2 %7159  ;;  %vm12722_vm3 = vmmov %vm12712_vm1 }
0x1346   :  { %v7275_v10 = vsel %vm12691_vm4, %v7271_v61, %v7176_v52  ;;  %v12649_v52 = vand.u32 4294901760, %v11982_v21  ;;  %vm12727_vm4 = vmmov %vm12712_vm1 }
0x1347   :  { %7688 = vmatpush.msra.mxu2 %v12692_v34  ;;  %v11994_v56 = vand.u32 4294901760, %v7275_v10  ;;  %7881 = vmatpush.msrb.mxu1 %v7880_v8  ;;  %v7903_v34 = vsub.f32 %v11990_v5, %v12648_v26 }
0x1348   :  { %v7891_v35 = vsub.f32 %v11982_v21, %v12649_v52  ;;  %v7898_v52 = vand.u32 4294901760, %v7897_v50 }
0x1349   :  { %7692 = vmatpush.msra.mxu2 %v12693_v4  ;;  %v7374_v32 = vsub.f32 %v7275_v10, %v11994_v56  ;;  %7503 = vmatmul.f32.vlgmr.msrb.gmra.mxu3 %v11994_v56  ;;  %v9014_v4 = vld [vmem:[%s12589_s9 + $0x1b8] sm:$0xff]  ;;  %v7904_v58 = vand.u32 4294901760, %v7903_v34 }
0x134a   :  { %v7892_v10 = vand.u32 4294901760, %v7891_v35  ;;  %v12037_v3 = vand.u32 4294901760, %v9014_v4  ;;  %v12694_v35 = vand.u32 4294901760, %v11772_v11  ;;  %7887 = vmatpush.msrb.mxu1 %v7886_v29  ;;  %v12697_v11 = vand.u32 4294901760, %v11775_v27  ;;  %8023 = vmatpush.msrb.mxu3 %v11843_v55 }
0x134b   :  { %v7375_v49 = vand.u32 4294901760, %v7374_v32  ;;  %7569 = vmatmul.f32.vlgmr.msra.gmra.mxu0 %v7374_v32 }
0x134c   :  { %v7134_v61 = vpop.permute.xlu0 %7133  ;;  %v7178_v44 = vpop.permute.xlu1 %7177  ;;  %7696 = vmatpush.msra.mxu2 %v12694_v35  ;;  %v12050_v14 = vsub.f32 %v9014_v4, %v12037_v3  ;;  %7893 = vmatpush.msrb.mxu1 %v7892_v10  ;;  %v9011_v10 = vld [vmem:[%s12589_s9 + $0x1a0] sm:$0xff] }
0x134d   :  { %v7376_v12 = vsub.f32 %v7374_v32, %v7375_v49  ;;  %v7268_v8 = vsel %vm69_vm0, %v11486_v0, %v7134_v61  ;;  %7623 = vmatmul.f32.vlgmr.msra.gmra.mxu1 %v7375_v49  ;;  %v9013_v32 = vld [vmem:[%s12589_s9 + $0x1b0] sm:$0xff]  ;;  %v12652_v61 = vand.u32 4294901760, %v12035_v48  ;;  %7800 = vmatpush.msrb.mxu0 %v12037_v3 }
0x134e   :  { %v7272_v26 = vsel %vm12695_vm8, %v7268_v8, %v11932_v23  ;;  %7700 = vmatpush.msra.mxu2 %v12697_v11  ;;  %v12058_v50 = vand.u32 4294901760, %v9013_v32  ;;  %v12651_v27 = vand.u32 4294901760, %v12050_v14  ;;  %7899 = vmatpush.msrb.mxu1 %v7898_v52  ;;  %v12086_v52 = vand.u32 4294901760, %v9011_v10  ;;  %vm12728_vm8 = vmmov %vm12712_vm1 }
0x134f   :  { %v7377_v49 = vand.u32 4294901760, %v7376_v12  ;;  %v7276_v30 = vsel %vm12696_vm9, %v7272_v26, %v7178_v44  ;;  %v9012_v12 = vld [vmem:[%s12589_s9 + $0x1a8] sm:$0xff]  ;;  %v7909_v26 = vsub.f32 %v12035_v48, %v12652_v61  ;;  %v12698_v61 = vand.u32 4294901760, %v11814_v9  ;;  %8025 = vmatpush.msrb.mxu3 %v11845_v42  ;;  %vm12729_vm9 = vmmov %vm12712_vm1 }
0x1350   :  { %v12055_v23 = vand.u32 4294901760, %v7276_v30  ;;  %v12068_v29 = vand.u32 4294901760, %v9012_v12  ;;  %v12073_v44 = vsub.f32 %v9013_v32, %v12058_v50  ;;  %v7915_v4 = vsub.f32 %v12050_v14, %v12651_v27  ;;  %7802 = vmatpush.msrb.mxu0 %v12058_v50  ;;  %7905 = vmatpush.msrb.mxu1 %v7904_v58 }
0x1351   :  { %7378 = vmatmul.f32.vlgmr.msrb.gmra.mxu2 %v7377_v49  ;;  %v7910_v34 = vand.u32 4294901760, %v7909_v26  ;;  %v12094_v27 = vsub.f32 %v9011_v10, %v12086_v52  ;;  %8027 = vmatpush.msrb.mxu3 %v11847_v37 }
0x1352   :  { %v7382_v25 = vsub.f32 %v7276_v30, %v12055_v23  ;;  %7507 = vmatmul.f32.gmra.mxu3 %v12055_v23  ;;  %v12083_v8 = vsub.f32 %v9012_v12, %v12068_v29  ;;  %v7916_v26 = vand.u32 4294901760, %v7915_v4  ;;  %7704 = vmatpush.msra.mxu2 %v12698_v61  ;;  %v12700_v54 = vand.u32 4294901760, %v12073_v44 }
0x1353   :  { %7804 = vmatpush.msrb.mxu0 %v12068_v29  ;;  %7911 = vmatpush.msrb.mxu1 %v7910_v34  ;;  %v7932_v61 = vand.u32 4294901760, %v12094_v27  ;;  %v12702_v4 = vand.u32 4294901760, %v11822_v53 }
0x1354   :  { %v7136_v35 = vpop.permute.xlu0 %7135  ;;  %7574 = vmatmul.f32.gmra.mxu0 %v7382_v25  ;;  %v7180_v32 = vpop.permute.xlu1 %7179  ;;  %v7383_v49 = vand.u32 4294901760, %v7382_v25  ;;  %v7926_v12 = vand.u32 4294901760, %v12083_v8  ;;  %8029 = vmatpush.msrb.mxu3 %v11895_v39 }
0x1355   :  { %v7269_v11 = vsel %vm69_vm0, %v11522_v16, %v7136_v35  ;;  %v7921_v35 = vsub.f32 %v12073_v44, %v12700_v54  ;;  %7708 = vmatpush.msra.mxu2 %v12702_v4  ;;  %7806 = vmatpush.msrb.mxu0 %v12086_v52  ;;  %v7933_v57 = vsub.f32 %v12094_v27, %v7932_v61  ;;  %v7187_v4 = vrot.slane %v11476_v40, 4 }
0x1356   :  { %v7273_v58 = vsel %vm12699_vm10, %v7269_v11, %v12020_v17  ;;  %7629 = vmatmul.f32.gmra.mxu1 %v7383_v49  ;;  %v7384_v30 = vsub.f32 %v7382_v25, %v7383_v49  ;;  %v7927_v9 = vsub.f32 %v12083_v8, %v7926_v12  ;;  %8031 = vmatpush.msrb.mxu3 %v11900_v46  ;;  %vm12730_vm10 = vmmov %vm12712_vm1 }
0x1357   :  { %v7277_v24 = vsel %vm12701_vm11, %v7273_v58, %v7180_v32  ;;  %v7922_v10 = vand.u32 4294901760, %v7921_v35  ;;  %7917 = vmatpush.msrb.mxu1 %v7916_v26  ;;  %v7934_v53 = vand.u32 4294901760, %v7933_v57  ;;  %7955 = vmatpush.msrb.mxu2 %v11855_v41  ;;  %v12704_v58 = vand.u32 4294901760, %v11855_v41  ;;  %v7234_v35 = vpop.permute.xlu2 %7233 }
0x1358   :  { %v12110_v17 = vand.u32 4294901760, %v7277_v24  ;;  %v7385_v25 = vand.u32 4294901760, %v7384_v30  ;;  %v7928_v54 = vand.u32 4294901760, %v7927_v9  ;;  %v12706_v41 = vand.u32 4294901760, %v11858_v38  ;;  %8033 = vmatpush.msrb.mxu3 %v11902_v15 }
0x1359   :  { %7923 = vmatpush.msrb.mxu1 %v7922_v10  ;;  %8082 = vmatpush.msra.mxu0 %v12704_v58  ;;  %v7188_v10 = vrot.slane %v11486_v0, 4 }
0x135a   :  { %v7390_v34 = vsub.f32 %v7277_v24, %v12110_v17  ;;  %7386 = vmatmul.f32.gmra.mxu2 %v7385_v25  ;;  %7511 = vmatmul.f32.gmra.mxu3 %v12110_v17 }
0x135b   :  { %7929 = vmatpush.msrb.mxu1 %v7928_v54  ;;  %7958 = vmatpush.msrb.mxu2 %v11858_v38 }
0x135c   :  { %v7138_v32 = vpop.permute.xlu0 %7137  ;;  %7579 = vmatmul.f32.gmra.mxu0 %v7390_v34  ;;  %v7182_v49 = vpop.permute.xlu1 %7181  ;;  %v7391_v30 = vand.u32 4294901760, %v7390_v34  ;;  %8035 = vmatpush.msrb.mxu3 %v11904_v2 }
0x135d   :  { %v7270_v19 = vsel %vm69_vm0, %v11527_v43, %v7138_v32  ;;  %7935 = vmatpush.msrb.mxu1 %v7934_v53  ;;  %8086 = vmatpush.msra.mxu0 %v12706_v41  ;;  %v12708_v53 = vand.u32 4294901760, %v11862_v22  ;;  %v7193_v41 = vrot.slane %v11527_v43, 4 }
0x135e   :  { %v7274_v11 = vsel %vm12703_vm5, %v7270_v19, %v7160_v36  ;;  %7635 = vmatmul.f32.gmra.mxu1 %v7391_v30  ;;  %v7392_v26 = vsub.f32 %v7390_v34, %v7391_v30  ;;  %7961 = vmatpush.msrb.mxu2 %v11862_v22  ;;  %v12710_v19 = vand.u32 4294901760, %v11910_v31 }
0x135f   :  { %v7278_v24 = vsel %vm12705_vm6, %v7274_v11, %v7182_v49  ;;  %8161 = vmatpush.msra.mxu1 %v11843_v55  ;;  %v7189_v55 = vsel %vm2664_vm14, %v7187_v4, %v7188_v10  ;;  %8090 = vmatpush.msra.mxu0 %v12708_v53  ;;  %v7236_v11 = vpop.permute.xlu2 %7235  ;;  %v12720_v53 = vand.u32 4294901760, %v11987_v59 }
0x1360   :  { %v12131_v9 = vand.u32 4294901760, %v7278_v24  ;;  %v7393_v25 = vand.u32 4294901760, %v7392_v26  ;;  %7964 = vmatpush.msrb.mxu2 %v11910_v31  ;;  %8037 = vmatpush.msrb.mxu3 %v11960_v47 }
0x1361   :  { %8163 = vmatpush.msra.mxu1 %v11845_v42  ;;  %8094 = vmatpush.msra.mxu0 %v12710_v19 }
0x1362   :  { %v7398_v36 = vsub.f32 %v7278_v24, %v12131_v9  ;;  %7394 = vmatmul.f32.gmra.mxu2 %v7393_v25  ;;  %7515 = vmatmul.f32.gmra.mxu3 %v12131_v9 }
0x1363   :  { %8165 = vmatpush.msra.mxu1 %v11847_v37  ;;  %v7190_v37 = vrot.slane %v11498_v13, 4  ;;  %7967 = vmatpush.msrb.mxu2 %v11913_v33 }
0x1364   :  { %v7212_v54 = vpop.permute.xlu0 %7211  ;;  %7584 = vmatmul.f32.gmra.mxu0 %v7398_v36  ;;  %v7256_v57 = vpop.permute.xlu1 %7255  ;;  %v7399_v34 = vand.u32 4294901760, %v7398_v36  ;;  %8039 = vmatpush.msrb.mxu3 %v11962_v62 }
0x1365   :  { %v7279_v38 = vsel %vm69_vm0, %v7189_v55, %v7212_v54  ;;  %8167 = vmatpush.msra.mxu1 %v11895_v39  ;;  %v7191_v31 = vsel %vm2664_vm14, %v7188_v10, %v7190_v37  ;;  %7970 = vmatpush.msrb.mxu2 %v11917_v28 }
0x1366   :  { %v7283_v40 = vsel %vm12707_vm12, %v7279_v38, %v7234_v35  ;;  %7641 = vmatmul.f32.gmra.mxu1 %v7399_v34  ;;  %v7400_v42 = vsub.f32 %v7398_v36, %v7399_v34  ;;  %8041 = vmatpush.msrb.mxu3 %v11964_v1  ;;  %v12715_v36 = vand.u32 4294901760, %v11920_v6 }
0x1367   :  { %v7287_v32 = vsel %vm12709_vm13, %v7283_v40, %v7256_v57  ;;  %8169 = vmatpush.msra.mxu1 %v11900_v46  ;;  %v12711_v46 = vand.u32 4294901760, %v11913_v33  ;;  %v12714_v33 = vand.u32 4294901760, %v11917_v28  ;;  %7973 = vmatpush.msrb.mxu2 %v11920_v6  ;;  %v7192_v28 = vrot.slane %v11522_v16, 4 }
0x1368   :  { %v12155_v49 = vand.u32 4294901760, %v7287_v32  ;;  %v7401_v30 = vand.u32 4294901760, %v7400_v42  ;;  %8043 = vmatpush.msrb.mxu3 %v11972_v18  ;;  %v7195_v42 = vrot.slane %v11539_v63, 4 }
0x1369   :  { %8171 = vmatpush.msra.mxu1 %v11902_v15  ;;  %8098 = vmatpush.msra.mxu0 %v12711_v46  ;;  %v7194_v55 = vsel %vm2664_vm14, %v7192_v28, %v7193_v41 }
0x136a   :  { %v12164_v22 = vsub.f32 %v7287_v32, %v12155_v49  ;;  %7402 = vmatmul.f32.gmra.mxu2 %v7401_v30  ;;  %7759 = vmatmul.f32.vlgmr.msra.gmra.mxu3 %v11994_v56 }
0x136b   :  { %8173 = vmatpush.msra.mxu1 %v11904_v2  ;;  %8102 = vmatpush.msra.mxu0 %v12714_v33 }
0x136c   :  { %v7809_v39 = vand.u32 4294901760, %v12164_v22  ;;  %v7214_v26 = vpop.permute.xlu0 %7213  ;;  %v7258_v58 = vpop.permute.xlu1 %7257  ;;  %7976 = vmatpush.msrb.mxu2 %v11979_v60  ;;  %8045 = vmatpush.msrb.mxu3 %v12022_v7 }
0x136d   :  { %v7280_v35 = vsel %vm69_vm0, %v7191_v31, %v7214_v26  ;;  %8175 = vmatpush.msra.mxu1 %v11960_v47  ;;  %8106 = vmatpush.msra.mxu0 %v12715_v36  ;;  %v7238_v47 = vpop.permute.xlu2 %7237  ;;  %v12724_v31 = vand.u32 4294901760, %v12035_v48 }
0x136e   :  { %v7810_v15 = vsub.f32 %v12164_v22, %v7809_v39  ;;  %v7284_v24 = vsel %vm12712_vm1, %v7280_v35, %v7236_v11  ;;  %7937 = vmatmul.f32.vlgmr.msrb.gmra.mxu1 %v12155_v49  ;;  %7979 = vmatpush.msrb.mxu2 %v11982_v21 }
0x136f   :  { %v7288_v25 = vsel %vm12713_vm7, %v7284_v24, %v7258_v58  ;;  %8177 = vmatpush.msra.mxu1 %v11962_v62  ;;  %v12716_v62 = vand.u32 4294901760, %v11979_v60  ;;  %8047 = vmatpush.msrb.mxu3 %v12037_v3  ;;  %v12719_v60 = vand.u32 4294901760, %v11982_v21  ;;  %v12725_v58 = vand.u32 4294901760, %v12050_v14 }
0x1370   :  { %v7811_v2 = vand.u32 4294901760, %v7810_v15  ;;  %v12187_v10 = vand.u32 4294901760, %v7288_v25  ;;  %7982 = vmatpush.msrb.mxu2 %v11987_v59  ;;  %v12721_v59 = vand.u32 4294901760, %v11990_v5 }
0x1371   :  { %8110 = vmatpush.msra.mxu0 %v12716_v62  ;;  %8179 = vmatpush.msra.mxu1 %v11964_v1 }
0x1372   :  { %v12196_v4 = vsub.f32 %v7288_v25, %v12187_v10  ;;  %7710 = vmatmul.f32.vlgmr.msra.gmra.mxu2 %v11994_v56  ;;  %7763 = vmatmul.f32.gmra.mxu3 %v12055_v23 }
0x1373   :  { %7812 = vmatmul.f32.vlgmr.msrb.gmra.mxu0 %v7811_v2  ;;  %8181 = vmatpush.msra.mxu1 %v11972_v18  ;;  %v7196_v18 = vsel %vm2664_vm14, %v7193_v41, %v7195_v42  ;;  %vm12723_vm14 = vmmov %vm12718_vm2 }
0x1374   :  { %v7216_v54 = vpop.permute.xlu0 %7215  ;;  %v7260_v6 = vpop.permute.xlu1 %7259  ;;  %v7817_v57 = vand.u32 4294901760, %v12196_v4  ;;  %8114 = vmatpush.msra.mxu0 %v12719_v60  ;;  %8049 = vmatpush.msrb.mxu3 %v12058_v50 }
0x1375   :  { %v7281_v56 = vsel %vm69_vm0, %v7194_v55, %v7216_v54  ;;  %8183 = vmatpush.msra.mxu1 %v12022_v7  ;;  %7985 = vmatpush.msrb.mxu2 %v11990_v5  ;;  %v7240_v7 = vpop.permute.xlu2 %7239 }
0x1376   :  { %v7285_v16 = vsel %vm12717_vm15, %v7281_v56, %v7238_v47  ;;  %7941 = vmatmul.f32.gmra.mxu1 %v12187_v10  ;;  %v7818_v34 = vsub.f32 %v12196_v4, %v7817_v57  ;;  %8118 = vmatpush.msra.mxu0 %v12720_v53  ;;  %v7339_v53 = vsel %vm69_vm0, %v11539_v63, 0 }
0x1377   :  { %v7289_v38 = vsel %vm12718_vm2, %v7285_v16, %v7260_v6  ;;  %8051 = vmatpush.msrb.mxu3 %v12068_v29  ;;  %8185 = vmatpush.msra.mxu1 %v12037_v3 }
0x1378   :  { %v12220_v1 = vand.u32 4294901760, %v7289_v38  ;;  %v7819_v40 = vand.u32 4294901760, %v7818_v34  ;;  %8122 = vmatpush.msra.mxu0 %v12721_v59  ;;  %7988 = vmatpush.msrb.mxu2 %v12035_v48  ;;  %v9030_v48 = vld [vmem:[%s12589_s9 + $0x238] sm:$0xff] }
0x1379   :  { %8053 = vmatpush.msrb.mxu3 %v12086_v52  ;;  %8187 = vmatpush.msra.mxu1 %v12058_v50 }
0x137a   :  { %v12229_v32 = vsub.f32 %v7289_v38, %v12220_v1  ;;  %7714 = vmatmul.f32.gmra.mxu2 %v12055_v23  ;;  %7767 = vmatmul.f32.gmra.mxu3 %v12110_v17  ;;  %v7337_v38 = vsel %vm69_vm0, %v11527_v43, 0 }
0x137b   :  { %7820 = vmatmul.f32.gmra.mxu0 %v7819_v40  ;;  %7991 = vmatpush.msrb.mxu2 %v12050_v14  ;;  %v9029_v14 = vld [vmem:[%s12589_s9 + $0x230] sm:$0xff]  ;;  %v8245_v40 = vand.u32 4294901760, %v7337_v38 }
0x137c   :  { %v7218_v21 = vpop.permute.xlu0 %7217  ;;  %v7825_v30 = vand.u32 4294901760, %v12229_v32  ;;  %v7262_v19 = vpop.permute.xlu1 %7261  ;;  %8126 = vmatpush.msra.mxu0 %v12724_v31  ;;  %8189 = vmatpush.msra.mxu1 %v12068_v29  ;;  %v12726_v29 = vand.u32 4294901760, %v12073_v44  ;;  %v8223_v35 = vand.u32 4294901760, %v9029_v14 }
0x137d   :  { %v7282_v37 = vsel %vm69_vm0, %v7196_v18, %v7218_v21  ;;  %7994 = vmatpush.msrb.mxu2 %v12073_v44  ;;  %v9028_v44 = vld [vmem:[%s12589_s9 + $0x228] sm:$0xff]  ;;  %v8246_v42 = vsub.f32 %v7337_v38, %v8245_v40  ;;  %v8253_v21 = vand.u32 4294901760, %v7339_v53 }
0x137e   :  { %v7286_v23 = vsel %vm12722_vm3, %v7282_v37, %v7240_v7  ;;  %7945 = vmatmul.f32.gmra.mxu1 %v12220_v1  ;;  %v7826_v11 = vsub.f32 %v12229_v32, %v7825_v30  ;;  %8130 = vmatpush.msra.mxu0 %v12725_v58  ;;  %v8281_v25 = vsub.f32 %v9029_v14, %v8223_v35  ;;  %v8225_v33 = vand.u32 4294901760, %v9028_v44 }
0x137f   :  { %v7290_v5 = vsel %vm12723_vm14, %v7286_v23, %v7262_v19  ;;  %8191 = vmatpush.msra.mxu1 %v12086_v52  ;;  %7997 = vmatpush.msrb.mxu2 %v12083_v8  ;;  %v9027_v52 = vld [vmem:[%s12589_s9 + $0x220] sm:$0xff]  ;;  %v8247_v18 = vand.u32 4294901760, %v8246_v42  ;;  %s9225_s9 = smov 8  }
0x1380   :  { %v12252_v3 = vand.u32 4294901760, %v7290_v5  ;;  %v7827_v26 = vand.u32 4294901760, %v7826_v11  ;;  %8134 = vmatpush.msra.mxu0 %v12726_v29  ;;  %v8227_v2 = vand.u32 4294901760, %v9027_v52  ;;  %v8287_v36 = vsub.f32 %v9028_v44, %v8225_v33  ;;  %v9080_v19 = vld [vmem:[%s12590_s10 + $0x1] ss:$0 sm:$0xff] }
0x1381   :  { %8000 = vmatpush.msrb.mxu2 %v12094_v27  ;;  %v8248_v43 = vsub.f32 %v8246_v42, %v8247_v18 }
0x1382   :  { %v12259_v46 = vsub.f32 %v7290_v5, %v12252_v3  ;;  %7718 = vmatmul.f32.gmra.mxu2 %v12110_v17  ;;  %7771 = vmatmul.f32.gmra.mxu3 %v12131_v9  ;;  %v8221_v17 = vand.u32 4294901760, %v9030_v48  ;;  %v8293_v28 = vsub.f32 %v9027_v52, %v8227_v2  ;;  %v8288_v54 = vand.u32 4294901760, %v8287_v36 }
0x1383   :  { %7828 = vmatmul.f32.gmra.mxu0 %v7827_v26  ;;  %v8249_v59 = vand.u32 4294901760, %v8248_v43 }
0x1384   :  { %v7833_v50 = vand.u32 4294901760, %v12259_v46  ;;  %8138 = vmatpush.msra.mxu0 %v7926_v12  ;;  %v8275_v24 = vsub.f32 %v9030_v48, %v8221_v17  ;;  %8373 = vmatpush.msrb.mxu1 %v8221_v17  ;;  %v8282_v12 = vand.u32 4294901760, %v8281_v25  ;;  %v8294_v6 = vand.u32 4294901760, %v8293_v28 }
0x1385   :  { %8222 = vmatpush.msra.mxu2 %v8221_v17  ;;  %v8289_v62 = vsub.f32 %v8287_v36, %v8288_v54 }
0x1386   :  { %7949 = vmatmul.f32.gmra.mxu1 %v12252_v3  ;;  %v7834_v15 = vsub.f32 %v12259_v46, %v7833_v50  ;;  %8142 = vmatpush.msra.mxu0 %v7932_v61  ;;  %v8276_v8 = vand.u32 4294901760, %v8275_v24  ;;  %v8283_v55 = vsub.f32 %v8281_v25, %v8282_v12  ;;  %v8295_v56 = vsub.f32 %v8293_v28, %v8294_v6 }
0x1387   :  { %8375 = vmatpush.msrb.mxu1 %v8223_v35  ;;  %8224 = vmatpush.msra.mxu2 %v8223_v35 }
0x1388   :  { %v7835_v41 = vand.u32 4294901760, %v7834_v15  ;;  %8329 = vmatpush.msrb.mxu0 %v8275_v24  ;;  %v8277_v47 = vsub.f32 %v8275_v24, %v8276_v8  ;;  %v8284_v61 = vand.u32 4294901760, %v8283_v55 }
0x1389   :  { %8377 = vmatpush.msrb.mxu1 %v8225_v33  ;;  %8226 = vmatpush.msra.mxu2 %v8225_v33 }
0x138a   :  { %7722 = vmatmul.f32.gmra.mxu2 %v12131_v9  ;;  %8057 = vmatmul.f32.vlgmr.msrb.gmra.mxu3 %v7809_v39  ;;  %v8278_v27 = vand.u32 4294901760, %v8277_v47  ;;  %v8290_v9 = vand.u32 4294901760, %v8289_v62  ;;  %v8296_v39 = vand.u32 4294901760, %v8295_v56 }
0x138b   :  { %7836 = vmatmul.f32.gmra.mxu0 %v7835_v41  ;;  %8379 = vmatpush.msrb.mxu1 %v8227_v2 }
0x138c   :  { %8332 = vmatpush.msrb.mxu0 %v8281_v25  ;;  %8279 = vmatpush.msra.mxu3 %v8278_v27 }
0x138d   :  { %8228 = vmatpush.msra.mxu2 %v8227_v2 }
0x138e   :  { %8193 = vmatmul.f32.vlgmr.msra.gmra.mxu1 %v12155_v49  ;;  %8335 = vmatpush.msrb.mxu0 %v8287_v36 }
0x138f   :  { %8285 = vmatpush.msra.mxu3 %v8284_v61 }
0x1390   :  { %8338 = vmatpush.msrb.mxu0 %v8293_v28 }
0x1391   :  { %8291 = vmatpush.msra.mxu3 %v8290_v9 }
0x1392   :  { %8003 = vmatmul.f32.vlgmr.msrb.gmra.mxu2 %v12164_v22  ;;  %8063 = vmatmul.f32.gmra.mxu3 %v7817_v57 }
0x1393   :  { %8144 = vmatmul.f32.vlgmr.msra.gmra.mxu0 %v12155_v49  ;;  %8420 = vmatpush.msrb.mxu2 %v8276_v8  ;;  %v7333_v49 = vsel %vm69_vm0, %v11486_v0, 0 }
0x1394   :  { %8297 = vmatpush.msra.mxu3 %v8296_v39  ;;  %v8229_v22 = vand.u32 4294901760, %v7333_v49 }
0x1395   :  { %8424 = vmatpush.msrb.mxu2 %v8282_v12 }
0x1396   :  { %8197 = vmatmul.f32.gmra.mxu1 %v12187_v10  ;;  %8463 = vmatpush.msrb.mxu3 %v8221_v17 }
0x1397   :  { %8428 = vmatpush.msrb.mxu2 %v8288_v54 }
0x1398   :  { %8465 = vmatpush.msrb.mxu3 %v8223_v35 }
0x1399   :  { %8432 = vmatpush.msrb.mxu2 %v8294_v6 }
0x139a   :  { %8008 = vmatmul.f32.gmra.mxu2 %v12196_v4  ;;  %8069 = vmatmul.f32.gmra.mxu3 %v7825_v30  ;;  %v8230_v4 = vsub.f32 %v7333_v49, %v8229_v22  ;;  %v8254_v30 = vsub.f32 %v7339_v53, %v8253_v21 }
0x139b   :  { %8148 = vmatmul.f32.gmra.mxu0 %v12187_v10  ;;  %8467 = vmatpush.msrb.mxu3 %v8225_v33  ;;  %v7335_v10 = vsel %vm69_vm0, %v11498_v13, 0 }
0x139c   :  { %v8231_v57 = vand.u32 4294901760, %v8230_v4  ;;  %v8237_v16 = vand.u32 4294901760, %v7335_v10  ;;  %v8255_v7 = vand.u32 4294901760, %v8254_v30 }
0x139d   :  { %8469 = vmatpush.msrb.mxu3 %v8227_v2 }
0x139e   :  { %8201 = vmatmul.f32.gmra.mxu1 %v12220_v1  ;;  %v8232_v0 = vsub.f32 %v8230_v4, %v8231_v57  ;;  %v8238_v34 = vsub.f32 %v7335_v10, %v8237_v16  ;;  %v8256_v37 = vsub.f32 %v8254_v30, %v8255_v7 }
0x13a0   :  { %v8233_v60 = vand.u32 4294901760, %v8232_v0  ;;  %v8257_v23 = vand.u32 4294901760, %v8256_v37 }
0x13a2   :  { %8013 = vmatmul.f32.gmra.mxu2 %v12229_v32  ;;  %8075 = vmatmul.f32.gmra.mxu3 %v7833_v50 }
0x13a3   :  { %8152 = vmatmul.f32.gmra.mxu0 %v12220_v1  ;;  %v8239_v1 = vand.u32 4294901760, %v8238_v34 }
0x13a5   :  { %v8240_v13 = vsub.f32 %v8238_v34, %v8239_v1 }
0x13a6   :  { %8205 = vmatmul.f32.gmra.mxu1 %v12252_v3 }
0x13a7   :  { %v8241_v32 = vand.u32 4294901760, %v8240_v13 }
0x13aa   :  { %8018 = vmatmul.f32.gmra.mxu2 %v12259_v46  ;;  %8299 = vmatmul.f32.vlgmr.msra.gmra.mxu3 %v8229_v22 }
0x13ab   :  { %8156 = vmatmul.f32.gmra.mxu0 %v12252_v3 }
0x13ae   :  { %8383 = vmatmul.f32.vlgmr.msrb.gmra.mxu1 %v8231_v57 }
0x13b2   :  { %8234 = vmatmul.f32.vlgmr.msra.gmra.mxu2 %v8233_v60  ;;  %8303 = vmatmul.f32.gmra.mxu3 %v8237_v16 }
0x13b3   :  { %8341 = vmatmul.f32.vlgmr.msrb.gmra.mxu0 %v8230_v4 }
0x13b6   :  { %8389 = vmatmul.f32.gmra.mxu1 %v8239_v1 }
0x13ba   :  { %8242 = vmatmul.f32.gmra.mxu2 %v8241_v32  ;;  %8307 = vmatmul.f32.gmra.mxu3 %v8245_v40 }
0x13bb   :  { %8346 = vmatmul.f32.gmra.mxu0 %v8238_v34 }
0x13be   :  { %8395 = vmatmul.f32.gmra.mxu1 %v8247_v18 }
0x13c2   :  { %8250 = vmatmul.f32.gmra.mxu2 %v8249_v59  ;;  %8311 = vmatmul.f32.gmra.mxu3 %v8253_v21 }
0x13c3   :  { %8351 = vmatmul.f32.gmra.mxu0 %v8246_v42 }
0x13c6   :  { %8401 = vmatmul.f32.gmra.mxu1 %v8255_v7 }
0x13c8   :  { %v7570_v11 = vpop.f32.mrf.mxu0 }
0x13ca   :  { %8258 = vmatmul.f32.gmra.mxu2 %v8257_v23  ;;  %8471 = vmatmul.f32.vlgmr.msrb.gmra.mxu3 %v8229_v22  ;;  %v7624_v5 = vpop.f32.mrf.mxu1 }
0x13cb   :  { %8356 = vmatmul.f32.gmra.mxu0 %v8254_v30 }
0x13cc   :  { %v7504_v63 = vpop.f32.mrf.mxu3 }
0x13d1   :  { %v7575_v14 = vpop.f32.mrf.mxu0 }
0x13d2   :  { %8434 = vmatmul.f32.vlgmr.msrb.gmra.mxu2 %v8229_v22  ;;  %8475 = vmatmul.f32.gmra.mxu3 %v8237_v16 }
0x13d3   :  { %v7630_v17 = vpop.f32.mrf.mxu1 }
0x13d4   :  { %v7379_v31 = vpop.f32.mrf.mxu2 }
0x13d5   :  { %v7380_v3 = vadd.f32 %v9080_v19, %v7379_v31  ;;  %v7508_v26 = vpop.f32.mrf.mxu3 }
0x13d7   :  { %v7505_v58 = vadd.f32 %v7504_v63, %v7380_v3 }
0x13d9   :  { %v7571_v46 = vadd.f32 %v7570_v11, %v7505_v58  ;;  %v7580_v33 = vpop.f32.mrf.mxu0 }
0x13da   :  { %8438 = vmatmul.f32.gmra.mxu2 %v8237_v16  ;;  %8479 = vmatmul.f32.gmra.mxu3 %v8245_v40 }
0x13db   :  { %v7625_v48 = vadd.f32 %v7624_v5, %v7571_v46  ;;  %v7636_v41 = vpop.f32.mrf.mxu1 }
0x13dd   :  { %v7387_v50 = vpop.f32.mrf.mxu2  ;;  %v7512_v29 = vpop.f32.mrf.mxu3 }
0x13de   :  { %v7388_v35 = vadd.f32 %v9080_v19, %v7387_v50  ;;  %v9037_v50 = vld [vmem:[%s12591_s11 + $0x68] sm:$0xff] }
0x13e0   :  { %v7509_v15 = vadd.f32 %v7508_v26, %v7388_v35  ;;  %v12371_v35 = vand.u32 4294901760, %v9037_v50 }
0x13e1   :  { %v7585_v54 = vpop.f32.mrf.mxu0 }
0x13e2   :  { %8442 = vmatmul.f32.gmra.mxu2 %v8245_v40  ;;  %8483 = vmatmul.f32.gmra.mxu3 %v8253_v21  ;;  %v7576_v24 = vadd.f32 %v7575_v14, %v7509_v15  ;;  %v9038_v14 = vld [vmem:[%s12591_s11 + $0x70] sm:$0xff] }
0x13e3   :  { %v7642_v27 = vpop.f32.mrf.mxu1 }
0x13e4   :  { %v7631_v25 = vadd.f32 %v7630_v17, %v7576_v24  ;;  %v12369_v17 = vand.u32 4294901760, %v9038_v14 }
0x13e5   :  { %v7395_v44 = vpop.f32.mrf.mxu2  ;;  %v7516_v52 = vpop.f32.mrf.mxu3 }
0x13e6   :  { %v7396_v2 = vadd.f32 %v9080_v19, %v7395_v44  ;;  %v12377_v24 = vsub.f32 %v9038_v14, %v12369_v17 }
0x13e8   :  { %v7513_v8 = vadd.f32 %v7512_v29, %v7396_v2 }
0x13ea   :  { %8446 = vmatmul.f32.gmra.mxu2 %v8253_v21  ;;  %v7581_v12 = vadd.f32 %v7580_v33, %v7513_v8  ;;  %v8590_v8 = vand.u32 4294901760, %v12377_v24 }
0x13eb   :  { %v7938_v4 = vpop.f32.mrf.mxu1 }
0x13ec   :  { %v7637_v36 = vadd.f32 %v7636_v41, %v7581_v12 }
0x13ed   :  { %v7403_v28 = vpop.f32.mrf.mxu2  ;;  %v7760_v47 = vpop.f32.mrf.mxu3 }
0x13ee   :  { %v7404_v55 = vadd.f32 %v9080_v19, %v7403_v28  ;;  %v8591_v28 = vsub.f32 %v12377_v24, %v8590_v8 }
0x13f0   :  { %v7517_v6 = vadd.f32 %v7516_v52, %v7404_v55  ;;  %v7813_v49 = vpop.f32.mrf.mxu0 }
0x13f2   :  { %v7586_v61 = vadd.f32 %v7585_v54, %v7517_v6 }
0x13f3   :  { %v12322_v1 = vpop.f32.mrf.mxu1 }
0x13f4   :  { %v7643_v62 = vadd.f32 %v7642_v27, %v7586_v61  ;;  %v8592_v27 = vand.u32 4294901760, %v8591_v28 }
0x13f5   :  { %v7711_v56 = vpop.f32.mrf.mxu2  ;;  %v7764_v9 = vpop.f32.mrf.mxu3 }
0x13f6   :  { %v7712_v39 = vadd.f32 %v7711_v56, %v7625_v48  ;;  %v9039_v48 = vld [vmem:[%s12591_s11 + $0x78] sm:$0xff] }
0x13f7   :  { %v12367_v29 = vand.u32 4294901760, %v9039_v48 }
0x13f8   :  { %v7761_v22 = vadd.f32 %v7760_v47, %v7712_v39  ;;  %v7821_v34 = vpop.f32.mrf.mxu0 }
0x13f9   :  { %v12374_v15 = vsub.f32 %v9039_v48, %v12367_v29  ;;  %8709 = vmatpush.msra.mxu3 %v12367_v29  ;;  %8526 = vmatpush.msra.mxu0 %v12367_v29 }
0x13fa   :  { %v7814_v44 = vadd.f32 %v7813_v49, %v7761_v22 }
0x13fb   :  { %v12328_v21 = vpop.f32.mrf.mxu1  ;;  %v8584_v41 = vand.u32 4294901760, %v12374_v15  ;;  %8657 = vmatpush.msra.mxu2 %v12374_v15  ;;  %8711 = vmatpush.msra.mxu3 %v12369_v17 }
0x13fc   :  { %8528 = vmatpush.msra.mxu0 %v12369_v17  ;;  %v7939_v55 = vadd.f32 %v7938_v4, %v7814_v44  ;;  %v9032_v44 = vld [vmem:[%s12591_s11 + $0x40] sm:$0xff] }
0x13fd   :  { %v7715_v10 = vpop.f32.mrf.mxu2  ;;  %v7768_v57 = vpop.f32.mrf.mxu3  ;;  %8660 = vmatpush.msra.mxu2 %v12377_v24  ;;  %8713 = vmatpush.msra.mxu3 %v12371_v35 }
0x13fe   :  { %v7716_v16 = vadd.f32 %v7715_v10, %v7631_v25  ;;  %v12380_v25 = vsub.f32 %v9037_v50, %v12371_v35  ;;  %8530 = vmatpush.msra.mxu0 %v12371_v35  ;;  %v9035_v10 = vld [vmem:[%s12591_s11 + $0x58] sm:$0xff] }
0x1400   :  { %v7765_v0 = vadd.f32 %v7764_v9, %v7716_v16  ;;  %v12326_v42 = vpop.f32.mrf.mxu0  ;;  %v8596_v12 = vand.u32 4294901760, %v12380_v25  ;;  %8663 = vmatpush.msra.mxu2 %v12380_v25  ;;  %v9036_v9 = vld [vmem:[%s12591_s11 + $0x60] sm:$0xff] }
0x1401   :  { %v12418_v22 = vand.u32 4294901760, %v9036_v9 }
0x1402   :  { %v8597_v47 = vsub.f32 %v12380_v25, %v8596_v12  ;;  %v7822_v56 = vadd.f32 %v7821_v34, %v7765_v0  ;;  %v12428_v0 = vand.u32 4294901760, %v9035_v10 }
0x1403   :  { %v12336_v37 = vpop.f32.mrf.mxu1  ;;  %v12426_v16 = vsub.f32 %v9036_v9, %v12418_v22  ;;  %8715 = vmatpush.msra.mxu3 %v12418_v22  ;;  %8532 = vmatpush.msra.mxu0 %v12418_v22 }
0x1404   :  { %v7943_v34 = vadd.f32 %v12322_v1, %v7822_v56 }
0x1405   :  { %v7719_v38 = vpop.f32.mrf.mxu2  ;;  %v7772_v60 = vpop.f32.mrf.mxu3  ;;  %8666 = vmatpush.msra.mxu2 %v12426_v16  ;;  %8717 = vmatpush.msra.mxu3 %v12428_v0 }
0x1406   :  { %v7720_v40 = vadd.f32 %v7719_v38, %v7637_v36  ;;  %v8585_v36 = vsub.f32 %v12374_v15, %v8584_v41  ;;  %v9034_v38 = vld [vmem:[%s12591_s11 + $0x50] sm:$0xff]  ;;  %8534 = vmatpush.msra.mxu0 %v12428_v0 }
0x1408   :  { %v12324_v13 = vadd.f32 %v7768_v57, %v7720_v40  ;;  %v12334_v7 = vpop.f32.mrf.mxu0  ;;  %v8586_v6 = vand.u32 4294901760, %v8585_v36  ;;  %v12438_v40 = vsub.f32 %v9035_v10, %v12428_v0 }
0x140a   :  { %8587 = vmatpush.msra.mxu1 %v8586_v6  ;;  %v8608_v14 = vand.u32 4294901760, %v12438_v40  ;;  %8669 = vmatpush.msra.mxu2 %v12438_v40 }
0x140b   :  { %v12344_v11 = vpop.f32.mrf.mxu1 }
0x140c   :  { %8593 = vmatpush.msra.mxu1 %v8592_v27  ;;  %v12476_v27 = vand.u32 4294901760, %v9032_v44 }
0x140d   :  { %v7723_v53 = vpop.f32.mrf.mxu2  ;;  %v8058_v32 = vpop.f32.mrf.mxu3 }
0x140e   :  { %v7724_v18 = vadd.f32 %v7723_v53, %v7643_v62  ;;  %v8598_v62 = vand.u32 4294901760, %v8597_v47  ;;  %v12441_v53 = vand.u32 4294901760, %v9034_v38  ;;  %v8609_v47 = vsub.f32 %v12438_v40, %v8608_v14 }
0x1410   :  { %v12330_v43 = vadd.f32 %v7772_v60, %v7724_v18  ;;  %v12342_v19 = vpop.f32.mrf.mxu0  ;;  %8599 = vmatpush.msra.mxu1 %v8598_v62  ;;  %v8602_v60 = vand.u32 4294901760, %v12426_v16  ;;  %v9033_v18 = vld [vmem:[%s12591_s11 + $0x48] sm:$0xff]  ;;  %v12455_v50 = vsub.f32 %v9034_v38, %v12441_v53  ;;  %8719 = vmatpush.msra.mxu3 %v12441_v53  ;;  %v8610_v62 = vand.u32 4294901760, %v8609_v47 }
0x1411   :  { %8536 = vmatpush.msra.mxu0 %v12441_v53 }
0x1412   :  { %v8603_v48 = vsub.f32 %v12426_v16, %v8602_v60  ;;  %8672 = vmatpush.msra.mxu2 %v12455_v50 }
0x1413   :  { %v12356_v46 = vpop.f32.mrf.mxu1 }
0x1414   :  { %v8604_v28 = vand.u32 4294901760, %v8603_v48 }
0x1415   :  { %v8004_v30 = vpop.f32.mrf.mxu2  ;;  %v12332_v59 = vpop.f32.mrf.mxu3 }
0x1416   :  { %v8005_v61 = vadd.f32 %v8004_v30, %v7939_v55  ;;  %v8614_v55 = vand.u32 4294901760, %v12455_v50  ;;  %8605 = vmatpush.msra.mxu1 %v8604_v28 }
0x1418   :  { %v12350_v3 = vpop.f32.mrf.mxu0  ;;  %v8059_v4 = vadd.f32 %v8058_v32, %v8005_v61  ;;  %v8615_v56 = vsub.f32 %v12455_v50, %v8614_v55  ;;  %8611 = vmatpush.msra.mxu1 %v8610_v62 }
0x141a   :  { %v8146_v1 = vadd.f32 %v12342_v19, %v8059_v4  ;;  %v7830_v19 = vadd.f32 %v12326_v42, %v12324_v13  ;;  %v8616_v16 = vand.u32 4294901760, %v8615_v56 }
0x141b   :  { %v12408_v54 = vpop.f32.mrf.mxu1 }
0x141c   :  { %v8195_v42 = vadd.f32 %v12344_v11, %v8146_v1  ;;  %v7947_v4 = vadd.f32 %v12328_v21, %v7830_v19  ;;  %8617 = vmatpush.msra.mxu1 %v8616_v16 }
0x141d   :  { %v12338_v23 = vpop.f32.mrf.mxu2  ;;  %v12340_v63 = vpop.f32.mrf.mxu3 }
0x141e   :  { %v8010_v32 = vadd.f32 %v12338_v23, %v7943_v34  ;;  %v12458_v23 = vand.u32 4294901760, %v9033_v18 }
0x1420   :  { %v12384_v52 = vpop.f32.mrf.mxu0  ;;  %v8619_v6 = vsub.f32 %v9033_v18, %v12458_v23  ;;  %8721 = vmatpush.msra.mxu3 %v12458_v23  ;;  %v8065_v13 = vadd.f32 %v12332_v59, %v8010_v32  ;;  %8538 = vmatpush.msra.mxu0 %v12458_v23  ;;  %v8625_v59 = vsub.f32 %v9032_v44, %v12476_v27 }
0x1421   :  { %v7838_v32 = vadd.f32 %v12334_v7, %v12330_v43 }
0x1422   :  { %v8620_v9 = vand.u32 4294901760, %v8619_v6  ;;  %8675 = vmatpush.msra.mxu2 %v8619_v6  ;;  %8723 = vmatpush.msra.mxu3 %v12476_v27  ;;  %v8150_v40 = vadd.f32 %v12350_v3, %v8065_v13  ;;  %v8626_v21 = vand.u32 4294901760, %v8625_v59 }
0x1423   :  { %v12450_v30 = vpop.f32.mrf.mxu1  ;;  %8540 = vmatpush.msra.mxu0 %v12476_v27  ;;  %v7951_v24 = vadd.f32 %v12336_v37, %v7838_v32 }
0x1424   :  { %v8621_v34 = vsub.f32 %v8619_v6, %v8620_v9  ;;  %8678 = vmatpush.msra.mxu2 %v8625_v59  ;;  %v8627_v18 = vsub.f32 %v8625_v59, %v8626_v21  ;;  %v8199_v3 = vadd.f32 %v12356_v46, %v8150_v40 }
0x1425   :  { %v12346_v5 = vpop.f32.mrf.mxu2  ;;  %v12348_v31 = vpop.f32.mrf.mxu3  ;;  %8760 = vmatpush.msrb.mxu0 %v8584_v41 }
0x1426   :  { %v8015_v38 = vadd.f32 %v12346_v5, %v7947_v4  ;;  %v8628_v41 = vand.u32 4294901760, %v8627_v18 }
0x1427   :  { %8764 = vmatpush.msrb.mxu0 %v8590_v8 }
0x1428   :  { %v12423_v57 = vpop.f32.mrf.mxu0  ;;  %v8071_v5 = vadd.f32 %v12340_v63, %v8015_v38 }
0x1429   :  { %8768 = vmatpush.msrb.mxu0 %v8596_v12 }
0x142a   :  { %v8154_v25 = vadd.f32 %v12384_v52, %v8071_v5 }
0x142b   :  { %v8384_v48 = vpop.f32.mrf.mxu1  ;;  %8772 = vmatpush.msrb.mxu0 %v8602_v60 }
0x142d   :  { %v12352_v26 = vpop.f32.mrf.mxu2  ;;  %v12354_v58 = vpop.f32.mrf.mxu3  ;;  %8776 = vmatpush.msrb.mxu0 %v8608_v14 }
0x142f   :  { %8780 = vmatpush.msrb.mxu0 %v8614_v55 }
0x1430   :  { %v8342_v11 = vpop.f32.mrf.mxu0 }
0x1431   :  { %8784 = vmatpush.msrb.mxu0 %v8620_v9 }
0x1433   :  { %v8390_v14 = vpop.f32.mrf.mxu1  ;;  %8788 = vmatpush.msrb.mxu0 %v8626_v21 }
0x1435   :  { %v12386_v33 = vpop.f32.mrf.mxu2  ;;  %v12388_v2 = vpop.f32.mrf.mxu3 }
0x1436   :  { %v8236_v10 = vadd.f32 %v12386_v33, %v8195_v42  ;;  %v8622_v33 = vand.u32 4294901760, %v8621_v34 }
0x1438   :  { %v8301_v1 = vadd.f32 %v12354_v58, %v8236_v10  ;;  %8623 = vmatpush.msra.mxu1 %v8622_v33  ;;  %v8020_v58 = vadd.f32 %v12352_v26, %v7951_v24  ;;  %v8347_v12 = vpop.f32.mrf.mxu0 }
0x143a   :  { %v8343_v43 = vadd.f32 %v8342_v11, %v8301_v1  ;;  %8629 = vmatpush.msra.mxu1 %v8628_v41 }
0x143c   :  { %8815 = vmatpush.msrb.mxu1 %v12367_v29  ;;  %v8385_v46 = vadd.f32 %v8384_v48, %v8343_v43  ;;  %v8203_v29 = vadd.f32 %v12408_v54, %v8154_v25 }
0x143d   :  { %v12414_v39 = vpop.f32.mrf.mxu2  ;;  %v12416_v49 = vpop.f32.mrf.mxu3 }
0x143e   :  { %v8244_v8 = vadd.f32 %v12414_v39, %v8199_v3  ;;  %8817 = vmatpush.msrb.mxu1 %v12369_v17  ;;  %v8077_v39 = vadd.f32 %v12348_v31, %v8020_v58 }
0x1440   :  { %v8305_v63 = vadd.f32 %v12388_v2, %v8244_v8  ;;  %8819 = vmatpush.msrb.mxu1 %v12371_v35  ;;  %v8158_v2 = vadd.f32 %v12423_v57, %v8077_v39  ;;  %v8352_v44 = vpop.f32.mrf.mxu0 }
0x1442   :  { %8821 = vmatpush.msrb.mxu1 %v12418_v22  ;;  %v8348_v52 = vadd.f32 %v8347_v12, %v8305_v63 }
0x1444   :  { %8823 = vmatpush.msrb.mxu1 %v12428_v0  ;;  %v8391_v19 = vadd.f32 %v8390_v14, %v8348_v52 }
0x1445   :  { %v12467_v36 = vpop.f32.mrf.mxu2  ;;  %v12479_v61 = vpop.f32.mrf.mxu3 }
0x1446   :  { %v8252_v26 = vadd.f32 %v12467_v36, %v8203_v29  ;;  %8825 = vmatpush.msrb.mxu1 %v12441_v53  ;;  %v8207_v36 = vadd.f32 %v12450_v30, %v8158_v2 }
0x1448   :  { %v8309_v31 = vadd.f32 %v12416_v49, %v8252_v26  ;;  %8827 = vmatpush.msrb.mxu1 %v12458_v23  ;;  %v8396_v49 = vpop.f32.mrf.mxu1  ;;  %v8357_v11 = vpop.f32.mrf.mxu0 }
0x144a   :  { %v8353_v55 = vadd.f32 %v8352_v44, %v8309_v31  ;;  %8829 = vmatpush.msrb.mxu1 %v12476_v27 }
0x144c   :  { %v8397_v62 = vadd.f32 %v8396_v49, %v8353_v55 }
0x144d   :  { %v8259_v15 = vpop.f32.mrf.mxu2  ;;  %v8472_v7 = vpop.f32.mrf.mxu3 }
0x144e   :  { %v8260_v47 = vadd.f32 %v8259_v15, %v8207_v36 }
0x1450   :  { %v8313_v23 = vadd.f32 %v12479_v61, %v8260_v47  ;;  %v8402_v21 = vpop.f32.mrf.mxu1 }
0x1452   :  { %v8358_v34 = vadd.f32 %v8357_v11, %v8313_v23 }
0x1454   :  { %v8403_v32 = vadd.f32 %v8402_v21, %v8358_v34 }
0x1455   :  { %v8435_v37 = vpop.f32.mrf.mxu2  ;;  %v8476_v35 = vpop.f32.mrf.mxu3 }
0x1456   :  { %v8436_v60 = vadd.f32 %v8435_v37, %v8385_v46 }
0x1458   :  { %v8473_v17 = vadd.f32 %v8472_v7, %v8436_v60 }
0x145a   :  { %v8487_v50 = vmax.f32 %v8473_v17, 0.0  ;;  %v9081_v17 = vld [vmem:[%s12592_s12 + $0x1] ss:$0 sm:$0xff] }
0x145c   :  { %v8506_v54 = vsel %vm12727_vm4, %v8487_v50, 0 }
0x145d   :  { %v12517_v22 = vand.u32 4294901760, %v8506_v54  ;;  %v8439_v28 = vpop.f32.mrf.mxu2  ;;  %v8480_v4 = vpop.f32.mrf.mxu3 }
0x145e   :  { %v8440_v0 = vadd.f32 %v8439_v28, %v8391_v19 }
0x145f   :  { %v8542_v57 = vsub.f32 %v8506_v54, %v12517_v22  ;;  %8631 = vmatmul.f32.vlgmr.msra.gmra.mxu1 %v12517_v22 }
0x1460   :  { %v8477_v53 = vadd.f32 %v8476_v35, %v8440_v0 }
0x1461   :  { %v8543_v6 = vand.u32 4294901760, %v8542_v57  ;;  %8681 = vmatmul.f32.vlgmr.msra.gmra.mxu2 %v8542_v57 }
0x1462   :  { %v8488_v13 = vmax.f32 %v8477_v53, 0.0 }
0x1463   :  { %v8544_v42 = vsub.f32 %v8542_v57, %v8543_v6  ;;  %8727 = vmatmul.f32.vlgmr.msra.gmra.mxu3 %v8543_v6 }
0x1464   :  { %v8509_v30 = vsel %vm12728_vm8, %v8488_v13, 0 }
0x1465   :  { %v8545_v56 = vand.u32 4294901760, %v8544_v42  ;;  %v8549_v9 = vand.u32 4294901760, %v8509_v30  ;;  %v8443_v10 = vpop.f32.mrf.mxu2  ;;  %v8484_v5 = vpop.f32.mrf.mxu3 }
0x1466   :  { %v8444_v59 = vadd.f32 %v8443_v10, %v8397_v62 }
0x1467   :  { %8546 = vmatmul.f32.vlgmr.msra.gmra.mxu0 %v8545_v56  ;;  %8635 = vmatmul.f32.gmra.mxu1 %v8549_v9  ;;  %v8550_v27 = vsub.f32 %v8509_v30, %v8549_v9 }
0x1468   :  { %v8481_v16 = vadd.f32 %v8480_v4, %v8444_v59 }
0x1469   :  { %8686 = vmatmul.f32.gmra.mxu2 %v8550_v27  ;;  %v8551_v38 = vand.u32 4294901760, %v8550_v27 }
0x146a   :  { %v8489_v40 = vmax.f32 %v8481_v16, 0.0 }
0x146b   :  { %8733 = vmatmul.f32.gmra.mxu3 %v8551_v38  ;;  %v8552_v61 = vsub.f32 %v8550_v27, %v8551_v38 }
0x146c   :  { %v8512_v33 = vsel %vm12729_vm9, %v8489_v40, 0 }
0x146d   :  { %v8557_v1 = vand.u32 4294901760, %v8512_v33  ;;  %v8447_v18 = vpop.f32.mrf.mxu2  ;;  %v8553_v48 = vand.u32 4294901760, %v8552_v61 }
0x146e   :  { %v8448_v15 = vadd.f32 %v8447_v18, %v8403_v32 }
0x146f   :  { %8554 = vmatmul.f32.gmra.mxu0 %v8553_v48  ;;  %8639 = vmatmul.f32.gmra.mxu1 %v8557_v1  ;;  %v8558_v3 = vsub.f32 %v8512_v33, %v8557_v1 }
0x1470   :  { %v8485_v41 = vadd.f32 %v8484_v5, %v8448_v15 }
0x1471   :  { %8691 = vmatmul.f32.gmra.mxu2 %v8558_v3  ;;  %v8559_v24 = vand.u32 4294901760, %v8558_v3 }
0x1472   :  { %v8490_v8 = vmax.f32 %v8485_v41, 0.0 }
0x1473   :  { %8739 = vmatmul.f32.gmra.mxu3 %v8559_v24  ;;  %v8560_v43 = vsub.f32 %v8558_v3, %v8559_v24 }
0x1474   :  { %v8515_v7 = vsel %vm12730_vm10, %v8490_v8, 0 }
0x1475   :  { %v8565_v58 = vand.u32 4294901760, %v8515_v7  ;;  %v8561_v25 = vand.u32 4294901760, %v8560_v43  ;;  %v12731_v43 = vld [vmem:[#allocation10_spill] sm:$0xff] }
0x1477   :  { %8562 = vmatmul.f32.gmra.mxu0 %v8561_v25  ;;  %8643 = vmatmul.f32.gmra.mxu1 %v8565_v58  ;;  %v8566_v12 = vsub.f32 %v8515_v7, %v8565_v58 }
0x1479   :  { %8696 = vmatmul.f32.gmra.mxu2 %v8566_v12  ;;  %v8567_v63 = vand.u32 4294901760, %v8566_v12 }
0x147b   :  { %8745 = vmatmul.f32.gmra.mxu3 %v8567_v63  ;;  %v8568_v46 = vsub.f32 %v8566_v12, %v8567_v63  ;;  %v12732_v12 = vld [vmem:[#allocation5_spill] sm:$0xff] }
0x147d   :  { %v8569_v37 = vand.u32 4294901760, %v8568_v46 }
0x147f   :  { %8570 = vmatmul.f32.gmra.mxu0 %v8569_v37  ;;  %8831 = vmatmul.f32.vlgmr.msrb.gmra.mxu1 %v12517_v22 }
0x1487   :  { %8790 = vmatmul.f32.vlgmr.msrb.gmra.mxu0 %v12517_v22  ;;  %8835 = vmatmul.f32.gmra.mxu1 %v8549_v9 }
0x148f   :  { %8794 = vmatmul.f32.gmra.mxu0 %v8549_v9  ;;  %8839 = vmatmul.f32.gmra.mxu1 %v8557_v1 }
0x1497   :  { %8798 = vmatmul.f32.gmra.mxu0 %v8557_v1  ;;  %8843 = vmatmul.f32.gmra.mxu1 %v8565_v58 }
0x149f   :  { %8802 = vmatmul.f32.gmra.mxu0 %v8565_v58 }
0x14dc   :  { %v8632_v39 = vpop.f32.mrf.mxu1 }
0x14e4   :  { %v8547_v29 = vpop.f32.mrf.mxu0  ;;  %v8636_v60 = vpop.f32.mrf.mxu1 }
0x14e5   :  { %v8548_v50 = vadd.f32 %v9081_v17, %v8547_v29  ;;  %v8682_v35 = vpop.f32.mrf.mxu2 }
0x14e6   :  { %v8728_v54 = vpop.f32.mrf.mxu3 }
0x14e7   :  { %v8633_v31 = vadd.f32 %v8632_v39, %v8548_v50 }
0x14e9   :  { %v8683_v44 = vadd.f32 %v8682_v35, %v8633_v31 }
0x14eb   :  { %v8729_v0 = vadd.f32 %v8728_v54, %v8683_v44 }
0x14ec   :  { %v8555_v14 = vpop.f32.mrf.mxu0  ;;  %v8640_v26 = vpop.f32.mrf.mxu1 }
0x14ed   :  { %v8556_v22 = vadd.f32 %v9081_v17, %v8555_v14  ;;  %v8687_v36 = vpop.f32.mrf.mxu2 }
0x14ee   :  { %v8734_v55 = vpop.f32.mrf.mxu3 }
0x14ef   :  { %v8637_v57 = vadd.f32 %v8636_v60, %v8556_v22 }
0x14f1   :  { %v8688_v49 = vadd.f32 %v8687_v36, %v8637_v57 }
0x14f3   :  { %v8735_v30 = vadd.f32 %v8734_v55, %v8688_v49 }
0x14f4   :  { %v8563_v52 = vpop.f32.mrf.mxu0  ;;  %v8644_v2 = vpop.f32.mrf.mxu1 }
0x14f5   :  { %v8564_v6 = vadd.f32 %v9081_v17, %v8563_v52  ;;  %v8692_v9 = vpop.f32.mrf.mxu2 }
0x14f6   :  { %v8740_v16 = vpop.f32.mrf.mxu3 }
0x14f7   :  { %v8641_v62 = vadd.f32 %v8640_v26, %v8564_v6 }
0x14f9   :  { %v8693_v59 = vadd.f32 %v8692_v9, %v8641_v62 }
0x14fb   :  { %v8741_v38 = vadd.f32 %v8740_v16, %v8693_v59 }
0x14fc   :  { %v8571_v19 = vpop.f32.mrf.mxu0  ;;  %v8832_v28 = vpop.f32.mrf.mxu1 }
0x14fd   :  { %v8572_v11 = vadd.f32 %v9081_v17, %v8571_v19  ;;  %v8697_v32 = vpop.f32.mrf.mxu2 }
0x14fe   :  { %v8746_v15 = vpop.f32.mrf.mxu3 }
0x14ff   :  { %v8645_v40 = vadd.f32 %v8644_v2, %v8572_v11 }
0x1501   :  { %v8698_v1 = vadd.f32 %v8697_v32, %v8645_v40 }
0x1503   :  { %v8747_v5 = vadd.f32 %v8746_v15, %v8698_v1 }
0x1504   :  { %v8791_v47 = vpop.f32.mrf.mxu0  ;;  %v8836_v23 = vpop.f32.mrf.mxu1 }
0x1505   :  { %v8792_v53 = vadd.f32 %v8791_v47, %v8729_v0 }
0x1507   :  { %v8833_v13 = vadd.f32 %v8832_v28, %v8792_v53 }
0x1509   :  { %v8847_v42 = vadd.f32 %v8833_v13, %v11470_v45 }
0x150b   :  { %v8855_v56 = vsel %vm69_vm0, %v8847_v42, 0.0 }
0x150c   :  { %v8795_v4 = vpop.f32.mrf.mxu0  ;;  %8856 = vadd.xlane.f32.xlu0 %v8855_v56  ;;  %v8840_v45 = vpop.f32.mrf.mxu1 }
0x150d   :  { %v8796_v10 = vadd.f32 %v8795_v4, %v8735_v30 }
0x150f   :  { %v8837_v27 = vadd.f32 %v8836_v23, %v8796_v10  ;;  %v9082_v10 = vld [vmem:[%s12593_s13 + $0x1] ss:$0 sm:$0xff]  ;;  %s9223_s13 = smov [#allocation2]  }
0x1511   :  { %v8848_v34 = vadd.f32 %v8837_v27, %v11479_v51  ;;  %v9083_v27 = vld [vmem:[%s12594_s14 + $0x1] ss:$0 sm:$0xff]  ;;  %s8969_s14 = sshll.u32 %s9223_s13, 4  ;;  %s8970_s14 = int_to_ptr.vmem [resolvable:$true] %s8969_s14 }
0x1513   :  { %v8858_v21 = vsel %vm69_vm0, %v8848_v34, 0.0 }
0x1514   :  { %v8799_v61 = vpop.f32.mrf.mxu0  ;;  %8859 = vadd.xlane.f32.xlu2 %v8858_v21  ;;  %v8844_v24 = vpop.f32.mrf.mxu1 }
0x1515   :  { %v8800_v33 = vadd.f32 %v8799_v61, %v8741_v38 }
0x1517   :  { %v8841_v18 = vadd.f32 %v8840_v45, %v8800_v33 }
0x1519   :  { %v8849_v48 = vadd.f32 %v8841_v18, %v11503_v20 }
0x151b   :  { %v8861_v3 = vsel %vm69_vm0, %v8849_v48, 0.0 }
0x151c   :  { %v8803_v41 = vpop.f32.mrf.mxu0  ;;  %8862 = vadd.xlane.f32.xlu1 %v8861_v3 }
0x151d   :  { %v8804_v51 = vadd.f32 %v8803_v41, %v8747_v5 }
0x151f   :  { %v8845_v8 = vadd.f32 %v8844_v24, %v8804_v51 }
0x1521   :  { %v8850_v7 = vadd.f32 %v8845_v8, %v12731_v43 }
0x1523   :  { %v8864_v58 = vsel %vm69_vm0, %v8850_v7, 0.0 }
0x1524   :  { %8865 = vadd.xlane.f32.xlu2 %v8864_v58 }
0x157f   :  { %v8857_v25 = vpop.xlane.xlu0 %8856 }
0x1580   :  { %v8867_v63 = vmul.f32 %v8857_v25, %v12732_v12 }
0x1582   :  { %v8871_v46 = vsub.f32 %v8847_v42, %v8867_v63 }
0x1584   :  { %v8875_v37 = vmul.f32 %v8871_v46, %v8871_v46 }
0x1586   :  { %v8879_v20 = vsel %vm69_vm0, %v8875_v37, 0.0 }
0x1587   :  { %v8860_v39 = vpop.xlane.xlu2 %8859  ;;  %8880 = vadd.xlane.f32.xlu0 %v8879_v20 }
0x1588   :  { %v8868_v29 = vmul.f32 %v8860_v39, %v12732_v12 }
0x158a   :  { %v8872_v60 = vsub.f32 %v8848_v34, %v8868_v29 }
0x158c   :  { %v8876_v14 = vmul.f32 %v8872_v60, %v8872_v60 }
0x158e   :  { %v8882_v26 = vsel %vm69_vm0, %v8876_v14, 0.0 }
0x158f   :  { %v8863_v17 = vpop.xlane.xlu1 %8862  ;;  %8883 = vadd.xlane.f32.xlu1 %v8882_v26 }
0x1590   :  { %v8869_v52 = vmul.f32 %v8863_v17, %v12732_v12  ;;  %v12735_v17 = vld [vmem:[#allocation8_spill] sm:$0xff] }
0x1592   :  { %v12546_v2 = vsub.f32 %v8849_v48, %v8869_v52  ;;  %v12733_v48 = vld [vmem:[#allocation7_spill] sm:$0xff] }
0x1594   :  { %v8877_v50 = vmul.f32 %v12546_v2, %v12546_v2 }
0x1596   :  { %v8885_v35 = vsel %vm69_vm0, %v8877_v50, 0.0 }
0x1597   :  { %8886 = vadd.xlane.f32.xlu2 %v8885_v35  ;;  %v8866_v31 = vpop.xlane.xlu2 %8865 }
0x1598   :  { %v8870_v54 = vmul.f32 %v8866_v31, %v12732_v12 }
0x159a   :  { %v12552_v19 = vsub.f32 %v8850_v7, %v8870_v54  ;;  %v12736_v54 = vld [vmem:[#allocation9_spill] sm:$0xff] }
0x159c   :  { %v8878_v44 = vmul.f32 %v12552_v19, %v12552_v19 }
0x159e   :  { %v8888_v22 = vsel %vm69_vm0, %v8878_v44, 0.0 }
0x159f   :  { %8889 = vadd.xlane.f32.xlu0 %v8888_v22 }
0x15fa   :  { %v8881_v28 = vpop.xlane.xlu0 %8880 }
0x15fb   :  { %v8891_v36 = vmul.f32 %v8881_v28, %v12732_v12 }
0x15fd   :  { %v8895_v0 = vadd.f32 1e-05, %v8891_v36 }
0x15ff   :  { %9174 = vrsqrt.f32 %v8895_v0  ;;  %vm8905_vm5 = vweird.f32 %v8895_v0 }
0x1602   :  { %v8884_v57 = vpop.xlane.xlu1 %8883 }
0x1603   :  { %v8892_v47 = vmul.f32 %v8884_v57, %v12732_v12 }
0x1605   :  { %v9175_v53 = vpop.eup %9174  ;;  %v8896_v55 = vadd.f32 1e-05, %v8892_v47 }
0x1606   :  { %v8900_v49 = vmul.f32 %v9175_v53, %v8895_v0  ;;  %vm8906_vm11 = vweird.f32 %v9175_v53 }
0x1607   :  { %9176 = vrsqrt.f32 %v8896_v55  ;;  %vm8907_vm6 = vmor %vm8905_vm5, %vm8906_vm11  ;;  %vm8915_vm13 = vweird.f32 %v8896_v55 }
0x1608   :  { %v8901_v6 = vmul.f32 %v9175_v53, %v8900_v49 }
0x160a   :  { %v8902_v13 = vmul.f32 0.5, %v8901_v6  ;;  %v8887_v42 = vpop.xlane.xlu2 %8886 }
0x160b   :  { %v8893_v23 = vmul.f32 %v8887_v42, %v12732_v12 }
0x160c   :  { %v8903_v30 = vsub.f32 1.5, %v8902_v13 }
0x160d   :  { %v9177_v62 = vpop.eup %9176  ;;  %v8897_v56 = vadd.f32 1e-05, %v8893_v23 }
0x160e   :  { %v8904_v9 = vmul.f32 %v9175_v53, %v8903_v30  ;;  %v8910_v4 = vmul.f32 %v9177_v62, %v8896_v55  ;;  %vm8916_vm12 = vweird.f32 %v9177_v62 }
0x160f   :  { %9178 = vrsqrt.f32 %v8897_v56  ;;  %vm8917_vm1 = vmor %vm8915_vm13, %vm8916_vm12  ;;  %vm8925_vm15 = vweird.f32 %v8897_v56 }
0x1610   :  { %v8908_v59 = vsel %vm8907_vm6, %v9175_v53, %v8904_v9  ;;  %v8911_v11 = vmul.f32 %v9177_v62, %v8910_v4 }
0x1611   :  { %v8939_v16 = vmul.f32 %v8908_v59, %v8871_v46 }
0x1612   :  { %v8912_v34 = vmul.f32 0.5, %v8911_v11  ;;  %v8890_v38 = vpop.xlane.xlu0 %8889 }
0x1613   :  { %v8946_v40 = vmul.f32 %v9082_v10, %v8939_v16  ;;  %v8894_v21 = vmul.f32 %v8890_v38, %v12732_v12  ;;  %v12734_v12 = vld [vmem:[#allocation6_spill] sm:$0xff] }
0x1614   :  { %v8913_v45 = vsub.f32 1.5, %v8912_v34 }
0x1615   :  { %v9179_v61 = vpop.eup %9178  ;;  %v8953_v33 = vadd.f32 %v9083_v27, %v8946_v40  ;;  %v8898_v32 = vadd.f32 1e-05, %v8894_v21 }
0x1616   :  { %v8914_v1 = vmul.f32 %v9177_v62, %v8913_v45  ;;  %v8920_v18 = vmul.f32 %v9179_v61, %v8897_v56  ;;  %vm8926_vm7 = vweird.f32 %v9179_v61 }
0x1617   :  { %v8957_v15 = vmul.f32 %v8953_v33, %v12733_v48  ;;  %9180 = vrsqrt.f32 %v8898_v32  ;;  %vm8927_vm2 = vmor %vm8925_vm15, %vm8926_vm7  ;;  %vm8935_vm14 = vweird.f32 %v8898_v32 }
0x1618   :  { %v8918_v5 = vsel %vm8917_vm1, %v9177_v62, %v8914_v1  ;;  %v8921_v3 = vmul.f32 %v9179_v61, %v8920_v18 }
0x1619   :  { %8961 = vst.msk [vmem:[#allocation2] sm:$0xff] %vm69_vm0, %v8957_v15  ;;  %v8940_v41 = vmul.f32 %v8918_v5, %v8872_v60 }
0x161a   :  { %v8922_v51 = vmul.f32 0.5, %v8921_v3 }
0x161b   :  { %v8947_v24 = vmul.f32 %v9082_v10, %v8940_v41 }
0x161c   :  { %v8923_v8 = vsub.f32 1.5, %v8922_v51 }
0x161d   :  { %v9181_v43 = vpop.eup %9180  ;;  %v8954_v7 = vadd.f32 %v9083_v27, %v8947_v24 }
0x161e   :  { %v8924_v58 = vmul.f32 %v9179_v61, %v8923_v8  ;;  %v8930_v25 = vmul.f32 %v9181_v43, %v8898_v32  ;;  %vm8936_vm3 = vweird.f32 %v9181_v43 }
0x161f   :  { %v8958_v63 = vmul.f32 %v8954_v7, %v12734_v12  ;;  %vm8937_vm4 = vmor %vm8935_vm14, %vm8936_vm3 }
0x1620   :  { %v8928_v46 = vsel %vm8927_vm2, %v9179_v61, %v8924_v58  ;;  %v8931_v37 = vmul.f32 %v9181_v43, %v8930_v25 }
0x1621   :  { %8962 = vst.msk [vmem:[#allocation2 + $0x8] sm:$0xff] %vm69_vm0, %v8958_v63  ;;  %v8941_v20 = vmul.f32 %v8928_v46, %v12546_v2 }
0x1622   :  { %v8932_v39 = vmul.f32 0.5, %v8931_v37 }
0x1623   :  { %v8948_v29 = vmul.f32 %v9082_v10, %v8941_v20 }
0x1624   :  { %v8933_v60 = vsub.f32 1.5, %v8932_v39 }
0x1625   :  { %v8955_v14 = vadd.f32 %v9083_v27, %v8948_v29 }
0x1626   :  { %v8934_v26 = vmul.f32 %v9181_v43, %v8933_v60 }
0x1627   :  { %v8959_v52 = vmul.f32 %v8955_v14, %v12735_v17 }
0x1628   :  { %v8938_v50 = vsel %vm8937_vm4, %v9181_v43, %v8934_v26 }
0x1629   :  { %8963 = vst.msk [vmem:[#allocation2 + $0x10] sm:$0xff] %vm69_vm0, %v8959_v52  ;;  %v8942_v35 = vmul.f32 %v8938_v50, %v12552_v19 }
0x162b   :  { %v8949_v31 = vmul.f32 %v9082_v10, %v8942_v35 }
0x162d   :  { %v8956_v2 = vadd.f32 %v9083_v27, %v8949_v31 }
0x162f   :  { %v8960_v44 = vmul.f32 %v8956_v2, %v12736_v54 }
0x1631   :  { %8964 = vst.msk [vmem:[#allocation2 + $0x18] sm:$0xff] %vm69_vm0, %v8960_v44 }
0x1632   :  { %8977 = dma.vmem_to_hbm [thread:$0]  %s8970_s14, 512, %s8972_s19, [#allocation3], %s9224_s20, %s9224_s20, %s9225_s9  }
0x1633   :  { %9212 = dma.done.wait [#allocation3], 512  }
0x1634   :  { %9213 = vsyncadd [#allocation3], 4294966784 }
0x1635   :  { %8982 = vsyncpa [#allocation3], 1 }

</bundles_post_ra>
